<compile_context>
chip_gen: v5e
topology: v5e:2x2
jax: 0.10.0
libtpu: 0.0.40
codegen_flags: <defaults>
</compile_context>

<pallas_src>
import functools

import numpy as np
import jax
import jax.numpy as jnp
from jax import lax
from jax.experimental import pallas as pl
from jax.experimental.pallas import tpu as pltpu

# ----------------------------- configuration --------------------------------
NUM_CLASSES = 3
NUM_ANCHORS = 3
FPN_CH = 32
BACKBONE_CH = {"stem": 16, "layer1": 16, "layer2": 32, "layer3": 64, "layer4": 128}

CONF_TH = [0.15, 0.15, 0.15, 0.15]
MIN_SIZES = [0.01, 0.02, 0.03, 0.04]
MAX_SIZES = [0.06, 0.08, 0.10, 0.12]
NMS_TH = [0.5, 0.5, 0.5, 0.5]
BOX_SCALE = [4, 8, 16, 32]
DELTA_MEANS = [0.0, 0.0, 0.0, 0.0]
DELTA_STDS = [0.2, 0.2, 0.2, 0.2]
WIDTH_SCALES = [0.8, 0.9, 1.0, 1.1]
HEIGHT_SCALES = [1.0, 1.2, 1.4, 1.6]

VMEM_LIMIT = 32 * 1024 * 1024


def round_up(x, m):
    return ((x + m - 1) // m) * m


def _tensorcores_per_chip():
    try:
        kind = jax.devices()[0].device_kind.lower()
    except Exception:
        return 1
    return 2 if ("v7" in kind or "7x" in kind or "v4" in kind) else 1


_NUM_TC = _tensorcores_per_chip()


def _choose_tm(M):
    """Single TC: one big step (<=1024). Dual TC: keep >=2 parallel steps."""
    if _NUM_TC >= 2 and M > 256:
        return max(256, min(512, round_up((M + 1) // 2, 8)))
    return max(8, min(1024, round_up(M, 8)))


# ------------------------ Pallas matmul (conv hot path) ---------------------
def _matmul_bias_kernel(a_ref, b_ref, bias_ref, o_ref, *, relu):
    acc = jnp.dot(a_ref[...], b_ref[...], preferred_element_type=jnp.float32)
    acc = acc + bias_ref[...]                    # (1, Npad) broadcasts over rows
    if relu:
        acc = jnp.maximum(acc, 0.0)
    o_ref[...] = acc.astype(o_ref.dtype)


def pallas_matmul_bias(a, w, bias, *, relu=False, out_dtype=jnp.bfloat16):
    """a:(M,K) bf16 @ w:(K,Npad) bf16 + bias:(1,Npad) f32.  Npad % 128 == 0.

    Lane-dense (128-padded) outputs, bf16 MXU inputs with f32 accumulation,
    out_dtype controls the (usually bf16) activation writeback."""
    M, K = a.shape
    _, Npad = w.shape
    tm = _choose_tm(M)
    Mp = round_up(M, tm)
    a = a.astype(jnp.bfloat16)
    if Mp != M:
        a = jnp.pad(a, ((0, Mp - M), (0, 0)))

    out = pl.pallas_call(
        functools.partial(_matmul_bias_kernel, relu=relu),
        out_shape=jax.ShapeDtypeStruct((Mp, Npad), out_dtype),
        grid=(Mp // tm,),
        in_specs=[
            pl.BlockSpec((tm, K), lambda i: (i, 0)),
            pl.BlockSpec((K, Npad), lambda i: (0, 0)),
            pl.BlockSpec((1, Npad), lambda i: (0, 0)),
        ],
        out_specs=pl.BlockSpec((tm, Npad), lambda i: (i, 0)),
        compiler_params=pltpu.CompilerParams(
            dimension_semantics=("parallel",), vmem_limit_bytes=VMEM_LIMIT),
    )(a, w, bias)
    return out if Mp == M else out[:M]


# -------------- grouped matmul: per-level weights in ONE pallas_call ---------
def _grouped_matmul_kernel(bg_ref, a_ref, w_ref, b_ref, o_ref, *, relu):
    del bg_ref                                   # only used by the index_maps
    acc = jnp.dot(a_ref[...], w_ref[0], preferred_element_type=jnp.float32)
    acc = acc + b_ref[0]
    if relu:
        acc = jnp.maximum(acc, 0.0)
    o_ref[...] = acc.astype(o_ref.dtype)


def grouped_matmul_bias(a_list, w_stack, bias_stack, *, tm=128, relu=False,
                        out_dtype=jnp.bfloat16):
    """Per-group weights: a_list[g] (rows_g, Kpad) bf16, w_stack (G,Kpad,Npad)
    bf16, bias_stack (G,1,Npad) f32.  One pallas_call; a scalar-prefetched
    per-row-block group-id selects the weight block via the index_map."""
    G, Kpad, Npad = w_stack.shape
    assert len(a_list) == G
    blocks, block_group, offs, sizes = [], [], [], []
    off = 0
    for g, a in enumerate(a_list):
        m, k = a.shape
        assert k == Kpad
        mp = round_up(m, tm)
        if mp != m:
            a = jnp.pad(a, ((0, mp - m), (0, 0)))
        blocks.append(a.astype(jnp.bfloat16))
        block_group.extend([g] * (mp // tm))
        offs.append(off)
        sizes.append(m)
        off += mp
    A = jnp.concatenate(blocks, axis=0)
    bg = jnp.asarray(np.asarray(block_group, np.int32))

    out = pl.pallas_call(
        functools.partial(_grouped_matmul_kernel, relu=relu),
        out_shape=jax.ShapeDtypeStruct((off, Npad), out_dtype),
        grid_spec=pltpu.PrefetchScalarGridSpec(
            num_scalar_prefetch=1,
            grid=(off // tm,),
            in_specs=[
                pl.BlockSpec((tm, Kpad), lambda i, bg_ref: (i, 0)),
                pl.BlockSpec((1, Kpad, Npad), lambda i, bg_ref: (bg_ref[i], 0, 0)),
                pl.BlockSpec((1, 1, Npad), lambda i, bg_ref: (bg_ref[i], 0, 0)),
            ],
            out_specs=pl.BlockSpec((tm, Npad), lambda i, bg_ref: (i, 0)),
        ),
        compiler_params=pltpu.CompilerParams(
            dimension_semantics=("parallel",), vmem_limit_bytes=VMEM_LIMIT),
    )(bg, A, w_stack, bias_stack)
    return out, offs, sizes


# ------------------------------- conv helpers --------------------------------
def im2col(x, kh, kw, stride, padding):
    """NHWC (bf16) -> (B*Ho*Wo, kh*kw*C) patch matrix (bf16)."""
    B, H, W, C = x.shape
    xp = jnp.pad(x, ((0, 0), (padding, padding), (padding, padding), (0, 0))) \
        if padding else x
    Hp, Wp = H + 2 * padding, W + 2 * padding
    Ho = (Hp - kh) // stride + 1
    Wo = (Wp - kw) // stride + 1
    # TODO(synk): im2col stays as XLA glue inside the jit; fully in-kernel
    # patch assembly (overlapping row blocks via manual DMA) is deferred.
    patches = [xp[:, i:i + Ho * stride:stride, j:j + Wo * stride:stride, :]
               for i in range(kh) for j in range(kw)]
    pat = jnp.concatenate(patches, axis=-1)
    return pat.reshape(B * Ho * Wo, kh * kw * C), (B, Ho, Wo)


def conv2d_multi(xs, wt, bias, *, cout, stride=1, padding=1, kh=3, kw=3,
                 relu=False, out_dtype=jnp.bfloat16):
    """One conv with SHARED weights applied to a list of NHWC inputs via a
    single fused Pallas matmul (rows of all inputs concatenated)."""
    rows, shapes = [], []
    for x in xs:
        a, sh = im2col(x, kh, kw, stride, padding)
        rows.append(a)
        shapes.append(sh)
    a = jnp.concatenate(rows, axis=0) if len(rows) > 1 else rows[0]
    out = pallas_matmul_bias(a, wt, bias, relu=relu, out_dtype=out_dtype)
    res, off = [], 0
    for (B, Ho, Wo) in shapes:
        m = B * Ho * Wo
        res.append(out[off:off + m, :cout].reshape(B, Ho, Wo, cout))
        off += m
    return res


def conv2d_single(x, wt, bias, *, cout, stride=1, padding=1, kh=3, kw=3,
                  relu=False, out_dtype=jnp.bfloat16):
    return conv2d_multi([x], wt, bias, cout=cout, stride=stride, padding=padding,
                        kh=kh, kw=kw, relu=relu, out_dtype=out_dtype)[0]


def upsample2x(x):  # NHWC, nearest-neighbor
    return jnp.repeat(jnp.repeat(x, 2, axis=1), 2, axis=2)


# --------------------- fused Pallas box-decoding kernel ----------------------
# One input slab (24, L): rows [cls logits (C), dx,dy,dw,dh, meta (13), pad].
# One output slab (16, L): rows [px1,py1,px2,py2, max_score, argmax_class,
# sigmoid probs (C), pad].  Lanes = (batch-major, per-level 128-padded anchors).
def _decode_kernel(x_ref, o_ref, *, num_classes, d_means, d_stds):
    C = num_classes
    x = x_ref[...]
    prob = jax.nn.sigmoid(x[0:C])
    dx, dy = x[C:C + 1], x[C + 1:C + 2]
    dw, dh = x[C + 2:C + 3], x[C + 3:C + 4]
    m = x[C + 4:C + 17]
    mdx, mdy, acx, acy = m[0:1], m[1:2], m[2:3], m[3:4]
    bw, bh, wsc, hsc = m[4:5], m[5:6], m[6:7], m[7:8]
    eminw, emaxw, eminh, emaxh, valid = m[8:9], m[9:10], m[10:11], m[11:12], m[12:13]

    dx = jnp.clip(dx * d_stds[0] + d_means[0], -1.0, 1.0) * mdx
    dy = jnp.clip(dy * d_stds[1] + d_means[1], -1.0, 1.0) * mdy
    pcx = jnp.clip(acx + dx, 0.0, 1.0)
    pcy = jnp.clip(acy + dy, 0.0, 1.0)

    dw = jnp.clip(dw * d_stds[2] + d_means[2], -2.0, 2.0)
    dh = jnp.clip(dh * d_stds[3] + d_means[3], -2.0, 2.0)
    pw = jnp.clip(bw * jnp.exp(dw * wsc), eminw, emaxw)
    ph = jnp.clip(bh * jnp.exp(dh * hsc), eminh, emaxh)

    maxv = jnp.max(prob, axis=0, keepdims=True)
    ids = lax.broadcasted_iota(jnp.int32, prob.shape, 0)
    cls_id = jnp.min(jnp.where(prob >= maxv, ids, C), axis=0,
                     keepdims=True).astype(jnp.float32)        # first max idx
    maxsc = jnp.where(valid > 0.5, maxv, -1.0)

    out = jnp.concatenate([
        jnp.clip(pcx - 0.5 * pw, 0.0, 1.0),
        jnp.clip(pcy - 0.5 * ph, 0.0, 1.0),
        jnp.clip(pcx + 0.5 * pw, 0.0, 1.0),
        jnp.clip(pcy + 0.5 * ph, 0.0, 1.0),
        maxsc, cls_id, prob,
        jnp.zeros((16 - 6 - C, prob.shape[1]), jnp.float32)], axis=0)
    o_ref[...] = out


# --------------------------- anchors / level meta -----------------------------
def generate_anchors_np(H, W, stride, base_size, ratios=(0.5, 1.0, 2.0)):
    ys = (np.arange(H, dtype=np.float32) + 0.5) * stride
    xs = (np.arange(W, dtype=np.float32) + 0.5) * stride
    cx, cy = np.meshgrid(xs, ys)                                # (H, W)
    out = []
    for r in ratios:
        w = base_size * np.sqrt(r)
        h = base_size / np.sqrt(r)
        a = np.stack([cx - w / 2, cy - h / 2, cx + w / 2, cy + h / 2], axis=-1)
        out.append(a.reshape(-1, 4))
    return np.concatenate(out, axis=0).astype(np.float32)       # (A*H*W, 4)


def _level_meta(l, H, W, image_size):
    """Static (numpy) per-anchor constants for level l, rows = 13."""
    anchors = generate_anchors_np(H, W, stride=BOX_SCALE[l],
                                  base_size=BOX_SCALE[l] * 4)
    inv = 1.0 / image_size
    aw = (anchors[:, 2] - anchors[:, 0]) * inv
    ah = (anchors[:, 3] - anchors[:, 1]) * inv
    acx = (anchors[:, 0] + 0.5 * (anchors[:, 2] - anchors[:, 0])) * inv
    acy = (anchors[:, 1] + 0.5 * (anchors[:, 3] - anchors[:, 1])) * inv
    fs = 1.0 / BOX_SCALE[l]
    ones = np.ones_like(aw)
    return np.stack([
        fs * aw, fs * ah, acx, acy,
        aw * WIDTH_SCALES[l], ah * HEIGHT_SCALES[l],
        ones * (0.2 + 0.1 * l), ones * (0.4 + 0.2 * l),
        ones * (MIN_SIZES[l] * 0.8), ones * (MAX_SIZES[l] * 0.9),
        ones * (MIN_SIZES[l] * 0.8), ones * (MAX_SIZES[l] * 1.2),
        ones], axis=0).astype(np.float32)                        # (13, N_l)


def _fpn_dims(H, W):
    dims, h, w = [], H, W
    for _ in range(5):
        h = (h - 1) // 2 + 1
        w = (w - 1) // 2 + 1
        dims.append((h, w))
    return dims[1:]            # layer1..layer4 / p1..p4 spatial sizes


# ----------------------------- parameters ------------------------------------
def _conv_init(key, c_out, c_in, kh, kw):
    fan_in = c_in * kh * kw
    w = jax.random.normal(key, (c_out, c_in, kh, kw), jnp.float32) * np.sqrt(2.0 / fan_in)
    return {"w": w, "b": jnp.zeros((c_out,), jnp.float32)}


def init_params(key):
    ks = iter(jax.random.split(key, 32))
    bb = {
        "stem": _conv_init(next(ks), BACKBONE_CH["stem"], 3, 3, 3),
        "layer1": _conv_init(next(ks), BACKBONE_CH["layer1"], BACKBONE_CH["stem"], 3, 3),
        "layer2": _conv_init(next(ks), BACKBONE_CH["layer2"], BACKBONE_CH["layer1"], 3, 3),
        "layer3": _conv_init(next(ks), BACKBONE_CH["layer3"], BACKBONE_CH["layer2"], 3, 3),
        "layer4": _conv_init(next(ks), BACKBONE_CH["layer4"], BACKBONE_CH["layer3"], 3, 3),
    }
    fpn = {}
    for i, lvl in enumerate(["layer1", "layer2", "layer3", "layer4"], start=1):
        fpn[f"lat{i}"] = _conv_init(next(ks), FPN_CH, BACKBONE_CH[lvl], 1, 1)
        fpn[f"out{i}"] = _conv_init(next(ks), FPN_CH, FPN_CH, 3, 3)
    head = {
        "shared": _conv_init(next(ks), FPN_CH, FPN_CH, 3, 3),
        "cls": _conv_init(next(ks), NUM_ANCHORS * NUM_CLASSES, FPN_CH, 3, 3),
        "box": _conv_init(next(ks), NUM_ANCHORS * 4, FPN_CH, 3, 3),
    }
    return {"backbone": bb, "fpn": fpn, "head": head}


def prepare_weights(params):
    """Pre-transpose / lane-pad / bf16-cast all weights ONCE."""
    def mat(w, b):
        c_out, c_in, kh, kw = w.shape
        K = kh * kw * c_in
        wt = jnp.transpose(w, (2, 3, 1, 0)).reshape(K, c_out)
        npad = round_up(c_out, 128)
        wt = jnp.pad(wt, ((0, 0), (0, npad - c_out))).astype(jnp.bfloat16)
        bb = jnp.pad(b, (0, npad - c_out)).astype(jnp.float32).reshape(1, npad)
        return wt, bb

    prep = {}
    for name in ("stem", "layer1", "layer2", "layer3", "layer4"):
        prep[name] = mat(params["backbone"][name]["w"], params["backbone"][name]["b"])

    lat_w, lat_b = [], []
    for i in range(1, 5):
        w = params["fpn"][f"lat{i}"]["w"]
        b = params["fpn"][f"lat{i}"]["b"]
        c_out, c_in = w.shape[0], w.shape[1]
        wt = jnp.transpose(w[:, :, 0, 0], (1, 0))              # (Cin, Cout)
        wt = jnp.pad(wt, ((0, 128 - c_in), (0, 128 - c_out)))
        lat_w.append(wt)
        lat_b.append(jnp.pad(b, (0, 128 - c_out)))
    prep["lat_w"] = jnp.stack(lat_w).astype(jnp.bfloat16)       # (4,128,128)
    prep["lat_b"] = jnp.stack(lat_b).astype(jnp.float32)[:, None, :]  # (4,1,128)

    fo_w, fo_b = [], []
    for i in range(1, 5):
        wt, bb = mat(params["fpn"][f"out{i}"]["w"], params["fpn"][f"out{i}"]["b"])
        fo_w.append(wt)
        fo_b.append(bb)
    prep["fout_w"] = jnp.stack(fo_w)                            # (4,288,128) bf16
    prep["fout_b"] = jnp.stack(fo_b)                            # (4,1,128)  f32

    prep["shared"] = mat(params["head"]["shared"]["w"], params["head"]["shared"]["b"])
    w_cb = jnp.concatenate([params["head"]["cls"]["w"], params["head"]["box"]["w"]], axis=0)
    b_cb = jnp.concatenate([params["head"]["cls"]["b"], params["head"]["box"]["b"]], axis=0)
    prep["clsbox"] = mat(w_cb, b_cb)
    return prep


# ----------------------------- jitted device path -----------------------------
def _device_forward(prep, images):
    B = images.shape[0]
    image_size = float(images.shape[-1])
    A, C = NUM_ANCHORS, NUM_CLASSES
    x = jnp.transpose(images, (0, 2, 3, 1)).astype(jnp.bfloat16)   # NCHW -> NHWC

    # ---- backbone: 5 strided 3x3 convs (one Pallas matmul each, sequential)
    cur = x
    feats = []
    for name in ("stem", "layer1", "layer2", "layer3", "layer4"):
        wt, bias = prep[name]
        cur = conv2d_single(cur, wt, bias, cout=BACKBONE_CH[name],
                            stride=2, padding=1, relu=True, out_dtype=jnp.bfloat16)
        feats.append(cur)
    c1, c2, c3, c4 = feats[1:]

    # ---- FPN laterals: 4 different 1x1 convs in ONE grouped pallas_call
    lat_in, lat_shapes = [], []
    for f in (c1, c2, c3, c4):
        Bf, H, W, Cf = f.shape
        a = f.reshape(Bf * H * W, Cf)
        if Cf < 128:
            a = jnp.pad(a, ((0, 0), (0, 128 - Cf)))
        lat_in.append(a)
        lat_shapes.append((Bf, H, W))
    lat_out, offs, sizes = grouped_matmul_bias(
        lat_in, prep["lat_w"], prep["lat_b"], relu=False, out_dtype=jnp.bfloat16)
    lats = [lat_out[o:o + m, :FPN_CH].reshape(b, h, w, FPN_CH)
            for (b, h, w), o, m in zip(lat_shapes, offs, sizes)]
    l4 = lats[3]
    l3 = lats[2] + upsample2x(l4)
    l2 = lats[1] + upsample2x(l3)
    l1 = lats[0] + upsample2x(l2)

    # ---- FPN output 3x3 convs: 4 different weights in ONE grouped pallas_call
    out_in, out_shapes = [], []
    for f in (l1, l2, l3, l4):
        a, sh = im2col(f, 3, 3, 1, 1)
        out_in.append(a)
        out_shapes.append(sh)
    fo, offs, sizes = grouped_matmul_bias(
        out_in, prep["fout_w"], prep["fout_b"], relu=False, out_dtype=jnp.bfloat16)
    fpn_feats = [fo[o:o + m, :FPN_CH].reshape(b, h, w, FPN_CH)
                 for (b, h, w), o, m in zip(out_shapes, offs, sizes)]

    # ---- detection head: shared conv + fused cls/box conv, batched over levels
    hs = conv2d_multi(fpn_feats, *prep["shared"], cout=FPN_CH,
                      padding=1, relu=True, out_dtype=jnp.bfloat16)
    cbs = conv2d_multi(hs, *prep["clsbox"], cout=A * (C + 4),
                       padding=1, relu=False, out_dtype=jnp.float32)

    # ---- build the fused decode slab: lanes = (batch, level, anchor[A,H,W])
    data_levels, lvl_N = [], []
    for l, cb in enumerate(cbs):
        Bc, H, W, _ = cb.shape
        N_l = A * H * W
        Npad_l = round_up(N_l, 128)
        cls = cb[..., :A * C].reshape(Bc, H * W, A, C)
        cls = jnp.transpose(cls, (3, 0, 2, 1)).reshape(C, Bc, N_l)
        box = cb[..., A * C:A * (C + 4)].reshape(Bc, H * W, A, 4)
        box = jnp.transpose(box, (3, 0, 2, 1)).reshape(4, Bc, N_l)
        meta = jnp.asarray(_level_meta(l, H, W, image_size))     # (13, N_l) const
        metab = jnp.broadcast_to(meta[:, None, :], (13, Bc, N_l))
        d = jnp.concatenate([cls, box, metab], axis=0)           # (20, B, N_l)
        if Npad_l != N_l:
            d = jnp.pad(d, ((0, 0), (0, 0), (0, Npad_l - N_l)))
        data_levels.append(d)
        lvl_N.append(N_l)
    data = jnp.concatenate(data_levels, axis=2)                  # (20, B, Ntot)
    Ntot = data.shape[2]
    L = B * Ntot
    data = data.reshape(20, L)
    NBLK = 512 if L >= 512 else 128
    L_pad = round_up(L, NBLK)
    data = jnp.pad(data, ((0, 24 - 20), (0, L_pad - L)))         # sublane-dense slab

    slab = pl.pallas_call(
        functools.partial(_decode_kernel, num_classes=C,
                          d_means=tuple(DELTA_MEANS), d_stds=tuple(DELTA_STDS)),
        out_shape=jax.ShapeDtypeStruct((16, L_pad), jnp.float32),
        grid=(L_pad // NBLK,),
        in_specs=[pl.BlockSpec((24, NBLK), lambda i: (0, i))],
        out_specs=pl.BlockSpec((16, NBLK), lambda i: (0, i)),
        compiler_params=pltpu.CompilerParams(
            dimension_semantics=("parallel",), vmem_limit_bytes=VMEM_LIMIT),
    )(data)

    # all_scores contract: LAST level's sigmoid scores, (B, N_last, C)
    N_last = lvl_N[-1]
    off_last = Ntot - round_up(N_last, 128)
    s = slab[:, :L].reshape(16, B, Ntot)
    all_scores = jnp.transpose(s[6:6 + C, :, off_last:off_last + N_last], (1, 2, 0))
    return slab, all_scores


_forward_jit = jax.jit(_device_forward)


# --------------------------- host-side post-process ---------------------------
# TODO(synk): confidence/size filtering and NMS produce data-dependent shapes —
# no clean fixed-shape Pallas equivalent; done host-side with numpy after a
# single device_get of the fused decode slab.
def nms_numpy(boxes, scores, iou_threshold):
    order = np.argsort(-scores, kind="stable")
    keep = []
    while order.size > 0:
        i = order[0]
        keep.append(int(i))
        if order.size == 1:
            break
        rest = order[1:]
        xx1 = np.maximum(boxes[i, 0], boxes[rest, 0])
        yy1 = np.maximum(boxes[i, 1], boxes[rest, 1])
        xx2 = np.minimum(boxes[i, 2], boxes[rest, 2])
        yy2 = np.minimum(boxes[i, 3], boxes[rest, 3])
        inter = np.maximum(0.0, xx2 - xx1) * np.maximum(0.0, yy2 - yy1)
        area_i = (boxes[i, 2] - boxes[i, 0]) * (boxes[i, 3] - boxes[i, 1])
        areas = (boxes[rest, 2] - boxes[rest, 0]) * (boxes[rest, 3] - boxes[rest, 1])
        iou = inter / (area_i + areas - inter + 1e-9)
        order = rest[iou <= iou_threshold]
    return np.array(keep, dtype=np.int64)


def detector_forward(prep, images):
    B = images.shape[0]
    slab, all_scores = _forward_jit(prep, images)
    slab_np = np.asarray(jax.device_get(slab))          # the ONE device->host hop

    dims = _fpn_dims(images.shape[2], images.shape[3])
    lvl_N, lvl_off, off = [], [], 0
    for (h, w) in dims:
        n = NUM_ANCHORS * h * w
        lvl_off.append(off)
        lvl_N.append(n)
        off += round_up(n, 128)
    Ntot = off

    all_boxes, all_sc, all_lb = [], [], []
    for l in range(len(lvl_N)):
        o, n = lvl_off[l], lvl_N[l]
        conf_any = any((slab_np[4, b * Ntot + o:b * Ntot + o + n] > CONF_TH[l]).any()
                       for b in range(B))
        if not conf_any:
            continue
        for b in range(B):
            cols = slice(b * Ntot + o, b * Ntot + o + n)
            msc = slab_np[4, cols]
            m = msc > CONF_TH[l]
            if not m.any():
                continue
            bb = slab_np[0:4, cols].T[m]                 # (k, 4)
            ss = msc[m]
            ll = slab_np[5, cols][m].astype(np.int64)
            widths = bb[:, 2] - bb[:, 0]
            heights = bb[:, 3] - bb[:, 1]
            mn, mx = MIN_SIZES[l], MAX_SIZES[l]
            sm = (widths > mn * 0.5) & (heights > mn * 0.5) & \
                 (widths < mx * 2.0) & (heights < mx * 2.0)
            if not sm.any():
                continue
            bb, ss, ll = bb[sm], ss[sm], ll[sm]
            keep = nms_numpy(bb, ss, NMS_TH[l])
            if len(keep) > 0:
                all_boxes.append(bb[keep])
                all_sc.append(ss[keep])
                all_lb.append(ll[keep])

    if all_boxes:
        boxes = jnp.asarray(np.concatenate(all_boxes, axis=0), jnp.float32)
        scores = jnp.asarray(np.concatenate(all_sc, axis=0), jnp.float32)
        labels = jnp.asarray(np.concatenate(all_lb, axis=0).astype(np.int32))
        return {"boxes": boxes[None], "scores": scores[None],
                "labels": labels[None] + 1, "all_scores": all_scores}
    return {"boxes": jnp.zeros((1, 0, 4), jnp.float32),
            "scores": jnp.zeros((1, 0), jnp.float32),
            "labels": jnp.zeros((1, 0), jnp.int32),
            "all_scores": all_scores}


# ----------------------------------- main --------------------------------------
if __name__ == "__main__":
    key = jax.random.PRNGKey(0)
    pkey, ikey = jax.random.split(key)
    params = init_params(pkey)
    prep = prepare_weights(params)                       # one-time weight prep
    images = jax.random.normal(ikey, (2, 3, 64, 64), jnp.float32)   # NCHW like PyTorch
    out = detector_forward(prep, images)
    jax.block_until_ready(out)
    assert out["boxes"].shape[0] == 1 and out["boxes"].shape[-1] == 4
    assert out["all_scores"].shape == (2, NUM_ANCHORS * 2 * 2, NUM_CLASSES)
    print("KERNEL_OK")
</pallas_src>

<mosaic_0001>
module attributes {stable_mosaic.version = 11 : i64} {
  func.func @_matmul_bias_kernel(%arg0: i32, %arg1: memref<1024x27xbf16, #tpu.memory_space<vmem>>, %arg2: memref<27x128xbf16, #tpu.memory_space<vmem>>, %arg3: memref<1x128xf32, #tpu.memory_space<vmem>>, %arg4: memref<1024x128xbf16, #tpu.memory_space<vmem>>) attributes {dimension_semantics = [#tpu.dimension_semantics<parallel>], iteration_bounds = array<i64: 2>, scalar_prefetch = 0 : i64, scratch_operands = 0 : i64, tpu.core_type = #tpu.core_type<tc>, window_params = [{transform_indices = @transform_0, window_bounds = array<i64: 1024, 27>}, {pipeline_mode = #tpu.pipeline_mode<synchronous>, transform_indices = @transform_1, window_bounds = array<i64: 27, 128>}, {pipeline_mode = #tpu.pipeline_mode<synchronous>, transform_indices = @transform_2, window_bounds = array<i64: 1, 128>}, {transform_indices = @transform_3, window_bounds = array<i64: 1024, 128>}]} {
    %c0 = arith.constant 0 : index
    %c0_0 = arith.constant 0 : index
    %0 = vector.load %arg1[%c0, %c0_0] : memref<1024x27xbf16, #tpu.memory_space<vmem>>, vector<1024x27xbf16>
    %c0_1 = arith.constant 0 : index
    %c0_2 = arith.constant 0 : index
    %1 = vector.load %arg2[%c0_1, %c0_2] : memref<27x128xbf16, #tpu.memory_space<vmem>>, vector<27x128xbf16>
    %cst = arith.constant dense<0.000000e+00> : vector<1024x128xf32>
    %2 = tpu.matmul %0, %1, %cst {dimension_numbers = #tpu.dot_dimension_numbers<[1], [0], [0], [1], [0, 0, 1, 1], [], []>} : vector<1024x27xbf16>, vector<27x128xbf16>, vector<1024x128xf32> -> vector<1024x128xf32>
    %c0_3 = arith.constant 0 : index
    %c0_4 = arith.constant 0 : index
    %3 = vector.load %arg3[%c0_3, %c0_4] : memref<1x128xf32, #tpu.memory_space<vmem>>, vector<1x128xf32>
    %4 = vector.broadcast %3 : vector<1x128xf32> to vector<1024x128xf32>
    %5 = arith.addf %2, %4 : vector<1024x128xf32>
    %cst_5 = arith.constant 0.000000e+00 : f32
    %6 = vector.broadcast %cst_5 : f32 to vector<1024x128xf32>
    %7 = arith.maximumf %5, %6 : vector<1024x128xf32>
    %8 = arith.truncf %7 : vector<1024x128xf32> to vector<1024x128xbf16>
    %c0_6 = arith.constant 0 : index
    %c0_7 = arith.constant 0 : index
    %9 = vector.load %arg4[%c0_6, %c0_7] : memref<1024x128xbf16, #tpu.memory_space<vmem>>, vector<1024x128xbf16>
    tpu.vector_store %arg4[%c0_6, %c0_7], %8 {strides = array<i32>} : memref<1024x128xbf16, #tpu.memory_space<vmem>>, vector<1024x128xbf16>,
    return
  }
  func.func @transform_0(%arg0: i32) -> (i32, i32) {
    %c0_i32 = arith.constant 0 : i32
    %c0_i32_0 = arith.constant 0 : i32
    return %arg0, %c0_i32 : i32, i32
  }
  func.func @transform_1(%arg0: i32) -> (i32, i32) {
    %c0_i32 = arith.constant 0 : i32
    %c0_i32_0 = arith.constant 0 : i32
    %c0_i32_1 = arith.constant 0 : i32
    return %c0_i32, %c0_i32_0 : i32, i32
  }
  func.func @transform_2(%arg0: i32) -> (i32, i32) {
    %c0_i32 = arith.constant 0 : i32
    %c0_i32_0 = arith.constant 0 : i32
    %c0_i32_1 = arith.constant 0 : i32
    return %c0_i32, %c0_i32_0 : i32, i32
  }
  func.func @transform_3(%arg0: i32) -> (i32, i32) {
    %c0_i32 = arith.constant 0 : i32
    %c0_i32_0 = arith.constant 0 : i32
    return %arg0, %c0_i32 : i32, i32
  }
}

module attributes {stable_mosaic.version = 11 : i64} {
  func.func @_matmul_bias_kernel(%arg0: i32, %arg1: memref<512x144xbf16, #tpu.memory_space<vmem>>, %arg2: memref<144x128xbf16, #tpu.memory_space<vmem>>, %arg3: memref<1x128xf32, #tpu.memory_space<vmem>>, %arg4: memref<512x128xbf16, #tpu.memory_space<vmem>>) attributes {dimension_semantics = [#tpu.dimension_semantics<parallel>], iteration_bounds = array<i64: 1>, scalar_prefetch = 0 : i64, scratch_operands = 0 : i64, tpu.core_type = #tpu.core_type<tc>, window_params = [{transform_indices = @transform_0, window_bounds = array<i64: 512, 144>}, {pipeline_mode = #tpu.pipeline_mode<synchronous>, transform_indices = @transform_1, window_bounds = array<i64: 144, 128>}, {pipeline_mode = #tpu.pipeline_mode<synchronous>, transform_indices = @transform_2, window_bounds = array<i64: 1, 128>}, {transform_indices = @transform_3, window_bounds = array<i64: 512, 128>}]} {
    %c0 = arith.constant 0 : index
    %c0_0 = arith.constant 0 : index
    %0 = vector.load %arg1[%c0, %c0_0] : memref<512x144xbf16, #tpu.memory_space<vmem>>, vector<512x144xbf16>
    %c0_1 = arith.constant 0 : index
    %c0_2 = arith.constant 0 : index
    %1 = vector.load %arg2[%c0_1, %c0_2] : memref<144x128xbf16, #tpu.memory_space<vmem>>, vector<144x128xbf16>
    %cst = arith.constant dense<0.000000e+00> : vector<512x128xf32>
    %2 = tpu.matmul %0, %1, %cst {dimension_numbers = #tpu.dot_dimension_numbers<[1], [0], [0], [1], [0, 0, 1, 1], [], []>} : vector<512x144xbf16>, vector<144x128xbf16>, vector<512x128xf32> -> vector<512x128xf32>
    %c0_3 = arith.constant 0 : index
    %c0_4 = arith.constant 0 : index
    %3 = vector.load %arg3[%c0_3, %c0_4] : memref<1x128xf32, #tpu.memory_space<vmem>>, vector<1x128xf32>
    %4 = vector.broadcast %3 : vector<1x128xf32> to vector<512x128xf32>
    %5 = arith.addf %2, %4 : vector<512x128xf32>
    %cst_5 = arith.constant 0.000000e+00 : f32
    %6 = vector.broadcast %cst_5 : f32 to vector<512x128xf32>
    %7 = arith.maximumf %5, %6 : vector<512x128xf32>
    %8 = arith.truncf %7 : vector<512x128xf32> to vector<512x128xbf16>
    %c0_6 = arith.constant 0 : index
    %c0_7 = arith.constant 0 : index
    %9 = vector.load %arg4[%c0_6, %c0_7] : memref<512x128xbf16, #tpu.memory_space<vmem>>, vector<512x128xbf16>
    tpu.vector_store %arg4[%c0_6, %c0_7], %8 {strides = array<i32>} : memref<512x128xbf16, #tpu.memory_space<vmem>>, vector<512x128xbf16>,
    return
  }
  func.func @transform_0(%arg0: i32) -> (i32, i32) {
    %c0_i32 = arith.constant 0 : i32
    %c0_i32_0 = arith.constant 0 : i32
    return %arg0, %c0_i32 : i32, i32
  }
  func.func @transform_1(%arg0: i32) -> (i32, i32) {
    %c0_i32 = arith.constant 0 : i32
    %c0_i32_0 = arith.constant 0 : i32
    %c0_i32_1 = arith.constant 0 : i32
    return %c0_i32, %c0_i32_0 : i32, i32
  }
  func.func @transform_2(%arg0: i32) -> (i32, i32) {
    %c0_i32 = arith.constant 0 : i32
    %c0_i32_0 = arith.constant 0 : i32
    %c0_i32_1 = arith.constant 0 : i32
    return %c0_i32, %c0_i32_0 : i32, i32
  }
  func.func @transform_3(%arg0: i32) -> (i32, i32) {
    %c0_i32 = arith.constant 0 : i32
    %c0_i32_0 = arith.constant 0 : i32
    return %arg0, %c0_i32 : i32, i32
  }
}

module attributes {stable_mosaic.version = 11 : i64} {
  func.func @_matmul_bias_kernel(%arg0: i32, %arg1: memref<128x144xbf16, #tpu.memory_space<vmem>>, %arg2: memref<144x128xbf16, #tpu.memory_space<vmem>>, %arg3: memref<1x128xf32, #tpu.memory_space<vmem>>, %arg4: memref<128x128xbf16, #tpu.memory_space<vmem>>) attributes {dimension_semantics = [#tpu.dimension_semantics<parallel>], iteration_bounds = array<i64: 1>, scalar_prefetch = 0 : i64, scratch_operands = 0 : i64, tpu.core_type = #tpu.core_type<tc>, window_params = [{transform_indices = @transform_0, window_bounds = array<i64: 128, 144>}, {pipeline_mode = #tpu.pipeline_mode<synchronous>, transform_indices = @transform_1, window_bounds = array<i64: 144, 128>}, {pipeline_mode = #tpu.pipeline_mode<synchronous>, transform_indices = @transform_2, window_bounds = array<i64: 1, 128>}, {transform_indices = @transform_3, window_bounds = array<i64: 128, 128>}]} {
    %c0 = arith.constant 0 : index
    %c0_0 = arith.constant 0 : index
    %0 = vector.load %arg1[%c0, %c0_0] : memref<128x144xbf16, #tpu.memory_space<vmem>>, vector<128x144xbf16>
    %c0_1 = arith.constant 0 : index
    %c0_2 = arith.constant 0 : index
    %1 = vector.load %arg2[%c0_1, %c0_2] : memref<144x128xbf16, #tpu.memory_space<vmem>>, vector<144x128xbf16>
    %cst = arith.constant dense<0.000000e+00> : vector<128x128xf32>
    %2 = tpu.matmul %0, %1, %cst {dimension_numbers = #tpu.dot_dimension_numbers<[1], [0], [0], [1], [0, 0, 1, 1], [], []>} : vector<128x144xbf16>, vector<144x128xbf16>, vector<128x128xf32> -> vector<128x128xf32>
    %c0_3 = arith.constant 0 : index
    %c0_4 = arith.constant 0 : index
    %3 = vector.load %arg3[%c0_3, %c0_4] : memref<1x128xf32, #tpu.memory_space<vmem>>, vector<1x128xf32>
    %4 = vector.broadcast %3 : vector<1x128xf32> to vector<128x128xf32>
    %5 = arith.addf %2, %4 : vector<128x128xf32>
    %cst_5 = arith.constant 0.000000e+00 : f32
    %6 = vector.broadcast %cst_5 : f32 to vector<128x128xf32>
    %7 = arith.maximumf %5, %6 : vector<128x128xf32>
    %8 = arith.truncf %7 : vector<128x128xf32> to vector<128x128xbf16>
    %c0_6 = arith.constant 0 : index
    %c0_7 = arith.constant 0 : index
    %9 = vector.load %arg4[%c0_6, %c0_7] : memref<128x128xbf16, #tpu.memory_space<vmem>>, vector<128x128xbf16>
    tpu.vector_store %arg4[%c0_6, %c0_7], %8 {strides = array<i32>} : memref<128x128xbf16, #tpu.memory_space<vmem>>, vector<128x128xbf16>,
    return
  }
  func.func @transform_0(%arg0: i32) -> (i32, i32) {
    %c0_i32 = arith.constant 0 : i32
    %c0_i32_0 = arith.constant 0 : i32
    return %arg0, %c0_i32 : i32, i32
  }
  func.func @transform_1(%arg0: i32) -> (i32, i32) {
    %c0_i32 = arith.constant 0 : i32
    %c0_i32_0 = arith.constant 0 : i32
    %c0_i32_1 = arith.constant 0 : i32
    return %c0_i32, %c0_i32_0 : i32, i32
  }
  func.func @transform_2(%arg0: i32) -> (i32, i32) {
    %c0_i32 = arith.constant 0 : i32
    %c0_i32_0 = arith.constant 0 : i32
    %c0_i32_1 = arith.constant 0 : i32
    return %c0_i32, %c0_i32_0 : i32, i32
  }
  func.func @transform_3(%arg0: i32) -> (i32, i32) {
    %c0_i32 = arith.constant 0 : i32
    %c0_i32_0 = arith.constant 0 : i32
    return %arg0, %c0_i32 : i32, i32
  }
}

module attributes {stable_mosaic.version = 11 : i64} {
  func.func @_matmul_bias_kernel(%arg0: i32, %arg1: memref<32x288xbf16, #tpu.memory_space<vmem>>, %arg2: memref<288x128xbf16, #tpu.memory_space<vmem>>, %arg3: memref<1x128xf32, #tpu.memory_space<vmem>>, %arg4: memref<32x128xbf16, #tpu.memory_space<vmem>>) attributes {dimension_semantics = [#tpu.dimension_semantics<parallel>], iteration_bounds = array<i64: 1>, scalar_prefetch = 0 : i64, scratch_operands = 0 : i64, tpu.core_type = #tpu.core_type<tc>, window_params = [{transform_indices = @transform_0, window_bounds = array<i64: 32, 288>}, {pipeline_mode = #tpu.pipeline_mode<synchronous>, transform_indices = @transform_1, window_bounds = array<i64: 288, 128>}, {pipeline_mode = #tpu.pipeline_mode<synchronous>, transform_indices = @transform_2, window_bounds = array<i64: 1, 128>}, {transform_indices = @transform_3, window_bounds = array<i64: 32, 128>}]} {
    %c0 = arith.constant 0 : index
    %c0_0 = arith.constant 0 : index
    %0 = vector.load %arg1[%c0, %c0_0] : memref<32x288xbf16, #tpu.memory_space<vmem>>, vector<32x288xbf16>
    %c0_1 = arith.constant 0 : index
    %c0_2 = arith.constant 0 : index
    %1 = vector.load %arg2[%c0_1, %c0_2] : memref<288x128xbf16, #tpu.memory_space<vmem>>, vector<288x128xbf16>
    %cst = arith.constant dense<0.000000e+00> : vector<32x128xf32>
    %2 = tpu.matmul %0, %1, %cst {dimension_numbers = #tpu.dot_dimension_numbers<[1], [0], [0], [1], [0, 0, 1, 1], [], []>} : vector<32x288xbf16>, vector<288x128xbf16>, vector<32x128xf32> -> vector<32x128xf32>
    %c0_3 = arith.constant 0 : index
    %c0_4 = arith.constant 0 : index
    %3 = vector.load %arg3[%c0_3, %c0_4] : memref<1x128xf32, #tpu.memory_space<vmem>>, vector<1x128xf32>
    %4 = vector.broadcast %3 : vector<1x128xf32> to vector<32x128xf32>
    %5 = arith.addf %2, %4 : vector<32x128xf32>
    %cst_5 = arith.constant 0.000000e+00 : f32
    %6 = vector.broadcast %cst_5 : f32 to vector<32x128xf32>
    %7 = arith.maximumf %5, %6 : vector<32x128xf32>
    %8 = arith.truncf %7 : vector<32x128xf32> to vector<32x128xbf16>
    %c0_6 = arith.constant 0 : index
    %c0_7 = arith.constant 0 : index
    %9 = vector.load %arg4[%c0_6, %c0_7] : memref<32x128xbf16, #tpu.memory_space<vmem>>, vector<32x128xbf16>
    tpu.vector_store %arg4[%c0_6, %c0_7], %8 {strides = array<i32>} : memref<32x128xbf16, #tpu.memory_space<vmem>>, vector<32x128xbf16>,
    return
  }
  func.func @transform_0(%arg0: i32) -> (i32, i32) {
    %c0_i32 = arith.constant 0 : i32
    %c0_i32_0 = arith.constant 0 : i32
    return %arg0, %c0_i32 : i32, i32
  }
  func.func @transform_1(%arg0: i32) -> (i32, i32) {
    %c0_i32 = arith.constant 0 : i32
    %c0_i32_0 = arith.constant 0 : i32
    %c0_i32_1 = arith.constant 0 : i32
    return %c0_i32, %c0_i32_0 : i32, i32
  }
  func.func @transform_2(%arg0: i32) -> (i32, i32) {
    %c0_i32 = arith.constant 0 : i32
    %c0_i32_0 = arith.constant 0 : i32
    %c0_i32_1 = arith.constant 0 : i32
    return %c0_i32, %c0_i32_0 : i32, i32
  }
  func.func @transform_3(%arg0: i32) -> (i32, i32) {
    %c0_i32 = arith.constant 0 : i32
    %c0_i32_0 = arith.constant 0 : i32
    return %arg0, %c0_i32 : i32, i32
  }
}

module attributes {stable_mosaic.version = 11 : i64} {
  func.func @_matmul_bias_kernel(%arg0: i32, %arg1: memref<8x576xbf16, #tpu.memory_space<vmem>>, %arg2: memref<576x128xbf16, #tpu.memory_space<vmem>>, %arg3: memref<1x128xf32, #tpu.memory_space<vmem>>, %arg4: memref<8x128xbf16, #tpu.memory_space<vmem>>) attributes {dimension_semantics = [#tpu.dimension_semantics<parallel>], iteration_bounds = array<i64: 1>, scalar_prefetch = 0 : i64, scratch_operands = 0 : i64, tpu.core_type = #tpu.core_type<tc>, window_params = [{transform_indices = @transform_0, window_bounds = array<i64: 8, 576>}, {pipeline_mode = #tpu.pipeline_mode<synchronous>, transform_indices = @transform_1, window_bounds = array<i64: 576, 128>}, {pipeline_mode = #tpu.pipeline_mode<synchronous>, transform_indices = @transform_2, window_bounds = array<i64: 1, 128>}, {transform_indices = @transform_3, window_bounds = array<i64: 8, 128>}]} {
    %c0 = arith.constant 0 : index
    %c0_0 = arith.constant 0 : index
    %0 = vector.load %arg1[%c0, %c0_0] : memref<8x576xbf16, #tpu.memory_space<vmem>>, vector<8x576xbf16>
    %c0_1 = arith.constant 0 : index
    %c0_2 = arith.constant 0 : index
    %1 = vector.load %arg2[%c0_1, %c0_2] : memref<576x128xbf16, #tpu.memory_space<vmem>>, vector<576x128xbf16>
    %cst = arith.constant dense<0.000000e+00> : vector<8x128xf32>
    %2 = tpu.matmul %0, %1, %cst {dimension_numbers = #tpu.dot_dimension_numbers<[1], [0], [0], [1], [0, 0, 1, 1], [], []>} : vector<8x576xbf16>, vector<576x128xbf16>, vector<8x128xf32> -> vector<8x128xf32>
    %c0_3 = arith.constant 0 : index
    %c0_4 = arith.constant 0 : index
    %3 = vector.load %arg3[%c0_3, %c0_4] : memref<1x128xf32, #tpu.memory_space<vmem>>, vector<1x128xf32>
    %4 = vector.broadcast %3 : vector<1x128xf32> to vector<8x128xf32>
    %5 = arith.addf %2, %4 : vector<8x128xf32>
    %cst_5 = arith.constant 0.000000e+00 : f32
    %6 = vector.broadcast %cst_5 : f32 to vector<8x128xf32>
    %7 = arith.maximumf %5, %6 : vector<8x128xf32>
    %8 = arith.truncf %7 : vector<8x128xf32> to vector<8x128xbf16>
    %c0_6 = arith.constant 0 : index
    %c0_7 = arith.constant 0 : index
    %9 = vector.load %arg4[%c0_6, %c0_7] : memref<8x128xbf16, #tpu.memory_space<vmem>>, vector<8x128xbf16>
    tpu.vector_store %arg4[%c0_6, %c0_7], %8 {strides = array<i32>} : memref<8x128xbf16, #tpu.memory_space<vmem>>, vector<8x128xbf16>,
    return
  }
  func.func @transform_0(%arg0: i32) -> (i32, i32) {
    %c0_i32 = arith.constant 0 : i32
    %c0_i32_0 = arith.constant 0 : i32
    return %arg0, %c0_i32 : i32, i32
  }
  func.func @transform_1(%arg0: i32) -> (i32, i32) {
    %c0_i32 = arith.constant 0 : i32
    %c0_i32_0 = arith.constant 0 : i32
    %c0_i32_1 = arith.constant 0 : i32
    return %c0_i32, %c0_i32_0 : i32, i32
  }
  func.func @transform_2(%arg0: i32) -> (i32, i32) {
    %c0_i32 = arith.constant 0 : i32
    %c0_i32_0 = arith.constant 0 : i32
    %c0_i32_1 = arith.constant 0 : i32
    return %c0_i32, %c0_i32_0 : i32, i32
  }
  func.func @transform_3(%arg0: i32) -> (i32, i32) {
    %c0_i32 = arith.constant 0 : i32
    %c0_i32_0 = arith.constant 0 : i32
    return %arg0, %c0_i32 : i32, i32
  }
}

module attributes {stable_mosaic.version = 11 : i64} {
  func.func @_grouped_matmul_kernel(%arg0: i32, %arg1: memref<7xi32, #tpu.memory_space<smem>>, %arg2: memref<128x128xbf16, #tpu.memory_space<vmem>>, %arg3: memref<1x128x128xbf16, #tpu.memory_space<vmem>>, %arg4: memref<1x1x128xf32, #tpu.memory_space<vmem>>, %arg5: memref<128x128xbf16, #tpu.memory_space<vmem>>) attributes {dimension_semantics = [#tpu.dimension_semantics<parallel>], iteration_bounds = array<i64: 7>, scalar_prefetch = 1 : i64, scratch_operands = 0 : i64, tpu.core_type = #tpu.core_type<tc>, window_params = [{transform_indices = @transform_0, window_bounds = array<i64: 128, 128>}, {transform_indices = @transform_1, window_bounds = array<i64: 1, 128, 128>}, {transform_indices = @transform_2, window_bounds = array<i64: 1, 1, 128>}, {transform_indices = @transform_3, window_bounds = array<i64: 128, 128>}]} {
    %c0 = arith.constant 0 : index
    %c0_0 = arith.constant 0 : index
    %0 = vector.load %arg2[%c0, %c0_0] : memref<128x128xbf16, #tpu.memory_space<vmem>>, vector<128x128xbf16>
    %c0_1 = arith.constant 0 : index
    %c0_2 = arith.constant 0 : index
    %c0_3 = arith.constant 0 : index
    %1 = vector.load %arg3[%c0_1, %c0_2, %c0_3] : memref<1x128x128xbf16, #tpu.memory_space<vmem>>, vector<1x128x128xbf16>
    %2 = vector.shape_cast %1 : vector<1x128x128xbf16> to vector<128x128xbf16>
    %cst = arith.constant dense<0.000000e+00> : vector<128x128xf32>
    %3 = tpu.matmul %0, %2, %cst {dimension_numbers = #tpu.dot_dimension_numbers<[1], [0], [0], [1], [0, 0, 1, 1], [], []>} : vector<128x128xbf16>, vector<128x128xbf16>, vector<128x128xf32> -> vector<128x128xf32>
    %c0_4 = arith.constant 0 : index
    %c0_5 = arith.constant 0 : index
    %c0_6 = arith.constant 0 : index
    %4 = vector.load %arg4[%c0_4, %c0_5, %c0_6] : memref<1x1x128xf32, #tpu.memory_space<vmem>>, vector<1x1x128xf32>
    %5 = vector.shape_cast %4 : vector<1x1x128xf32> to vector<1x128xf32>
    %6 = vector.broadcast %5 : vector<1x128xf32> to vector<128x128xf32>
    %7 = arith.addf %3, %6 : vector<128x128xf32>
    %8 = arith.truncf %7 : vector<128x128xf32> to vector<128x128xbf16>
    %c0_7 = arith.constant 0 : index
    %c0_8 = arith.constant 0 : index
    %9 = vector.load %arg5[%c0_7, %c0_8] : memref<128x128xbf16, #tpu.memory_space<vmem>>, vector<128x128xbf16>
    tpu.vector_store %arg5[%c0_7, %c0_8], %8 {strides = array<i32>} : memref<128x128xbf16, #tpu.memory_space<vmem>>, vector<128x128xbf16>,
    return
  }
  func.func @transform_0(%arg0: i32, %arg1: memref<7xi32, #tpu.memory_space<smem>>) -> (i32, i32) {
    %c0_i32 = arith.constant 0 : i32
    %c0_i32_0 = arith.constant 0 : i32
    return %arg0, %c0_i32 : i32, i32
  }
  func.func @transform_1(%arg0: i32, %arg1: memref<7xi32, #tpu.memory_space<smem>>) -> (i32, i32, i32) {
    %0 = arith.index_cast %arg0 : i32 to index
    %1 = memref.load %arg1[%0] : memref<7xi32, #tpu.memory_space<smem>>
    %c0_i32 = arith.constant 0 : i32
    %c0_i32_0 = arith.constant 0 : i32
    %c0_i32_1 = arith.constant 0 : i32
    return %1, %c0_i32, %c0_i32_0 : i32, i32, i32
  }
  func.func @transform_2(%arg0: i32, %arg1: memref<7xi32, #tpu.memory_space<smem>>) -> (i32, i32, i32) {
    %0 = arith.index_cast %arg0 : i32 to index
    %1 = memref.load %arg1[%0] : memref<7xi32, #tpu.memory_space<smem>>
    %c0_i32 = arith.constant 0 : i32
    %c0_i32_0 = arith.constant 0 : i32
    %c0_i32_1 = arith.constant 0 : i32
    return %1, %c0_i32, %c0_i32_0 : i32, i32, i32
  }
  func.func @transform_3(%arg0: i32, %arg1: memref<7xi32, #tpu.memory_space<smem>>) -> (i32, i32) {
    %c0_i32 = arith.constant 0 : i32
    %c0_i32_0 = arith.constant 0 : i32
    return %arg0, %c0_i32 : i32, i32
  }
}

module attributes {stable_mosaic.version = 11 : i64} {
  func.func @_grouped_matmul_kernel(%arg0: i32, %arg1: memref<7xi32, #tpu.memory_space<smem>>, %arg2: memref<128x288xbf16, #tpu.memory_space<vmem>>, %arg3: memref<1x288x128xbf16, #tpu.memory_space<vmem>>, %arg4: memref<1x1x128xf32, #tpu.memory_space<vmem>>, %arg5: memref<128x128xbf16, #tpu.memory_space<vmem>>) attributes {dimension_semantics = [#tpu.dimension_semantics<parallel>], iteration_bounds = array<i64: 7>, scalar_prefetch = 1 : i64, scratch_operands = 0 : i64, tpu.core_type = #tpu.core_type<tc>, window_params = [{transform_indices = @transform_0, window_bounds = array<i64: 128, 288>}, {transform_indices = @transform_1, window_bounds = array<i64: 1, 288, 128>}, {transform_indices = @transform_2, window_bounds = array<i64: 1, 1, 128>}, {transform_indices = @transform_3, window_bounds = array<i64: 128, 128>}]} {
    %c0 = arith.constant 0 : index
    %c0_0 = arith.constant 0 : index
    %0 = vector.load %arg2[%c0, %c0_0] : memref<128x288xbf16, #tpu.memory_space<vmem>>, vector<128x288xbf16>
    %c0_1 = arith.constant 0 : index
    %c0_2 = arith.constant 0 : index
    %c0_3 = arith.constant 0 : index
    %1 = vector.load %arg3[%c0_1, %c0_2, %c0_3] : memref<1x288x128xbf16, #tpu.memory_space<vmem>>, vector<1x288x128xbf16>
    %2 = vector.shape_cast %1 : vector<1x288x128xbf16> to vector<288x128xbf16>
    %cst = arith.constant dense<0.000000e+00> : vector<128x128xf32>
    %3 = tpu.matmul %0, %2, %cst {dimension_numbers = #tpu.dot_dimension_numbers<[1], [0], [0], [1], [0, 0, 1, 1], [], []>} : vector<128x288xbf16>, vector<288x128xbf16>, vector<128x128xf32> -> vector<128x128xf32>
    %c0_4 = arith.constant 0 : index
    %c0_5 = arith.constant 0 : index
    %c0_6 = arith.constant 0 : index
    %4 = vector.load %arg4[%c0_4, %c0_5, %c0_6] : memref<1x1x128xf32, #tpu.memory_space<vmem>>, vector<1x1x128xf32>
    %5 = vector.shape_cast %4 : vector<1x1x128xf32> to vector<1x128xf32>
    %6 = vector.broadcast %5 : vector<1x128xf32> to vector<128x128xf32>
    %7 = arith.addf %3, %6 : vector<128x128xf32>
    %8 = arith.truncf %7 : vector<128x128xf32> to vector<128x128xbf16>
    %c0_7 = arith.constant 0 : index
    %c0_8 = arith.constant 0 : index
    %9 = vector.load %arg5[%c0_7, %c0_8] : memref<128x128xbf16, #tpu.memory_space<vmem>>, vector<128x128xbf16>
    tpu.vector_store %arg5[%c0_7, %c0_8], %8 {strides = array<i32>} : memref<128x128xbf16, #tpu.memory_space<vmem>>, vector<128x128xbf16>,
    return
  }
  func.func @transform_0(%arg0: i32, %arg1: memref<7xi32, #tpu.memory_space<smem>>) -> (i32, i32) {
    %c0_i32 = arith.constant 0 : i32
    %c0_i32_0 = arith.constant 0 : i32
    return %arg0, %c0_i32 : i32, i32
  }
  func.func @transform_1(%arg0: i32, %arg1: memref<7xi32, #tpu.memory_space<smem>>) -> (i32, i32, i32) {
    %0 = arith.index_cast %arg0 : i32 to index
    %1 = memref.load %arg1[%0] : memref<7xi32, #tpu.memory_space<smem>>
    %c0_i32 = arith.constant 0 : i32
    %c0_i32_0 = arith.constant 0 : i32
    %c0_i32_1 = arith.constant 0 : i32
    return %1, %c0_i32, %c0_i32_0 : i32, i32, i32
  }
  func.func @transform_2(%arg0: i32, %arg1: memref<7xi32, #tpu.memory_space<smem>>) -> (i32, i32, i32) {
    %0 = arith.index_cast %arg0 : i32 to index
    %1 = memref.load %arg1[%0] : memref<7xi32, #tpu.memory_space<smem>>
    %c0_i32 = arith.constant 0 : i32
    %c0_i32_0 = arith.constant 0 : i32
    %c0_i32_1 = arith.constant 0 : i32
    return %1, %c0_i32, %c0_i32_0 : i32, i32, i32
  }
  func.func @transform_3(%arg0: i32, %arg1: memref<7xi32, #tpu.memory_space<smem>>) -> (i32, i32) {
    %c0_i32 = arith.constant 0 : i32
    %c0_i32_0 = arith.constant 0 : i32
    return %arg0, %c0_i32 : i32, i32
  }
}

module attributes {stable_mosaic.version = 11 : i64} {
  func.func @_matmul_bias_kernel(%arg0: i32, %arg1: memref<680x288xbf16, #tpu.memory_space<vmem>>, %arg2: memref<288x128xbf16, #tpu.memory_space<vmem>>, %arg3: memref<1x128xf32, #tpu.memory_space<vmem>>, %arg4: memref<680x128xbf16, #tpu.memory_space<vmem>>) attributes {dimension_semantics = [#tpu.dimension_semantics<parallel>], iteration_bounds = array<i64: 1>, scalar_prefetch = 0 : i64, scratch_operands = 0 : i64, tpu.core_type = #tpu.core_type<tc>, window_params = [{transform_indices = @transform_0, window_bounds = array<i64: 680, 288>}, {pipeline_mode = #tpu.pipeline_mode<synchronous>, transform_indices = @transform_1, window_bounds = array<i64: 288, 128>}, {pipeline_mode = #tpu.pipeline_mode<synchronous>, transform_indices = @transform_2, window_bounds = array<i64: 1, 128>}, {transform_indices = @transform_3, window_bounds = array<i64: 680, 128>}]} {
    %c0 = arith.constant 0 : index
    %c0_0 = arith.constant 0 : index
    %0 = vector.load %arg1[%c0, %c0_0] : memref<680x288xbf16, #tpu.memory_space<vmem>>, vector<680x288xbf16>
    %c0_1 = arith.constant 0 : index
    %c0_2 = arith.constant 0 : index
    %1 = vector.load %arg2[%c0_1, %c0_2] : memref<288x128xbf16, #tpu.memory_space<vmem>>, vector<288x128xbf16>
    %cst = arith.constant dense<0.000000e+00> : vector<680x128xf32>
    %2 = tpu.matmul %0, %1, %cst {dimension_numbers = #tpu.dot_dimension_numbers<[1], [0], [0], [1], [0, 0, 1, 1], [], []>} : vector<680x288xbf16>, vector<288x128xbf16>, vector<680x128xf32> -> vector<680x128xf32>
    %c0_3 = arith.constant 0 : index
    %c0_4 = arith.constant 0 : index
    %3 = vector.load %arg3[%c0_3, %c0_4] : memref<1x128xf32, #tpu.memory_space<vmem>>, vector<1x128xf32>
    %4 = vector.broadcast %3 : vector<1x128xf32> to vector<680x128xf32>
    %5 = arith.addf %2, %4 : vector<680x128xf32>
    %cst_5 = arith.constant 0.000000e+00 : f32
    %6 = vector.broadcast %cst_5 : f32 to vector<680x128xf32>
    %7 = arith.maximumf %5, %6 : vector<680x128xf32>
    %8 = arith.truncf %7 : vector<680x128xf32> to vector<680x128xbf16>
    %c0_6 = arith.constant 0 : index
    %c0_7 = arith.constant 0 : index
    %9 = vector.load %arg4[%c0_6, %c0_7] : memref<680x128xbf16, #tpu.memory_space<vmem>>, vector<680x128xbf16>
    tpu.vector_store %arg4[%c0_6, %c0_7], %8 {strides = array<i32>} : memref<680x128xbf16, #tpu.memory_space<vmem>>, vector<680x128xbf16>,
    return
  }
  func.func @transform_0(%arg0: i32) -> (i32, i32) {
    %c0_i32 = arith.constant 0 : i32
    %c0_i32_0 = arith.constant 0 : i32
    return %arg0, %c0_i32 : i32, i32
  }
  func.func @transform_1(%arg0: i32) -> (i32, i32) {
    %c0_i32 = arith.constant 0 : i32
    %c0_i32_0 = arith.constant 0 : i32
    %c0_i32_1 = arith.constant 0 : i32
    return %c0_i32, %c0_i32_0 : i32, i32
  }
  func.func @transform_2(%arg0: i32) -> (i32, i32) {
    %c0_i32 = arith.constant 0 : i32
    %c0_i32_0 = arith.constant 0 : i32
    %c0_i32_1 = arith.constant 0 : i32
    return %c0_i32, %c0_i32_0 : i32, i32
  }
  func.func @transform_3(%arg0: i32) -> (i32, i32) {
    %c0_i32 = arith.constant 0 : i32
    %c0_i32_0 = arith.constant 0 : i32
    return %arg0, %c0_i32 : i32, i32
  }
}

module attributes {stable_mosaic.version = 11 : i64} {
  func.func @_matmul_bias_kernel(%arg0: i32, %arg1: memref<680x288xbf16, #tpu.memory_space<vmem>>, %arg2: memref<288x128xbf16, #tpu.memory_space<vmem>>, %arg3: memref<1x128xf32, #tpu.memory_space<vmem>>, %arg4: memref<680x128xf32, #tpu.memory_space<vmem>>) attributes {dimension_semantics = [#tpu.dimension_semantics<parallel>], iteration_bounds = array<i64: 1>, scalar_prefetch = 0 : i64, scratch_operands = 0 : i64, tpu.core_type = #tpu.core_type<tc>, window_params = [{transform_indices = @transform_0, window_bounds = array<i64: 680, 288>}, {pipeline_mode = #tpu.pipeline_mode<synchronous>, transform_indices = @transform_1, window_bounds = array<i64: 288, 128>}, {pipeline_mode = #tpu.pipeline_mode<synchronous>, transform_indices = @transform_2, window_bounds = array<i64: 1, 128>}, {transform_indices = @transform_3, window_bounds = array<i64: 680, 128>}]} {
    %c0 = arith.constant 0 : index
    %c0_0 = arith.constant 0 : index
    %0 = vector.load %arg1[%c0, %c0_0] : memref<680x288xbf16, #tpu.memory_space<vmem>>, vector<680x288xbf16>
    %c0_1 = arith.constant 0 : index
    %c0_2 = arith.constant 0 : index
    %1 = vector.load %arg2[%c0_1, %c0_2] : memref<288x128xbf16, #tpu.memory_space<vmem>>, vector<288x128xbf16>
    %cst = arith.constant dense<0.000000e+00> : vector<680x128xf32>
    %2 = tpu.matmul %0, %1, %cst {dimension_numbers = #tpu.dot_dimension_numbers<[1], [0], [0], [1], [0, 0, 1, 1], [], []>} : vector<680x288xbf16>, vector<288x128xbf16>, vector<680x128xf32> -> vector<680x128xf32>
    %c0_3 = arith.constant 0 : index
    %c0_4 = arith.constant 0 : index
    %3 = vector.load %arg3[%c0_3, %c0_4] : memref<1x128xf32, #tpu.memory_space<vmem>>, vector<1x128xf32>
    %4 = vector.broadcast %3 : vector<1x128xf32> to vector<680x128xf32>
    %5 = arith.addf %2, %4 : vector<680x128xf32>
    %c0_5 = arith.constant 0 : index
    %c0_6 = arith.constant 0 : index
    %6 = vector.load %arg4[%c0_5, %c0_6] : memref<680x128xf32, #tpu.memory_space<vmem>>, vector<680x128xf32>
    tpu.vector_store %arg4[%c0_5, %c0_6], %5 {strides = array<i32>} : memref<680x128xf32, #tpu.memory_space<vmem>>, vector<680x128xf32>,
    return
  }
  func.func @transform_0(%arg0: i32) -> (i32, i32) {
    %c0_i32 = arith.constant 0 : i32
    %c0_i32_0 = arith.constant 0 : i32
    return %arg0, %c0_i32 : i32, i32
  }
  func.func @transform_1(%arg0: i32) -> (i32, i32) {
    %c0_i32 = arith.constant 0 : i32
    %c0_i32_0 = arith.constant 0 : i32
    %c0_i32_1 = arith.constant 0 : i32
    return %c0_i32, %c0_i32_0 : i32, i32
  }
  func.func @transform_2(%arg0: i32) -> (i32, i32) {
    %c0_i32 = arith.constant 0 : i32
    %c0_i32_0 = arith.constant 0 : i32
    %c0_i32_1 = arith.constant 0 : i32
    return %c0_i32, %c0_i32_0 : i32, i32
  }
  func.func @transform_3(%arg0: i32) -> (i32, i32) {
    %c0_i32 = arith.constant 0 : i32
    %c0_i32_0 = arith.constant 0 : i32
    return %arg0, %c0_i32 : i32, i32
  }
}

module attributes {stable_mosaic.version = 11 : i64} {
  func.func @_decode_kernel(%arg0: i32, %arg1: memref<24x512xf32, #tpu.memory_space<vmem>>, %arg2: memref<16x512xf32, #tpu.memory_space<vmem>>) attributes {dimension_semantics = [#tpu.dimension_semantics<parallel>], iteration_bounds = array<i64: 5>, scalar_prefetch = 0 : i64, scratch_operands = 0 : i64, tpu.core_type = #tpu.core_type<tc>, window_params = [{transform_indices = @transform_0, window_bounds = array<i64: 24, 512>}, {transform_indices = @transform_1, window_bounds = array<i64: 16, 512>}]} {
    %c0 = arith.constant 0 : index
    %c0_0 = arith.constant 0 : index
    %0 = vector.load %arg1[%c0, %c0_0] : memref<24x512xf32, #tpu.memory_space<vmem>>, vector<24x512xf32>
    %1 = vector.extract_strided_slice %0 {offsets = [0, 0], sizes = [3, 512], strides = [1, 1]} : vector<24x512xf32> to vector<3x512xf32>
    %2 = arith.negf %1 : vector<3x512xf32>
    %3 = math.exp %2 : vector<3x512xf32>
    %cst = arith.constant 1.000000e+00 : f32
    %4 = vector.broadcast %cst : f32 to vector<3x512xf32>
    %5 = arith.addf %4, %3 : vector<3x512xf32>
    %6 = arith.divf %4, %5 : vector<3x512xf32>
    %7 = vector.extract_strided_slice %0 {offsets = [3, 0], sizes = [1, 512], strides = [1, 1]} : vector<24x512xf32> to vector<1x512xf32>
    %8 = vector.extract_strided_slice %0 {offsets = [4, 0], sizes = [1, 512], strides = [1, 1]} : vector<24x512xf32> to vector<1x512xf32>
    %9 = vector.extract_strided_slice %0 {offsets = [5, 0], sizes = [1, 512], strides = [1, 1]} : vector<24x512xf32> to vector<1x512xf32>
    %10 = vector.extract_strided_slice %0 {offsets = [6, 0], sizes = [1, 512], strides = [1, 1]} : vector<24x512xf32> to vector<1x512xf32>
    %11 = vector.extract_strided_slice %0 {offsets = [7, 0], sizes = [13, 512], strides = [1, 1]} : vector<24x512xf32> to vector<13x512xf32>
    %12 = vector.extract_strided_slice %11 {offsets = [0, 0], sizes = [1, 512], strides = [1, 1]} : vector<13x512xf32> to vector<1x512xf32>
    %13 = vector.extract_strided_slice %11 {offsets = [1, 0], sizes = [1, 512], strides = [1, 1]} : vector<13x512xf32> to vector<1x512xf32>
    %14 = vector.extract_strided_slice %11 {offsets = [2, 0], sizes = [1, 512], strides = [1, 1]} : vector<13x512xf32> to vector<1x512xf32>
    %15 = vector.extract_strided_slice %11 {offsets = [3, 0], sizes = [1, 512], strides = [1, 1]} : vector<13x512xf32> to vector<1x512xf32>
    %16 = vector.extract_strided_slice %11 {offsets = [4, 0], sizes = [1, 512], strides = [1, 1]} : vector<13x512xf32> to vector<1x512xf32>
    %17 = vector.extract_strided_slice %11 {offsets = [5, 0], sizes = [1, 512], strides = [1, 1]} : vector<13x512xf32> to vector<1x512xf32>
    %18 = vector.extract_strided_slice %11 {offsets = [6, 0], sizes = [1, 512], strides = [1, 1]} : vector<13x512xf32> to vector<1x512xf32>
    %19 = vector.extract_strided_slice %11 {offsets = [7, 0], sizes = [1, 512], strides = [1, 1]} : vector<13x512xf32> to vector<1x512xf32>
    %20 = vector.extract_strided_slice %11 {offsets = [8, 0], sizes = [1, 512], strides = [1, 1]} : vector<13x512xf32> to vector<1x512xf32>
    %21 = vector.extract_strided_slice %11 {offsets = [9, 0], sizes = [1, 512], strides = [1, 1]} : vector<13x512xf32> to vector<1x512xf32>
    %22 = vector.extract_strided_slice %11 {offsets = [10, 0], sizes = [1, 512], strides = [1, 1]} : vector<13x512xf32> to vector<1x512xf32>
    %23 = vector.extract_strided_slice %11 {offsets = [11, 0], sizes = [1, 512], strides = [1, 1]} : vector<13x512xf32> to vector<1x512xf32>
    %24 = vector.extract_strided_slice %11 {offsets = [12, 0], sizes = [1, 512], strides = [1, 1]} : vector<13x512xf32> to vector<1x512xf32>
    %cst_1 = arith.constant 2.000000e-01 : f32
    %25 = vector.broadcast %cst_1 : f32 to vector<1x512xf32>
    %26 = arith.mulf %7, %25 : vector<1x512xf32>
    %cst_2 = arith.constant 0.000000e+00 : f32
    %27 = vector.broadcast %cst_2 : f32 to vector<1x512xf32>
    %28 = arith.addf %26, %27 : vector<1x512xf32>
    %cst_3 = arith.constant -1.000000e+00 : f32
    %cst_4 = arith.constant 1.000000e+00 : f32
    %29 = vector.broadcast %cst_3 : f32 to vector<1x512xf32>
    %30 = arith.maximumf %29, %28 : vector<1x512xf32>
    %31 = vector.broadcast %cst_4 : f32 to vector<1x512xf32>
    %32 = arith.minimumf %31, %30 : vector<1x512xf32>
    %33 = arith.mulf %32, %12 : vector<1x512xf32>
    %cst_5 = arith.constant 2.000000e-01 : f32
    %34 = vector.broadcast %cst_5 : f32 to vector<1x512xf32>
    %35 = arith.mulf %8, %34 : vector<1x512xf32>
    %cst_6 = arith.constant 0.000000e+00 : f32
    %36 = vector.broadcast %cst_6 : f32 to vector<1x512xf32>
    %37 = arith.addf %35, %36 : vector<1x512xf32>
    %cst_7 = arith.constant -1.000000e+00 : f32
    %cst_8 = arith.constant 1.000000e+00 : f32
    %38 = vector.broadcast %cst_7 : f32 to vector<1x512xf32>
    %39 = arith.maximumf %38, %37 : vector<1x512xf32>
    %40 = vector.broadcast %cst_8 : f32 to vector<1x512xf32>
    %41 = arith.minimumf %40, %39 : vector<1x512xf32>
    %42 = arith.mulf %41, %13 : vector<1x512xf32>
    %43 = arith.addf %14, %33 : vector<1x512xf32>
    %cst_9 = arith.constant 0.000000e+00 : f32
    %cst_10 = arith.constant 1.000000e+00 : f32
    %44 = vector.broadcast %cst_9 : f32 to vector<1x512xf32>
    %45 = arith.maximumf %44, %43 : vector<1x512xf32>
    %46 = vector.broadcast %cst_10 : f32 to vector<1x512xf32>
    %47 = arith.minimumf %46, %45 : vector<1x512xf32>
    %48 = arith.addf %15, %42 : vector<1x512xf32>
    %cst_11 = arith.constant 0.000000e+00 : f32
    %cst_12 = arith.constant 1.000000e+00 : f32
    %49 = vector.broadcast %cst_11 : f32 to vector<1x512xf32>
    %50 = arith.maximumf %49, %48 : vector<1x512xf32>
    %51 = vector.broadcast %cst_12 : f32 to vector<1x512xf32>
    %52 = arith.minimumf %51, %50 : vector<1x512xf32>
    %cst_13 = arith.constant 2.000000e-01 : f32
    %53 = vector.broadcast %cst_13 : f32 to vector<1x512xf32>
    %54 = arith.mulf %9, %53 : vector<1x512xf32>
    %cst_14 = arith.constant 0.000000e+00 : f32
    %55 = vector.broadcast %cst_14 : f32 to vector<1x512xf32>
    %56 = arith.addf %54, %55 : vector<1x512xf32>
    %cst_15 = arith.constant -2.000000e+00 : f32
    %cst_16 = arith.constant 2.000000e+00 : f32
    %57 = vector.broadcast %cst_15 : f32 to vector<1x512xf32>
    %58 = arith.maximumf %57, %56 : vector<1x512xf32>
    %59 = vector.broadcast %cst_16 : f32 to vector<1x512xf32>
    %60 = arith.minimumf %59, %58 : vector<1x512xf32>
    %cst_17 = arith.constant 2.000000e-01 : f32
    %61 = vector.broadcast %cst_17 : f32 to vector<1x512xf32>
    %62 = arith.mulf %10, %61 : vector<1x512xf32>
    %cst_18 = arith.constant 0.000000e+00 : f32
    %63 = vector.broadcast %cst_18 : f32 to vector<1x512xf32>
    %64 = arith.addf %62, %63 : vector<1x512xf32>
    %cst_19 = arith.constant -2.000000e+00 : f32
    %cst_20 = arith.constant 2.000000e+00 : f32
    %65 = vector.broadcast %cst_19 : f32 to vector<1x512xf32>
    %66 = arith.maximumf %65, %64 : vector<1x512xf32>
    %67 = vector.broadcast %cst_20 : f32 to vector<1x512xf32>
    %68 = arith.minimumf %67, %66 : vector<1x512xf32>
    %69 = arith.mulf %60, %18 : vector<1x512xf32>
    %70 = math.exp %69 : vector<1x512xf32>
    %71 = arith.mulf %16, %70 : vector<1x512xf32>
    %72 = arith.maximumf %20, %71 : vector<1x512xf32>
    %73 = arith.minimumf %21, %72 : vector<1x512xf32>
    %74 = arith.mulf %68, %19 : vector<1x512xf32>
    %75 = math.exp %74 : vector<1x512xf32>
    %76 = arith.mulf %17, %75 : vector<1x512xf32>
    %77 = arith.maximumf %22, %76 : vector<1x512xf32>
    %78 = arith.minimumf %23, %77 : vector<1x512xf32>
    %cst_21 = arith.constant dense<0xFF800000> : vector<512xf32>
    %79 = vector.multi_reduction <maximumf>, %6, %cst_21 [0] : vector<3x512xf32> to vector<512xf32>
    %80 = vector.shape_cast %79 : vector<512xf32> to vector<1x512xf32>
    %81 = tpu.iota {dimensions = array<i32: 0>} : vector<3x512xi32>
    %82 = vector.broadcast %80 : vector<1x512xf32> to vector<3x512xf32>
    %83 = arith.cmpf oge, %6, %82 : vector<3x512xf32>
    %c3_i32 = arith.constant 3 : i32
    %84 = vector.broadcast %c3_i32 : i32 to vector<3x512xi32>
    %85 = arith.select %83, %81, %84 : vector<3x512xi1>, vector<3x512xi32>
    %cst_22 = arith.constant dense<2147483647> : vector<512xi32>
    %86 = vector.multi_reduction <minsi>, %85, %cst_22 [0] : vector<3x512xi32> to vector<512xi32>
    %87 = vector.shape_cast %86 : vector<512xi32> to vector<1x512xi32>
    %88 = arith.sitofp %87 : vector<1x512xi32> to vector<1x512xf32>
    %cst_23 = arith.constant 5.000000e-01 : f32
    %89 = vector.broadcast %cst_23 : f32 to vector<1x512xf32>
    %90 = arith.cmpf ogt, %24, %89 : vector<1x512xf32>
    %cst_24 = arith.constant -1.000000e+00 : f32
    %91 = vector.broadcast %cst_24 : f32 to vector<1x512xf32>
    %92 = arith.select %90, %80, %91 : vector<1x512xi1>, vector<1x512xf32>
    %cst_25 = arith.constant 5.000000e-01 : f32
    %93 = vector.broadcast %cst_25 : f32 to vector<1x512xf32>
    %94 = arith.mulf %93, %73 : vector<1x512xf32>
    %95 = arith.subf %47, %94 : vector<1x512xf32>
    %cst_26 = arith.constant 0.000000e+00 : f32
    %cst_27 = arith.constant 1.000000e+00 : f32
    %96 = vector.broadcast %cst_26 : f32 to vector<1x512xf32>
    %97 = arith.maximumf %96, %95 : vector<1x512xf32>
    %98 = vector.broadcast %cst_27 : f32 to vector<1x512xf32>
    %99 = arith.minimumf %98, %97 : vector<1x512xf32>
    %cst_28 = arith.constant 5.000000e-01 : f32
    %100 = vector.broadcast %cst_28 : f32 to vector<1x512xf32>
    %101 = arith.mulf %100, %78 : vector<1x512xf32>
    %102 = arith.subf %52, %101 : vector<1x512xf32>
    %cst_29 = arith.constant 0.000000e+00 : f32
    %cst_30 = arith.constant 1.000000e+00 : f32
    %103 = vector.broadcast %cst_29 : f32 to vector<1x512xf32>
    %104 = arith.maximumf %103, %102 : vector<1x512xf32>
    %105 = vector.broadcast %cst_30 : f32 to vector<1x512xf32>
    %106 = arith.minimumf %105, %104 : vector<1x512xf32>
    %cst_31 = arith.constant 5.000000e-01 : f32
    %107 = vector.broadcast %cst_31 : f32 to vector<1x512xf32>
    %108 = arith.mulf %107, %73 : vector<1x512xf32>
    %109 = arith.addf %47, %108 : vector<1x512xf32>
    %cst_32 = arith.constant 0.000000e+00 : f32
    %cst_33 = arith.constant 1.000000e+00 : f32
    %110 = vector.broadcast %cst_32 : f32 to vector<1x512xf32>
    %111 = arith.maximumf %110, %109 : vector<1x512xf32>
    %112 = vector.broadcast %cst_33 : f32 to vector<1x512xf32>
    %113 = arith.minimumf %112, %111 : vector<1x512xf32>
    %cst_34 = arith.constant 5.000000e-01 : f32
    %114 = vector.broadcast %cst_34 : f32 to vector<1x512xf32>
    %115 = arith.mulf %114, %78 : vector<1x512xf32>
    %116 = arith.addf %52, %115 : vector<1x512xf32>
    %cst_35 = arith.constant 0.000000e+00 : f32
    %cst_36 = arith.constant 1.000000e+00 : f32
    %117 = vector.broadcast %cst_35 : f32 to vector<1x512xf32>
    %118 = arith.maximumf %117, %116 : vector<1x512xf32>
    %119 = vector.broadcast %cst_36 : f32 to vector<1x512xf32>
    %120 = arith.minimumf %119, %118 : vector<1x512xf32>
    %cst_37 = arith.constant 0.000000e+00 : f32
    %121 = vector.broadcast %cst_37 : f32 to vector<7x512xf32>
    %122 = tpu.concatenate %99, %106, %113, %120, %92, %88, %6, %121 in 0 : vector<1x512xf32>, vector<1x512xf32>, vector<1x512xf32>, vector<1x512xf32>, vector<1x512xf32>, vector<1x512xf32>, vector<3x512xf32>, vector<7x512xf32> -> vector<16x512xf32>
    %c0_38 = arith.constant 0 : index
    %c0_39 = arith.constant 0 : index
    %123 = vector.load %arg2[%c0_38, %c0_39] : memref<16x512xf32, #tpu.memory_space<vmem>>, vector<16x512xf32>
    tpu.vector_store %arg2[%c0_38, %c0_39], %122 {strides = array<i32>} : memref<16x512xf32, #tpu.memory_space<vmem>>, vector<16x512xf32>,
    return
  }
  func.func @transform_0(%arg0: i32) -> (i32, i32) {
    %c0_i32 = arith.constant 0 : i32
    %c0_i32_0 = arith.constant 0 : i32
    return %c0_i32, %arg0 : i32, i32
  }
  func.func @transform_1(%arg0: i32) -> (i32, i32) {
    %c0_i32 = arith.constant 0 : i32
    %c0_i32_0 = arith.constant 0 : i32
    return %c0_i32, %arg0 : i32, i32
  }
}

</mosaic_0001>

<bundles_post_ra>
// kernel: _device_forward.10
= control target key start
LH: loop header
LB: loop body
LE: loop exit
PB: predicated region body
PF: predicated region fallthrough
CT: control target
= control target key end

     0   :  { %s2445_s12 = smov 0   ;;  %s2796_s0 = inlined_call_operand.vmem [shape: bf16[2048,27], index: 0, kind: input, shape index: {}]   ;;  %s2797_s1 = inlined_call_operand.vmem [shape: bf16[27,128], index: 1, kind: input, shape index: {}]   ;;  %s2798_s2 = inlined_call_operand.vmem [shape: f32[1,128], index: 2, kind: input, shape index: {}]   ;;  %s2799_s3 = inlined_call_operand.vmem [shape: bf16[2048,128], index: 3, kind: output, shape index: {}]  }
   0x1 LB: > { %s1611_s13 = sadd.s32 4294967295, %s2422_s12   ;;  %p1615_p0 = scmp.ge.s32.totalorder %s2422_s12, 1  ;;  %s2422_s12 = sphi %s2445_s12, %s13_s12  }
   0x2   : > { %p138_p1 = scmp.lt.s32.totalorder %s2422_s12, 3 }
   0x4   : > { %p139_p2 = pnand %p1615_p0, %p138_p1 }
   0x5   : > { %s1616_s18 = sshll.u32 (!%p139_p2), %s1611_s13, 7 }
   0x6   : > { %142 = sbr.rel (%p139_p2) target bundleno = 413 (0x19d), region = 32  ;;  %p163_p3 = scmp.lt.s32.totalorder (!%p139_p2), %s1616_s18, 255 }
   0xb   : > { %v1882_v0 = vld [vmem:[%s2797_s1 + $0x8] sm:$0xf]  ;;  %v2015_v1 = vld [vmem:[%s2797_s1 + $0x8] sm:$0x30]  ;;  %vm835_vm0 = vcmask 1044480   ;;  %vm836_vm1 = vcmask 1045504  }
   0xc   : > { %v1883_v2 = vor.u32 %v2015_v1, %v1882_v0  ;;  %v2424_v3 = vmov 65535   ;;  %s2801_s18 = smov (!%p163_p3, %s1616_s18), 255  ;;  %v2014_v7 = vld [vmem:[%s2797_s1] sm:$0xff]  ;;  %vm642_vm2 = vcmask 220160  }
   0xd   : > { %v837_v4 = vsel %vm835_vm0, 4294967295, %v2424_v3  ;;  %s1617_s21 = sshll.u32 %s2801_s18, 2  ;;  %v2543_v46 = vld [vmem:[%s2798_s2] ss:$0 sm:$0xff] }
   0xe   : > { %v838_v5 = vsel %vm836_vm1, %v837_v4, 0  ;;  %s2470_s24 = scalar_lea.vmem %s2796_s0, %s1617_s21  ;;  %s2558_s29 = scalar_lea.vmem %s2799_s3, %s1617_s21 }
   0xf   : > { %v840_v6 = vand.u32 %v1883_v2, %v838_v5  ;;  %v1950_v8 = vld [vmem:[%s2470_s24] sm:$0xff]  ;;  %v1951_v12 = vld [vmem:[%s2470_s24 + $0x8] sm:$0xff]  ;;  %v1952_v16 = vld [vmem:[%s2470_s24 + $0x10] sm:$0xff] }
  0x10   : > { %v1966_v9 = vld [vmem:[%s2470_s24 + $0x80] sm:$0xff]  ;;  %v1967_v13 = vld [vmem:[%s2470_s24 + $0x88] sm:$0xff]  ;;  %v1968_v17 = vld [vmem:[%s2470_s24 + $0x90] sm:$0xff] }
  0x11   : > { %848 = vmatpush.bf16.msra.mxu0 %v840_v6  ;;  %2399 = vmatpush.bf16.msra.mxu1 %v840_v6  ;;  %v1982_v10 = vld [vmem:[%s2470_s24 + $0x100] sm:$0xff]  ;;  %v1983_v14 = vld [vmem:[%s2470_s24 + $0x108] sm:$0xff]  ;;  %v1984_v18 = vld [vmem:[%s2470_s24 + $0x110] sm:$0xff] }
  0x12   : > { %2400 = vmatpush.bf16.msra.mxu2 %v840_v6  ;;  %2401 = vmatpush.bf16.msra.mxu3 %v840_v6  ;;  %v1998_v11 = vld [vmem:[%s2470_s24 + $0x180] sm:$0xff]  ;;  %v1999_v15 = vld [vmem:[%s2470_s24 + $0x188] sm:$0xff]  ;;  %v2000_v19 = vld [vmem:[%s2470_s24 + $0x190] sm:$0xff] }
  0x13   : > { %v1953_v20 = vld [vmem:[%s2470_s24 + $0x18] sm:$0xff]  ;;  %v1954_v24 = vld [vmem:[%s2470_s24 + $0x20] sm:$0xff]  ;;  %v1955_v28 = vld [vmem:[%s2470_s24 + $0x28] sm:$0xff] }
  0x14   : > { %v1969_v21 = vld [vmem:[%s2470_s24 + $0x98] sm:$0xff]  ;;  %v1970_v25 = vld [vmem:[%s2470_s24 + $0xa0] sm:$0xff]  ;;  %v1971_v29 = vld [vmem:[%s2470_s24 + $0xa8] sm:$0xff] }
  0x15   : > { %849 = vmatpush.bf16.msra.mxu0 %v2014_v7  ;;  %2402 = vmatpush.bf16.msra.mxu1 %v2014_v7  ;;  %v1985_v22 = vld [vmem:[%s2470_s24 + $0x118] sm:$0xff]  ;;  %v1986_v26 = vld [vmem:[%s2470_s24 + $0x120] sm:$0xff]  ;;  %v1987_v30 = vld [vmem:[%s2470_s24 + $0x128] sm:$0xff] }
  0x16   : > { %2403 = vmatpush.bf16.msra.mxu2 %v2014_v7  ;;  %2404 = vmatpush.bf16.msra.mxu3 %v2014_v7  ;;  %v2001_v23 = vld [vmem:[%s2470_s24 + $0x198] sm:$0xff]  ;;  %v2002_v27 = vld [vmem:[%s2470_s24 + $0x1a0] sm:$0xff]  ;;  %v2003_v31 = vld [vmem:[%s2470_s24 + $0x1a8] sm:$0xff] }
  0x17   : > { %v1956_v32 = vld [vmem:[%s2470_s24 + $0x30] sm:$0xff]  ;;  %v1957_v36 = vld [vmem:[%s2470_s24 + $0x38] sm:$0xff]  ;;  %v1958_v40 = vld [vmem:[%s2470_s24 + $0x40] sm:$0xff] }
  0x18   : > { %1884 = vmatmul.msk.bf16.vlgmr.msra.gmra.mxu0 %vm642_vm2, %v1950_v8  ;;  %1900 = vmatmul.msk.bf16.vlgmr.msra.gmra.mxu1 %vm642_vm2, %v1966_v9  ;;  %v1972_v33 = vld [vmem:[%s2470_s24 + $0xb0] sm:$0xff]  ;;  %v1973_v37 = vld [vmem:[%s2470_s24 + $0xb8] sm:$0xff]  ;;  %v1974_v41 = vld [vmem:[%s2470_s24 + $0xc0] sm:$0xff] }
  0x19   : > { %1916 = vmatmul.msk.bf16.vlgmr.msra.gmra.mxu2 %vm642_vm2, %v1982_v10  ;;  %1932 = vmatmul.msk.bf16.vlgmr.msra.gmra.mxu3 %vm642_vm2, %v1998_v11  ;;  %v1988_v34 = vld [vmem:[%s2470_s24 + $0x130] sm:$0xff]  ;;  %v1989_v38 = vld [vmem:[%s2470_s24 + $0x138] sm:$0xff]  ;;  %v1990_v44 = vld [vmem:[%s2470_s24 + $0x140] sm:$0xff] }
  0x1a   : > { %v2004_v35 = vld [vmem:[%s2470_s24 + $0x1b0] sm:$0xff]  ;;  %v2005_v39 = vld [vmem:[%s2470_s24 + $0x1b8] sm:$0xff]  ;;  %v2006_v45 = vld [vmem:[%s2470_s24 + $0x1c0] sm:$0xff] }
  0x1b   : > { %v1959_v1 = vld [vmem:[%s2470_s24 + $0x48] sm:$0xff] }
  0x1c   : > { %v1975_v2 = vld [vmem:[%s2470_s24 + $0xc8] sm:$0xff] }
  0x1d   : > { %v1991_v7 = vld [vmem:[%s2470_s24 + $0x148] sm:$0xff] }
  0x1e   : > { %v2007_v8 = vld [vmem:[%s2470_s24 + $0x1c8] sm:$0xff] }
  0x28   : > { %1885 = vmatmul.msk.bf16.gmra.mxu0 %vm642_vm2, %v1951_v12  ;;  %1901 = vmatmul.msk.bf16.gmra.mxu1 %vm642_vm2, %v1967_v13 }
  0x29   : > { %1917 = vmatmul.msk.bf16.gmra.mxu2 %vm642_vm2, %v1983_v14  ;;  %1933 = vmatmul.msk.bf16.gmra.mxu3 %vm642_vm2, %v1999_v15 }
  0x38   : > { %1886 = vmatmul.msk.bf16.gmra.mxu0 %vm642_vm2, %v1952_v16  ;;  %1902 = vmatmul.msk.bf16.gmra.mxu1 %vm642_vm2, %v1968_v17 }
  0x39   : > { %1918 = vmatmul.msk.bf16.gmra.mxu2 %vm642_vm2, %v1984_v18  ;;  %1934 = vmatmul.msk.bf16.gmra.mxu3 %vm642_vm2, %v2000_v19 }
  0x48   : > { %1887 = vmatmul.msk.bf16.gmra.mxu0 %vm642_vm2, %v1953_v20  ;;  %1903 = vmatmul.msk.bf16.gmra.mxu1 %vm642_vm2, %v1969_v21 }
  0x49   : > { %1919 = vmatmul.msk.bf16.gmra.mxu2 %vm642_vm2, %v1985_v22  ;;  %1935 = vmatmul.msk.bf16.gmra.mxu3 %vm642_vm2, %v2001_v23 }
  0x58   : > { %1888 = vmatmul.msk.bf16.gmra.mxu0 %vm642_vm2, %v1954_v24  ;;  %1904 = vmatmul.msk.bf16.gmra.mxu1 %vm642_vm2, %v1970_v25 }
  0x59   : > { %1920 = vmatmul.msk.bf16.gmra.mxu2 %vm642_vm2, %v1986_v26  ;;  %1936 = vmatmul.msk.bf16.gmra.mxu3 %vm642_vm2, %v2002_v27 }
  0x68   : > { %1889 = vmatmul.msk.bf16.gmra.mxu0 %vm642_vm2, %v1955_v28  ;;  %1905 = vmatmul.msk.bf16.gmra.mxu1 %vm642_vm2, %v1971_v29 }
  0x69   : > { %1921 = vmatmul.msk.bf16.gmra.mxu2 %vm642_vm2, %v1987_v30  ;;  %1937 = vmatmul.msk.bf16.gmra.mxu3 %vm642_vm2, %v2003_v31 }
  0x78   : > { %1890 = vmatmul.msk.bf16.gmra.mxu0 %vm642_vm2, %v1956_v32  ;;  %1906 = vmatmul.msk.bf16.gmra.mxu1 %vm642_vm2, %v1972_v33  ;;  %v1960_v33 = vld [vmem:[%s2470_s24 + $0x50] sm:$0xff] }
  0x79   : > { %1922 = vmatmul.msk.bf16.gmra.mxu2 %vm642_vm2, %v1988_v34  ;;  %1938 = vmatmul.msk.bf16.gmra.mxu3 %vm642_vm2, %v2004_v35  ;;  %v1976_v34 = vld [vmem:[%s2470_s24 + $0xd0] sm:$0xff] }
  0x88   : > { %1891 = vmatmul.msk.bf16.gmra.mxu0 %vm642_vm2, %v1957_v36  ;;  %1907 = vmatmul.msk.bf16.gmra.mxu1 %vm642_vm2, %v1973_v37 }
  0x89   : > { %1923 = vmatmul.msk.bf16.gmra.mxu2 %vm642_vm2, %v1989_v38  ;;  %1939 = vmatmul.msk.bf16.gmra.mxu3 %vm642_vm2, %v2005_v39  ;;  %v1992_v39 = vld [vmem:[%s2470_s24 + $0x150] sm:$0xff] }
  0x95   : > { %v851_v42 = vpop.f32.mrf.mxu0  ;;  %v931_v43 = vpop.f32.mrf.mxu1 }
  0x96   : > { %v852_v47 = vadd.f32 %v2543_v46, %v851_v42  ;;  %v932_v48 = vadd.f32 %v2543_v46, %v931_v43 }
  0x98   : > { %1892 = vmatmul.msk.bf16.gmra.mxu0 %vm642_vm2, %v1958_v40  ;;  %1908 = vmatmul.msk.bf16.gmra.mxu1 %vm642_vm2, %v1974_v41  ;;  %v1171_v55 = vmax.f32 %v852_v47, 0.0  ;;  %v1203_v56 = vmax.f32 %v932_v48, 0.0  ;;  %v2008_v40 = vld [vmem:[%s2470_s24 + $0x1d0] sm:$0xff] }
  0x99   : > { %1924 = vmatmul.msk.bf16.gmra.mxu2 %vm642_vm2, %v1990_v44  ;;  %1940 = vmatmul.msk.bf16.gmra.mxu3 %vm642_vm2, %v2006_v45 }
  0x9c   : > { %v1011_v49 = vpop.f32.mrf.mxu2  ;;  %v1091_v50 = vpop.f32.mrf.mxu3 }
  0x9d   : > { %v853_v51 = vpop.f32.mrf.mxu0  ;;  %v933_v52 = vpop.f32.mrf.mxu1  ;;  %v1012_v61 = vadd.f32 %v2543_v46, %v1011_v49  ;;  %v1092_v62 = vadd.f32 %v2543_v46, %v1091_v50 }
  0x9e   : > { %v854_v53 = vadd.f32 %v2543_v46, %v853_v51  ;;  %v934_v54 = vadd.f32 %v2543_v46, %v933_v52 }
  0x9f   : > { %v1235_v9 = vmax.f32 %v1012_v61, 0.0  ;;  %v1267_v10 = vmax.f32 %v1092_v62, 0.0 }
  0xa0   : > { %v1172_v57 = vmax.f32 %v854_v53, 0.0  ;;  %v1204_v58 = vmax.f32 %v934_v54, 0.0 }
  0xa2   : > { %v2019_v59 = vpack.c.bf16 %v1172_v57, %v1171_v55  ;;  %v2099_v60 = vpack.c.bf16 %v1204_v58, %v1203_v56 }
  0xa4   : > { %2020 = vst [vmem:[%s2558_s29] sm:$0xff] %v2019_v59   ;;  %v1013_v63 = vpop.f32.mrf.mxu2  ;;  %v1093_v0 = vpop.f32.mrf.mxu3 }
  0xa5   : > { %2351 = vst [vmem:[%s2558_s29 + $0x80] sm:$0xff] %v2099_v60   ;;  %v1014_v3 = vadd.f32 %v2543_v46, %v1013_v63  ;;  %v1094_v4 = vadd.f32 %v2543_v46, %v1093_v0  ;;  %v856_v5 = vpop.f32.mrf.mxu0  ;;  %v936_v6 = vpop.f32.mrf.mxu1 }
  0xa6   : > { %v857_v15 = vadd.f32 %v2543_v46, %v856_v5  ;;  %v937_v16 = vadd.f32 %v2543_v46, %v936_v6 }
  0xa7   : > { %v1236_v11 = vmax.f32 %v1014_v3, 0.0  ;;  %v1268_v12 = vmax.f32 %v1094_v4, 0.0  ;;  %v1977_v3 = vld [vmem:[%s2470_s24 + $0xd8] sm:$0xff] }
  0xa8   : > { %1893 = vmatmul.msk.bf16.gmra.mxu0 %vm642_vm2, %v1959_v1  ;;  %1909 = vmatmul.msk.bf16.gmra.mxu1 %vm642_vm2, %v1975_v2  ;;  %v1173_v23 = vmax.f32 %v857_v15, 0.0  ;;  %v1205_v24 = vmax.f32 %v937_v16, 0.0  ;;  %v1961_v2 = vld [vmem:[%s2470_s24 + $0x58] sm:$0xff] }
  0xa9   : > { %v2179_v13 = vpack.c.bf16 %v1236_v11, %v1235_v9  ;;  %v2259_v14 = vpack.c.bf16 %v1268_v12, %v1267_v10  ;;  %1925 = vmatmul.msk.bf16.gmra.mxu2 %vm642_vm2, %v1991_v7  ;;  %1941 = vmatmul.msk.bf16.gmra.mxu3 %vm642_vm2, %v2007_v8  ;;  %v1993_v8 = vld [vmem:[%s2470_s24 + $0x158] sm:$0xff] }
  0xaa   : > { %v2009_v9 = vld [vmem:[%s2470_s24 + $0x1d8] sm:$0xff] }
  0xab   : > { %2367 = vst [vmem:[%s2558_s29 + $0x100] sm:$0xff] %v2179_v13  }
  0xac   : > { %2383 = vst [vmem:[%s2558_s29 + $0x180] sm:$0xff] %v2259_v14   ;;  %v1016_v17 = vpop.f32.mrf.mxu2  ;;  %v1096_v18 = vpop.f32.mrf.mxu3 }
  0xad   : > { %v858_v19 = vpop.f32.mrf.mxu0  ;;  %v938_v20 = vpop.f32.mrf.mxu1  ;;  %v1017_v29 = vadd.f32 %v2543_v46, %v1016_v17  ;;  %v1097_v30 = vadd.f32 %v2543_v46, %v1096_v18 }
  0xae   : > { %v859_v21 = vadd.f32 %v2543_v46, %v858_v19  ;;  %v939_v22 = vadd.f32 %v2543_v46, %v938_v20 }
  0xaf   : > { %v1237_v41 = vmax.f32 %v1017_v29, 0.0  ;;  %v1269_v42 = vmax.f32 %v1097_v30, 0.0 }
  0xb0   : > { %v1174_v25 = vmax.f32 %v859_v21, 0.0  ;;  %v1206_v26 = vmax.f32 %v939_v22, 0.0 }
  0xb2   : > { %v2024_v27 = vpack.c.bf16 %v1174_v25, %v1173_v23  ;;  %v2104_v28 = vpack.c.bf16 %v1206_v26, %v1205_v24 }
  0xb4   : > { %2336 = vst [vmem:[%s2558_s29 + $0x8] sm:$0xff] %v2024_v27   ;;  %v1018_v31 = vpop.f32.mrf.mxu2  ;;  %v1098_v32 = vpop.f32.mrf.mxu3 }
  0xb5   : > { %2352 = vst [vmem:[%s2558_s29 + $0x88] sm:$0xff] %v2104_v28   ;;  %v1019_v35 = vadd.f32 %v2543_v46, %v1018_v31  ;;  %v1099_v36 = vadd.f32 %v2543_v46, %v1098_v32  ;;  %v861_v37 = vpop.f32.mrf.mxu0  ;;  %v941_v38 = vpop.f32.mrf.mxu1 }
  0xb6   : > { %v862_v48 = vadd.f32 %v2543_v46, %v861_v37  ;;  %v942_v49 = vadd.f32 %v2543_v46, %v941_v38 }
  0xb7   : > { %v1238_v43 = vmax.f32 %v1019_v35, 0.0  ;;  %v1270_v44 = vmax.f32 %v1099_v36, 0.0  ;;  %v1978_v35 = vld [vmem:[%s2470_s24 + $0xe0] sm:$0xff] }
  0xb8   : > { %1894 = vmatmul.msk.bf16.gmra.mxu0 %vm642_vm2, %v1960_v33  ;;  %1910 = vmatmul.msk.bf16.gmra.mxu1 %vm642_vm2, %v1976_v34  ;;  %v1175_v56 = vmax.f32 %v862_v48, 0.0  ;;  %v1207_v57 = vmax.f32 %v942_v49, 0.0  ;;  %v1962_v34 = vld [vmem:[%s2470_s24 + $0x60] sm:$0xff] }
  0xb9   : > { %v2184_v45 = vpack.c.bf16 %v1238_v43, %v1237_v41  ;;  %v2264_v47 = vpack.c.bf16 %v1270_v44, %v1269_v42  ;;  %1926 = vmatmul.msk.bf16.gmra.mxu2 %vm642_vm2, %v1992_v39  ;;  %1942 = vmatmul.msk.bf16.gmra.mxu3 %vm642_vm2, %v2008_v40  ;;  %v1994_v40 = vld [vmem:[%s2470_s24 + $0x160] sm:$0xff] }
  0xba   : > { %v2010_v41 = vld [vmem:[%s2470_s24 + $0x1e0] sm:$0xff] }
  0xbb   : > { %2368 = vst [vmem:[%s2558_s29 + $0x108] sm:$0xff] %v2184_v45  }
  0xbc   : > { %2384 = vst [vmem:[%s2558_s29 + $0x188] sm:$0xff] %v2264_v47   ;;  %v1021_v50 = vpop.f32.mrf.mxu2  ;;  %v1101_v51 = vpop.f32.mrf.mxu3 }
  0xbd   : > { %v863_v52 = vpop.f32.mrf.mxu0  ;;  %v943_v53 = vpop.f32.mrf.mxu1  ;;  %v1022_v62 = vadd.f32 %v2543_v46, %v1021_v50  ;;  %v1102_v63 = vadd.f32 %v2543_v46, %v1101_v51 }
  0xbe   : > { %v864_v54 = vadd.f32 %v2543_v46, %v863_v52  ;;  %v944_v55 = vadd.f32 %v2543_v46, %v943_v53 }
  0xbf   : > { %v1239_v10 = vmax.f32 %v1022_v62, 0.0  ;;  %v1271_v11 = vmax.f32 %v1102_v63, 0.0 }
  0xc0   : > { %v1176_v58 = vmax.f32 %v864_v54, 0.0  ;;  %v1208_v59 = vmax.f32 %v944_v55, 0.0 }
  0xc2   : > { %v2029_v60 = vpack.c.bf16 %v1176_v58, %v1175_v56  ;;  %v2109_v61 = vpack.c.bf16 %v1208_v59, %v1207_v57 }
  0xc4   : > { %2337 = vst [vmem:[%s2558_s29 + $0x10] sm:$0xff] %v2029_v60   ;;  %v1023_v0 = vpop.f32.mrf.mxu2  ;;  %v1103_v1 = vpop.f32.mrf.mxu3 }
  0xc5   : > { %2353 = vst [vmem:[%s2558_s29 + $0x90] sm:$0xff] %v2109_v61   ;;  %v1024_v4 = vadd.f32 %v2543_v46, %v1023_v0  ;;  %v1104_v5 = vadd.f32 %v2543_v46, %v1103_v1  ;;  %v866_v6 = vpop.f32.mrf.mxu0  ;;  %v946_v7 = vpop.f32.mrf.mxu1 }
  0xc6   : > { %v867_v16 = vadd.f32 %v2543_v46, %v866_v6  ;;  %v947_v17 = vadd.f32 %v2543_v46, %v946_v7 }
  0xc7   : > { %v1240_v12 = vmax.f32 %v1024_v4, 0.0  ;;  %v1272_v13 = vmax.f32 %v1104_v5, 0.0  ;;  %v1979_v4 = vld [vmem:[%s2470_s24 + $0xe8] sm:$0xff] }
  0xc8   : > { %1895 = vmatmul.msk.bf16.gmra.mxu0 %vm642_vm2, %v1961_v2  ;;  %1911 = vmatmul.msk.bf16.gmra.mxu1 %vm642_vm2, %v1977_v3  ;;  %v1177_v24 = vmax.f32 %v867_v16, 0.0  ;;  %v1209_v25 = vmax.f32 %v947_v17, 0.0  ;;  %v1963_v3 = vld [vmem:[%s2470_s24 + $0x68] sm:$0xff] }
  0xc9   : > { %v2189_v14 = vpack.c.bf16 %v1240_v12, %v1239_v10  ;;  %v2269_v15 = vpack.c.bf16 %v1272_v13, %v1271_v11  ;;  %1927 = vmatmul.msk.bf16.gmra.mxu2 %vm642_vm2, %v1993_v8  ;;  %1943 = vmatmul.msk.bf16.gmra.mxu3 %vm642_vm2, %v2009_v9  ;;  %v1995_v9 = vld [vmem:[%s2470_s24 + $0x168] sm:$0xff] }
  0xca   : > { %v2011_v10 = vld [vmem:[%s2470_s24 + $0x1e8] sm:$0xff] }
  0xcb   : > { %2369 = vst [vmem:[%s2558_s29 + $0x110] sm:$0xff] %v2189_v14  }
  0xcc   : > { %2385 = vst [vmem:[%s2558_s29 + $0x190] sm:$0xff] %v2269_v15   ;;  %v1026_v18 = vpop.f32.mrf.mxu2  ;;  %v1106_v19 = vpop.f32.mrf.mxu3 }
  0xcd   : > { %v868_v20 = vpop.f32.mrf.mxu0  ;;  %v948_v21 = vpop.f32.mrf.mxu1  ;;  %v1027_v30 = vadd.f32 %v2543_v46, %v1026_v18  ;;  %v1107_v31 = vadd.f32 %v2543_v46, %v1106_v19 }
  0xce   : > { %v869_v22 = vadd.f32 %v2543_v46, %v868_v20  ;;  %v949_v23 = vadd.f32 %v2543_v46, %v948_v21 }
  0xcf   : > { %v1241_v42 = vmax.f32 %v1027_v30, 0.0  ;;  %v1273_v43 = vmax.f32 %v1107_v31, 0.0 }
  0xd0   : > { %v1178_v26 = vmax.f32 %v869_v22, 0.0  ;;  %v1210_v27 = vmax.f32 %v949_v23, 0.0 }
  0xd2   : > { %v2034_v28 = vpack.c.bf16 %v1178_v26, %v1177_v24  ;;  %v2114_v29 = vpack.c.bf16 %v1210_v27, %v1209_v25 }
  0xd4   : > { %2338 = vst [vmem:[%s2558_s29 + $0x18] sm:$0xff] %v2034_v28   ;;  %v1028_v32 = vpop.f32.mrf.mxu2  ;;  %v1108_v33 = vpop.f32.mrf.mxu3 }
  0xd5   : > { %2354 = vst [vmem:[%s2558_s29 + $0x98] sm:$0xff] %v2114_v29   ;;  %v1029_v36 = vadd.f32 %v2543_v46, %v1028_v32  ;;  %v1109_v37 = vadd.f32 %v2543_v46, %v1108_v33  ;;  %v871_v38 = vpop.f32.mrf.mxu0  ;;  %v951_v39 = vpop.f32.mrf.mxu1 }
  0xd6   : > { %v872_v49 = vadd.f32 %v2543_v46, %v871_v38  ;;  %v952_v50 = vadd.f32 %v2543_v46, %v951_v39 }
  0xd7   : > { %v1242_v44 = vmax.f32 %v1029_v36, 0.0  ;;  %v1274_v45 = vmax.f32 %v1109_v37, 0.0  ;;  %v1980_v36 = vld [vmem:[%s2470_s24 + $0xf0] sm:$0xff] }
  0xd8   : > { %1896 = vmatmul.msk.bf16.gmra.mxu0 %vm642_vm2, %v1962_v34  ;;  %1912 = vmatmul.msk.bf16.gmra.mxu1 %vm642_vm2, %v1978_v35  ;;  %v1179_v57 = vmax.f32 %v872_v49, 0.0  ;;  %v1211_v58 = vmax.f32 %v952_v50, 0.0  ;;  %v1964_v35 = vld [vmem:[%s2470_s24 + $0x70] sm:$0xff] }
  0xd9   : > { %v2194_v47 = vpack.c.bf16 %v1242_v44, %v1241_v42  ;;  %v2274_v48 = vpack.c.bf16 %v1274_v45, %v1273_v43  ;;  %1928 = vmatmul.msk.bf16.gmra.mxu2 %vm642_vm2, %v1994_v40  ;;  %1944 = vmatmul.msk.bf16.gmra.mxu3 %vm642_vm2, %v2010_v41  ;;  %v1996_v41 = vld [vmem:[%s2470_s24 + $0x170] sm:$0xff] }
  0xda   : > { %v2012_v42 = vld [vmem:[%s2470_s24 + $0x1f0] sm:$0xff] }
  0xdb   : > { %2370 = vst [vmem:[%s2558_s29 + $0x118] sm:$0xff] %v2194_v47  }
  0xdc   : > { %2386 = vst [vmem:[%s2558_s29 + $0x198] sm:$0xff] %v2274_v48   ;;  %v1031_v51 = vpop.f32.mrf.mxu2  ;;  %v1111_v52 = vpop.f32.mrf.mxu3 }
  0xdd   : > { %v873_v53 = vpop.f32.mrf.mxu0  ;;  %v953_v54 = vpop.f32.mrf.mxu1  ;;  %v1032_v63 = vadd.f32 %v2543_v46, %v1031_v51  ;;  %v1112_v0 = vadd.f32 %v2543_v46, %v1111_v52 }
  0xde   : > { %v874_v55 = vadd.f32 %v2543_v46, %v873_v53  ;;  %v954_v56 = vadd.f32 %v2543_v46, %v953_v54 }
  0xdf   : > { %v1243_v11 = vmax.f32 %v1032_v63, 0.0  ;;  %v1275_v12 = vmax.f32 %v1112_v0, 0.0 }
  0xe0   : > { %v1180_v59 = vmax.f32 %v874_v55, 0.0  ;;  %v1212_v60 = vmax.f32 %v954_v56, 0.0 }
  0xe2   : > { %v2039_v61 = vpack.c.bf16 %v1180_v59, %v1179_v57  ;;  %v2119_v62 = vpack.c.bf16 %v1212_v60, %v1211_v58 }
  0xe4   : > { %2339 = vst [vmem:[%s2558_s29 + $0x20] sm:$0xff] %v2039_v61   ;;  %v1033_v1 = vpop.f32.mrf.mxu2  ;;  %v1113_v2 = vpop.f32.mrf.mxu3 }
  0xe5   : > { %2355 = vst [vmem:[%s2558_s29 + $0xa0] sm:$0xff] %v2119_v62   ;;  %v1034_v5 = vadd.f32 %v2543_v46, %v1033_v1  ;;  %v1114_v6 = vadd.f32 %v2543_v46, %v1113_v2  ;;  %v876_v7 = vpop.f32.mrf.mxu0  ;;  %v956_v8 = vpop.f32.mrf.mxu1 }
  0xe6   : > { %v877_v17 = vadd.f32 %v2543_v46, %v876_v7  ;;  %v957_v18 = vadd.f32 %v2543_v46, %v956_v8 }
  0xe7   : > { %v1244_v13 = vmax.f32 %v1034_v5, 0.0  ;;  %v1276_v14 = vmax.f32 %v1114_v6, 0.0  ;;  %v1981_v5 = vld [vmem:[%s2470_s24 + $0xf8] sm:$0xff] }
  0xe8   : > { %1897 = vmatmul.msk.bf16.gmra.mxu0 %vm642_vm2, %v1963_v3  ;;  %1913 = vmatmul.msk.bf16.gmra.mxu1 %vm642_vm2, %v1979_v4  ;;  %v1181_v25 = vmax.f32 %v877_v17, 0.0  ;;  %v1213_v26 = vmax.f32 %v957_v18, 0.0  ;;  %v1965_v4 = vld [vmem:[%s2470_s24 + $0x78] sm:$0xff] }
  0xe9   : > { %v2199_v15 = vpack.c.bf16 %v1244_v13, %v1243_v11  ;;  %v2279_v16 = vpack.c.bf16 %v1276_v14, %v1275_v12  ;;  %1929 = vmatmul.msk.bf16.gmra.mxu2 %vm642_vm2, %v1995_v9  ;;  %1945 = vmatmul.msk.bf16.gmra.mxu3 %vm642_vm2, %v2011_v10  ;;  %v1997_v10 = vld [vmem:[%s2470_s24 + $0x178] sm:$0xff] }
  0xea   : > { %v2013_v11 = vld [vmem:[%s2470_s24 + $0x1f8] sm:$0xff] }
  0xeb   : > { %2371 = vst [vmem:[%s2558_s29 + $0x120] sm:$0xff] %v2199_v15  }
  0xec   : > { %2387 = vst [vmem:[%s2558_s29 + $0x1a0] sm:$0xff] %v2279_v16   ;;  %v1036_v19 = vpop.f32.mrf.mxu2  ;;  %v1116_v20 = vpop.f32.mrf.mxu3 }
  0xed   : > { %v878_v21 = vpop.f32.mrf.mxu0  ;;  %v958_v22 = vpop.f32.mrf.mxu1  ;;  %v1037_v31 = vadd.f32 %v2543_v46, %v1036_v19  ;;  %v1117_v32 = vadd.f32 %v2543_v46, %v1116_v20 }
  0xee   : > { %v879_v23 = vadd.f32 %v2543_v46, %v878_v21  ;;  %v959_v24 = vadd.f32 %v2543_v46, %v958_v22 }
  0xef   : > { %v1245_v43 = vmax.f32 %v1037_v31, 0.0  ;;  %v1277_v44 = vmax.f32 %v1117_v32, 0.0 }
  0xf0   : > { %v1182_v27 = vmax.f32 %v879_v23, 0.0  ;;  %v1214_v28 = vmax.f32 %v959_v24, 0.0 }
  0xf2   : > { %v2044_v29 = vpack.c.bf16 %v1182_v27, %v1181_v25  ;;  %v2124_v30 = vpack.c.bf16 %v1214_v28, %v1213_v26 }
  0xf4   : > { %2340 = vst [vmem:[%s2558_s29 + $0x28] sm:$0xff] %v2044_v29   ;;  %v1038_v33 = vpop.f32.mrf.mxu2  ;;  %v1118_v34 = vpop.f32.mrf.mxu3 }
  0xf5   : > { %2356 = vst [vmem:[%s2558_s29 + $0xa8] sm:$0xff] %v2124_v30   ;;  %v1039_v37 = vadd.f32 %v2543_v46, %v1038_v33  ;;  %v1119_v38 = vadd.f32 %v2543_v46, %v1118_v34  ;;  %v881_v39 = vpop.f32.mrf.mxu0  ;;  %v961_v40 = vpop.f32.mrf.mxu1 }
  0xf6   : > { %v882_v50 = vadd.f32 %v2543_v46, %v881_v39  ;;  %v962_v51 = vadd.f32 %v2543_v46, %v961_v40 }
  0xf7   : > { %v1246_v45 = vmax.f32 %v1039_v37, 0.0  ;;  %v1278_v47 = vmax.f32 %v1119_v38, 0.0 }
  0xf8   : > { %1898 = vmatmul.msk.bf16.gmra.mxu0 %vm642_vm2, %v1964_v35  ;;  %1914 = vmatmul.msk.bf16.gmra.mxu1 %vm642_vm2, %v1980_v36  ;;  %v1183_v58 = vmax.f32 %v882_v50, 0.0  ;;  %v1215_v59 = vmax.f32 %v962_v51, 0.0 }
  0xf9   : > { %v2204_v48 = vpack.c.bf16 %v1246_v45, %v1245_v43  ;;  %v2284_v49 = vpack.c.bf16 %v1278_v47, %v1277_v44  ;;  %1930 = vmatmul.msk.bf16.gmra.mxu2 %vm642_vm2, %v1996_v41  ;;  %1946 = vmatmul.msk.bf16.gmra.mxu3 %vm642_vm2, %v2012_v42 }
  0xfb   : > { %2372 = vst [vmem:[%s2558_s29 + $0x128] sm:$0xff] %v2204_v48  }
  0xfc   : > { %2388 = vst [vmem:[%s2558_s29 + $0x1a8] sm:$0xff] %v2284_v49   ;;  %v1041_v52 = vpop.f32.mrf.mxu2  ;;  %v1121_v53 = vpop.f32.mrf.mxu3 }
  0xfd   : > { %v883_v54 = vpop.f32.mrf.mxu0  ;;  %v963_v55 = vpop.f32.mrf.mxu1  ;;  %v1042_v0 = vadd.f32 %v2543_v46, %v1041_v52  ;;  %v1122_v1 = vadd.f32 %v2543_v46, %v1121_v53 }
  0xfe   : > { %v884_v56 = vadd.f32 %v2543_v46, %v883_v54  ;;  %v964_v57 = vadd.f32 %v2543_v46, %v963_v55 }
  0xff   : > { %v1247_v12 = vmax.f32 %v1042_v0, 0.0  ;;  %v1279_v13 = vmax.f32 %v1122_v1, 0.0 }
 0x100   : > { %v1184_v60 = vmax.f32 %v884_v56, 0.0  ;;  %v1216_v61 = vmax.f32 %v964_v57, 0.0 }
 0x102   : > { %v2049_v62 = vpack.c.bf16 %v1184_v60, %v1183_v58  ;;  %v2129_v63 = vpack.c.bf16 %v1216_v61, %v1215_v59 }
 0x104   : > { %2341 = vst [vmem:[%s2558_s29 + $0x30] sm:$0xff] %v2049_v62   ;;  %v1043_v2 = vpop.f32.mrf.mxu2  ;;  %v1123_v3 = vpop.f32.mrf.mxu3 }
 0x105   : > { %2357 = vst [vmem:[%s2558_s29 + $0xb0] sm:$0xff] %v2129_v63   ;;  %v1044_v6 = vadd.f32 %v2543_v46, %v1043_v2  ;;  %v1124_v7 = vadd.f32 %v2543_v46, %v1123_v3  ;;  %v886_v8 = vpop.f32.mrf.mxu0  ;;  %v966_v9 = vpop.f32.mrf.mxu1 }
 0x106   : > { %v887_v18 = vadd.f32 %v2543_v46, %v886_v8  ;;  %v967_v19 = vadd.f32 %v2543_v46, %v966_v9 }
 0x107   : > { %v1248_v14 = vmax.f32 %v1044_v6, 0.0  ;;  %v1280_v15 = vmax.f32 %v1124_v7, 0.0 }
 0x108   : > { %1899 = vmatmul.msk.bf16.gmra.mxu0 %vm642_vm2, %v1965_v4  ;;  %1915 = vmatmul.msk.bf16.gmra.mxu1 %vm642_vm2, %v1981_v5  ;;  %v1185_v26 = vmax.f32 %v887_v18, 0.0  ;;  %v1217_v27 = vmax.f32 %v967_v19, 0.0 }
 0x109   : > { %v2209_v16 = vpack.c.bf16 %v1248_v14, %v1247_v12  ;;  %v2289_v17 = vpack.c.bf16 %v1280_v15, %v1279_v13  ;;  %1931 = vmatmul.msk.bf16.gmra.mxu2 %vm642_vm2, %v1997_v10  ;;  %1947 = vmatmul.msk.bf16.gmra.mxu3 %vm642_vm2, %v2013_v11 }
 0x10b   : > { %2373 = vst [vmem:[%s2558_s29 + $0x130] sm:$0xff] %v2209_v16  }
 0x10c   : > { %2389 = vst [vmem:[%s2558_s29 + $0x1b0] sm:$0xff] %v2289_v17   ;;  %v1046_v20 = vpop.f32.mrf.mxu2  ;;  %v1126_v21 = vpop.f32.mrf.mxu3 }
 0x10d   : > { %v888_v22 = vpop.f32.mrf.mxu0  ;;  %v968_v23 = vpop.f32.mrf.mxu1  ;;  %v1047_v32 = vadd.f32 %v2543_v46, %v1046_v20  ;;  %v1127_v33 = vadd.f32 %v2543_v46, %v1126_v21 }
 0x10e   : > { %v889_v24 = vadd.f32 %v2543_v46, %v888_v22  ;;  %v969_v25 = vadd.f32 %v2543_v46, %v968_v23 }
 0x10f   : > { %v1249_v40 = vmax.f32 %v1047_v32, 0.0  ;;  %v1281_v41 = vmax.f32 %v1127_v33, 0.0 }
 0x110   : > { %v1186_v28 = vmax.f32 %v889_v24, 0.0  ;;  %v1218_v29 = vmax.f32 %v969_v25, 0.0 }
 0x112   : > { %v2054_v30 = vpack.c.bf16 %v1186_v28, %v1185_v26  ;;  %v2134_v31 = vpack.c.bf16 %v1218_v29, %v1217_v27 }
 0x114   : > { %2342 = vst [vmem:[%s2558_s29 + $0x38] sm:$0xff] %v2054_v30   ;;  %v1048_v34 = vpop.f32.mrf.mxu2  ;;  %v1128_v35 = vpop.f32.mrf.mxu3 }
 0x115   : > { %2358 = vst [vmem:[%s2558_s29 + $0xb8] sm:$0xff] %v2134_v31   ;;  %v1049_v36 = vadd.f32 %v2543_v46, %v1048_v34  ;;  %v1129_v37 = vadd.f32 %v2543_v46, %v1128_v35  ;;  %v891_v38 = vpop.f32.mrf.mxu0  ;;  %v971_v39 = vpop.f32.mrf.mxu1 }
 0x116   : > { %v892_v47 = vadd.f32 %v2543_v46, %v891_v38  ;;  %v972_v48 = vadd.f32 %v2543_v46, %v971_v39 }
 0x117   : > { %v1250_v42 = vmax.f32 %v1049_v36, 0.0  ;;  %v1282_v43 = vmax.f32 %v1129_v37, 0.0 }
 0x118   : > { %v1187_v55 = vmax.f32 %v892_v47, 0.0  ;;  %v1219_v56 = vmax.f32 %v972_v48, 0.0 }
 0x119   : > { %v2214_v44 = vpack.c.bf16 %v1250_v42, %v1249_v40  ;;  %v2294_v45 = vpack.c.bf16 %v1282_v43, %v1281_v41 }
 0x11b   : > { %2374 = vst [vmem:[%s2558_s29 + $0x138] sm:$0xff] %v2214_v44  }
 0x11c   : > { %2390 = vst [vmem:[%s2558_s29 + $0x1b8] sm:$0xff] %v2294_v45   ;;  %v1051_v49 = vpop.f32.mrf.mxu2  ;;  %v1131_v50 = vpop.f32.mrf.mxu3 }
 0x11d   : > { %v893_v51 = vpop.f32.mrf.mxu0  ;;  %v973_v52 = vpop.f32.mrf.mxu1  ;;  %v1052_v61 = vadd.f32 %v2543_v46, %v1051_v49  ;;  %v1132_v62 = vadd.f32 %v2543_v46, %v1131_v50 }
 0x11e   : > { %v894_v53 = vadd.f32 %v2543_v46, %v893_v51  ;;  %v974_v54 = vadd.f32 %v2543_v46, %v973_v52 }
 0x11f   : > { %v1251_v5 = vmax.f32 %v1052_v61, 0.0  ;;  %v1283_v6 = vmax.f32 %v1132_v62, 0.0 }
 0x120   : > { %v1188_v57 = vmax.f32 %v894_v53, 0.0  ;;  %v1220_v58 = vmax.f32 %v974_v54, 0.0 }
 0x122   : > { %v2059_v59 = vpack.c.bf16 %v1188_v57, %v1187_v55  ;;  %v2139_v60 = vpack.c.bf16 %v1220_v58, %v1219_v56 }
 0x124   : > { %2343 = vst [vmem:[%s2558_s29 + $0x40] sm:$0xff] %v2059_v59   ;;  %v1053_v63 = vpop.f32.mrf.mxu2  ;;  %v1133_v0 = vpop.f32.mrf.mxu3 }
 0x125   : > { %2359 = vst [vmem:[%s2558_s29 + $0xc0] sm:$0xff] %v2139_v60   ;;  %v1054_v1 = vadd.f32 %v2543_v46, %v1053_v63  ;;  %v1134_v2 = vadd.f32 %v2543_v46, %v1133_v0  ;;  %v896_v3 = vpop.f32.mrf.mxu0  ;;  %v976_v4 = vpop.f32.mrf.mxu1 }
 0x126   : > { %v897_v11 = vadd.f32 %v2543_v46, %v896_v3  ;;  %v977_v12 = vadd.f32 %v2543_v46, %v976_v4 }
 0x127   : > { %v1252_v7 = vmax.f32 %v1054_v1, 0.0  ;;  %v1284_v8 = vmax.f32 %v1134_v2, 0.0 }
 0x128   : > { %v1189_v19 = vmax.f32 %v897_v11, 0.0  ;;  %v1221_v20 = vmax.f32 %v977_v12, 0.0 }
 0x129   : > { %v2219_v9 = vpack.c.bf16 %v1252_v7, %v1251_v5  ;;  %v2299_v10 = vpack.c.bf16 %v1284_v8, %v1283_v6 }
 0x12b   : > { %2375 = vst [vmem:[%s2558_s29 + $0x140] sm:$0xff] %v2219_v9  }
 0x12c   : > { %2391 = vst [vmem:[%s2558_s29 + $0x1c0] sm:$0xff] %v2299_v10   ;;  %v1056_v13 = vpop.f32.mrf.mxu2  ;;  %v1136_v14 = vpop.f32.mrf.mxu3 }
 0x12d   : > { %v898_v15 = vpop.f32.mrf.mxu0  ;;  %v978_v16 = vpop.f32.mrf.mxu1  ;;  %v1057_v25 = vadd.f32 %v2543_v46, %v1056_v13  ;;  %v1137_v26 = vadd.f32 %v2543_v46, %v1136_v14 }
 0x12e   : > { %v899_v17 = vadd.f32 %v2543_v46, %v898_v15  ;;  %v979_v18 = vadd.f32 %v2543_v46, %v978_v16 }
 0x12f   : > { %v1253_v33 = vmax.f32 %v1057_v25, 0.0  ;;  %v1285_v34 = vmax.f32 %v1137_v26, 0.0 }
 0x130   : > { %v1190_v21 = vmax.f32 %v899_v17, 0.0  ;;  %v1222_v22 = vmax.f32 %v979_v18, 0.0 }
 0x132   : > { %v2064_v23 = vpack.c.bf16 %v1190_v21, %v1189_v19  ;;  %v2144_v24 = vpack.c.bf16 %v1222_v22, %v1221_v20 }
 0x134   : > { %2344 = vst [vmem:[%s2558_s29 + $0x48] sm:$0xff] %v2064_v23   ;;  %v1058_v27 = vpop.f32.mrf.mxu2  ;;  %v1138_v28 = vpop.f32.mrf.mxu3 }
 0x135   : > { %2360 = vst [vmem:[%s2558_s29 + $0xc8] sm:$0xff] %v2144_v24   ;;  %v1059_v29 = vadd.f32 %v2543_v46, %v1058_v27  ;;  %v1139_v30 = vadd.f32 %v2543_v46, %v1138_v28  ;;  %v901_v31 = vpop.f32.mrf.mxu0  ;;  %v981_v32 = vpop.f32.mrf.mxu1 }
 0x136   : > { %v902_v39 = vadd.f32 %v2543_v46, %v901_v31  ;;  %v982_v40 = vadd.f32 %v2543_v46, %v981_v32 }
 0x137   : > { %v1254_v35 = vmax.f32 %v1059_v29, 0.0  ;;  %v1286_v36 = vmax.f32 %v1139_v30, 0.0 }
 0x138   : > { %v1191_v48 = vmax.f32 %v902_v39, 0.0  ;;  %v1223_v49 = vmax.f32 %v982_v40, 0.0 }
 0x139   : > { %v2224_v37 = vpack.c.bf16 %v1254_v35, %v1253_v33  ;;  %v2304_v38 = vpack.c.bf16 %v1286_v36, %v1285_v34 }
 0x13b   : > { %2376 = vst [vmem:[%s2558_s29 + $0x148] sm:$0xff] %v2224_v37  }
 0x13c   : > { %2392 = vst [vmem:[%s2558_s29 + $0x1c8] sm:$0xff] %v2304_v38   ;;  %v1061_v41 = vpop.f32.mrf.mxu2  ;;  %v1141_v42 = vpop.f32.mrf.mxu3 }
 0x13d   : > { %v903_v43 = vpop.f32.mrf.mxu0  ;;  %v983_v44 = vpop.f32.mrf.mxu1  ;;  %v1062_v54 = vadd.f32 %v2543_v46, %v1061_v41  ;;  %v1142_v55 = vadd.f32 %v2543_v46, %v1141_v42 }
 0x13e   : > { %v904_v45 = vadd.f32 %v2543_v46, %v903_v43  ;;  %v984_v47 = vadd.f32 %v2543_v46, %v983_v44 }
 0x13f   : > { %v1255_v62 = vmax.f32 %v1062_v54, 0.0  ;;  %v1287_v63 = vmax.f32 %v1142_v55, 0.0 }
 0x140   : > { %v1192_v50 = vmax.f32 %v904_v45, 0.0  ;;  %v1224_v51 = vmax.f32 %v984_v47, 0.0 }
 0x142   : > { %v2069_v52 = vpack.c.bf16 %v1192_v50, %v1191_v48  ;;  %v2149_v53 = vpack.c.bf16 %v1224_v51, %v1223_v49 }
 0x144   : > { %2345 = vst [vmem:[%s2558_s29 + $0x50] sm:$0xff] %v2069_v52   ;;  %v1063_v56 = vpop.f32.mrf.mxu2  ;;  %v1143_v57 = vpop.f32.mrf.mxu3 }
 0x145   : > { %2361 = vst [vmem:[%s2558_s29 + $0xd0] sm:$0xff] %v2149_v53   ;;  %v1064_v58 = vadd.f32 %v2543_v46, %v1063_v56  ;;  %v1144_v59 = vadd.f32 %v2543_v46, %v1143_v57  ;;  %v906_v60 = vpop.f32.mrf.mxu0  ;;  %v986_v61 = vpop.f32.mrf.mxu1 }
 0x146   : > { %v907_v4 = vadd.f32 %v2543_v46, %v906_v60  ;;  %v987_v5 = vadd.f32 %v2543_v46, %v986_v61 }
 0x147   : > { %v1256_v0 = vmax.f32 %v1064_v58, 0.0  ;;  %v1288_v1 = vmax.f32 %v1144_v59, 0.0 }
 0x148   : > { %v1193_v12 = vmax.f32 %v907_v4, 0.0  ;;  %v1225_v13 = vmax.f32 %v987_v5, 0.0 }
 0x149   : > { %v2229_v2 = vpack.c.bf16 %v1256_v0, %v1255_v62  ;;  %v2309_v3 = vpack.c.bf16 %v1288_v1, %v1287_v63 }
 0x14b   : > { %2377 = vst [vmem:[%s2558_s29 + $0x150] sm:$0xff] %v2229_v2  }
 0x14c   : > { %2393 = vst [vmem:[%s2558_s29 + $0x1d0] sm:$0xff] %v2309_v3   ;;  %v1066_v6 = vpop.f32.mrf.mxu2  ;;  %v1146_v7 = vpop.f32.mrf.mxu3 }
 0x14d   : > { %v908_v8 = vpop.f32.mrf.mxu0  ;;  %v988_v9 = vpop.f32.mrf.mxu1  ;;  %v1067_v18 = vadd.f32 %v2543_v46, %v1066_v6  ;;  %v1147_v19 = vadd.f32 %v2543_v46, %v1146_v7 }
 0x14e   : > { %v909_v10 = vadd.f32 %v2543_v46, %v908_v8  ;;  %v989_v11 = vadd.f32 %v2543_v46, %v988_v9 }
 0x14f   : > { %v1257_v26 = vmax.f32 %v1067_v18, 0.0  ;;  %v1289_v27 = vmax.f32 %v1147_v19, 0.0 }
 0x150   : > { %v1194_v14 = vmax.f32 %v909_v10, 0.0  ;;  %v1226_v15 = vmax.f32 %v989_v11, 0.0 }
 0x152   : > { %v2074_v16 = vpack.c.bf16 %v1194_v14, %v1193_v12  ;;  %v2154_v17 = vpack.c.bf16 %v1226_v15, %v1225_v13 }
 0x154   : > { %2346 = vst [vmem:[%s2558_s29 + $0x58] sm:$0xff] %v2074_v16   ;;  %v1068_v20 = vpop.f32.mrf.mxu2  ;;  %v1148_v21 = vpop.f32.mrf.mxu3 }
 0x155   : > { %2362 = vst [vmem:[%s2558_s29 + $0xd8] sm:$0xff] %v2154_v17   ;;  %v1069_v22 = vadd.f32 %v2543_v46, %v1068_v20  ;;  %v1149_v23 = vadd.f32 %v2543_v46, %v1148_v21  ;;  %v911_v24 = vpop.f32.mrf.mxu0  ;;  %v991_v25 = vpop.f32.mrf.mxu1 }
 0x156   : > { %v912_v32 = vadd.f32 %v2543_v46, %v911_v24  ;;  %v992_v33 = vadd.f32 %v2543_v46, %v991_v25 }
 0x157   : > { %v1258_v28 = vmax.f32 %v1069_v22, 0.0  ;;  %v1290_v29 = vmax.f32 %v1149_v23, 0.0 }
 0x158   : > { %v1195_v40 = vmax.f32 %v912_v32, 0.0  ;;  %v1227_v41 = vmax.f32 %v992_v33, 0.0 }
 0x159   : > { %v2234_v30 = vpack.c.bf16 %v1258_v28, %v1257_v26  ;;  %v2314_v31 = vpack.c.bf16 %v1290_v29, %v1289_v27 }
 0x15b   : > { %2378 = vst [vmem:[%s2558_s29 + $0x158] sm:$0xff] %v2234_v30  }
 0x15c   : > { %2394 = vst [vmem:[%s2558_s29 + $0x1d8] sm:$0xff] %v2314_v31   ;;  %v1071_v34 = vpop.f32.mrf.mxu2  ;;  %v1151_v35 = vpop.f32.mrf.mxu3  ;;  %v2415_v31 = vld [vmem:[%s2798_s2] ss:$0 sm:$0xff] }
 0x15d   : > { %v913_v36 = vpop.f32.mrf.mxu0  ;;  %v993_v37 = vpop.f32.mrf.mxu1  ;;  %v1072_v47 = vadd.f32 %v2543_v46, %v1071_v34  ;;  %v1152_v48 = vadd.f32 %v2543_v46, %v1151_v35 }
 0x15e   : > { %v914_v38 = vadd.f32 %v2543_v46, %v913_v36  ;;  %v994_v39 = vadd.f32 %v2543_v46, %v993_v37 }
 0x15f   : > { %v1259_v55 = vmax.f32 %v1072_v47, 0.0  ;;  %v1291_v56 = vmax.f32 %v1152_v48, 0.0 }
 0x160   : > { %v1196_v42 = vmax.f32 %v914_v38, 0.0  ;;  %v1228_v43 = vmax.f32 %v994_v39, 0.0 }
 0x162   : > { %v2079_v44 = vpack.c.bf16 %v1196_v42, %v1195_v40  ;;  %v2159_v45 = vpack.c.bf16 %v1228_v43, %v1227_v41 }
 0x164   : > { %2347 = vst [vmem:[%s2558_s29 + $0x60] sm:$0xff] %v2079_v44   ;;  %v1073_v49 = vpop.f32.mrf.mxu2  ;;  %v1153_v50 = vpop.f32.mrf.mxu3 }
 0x165   : > { %2363 = vst [vmem:[%s2558_s29 + $0xe0] sm:$0xff] %v2159_v45   ;;  %v1074_v51 = vadd.f32 %v2543_v46, %v1073_v49  ;;  %v1154_v52 = vadd.f32 %v2543_v46, %v1153_v50  ;;  %v916_v53 = vpop.f32.mrf.mxu0  ;;  %v996_v54 = vpop.f32.mrf.mxu1 }
 0x166   : > { %v917_v61 = vadd.f32 %v2543_v46, %v916_v53  ;;  %v997_v62 = vadd.f32 %v2543_v46, %v996_v54 }
 0x167   : > { %v1260_v57 = vmax.f32 %v1074_v51, 0.0  ;;  %v1292_v58 = vmax.f32 %v1154_v52, 0.0 }
 0x168   : > { %v1197_v5 = vmax.f32 %v917_v61, 0.0  ;;  %v1229_v6 = vmax.f32 %v997_v62, 0.0 }
 0x169   : > { %v2239_v59 = vpack.c.bf16 %v1260_v57, %v1259_v55  ;;  %v2319_v60 = vpack.c.bf16 %v1292_v58, %v1291_v56 }
 0x16b   : > { %2379 = vst [vmem:[%s2558_s29 + $0x160] sm:$0xff] %v2239_v59  }
 0x16c   : > { %2395 = vst [vmem:[%s2558_s29 + $0x1e0] sm:$0xff] %v2319_v60   ;;  %v1076_v63 = vpop.f32.mrf.mxu2  ;;  %v1156_v0 = vpop.f32.mrf.mxu3 }
 0x16d   : > { %v918_v1 = vpop.f32.mrf.mxu0  ;;  %v998_v2 = vpop.f32.mrf.mxu1  ;;  %v1077_v11 = vadd.f32 %v2543_v46, %v1076_v63  ;;  %v1157_v12 = vadd.f32 %v2543_v46, %v1156_v0 }
 0x16e   : > { %v919_v3 = vadd.f32 %v2543_v46, %v918_v1  ;;  %v999_v4 = vadd.f32 %v2543_v46, %v998_v2 }
 0x16f   : > { %v1261_v19 = vmax.f32 %v1077_v11, 0.0  ;;  %v1293_v20 = vmax.f32 %v1157_v12, 0.0 }
 0x170   : > { %v1198_v7 = vmax.f32 %v919_v3, 0.0  ;;  %v1230_v8 = vmax.f32 %v999_v4, 0.0 }
 0x172   : > { %v2084_v9 = vpack.c.bf16 %v1198_v7, %v1197_v5  ;;  %v2164_v10 = vpack.c.bf16 %v1230_v8, %v1229_v6 }
 0x174   : > { %2348 = vst [vmem:[%s2558_s29 + $0x68] sm:$0xff] %v2084_v9   ;;  %v1078_v13 = vpop.f32.mrf.mxu2  ;;  %v1158_v14 = vpop.f32.mrf.mxu3 }
 0x175   : > { %2364 = vst [vmem:[%s2558_s29 + $0xe8] sm:$0xff] %v2164_v10   ;;  %v1079_v15 = vadd.f32 %v2543_v46, %v1078_v13  ;;  %v1159_v16 = vadd.f32 %v2543_v46, %v1158_v14  ;;  %v921_v17 = vpop.f32.mrf.mxu0  ;;  %v1001_v18 = vpop.f32.mrf.mxu1 }
 0x176   : > { %v922_v25 = vadd.f32 %v2543_v46, %v921_v17  ;;  %v1002_v26 = vadd.f32 %v2543_v46, %v1001_v18 }
 0x177   : > { %v1262_v21 = vmax.f32 %v1079_v15, 0.0  ;;  %v1294_v22 = vmax.f32 %v1159_v16, 0.0 }
 0x178   : > { %v1199_v34 = vmax.f32 %v922_v25, 0.0  ;;  %v1231_v35 = vmax.f32 %v1002_v26, 0.0 }
 0x179   : > { %v2244_v23 = vpack.c.bf16 %v1262_v21, %v1261_v19  ;;  %v2324_v24 = vpack.c.bf16 %v1294_v22, %v1293_v20 }
 0x17b   : > { %2380 = vst [vmem:[%s2558_s29 + $0x168] sm:$0xff] %v2244_v23  }
 0x17c   : > { %2396 = vst [vmem:[%s2558_s29 + $0x1e8] sm:$0xff] %v2324_v24   ;;  %v1081_v27 = vpop.f32.mrf.mxu2  ;;  %v1161_v28 = vpop.f32.mrf.mxu3 }
 0x17d   : > { %v923_v29 = vpop.f32.mrf.mxu0  ;;  %v1003_v30 = vpop.f32.mrf.mxu1  ;;  %v1082_v40 = vadd.f32 %v2415_v31, %v1081_v27  ;;  %v1162_v46 = vadd.f32 %v2415_v31, %v1161_v28 }
 0x17e   : > { %v924_v32 = vadd.f32 %v2415_v31, %v923_v29  ;;  %v1004_v33 = vadd.f32 %v2415_v31, %v1003_v30 }
 0x17f   : > { %v1263_v48 = vmax.f32 %v1082_v40, 0.0  ;;  %v1295_v49 = vmax.f32 %v1162_v46, 0.0 }
 0x180   : > { %v1200_v36 = vmax.f32 %v924_v32, 0.0  ;;  %v1232_v37 = vmax.f32 %v1004_v33, 0.0 }
 0x182   : > { %v2089_v38 = vpack.c.bf16 %v1200_v36, %v1199_v34  ;;  %v2169_v39 = vpack.c.bf16 %v1232_v37, %v1231_v35 }
 0x184   : > { %2349 = vst [vmem:[%s2558_s29 + $0x70] sm:$0xff] %v2089_v38   ;;  %v1083_v41 = vpop.f32.mrf.mxu2  ;;  %v1163_v42 = vpop.f32.mrf.mxu3 }
 0x185   : > { %2365 = vst [vmem:[%s2558_s29 + $0xf0] sm:$0xff] %v2169_v39   ;;  %v1084_v43 = vadd.f32 %v2415_v31, %v1083_v41  ;;  %v1164_v44 = vadd.f32 %v2415_v31, %v1163_v42  ;;  %v926_v45 = vpop.f32.mrf.mxu0  ;;  %v1006_v47 = vpop.f32.mrf.mxu1 }
 0x186   : > { %v927_v54 = vadd.f32 %v2415_v31, %v926_v45  ;;  %v1007_v55 = vadd.f32 %v2415_v31, %v1006_v47 }
 0x187   : > { %v1264_v50 = vmax.f32 %v1084_v43, 0.0  ;;  %v1296_v51 = vmax.f32 %v1164_v44, 0.0 }
 0x188   : > { %v1201_v62 = vmax.f32 %v927_v54, 0.0  ;;  %v1233_v63 = vmax.f32 %v1007_v55, 0.0 }
 0x189   : > { %v2249_v52 = vpack.c.bf16 %v1264_v50, %v1263_v48  ;;  %v2329_v53 = vpack.c.bf16 %v1296_v51, %v1295_v49 }
 0x18b   : > { %2381 = vst [vmem:[%s2558_s29 + $0x170] sm:$0xff] %v2249_v52  }
 0x18c   : > { %2397 = vst [vmem:[%s2558_s29 + $0x1f0] sm:$0xff] %v2329_v53   ;;  %v1086_v56 = vpop.f32.mrf.mxu2  ;;  %v1166_v57 = vpop.f32.mrf.mxu3 }
 0x18d   : > { %v928_v58 = vpop.f32.mrf.mxu0  ;;  %v1008_v59 = vpop.f32.mrf.mxu1  ;;  %v1087_v4 = vadd.f32 %v2415_v31, %v1086_v56  ;;  %v1167_v5 = vadd.f32 %v2415_v31, %v1166_v57 }
 0x18e   : > { %v929_v60 = vadd.f32 %v2415_v31, %v928_v58  ;;  %v1009_v61 = vadd.f32 %v2415_v31, %v1008_v59 }
 0x18f   : > { %v1265_v10 = vmax.f32 %v1087_v4, 0.0  ;;  %v1297_v11 = vmax.f32 %v1167_v5, 0.0 }
 0x190   : > { %v1202_v0 = vmax.f32 %v929_v60, 0.0  ;;  %v1234_v1 = vmax.f32 %v1009_v61, 0.0 }
 0x192   : > { %v2094_v2 = vpack.c.bf16 %v1202_v0, %v1201_v62  ;;  %v2174_v3 = vpack.c.bf16 %v1234_v1, %v1233_v63 }
 0x194   : > { %2350 = vst [vmem:[%s2558_s29 + $0x78] sm:$0xff] %v2094_v2   ;;  %v1088_v6 = vpop.f32.mrf.mxu2  ;;  %v1168_v7 = vpop.f32.mrf.mxu3 }
 0x195   : > { %2366 = vst [vmem:[%s2558_s29 + $0xf8] sm:$0xff] %v2174_v3   ;;  %v1089_v8 = vadd.f32 %v2415_v31, %v1088_v6  ;;  %v1169_v9 = vadd.f32 %v2415_v31, %v1168_v7 }
 0x197   : > { %v1266_v12 = vmax.f32 %v1089_v8, 0.0  ;;  %v1298_v13 = vmax.f32 %v1169_v9, 0.0 }
 0x199   : > { %v2254_v14 = vpack.c.bf16 %v1266_v12, %v1265_v10  ;;  %v2334_v15 = vpack.c.bf16 %v1298_v13, %v1297_v11 }
 0x19b   : > { %2382 = vst [vmem:[%s2558_s29 + $0x178] sm:$0xff] %v2254_v14  }
 0x19c   : > { %2398 = vst [vmem:[%s2558_s29 + $0x1f8] sm:$0xff] %v2334_v15  }
 0x19d PF: > { %s13_s12 = sadd.s32 1, %s2422_s12  }
 0x19e   : > { %p10_p4 = scmp.ge.s32.totalorder %s13_s12, 4  }
 0x1a0   :  { %12 = sbr.rel (!%p10_p4) target bundleno = 1 (0x1), region = 62 }

// kernel: _device_forward.11
= control target key start
LH: loop header
LB: loop body
LE: loop exit
PB: predicated region body
PF: predicated region fallthrough
CT: control target
= control target key end

     0   :  { %vm443_vm0 = vcmask 130048   ;;  %s2378_s1 = inlined_call_operand.vmem [shape: bf16[144,128], index: 1, kind: input, shape index: {}]   ;;  %s2379_s0 = inlined_call_operand.vmem [shape: bf16[512,144], index: 0, kind: input, shape index: {}]   ;;  %s2380_s2 = inlined_call_operand.vmem [shape: f32[1,128], index: 2, kind: input, shape index: {}]   ;;  %s2381_s3 = inlined_call_operand.vmem [shape: bf16[512,128], index: 3, kind: output, shape index: {}]  }
   0x1   :  { %v1469_v0 = vld [vmem:[%s2378_s1 + $0x38] sm:$0xff]  ;;  %v1470_v1 = vld [vmem:[%s2378_s1 + $0x40] sm:$0xff]  ;;  %v1078_v3 = vld [vmem:[%s2379_s0 + $0x8] sm:$0xf0] }
   0x2   :  { %v1398_v2 = vld [vmem:[%s2379_s0 + $0x4] sm:$0xf]  ;;  %540 = vmatpush.bf16.msra.mxu0 %v1469_v0  ;;  %1662 = vmatpush.bf16.msra.mxu2 %v1469_v0  ;;  %v1468_v5 = vld [vmem:[%s2378_s1 + $0x30] sm:$0xff]  ;;  %v1467_v6 = vld [vmem:[%s2378_s1 + $0x28] sm:$0xff] }
   0x3   :  { %v1081_v4 = vor.u32 %v1398_v2, %v1078_v3  ;;  %716 = vmatpush.bf16.msra.mxu1 %v1470_v1  ;;  %1670 = vmatpush.bf16.msra.mxu3 %v1470_v1  ;;  %v1432_v7 = vld [vmem:[%s2379_s0 + $0x114] sm:$0xf]  ;;  %v1214_v8 = vld [vmem:[%s2379_s0 + $0x118] sm:$0xf0]  ;;  %v1466_v10 = vld [vmem:[%s2378_s1 + $0x20] sm:$0xff] }
   0x4   :  { %v1217_v9 = vor.u32 %v1432_v7, %v1214_v8  ;;  %v1465_v11 = vld [vmem:[%s2378_s1 + $0x18] sm:$0xff]  ;;  %v1400_v12 = vld [vmem:[%s2379_s0 + $0x14] sm:$0xf]  ;;  %v1463_v16 = vld [vmem:[%s2378_s1 + $0x8] sm:$0xff] }
   0x5   :  { %v1086_v13 = vld [vmem:[%s2379_s0 + $0x18] sm:$0xf0]  ;;  %v1464_v15 = vld [vmem:[%s2378_s1 + $0x10] sm:$0xff]  ;;  %v1434_v17 = vld [vmem:[%s2379_s0 + $0x124] sm:$0xf] }
   0x6   :  { %1366 = vmatmul.msk.bf16.vlgmr.msra.gmra.mxu1 %vm443_vm0, %v1081_v4  ;;  %541 = vmatpush.bf16.msra.mxu0 %v1468_v5  ;;  %v1089_v14 = vor.u32 %v1400_v12, %v1086_v13  ;;  %v1222_v18 = vld [vmem:[%s2379_s0 + $0x128] sm:$0xf0]  ;;  %v1462_v20 = vld [vmem:[%s2378_s1] sm:$0xff]  ;;  %v1399_v22 = vld [vmem:[%s2379_s0 + $0x4] sm:$0xf0] }
   0x7   :  { %1663 = vmatpush.bf16.msra.mxu2 %v1468_v5  ;;  %1383 = vmatmul.msk.bf16.vlgmr.msra.gmra.mxu3 %vm443_vm0, %v1217_v9  ;;  %v1225_v19 = vor.u32 %v1434_v17, %v1222_v18  ;;  %v1076_v21 = vld [vmem:[%s2379_s0] sm:$0xf]  ;;  %v1431_v24 = vld [vmem:[%s2379_s0 + $0x104] sm:$0xf0]  ;;  %v1402_v27 = vld [vmem:[%s2379_s0 + $0x24] sm:$0xf] }
   0x8   :  { %v1204_v23 = vld [vmem:[%s2379_s0 + $0x100] sm:$0xf]  ;;  %v1077_v25 = vor.u32 %v1399_v22, %v1076_v21  ;;  %v1094_v28 = vld [vmem:[%s2379_s0 + $0x28] sm:$0xf0]  ;;  %v1436_v30 = vld [vmem:[%s2379_s0 + $0x134] sm:$0xf] }
   0x9   :  { %v1205_v26 = vor.u32 %v1431_v24, %v1204_v23  ;;  %v1097_v29 = vor.u32 %v1402_v27, %v1094_v28  ;;  %v1230_v31 = vld [vmem:[%s2379_s0 + $0x138] sm:$0xf0]  ;;  %v1084_v33 = vld [vmem:[%s2379_s0 + $0x10] sm:$0xf]  ;;  %v1401_v34 = vld [vmem:[%s2379_s0 + $0x14] sm:$0xf0] }
   0xa   :  { %542 = vmatpush.bf16.msra.mxu0 %v1467_v6  ;;  %v1233_v32 = vor.u32 %v1436_v30, %v1230_v31  ;;  %v1212_v35 = vld [vmem:[%s2379_s0 + $0x110] sm:$0xf]  ;;  %v1433_v36 = vld [vmem:[%s2379_s0 + $0x114] sm:$0xf0]  ;;  %v1085_v37 = vor.u32 %v1401_v34, %v1084_v33  ;;  %v1404_v39 = vld [vmem:[%s2379_s0 + $0x34] sm:$0xf] }
   0xb   :  { %1664 = vmatpush.bf16.msra.mxu2 %v1467_v6  ;;  %v1213_v38 = vor.u32 %v1433_v36, %v1212_v35  ;;  %v1102_v40 = vld [vmem:[%s2379_s0 + $0x38] sm:$0xf0]  ;;  %v1438_v42 = vld [vmem:[%s2379_s0 + $0x144] sm:$0xf]  ;;  %v1238_v43 = vld [vmem:[%s2379_s0 + $0x148] sm:$0xf0] }
   0xc   :  { %v1105_v41 = vor.u32 %v1404_v39, %v1102_v40  ;;  %v1241_v44 = vor.u32 %v1438_v42, %v1238_v43  ;;  %v1092_v45 = vld [vmem:[%s2379_s0 + $0x20] sm:$0xf]  ;;  %v1403_v46 = vld [vmem:[%s2379_s0 + $0x24] sm:$0xf0]  ;;  %v1406_v51 = vld [vmem:[%s2379_s0 + $0x44] sm:$0xf] }
   0xd   :  { %v1220_v47 = vld [vmem:[%s2379_s0 + $0x120] sm:$0xf]  ;;  %v1435_v48 = vld [vmem:[%s2379_s0 + $0x124] sm:$0xf0]  ;;  %v1093_v49 = vor.u32 %v1403_v46, %v1092_v45  ;;  %v1110_v52 = vld [vmem:[%s2379_s0 + $0x48] sm:$0xf0] }
   0xe   :  { %543 = vmatpush.bf16.msra.mxu0 %v1466_v10  ;;  %v1221_v50 = vor.u32 %v1435_v48, %v1220_v47  ;;  %v1113_v53 = vor.u32 %v1406_v51, %v1110_v52  ;;  %v1440_v54 = vld [vmem:[%s2379_s0 + $0x154] sm:$0xf]  ;;  %v1246_v55 = vld [vmem:[%s2379_s0 + $0x158] sm:$0xf0]  ;;  %v1100_v57 = vld [vmem:[%s2379_s0 + $0x30] sm:$0xf] }
   0xf   :  { %1665 = vmatpush.bf16.msra.mxu2 %v1466_v10  ;;  %v1249_v56 = vor.u32 %v1440_v54, %v1246_v55  ;;  %v1405_v58 = vld [vmem:[%s2379_s0 + $0x34] sm:$0xf0]  ;;  %v1228_v59 = vld [vmem:[%s2379_s0 + $0x130] sm:$0xf]  ;;  %v1408_v63 = vld [vmem:[%s2379_s0 + $0x54] sm:$0xf] }
  0x10   :  { %v1437_v60 = vld [vmem:[%s2379_s0 + $0x134] sm:$0xf0]  ;;  %v1101_v61 = vor.u32 %v1405_v58, %v1100_v57  ;;  %v1118_v0 = vld [vmem:[%s2379_s0 + $0x58] sm:$0xf0]  ;;  %v1442_v2 = vld [vmem:[%s2379_s0 + $0x164] sm:$0xf] }
  0x11   :  { %v1229_v62 = vor.u32 %v1437_v60, %v1228_v59  ;;  %v1121_v1 = vor.u32 %v1408_v63, %v1118_v0  ;;  %v1254_v3 = vld [vmem:[%s2379_s0 + $0x168] sm:$0xf0]  ;;  %v1108_v5 = vld [vmem:[%s2379_s0 + $0x40] sm:$0xf]  ;;  %v1407_v6 = vld [vmem:[%s2379_s0 + $0x44] sm:$0xf0] }
  0x12   :  { %544 = vmatpush.bf16.msra.mxu0 %v1465_v11  ;;  %v1257_v4 = vor.u32 %v1442_v2, %v1254_v3  ;;  %v1236_v7 = vld [vmem:[%s2379_s0 + $0x140] sm:$0xf]  ;;  %v1439_v8 = vld [vmem:[%s2379_s0 + $0x144] sm:$0xf0]  ;;  %v1109_v9 = vor.u32 %v1407_v6, %v1108_v5  ;;  %v1126_v12 = vld [vmem:[%s2379_s0 + $0x68] sm:$0xf0] }
  0x13   :  { %1666 = vmatpush.bf16.msra.mxu2 %v1465_v11  ;;  %v1237_v10 = vor.u32 %v1439_v8, %v1236_v7  ;;  %v1410_v11 = vld [vmem:[%s2379_s0 + $0x64] sm:$0xf]  ;;  %v1409_v17 = vld [vmem:[%s2379_s0 + $0x54] sm:$0xf0]  ;;  %v1412_v23 = vld [vmem:[%s2379_s0 + $0x74] sm:$0xf] }
  0x14   :  { %v1129_v13 = vor.u32 %v1410_v11, %v1126_v12  ;;  %v1134_v24 = vld [vmem:[%s2379_s0 + $0x78] sm:$0xf0]  ;;  %v1270_v27 = vld [vmem:[%s2379_s0 + $0x188] sm:$0xf0]  ;;  %v1124_v28 = vld [vmem:[%s2379_s0 + $0x60] sm:$0xf] }
  0x15   :  { %v1252_v31 = vld [vmem:[%s2379_s0 + $0x160] sm:$0xf]  ;;  %v1414_v35 = vld [vmem:[%s2379_s0 + $0x84] sm:$0xf]  ;;  %v1142_v36 = vld [vmem:[%s2379_s0 + $0x88] sm:$0xf0] }
  0x16   :  { %1367 = vmatmul.msk.bf16.gmra.mxu1 %vm443_vm0, %v1089_v14  ;;  %545 = vmatpush.bf16.msra.mxu0 %v1464_v15  ;;  %v1444_v14 = vld [vmem:[%s2379_s0 + $0x174] sm:$0xf]  ;;  %v1278_v40 = vld [vmem:[%s2379_s0 + $0x198] sm:$0xf0]  ;;  %v1413_v42 = vld [vmem:[%s2379_s0 + $0x74] sm:$0xf0] }
  0x17   :  { %1667 = vmatpush.bf16.msra.mxu2 %v1464_v15  ;;  %1384 = vmatmul.msk.bf16.gmra.mxu3 %vm443_vm0, %v1225_v19  ;;  %v1262_v15 = vld [vmem:[%s2379_s0 + $0x178] sm:$0xf0]  ;;  %v1244_v19 = vld [vmem:[%s2379_s0 + $0x150] sm:$0xf]  ;;  %v1448_v39 = vld [vmem:[%s2379_s0 + $0x194] sm:$0xf] }
  0x18   :  { %v1265_v18 = vor.u32 %v1444_v14, %v1262_v15  ;;  %v1281_v43 = vor.u32 %v1448_v39, %v1278_v40  ;;  %v1260_v45 = vld [vmem:[%s2379_s0 + $0x170] sm:$0xf]  ;;  %v1445_v46 = vld [vmem:[%s2379_s0 + $0x174] sm:$0xf0]  ;;  %v1450_v55 = vld [vmem:[%s2379_s0 + $0x1a4] sm:$0xf] }
  0x19   :  { %v1261_v48 = vor.u32 %v1445_v46, %v1260_v45  ;;  %v1140_v57 = vld [vmem:[%s2379_s0 + $0x80] sm:$0xf]  ;;  %v1415_v58 = vld [vmem:[%s2379_s0 + $0x84] sm:$0xf0]  ;;  %v1418_v3 = vld [vmem:[%s2379_s0 + $0xa4] sm:$0xf] }
  0x1a   :  { %546 = vmatpush.bf16.msra.mxu0 %v1463_v16  ;;  %v1141_v63 = vor.u32 %v1415_v58, %v1140_v57  ;;  %v1974_v2 = vld [vmem:[%s2380_s2] ss:$0 sm:$0xff]  ;;  %v1452_v15 = vld [vmem:[%s2379_s0 + $0x1b4] sm:$0xf]  ;;  %v1419_v46 = vld [vmem:[%s2379_s0 + $0xa4] sm:$0xf0] }
  0x1b   :  { %1668 = vmatpush.bf16.msra.mxu2 %v1463_v16  ;;  %v1116_v16 = vld [vmem:[%s2379_s0 + $0x50] sm:$0xf]  ;;  %v1156_v45 = vld [vmem:[%s2379_s0 + $0xa0] sm:$0xf] }
  0x1c   :  { %v1117_v21 = vor.u32 %v1409_v17, %v1116_v16  ;;  %v1294_v16 = vld [vmem:[%s2379_s0 + $0x1b8] sm:$0xf0]  ;;  %v1148_v17 = vld [vmem:[%s2379_s0 + $0x90] sm:$0xf]  ;;  %v1157_v57 = vor.u32 %v1419_v46, %v1156_v45 }
  0x1e   :  { %547 = vmatpush.bf16.msra.mxu0 %v1462_v20 }
  0x1f   :  { %1669 = vmatpush.bf16.msra.mxu2 %v1462_v20  ;;  %v1441_v20 = vld [vmem:[%s2379_s0 + $0x154] sm:$0xf0] }
  0x20   :  { %v1245_v22 = vor.u32 %v1441_v20, %v1244_v19  ;;  %v1297_v19 = vor.u32 %v1452_v15, %v1294_v16 }
  0x21   :  { %548 = vmatmul.bf16.vlgmr.msra.gmra.mxu0 %v1077_v25  ;;  %v1137_v25 = vor.u32 %v1412_v23, %v1134_v24  ;;  %v1276_v23 = vld [vmem:[%s2379_s0 + $0x190] sm:$0xf]  ;;  %v1449_v24 = vld [vmem:[%s2379_s0 + $0x194] sm:$0xf0] }
  0x22   :  { %628 = vmatmul.bf16.vlgmr.msra.gmra.mxu2 %v1205_v26  ;;  %v1446_v26 = vld [vmem:[%s2379_s0 + $0x184] sm:$0xf] }
  0x23   :  { %v1273_v30 = vor.u32 %v1446_v26, %v1270_v27 }
  0x26   :  { %1368 = vmatmul.msk.bf16.gmra.mxu1 %vm443_vm0, %v1097_v29  ;;  %v1411_v29 = vld [vmem:[%s2379_s0 + $0x64] sm:$0xf0] }
  0x27   :  { %1385 = vmatmul.msk.bf16.gmra.mxu3 %vm443_vm0, %v1233_v32  ;;  %v1443_v32 = vld [vmem:[%s2379_s0 + $0x164] sm:$0xf0]  ;;  %v1125_v33 = vor.u32 %v1411_v29, %v1124_v28  ;;  %v1277_v29 = vor.u32 %v1449_v24, %v1276_v23 }
  0x28   :  { %v1253_v34 = vor.u32 %v1443_v32, %v1252_v31  ;;  %v1166_v31 = vld [vmem:[%s2379_s0 + $0xb8] sm:$0xf0] }
  0x31   :  { %553 = vmatmul.bf16.gmra.mxu0 %v1085_v37  ;;  %v1145_v37 = vor.u32 %v1414_v35, %v1142_v36 }
  0x32   :  { %633 = vmatmul.bf16.gmra.mxu2 %v1213_v38 }
  0x36   :  { %1369 = vmatmul.msk.bf16.gmra.mxu1 %vm443_vm0, %v1105_v41  ;;  %v1132_v41 = vld [vmem:[%s2379_s0 + $0x70] sm:$0xf] }
  0x37   :  { %1386 = vmatmul.msk.bf16.gmra.mxu3 %vm443_vm0, %v1241_v44  ;;  %v1133_v47 = vor.u32 %v1413_v42, %v1132_v41  ;;  %v1454_v42 = vld [vmem:[%s2379_s0 + $0x1c4] sm:$0xf] }
  0x41   :  { %558 = vmatmul.bf16.gmra.mxu0 %v1093_v49  ;;  %v1416_v49 = vld [vmem:[%s2379_s0 + $0x94] sm:$0xf] }
  0x42   :  { %638 = vmatmul.bf16.gmra.mxu2 %v1221_v50  ;;  %v1150_v50 = vld [vmem:[%s2379_s0 + $0x98] sm:$0xf0] }
  0x43   :  { %v1153_v52 = vor.u32 %v1416_v49, %v1150_v50 }
  0x46   :  { %1370 = vmatmul.msk.bf16.gmra.mxu1 %vm443_vm0, %v1113_v53 }
  0x47   :  { %1387 = vmatmul.msk.bf16.gmra.mxu3 %vm443_vm0, %v1249_v56  ;;  %v1286_v56 = vld [vmem:[%s2379_s0 + $0x1a8] sm:$0xf0] }
  0x48   :  { %v1289_v59 = vor.u32 %v1450_v55, %v1286_v56 }
  0x51   :  { %563 = vmatmul.bf16.gmra.mxu0 %v1101_v61  ;;  %v1268_v61 = vld [vmem:[%s2379_s0 + $0x180] sm:$0xf] }
  0x52   :  { %643 = vmatmul.bf16.gmra.mxu2 %v1229_v62  ;;  %v1447_v62 = vld [vmem:[%s2379_s0 + $0x184] sm:$0xf0] }
  0x56   :  { %1371 = vmatmul.msk.bf16.gmra.mxu1 %vm443_vm0, %v1121_v1  ;;  %v1269_v1 = vor.u32 %v1447_v62, %v1268_v61  ;;  %v1422_v62 = vld [vmem:[%s2379_s0 + $0xc4] sm:$0xf] }
  0x57   :  { %1388 = vmatmul.msk.bf16.gmra.mxu3 %vm443_vm0, %v1257_v4  ;;  %v1158_v4 = vld [vmem:[%s2379_s0 + $0xa8] sm:$0xf0] }
  0x58   :  { %v1161_v6 = vor.u32 %v1418_v3, %v1158_v4 }
  0x61   :  { %568 = vmatmul.bf16.gmra.mxu0 %v1109_v9 }
  0x62   :  { %648 = vmatmul.bf16.gmra.mxu2 %v1237_v10 }
  0x66   :  { %1372 = vmatmul.msk.bf16.gmra.mxu1 %vm443_vm0, %v1129_v13 }
  0x67   :  { %1389 = vmatmul.msk.bf16.gmra.mxu3 %vm443_vm0, %v1265_v18  ;;  %v1417_v18 = vld [vmem:[%s2379_s0 + $0x94] sm:$0xf0] }
  0x68   :  { %v1149_v27 = vor.u32 %v1417_v18, %v1148_v17  ;;  %v1456_v17 = vld [vmem:[%s2379_s0 + $0x1d4] sm:$0xf]  ;;  %v1310_v18 = vld [vmem:[%s2379_s0 + $0x1d8] sm:$0xf0] }
  0x71   :  { %573 = vmatmul.bf16.gmra.mxu0 %v1117_v21 }
  0x72   :  { %653 = vmatmul.bf16.gmra.mxu2 %v1245_v22 }
  0x76   :  { %1373 = vmatmul.msk.bf16.gmra.mxu1 %vm443_vm0, %v1137_v25 }
  0x77   :  { %1390 = vmatmul.msk.bf16.gmra.mxu3 %vm443_vm0, %v1273_v30  ;;  %v1420_v30 = vld [vmem:[%s2379_s0 + $0xb4] sm:$0xf] }
  0x81   :  { %578 = vmatmul.bf16.gmra.mxu0 %v1125_v33  ;;  %v1169_v33 = vor.u32 %v1420_v30, %v1166_v31 }
  0x82   :  { %658 = vmatmul.bf16.gmra.mxu2 %v1253_v34 }
  0x83   :  { %v718_v38 = vpop.f32.mrf.mxu1 }
  0x86   :  { %1374 = vmatmul.msk.bf16.gmra.mxu1 %vm443_vm0, %v1145_v37 }
  0x87   :  { %1391 = vmatmul.msk.bf16.gmra.mxu3 %vm443_vm0, %v1281_v43  ;;  %v1302_v43 = vld [vmem:[%s2379_s0 + $0x1c8] sm:$0xf0] }
  0x8a   :  { %v1947_v51 = vpop.f32.mrf.mxu3 }
  0x8b   :  { %v720_v44 = vpop.f32.mrf.mxu1 }
  0x91   :  { %583 = vmatmul.bf16.gmra.mxu0 %v1133_v47  ;;  %v1305_v47 = vor.u32 %v1454_v42, %v1302_v43 }
  0x92   :  { %663 = vmatmul.bf16.gmra.mxu2 %v1261_v48  ;;  %v1950_v54 = vpop.f32.mrf.mxu3 }
  0x93   :  { %v723_v53 = vpop.f32.mrf.mxu1 }
  0x96   :  { %1375 = vmatmul.msk.bf16.gmra.mxu1 %vm443_vm0, %v1153_v52  ;;  %v1284_v52 = vld [vmem:[%s2379_s0 + $0x1a0] sm:$0xf] }
  0x97   :  { %1392 = vmatmul.msk.bf16.gmra.mxu3 %vm443_vm0, %v1289_v59 }
  0x9a   :  { %v1982_v5 = vpop.f32.mrf.mxu3 }
  0x9b   :  { %v725_v60 = vpop.f32.mrf.mxu1 }
  0x9e   :  { %v549_v0 = vpop.f32.mrf.mxu0 }
  0x9f   :  { %v550_v7 = vadd.f32 %v1974_v2, %v549_v0 }
  0xa1   :  { %588 = vmatmul.bf16.gmra.mxu0 %v1141_v63  ;;  %v719_v11 = vadd.f32 %v718_v38, %v550_v7  ;;  %v1174_v63 = vld [vmem:[%s2379_s0 + $0xc8] sm:$0xf0] }
  0xa2   :  { %668 = vmatmul.bf16.gmra.mxu2 %v1269_v1  ;;  %v1991_v13 = vpop.f32.mrf.mxu3  ;;  %v1177_v4 = vor.u32 %v1422_v62, %v1174_v63  ;;  %v1300_v62 = vld [vmem:[%s2379_s0 + $0x1c0] sm:$0xf]  ;;  %v1455_v63 = vld [vmem:[%s2379_s0 + $0x1c4] sm:$0xf0] }
  0xa3   :  { %v1985_v8 = vpop.f32.mrf.mxu1  ;;  %v878_v20 = vmax.f32 %v719_v11, 0.0 }
  0xa5   :  { %v1987_v9 = vpop.f32.mrf.mxu2 }
  0xa6   :  { %1376 = vmatmul.msk.bf16.gmra.mxu1 %vm443_vm0, %v1161_v6  ;;  %v551_v10 = vpop.f32.mrf.mxu0 }
  0xa7   :  { %v552_v12 = vadd.f32 %v1974_v2, %v551_v10  ;;  %1393 = vmatmul.msk.bf16.gmra.mxu3 %vm443_vm0, %v1297_v19 }
  0xa9   :  { %v721_v14 = vadd.f32 %v720_v44, %v552_v12 }
  0xaa   :  { %v2025_v32 = vpop.f32.mrf.mxu3 }
  0xab   :  { %v879_v21 = vmax.f32 %v721_v14, 0.0  ;;  %v2005_v22 = vpop.f32.mrf.mxu1 }
  0xad   :  { %v1474_v25 = vpack.c.bf16 %v879_v21, %v878_v20  ;;  %v2014_v26 = vpop.f32.mrf.mxu2  ;;  %v1421_v20 = vld [vmem:[%s2379_s0 + $0xb4] sm:$0xf0]  ;;  %v1313_v21 = vor.u32 %v1456_v17, %v1310_v18 }
  0xae   :  { %v554_v28 = vpop.f32.mrf.mxu0 }
  0xaf   :  { %1475 = vst [vmem:[%s2381_s3] sm:$0xff] %v1474_v25   ;;  %v555_v34 = vadd.f32 %v1974_v2, %v554_v28  ;;  %v1292_v25 = vld [vmem:[%s2379_s0 + $0x1b0] sm:$0xf] }
  0xb1   :  { %593 = vmatmul.bf16.gmra.mxu0 %v1149_v27  ;;  %v724_v38 = vadd.f32 %v723_v53, %v555_v34  ;;  %v1451_v53 = vld [vmem:[%s2379_s0 + $0x1a4] sm:$0xf0]  ;;  %v1453_v27 = vld [vmem:[%s2379_s0 + $0x1b4] sm:$0xf0] }
  0xb2   :  { %673 = vmatmul.bf16.gmra.mxu2 %v1277_v29  ;;  %v2032_v40 = vpop.f32.mrf.mxu3  ;;  %v1285_v61 = vor.u32 %v1451_v53, %v1284_v52 }
  0xb3   :  { %v2028_v35 = vpop.f32.mrf.mxu1  ;;  %v880_v48 = vmax.f32 %v724_v38, 0.0  ;;  %v1182_v38 = vld [vmem:[%s2379_s0 + $0xd8] sm:$0xf0] }
  0xb5   :  { %v634_v36 = vpop.f32.mrf.mxu2 }
  0xb6   :  { %1377 = vmatmul.msk.bf16.gmra.mxu1 %vm443_vm0, %v1169_v33  ;;  %v556_v37 = vpop.f32.mrf.mxu0  ;;  %v635_v44 = vadd.f32 %v1974_v2, %v634_v36  ;;  %v1293_v36 = vor.u32 %v1453_v27, %v1292_v25  ;;  %v1460_v27 = vld [vmem:[%s2379_s0 + $0x1f4] sm:$0xf] }
  0xb7   :  { %v557_v39 = vadd.f32 %v1974_v2, %v556_v37  ;;  %1394 = vmatmul.msk.bf16.gmra.mxu3 %vm443_vm0, %v1305_v47  ;;  %v1424_v37 = vld [vmem:[%s2379_s0 + $0xd4] sm:$0xf] }
  0xb8   :  { %v804_v58 = vadd.f32 %v1947_v51, %v635_v44  ;;  %v1185_v43 = vor.u32 %v1424_v37, %v1182_v38  ;;  %v1457_v37 = vld [vmem:[%s2379_s0 + $0x1d4] sm:$0xf0] }
  0xb9   :  { %v726_v41 = vadd.f32 %v725_v60, %v557_v39 }
  0xba   :  { %v2067_v0 = vpop.f32.mrf.mxu3  ;;  %v912_v1 = vmax.f32 %v804_v58, 0.0  ;;  %v1423_v58 = vld [vmem:[%s2379_s0 + $0xc4] sm:$0xf0] }
  0xbb   :  { %v881_v49 = vmax.f32 %v726_v41, 0.0  ;;  %v2047_v50 = vpop.f32.mrf.mxu1 }
  0xbd   :  { %v1479_v55 = vpack.c.bf16 %v881_v49, %v880_v48  ;;  %v636_v56 = vpop.f32.mrf.mxu2 }
  0xbe   :  { %v637_v59 = vadd.f32 %v1974_v2, %v636_v56  ;;  %v559_v60 = vpop.f32.mrf.mxu0  ;;  %v1318_v56 = vld [vmem:[%s2379_s0 + $0x1e8] sm:$0xf0] }
  0xbf   :  { %1631 = vst [vmem:[%s2381_s3 + $0x8] sm:$0xff] %v1479_v55   ;;  %v560_v6 = vadd.f32 %v1974_v2, %v559_v60  ;;  %v1458_v55 = vld [vmem:[%s2379_s0 + $0x1e4] sm:$0xf] }
  0xc0   :  { %v806_v51 = vadd.f32 %v1950_v54, %v637_v59  ;;  %v1321_v59 = vor.u32 %v1458_v55, %v1318_v56 }
  0xc1   :  { %598 = vmatmul.bf16.gmra.mxu0 %v1157_v57  ;;  %v729_v54 = vadd.f32 %v1985_v8, %v560_v6  ;;  %v1164_v8 = vld [vmem:[%s2379_s0 + $0xb0] sm:$0xf] }
  0xc2   :  { %v913_v3 = vmax.f32 %v806_v51, 0.0  ;;  %678 = vmatmul.bf16.gmra.mxu2 %v1285_v61  ;;  %v2079_v15 = vpop.f32.mrf.mxu3  ;;  %v1165_v30 = vor.u32 %v1421_v20, %v1164_v8 }
  0xc3   :  { %v2071_v7 = vpop.f32.mrf.mxu1 }
  0xc4   :  { %v1559_v10 = vpack.c.bf16 %v913_v3, %v912_v1 }
  0xc5   :  { %v639_v11 = vpop.f32.mrf.mxu2 }
  0xc6   :  { %1647 = vst [vmem:[%s2381_s3 + $0x88] sm:$0xff] %v1559_v10   ;;  %1378 = vmatmul.msk.bf16.gmra.mxu1 %vm443_vm0, %v1177_v4  ;;  %v561_v12 = vpop.f32.mrf.mxu0  ;;  %v640_v19 = vadd.f32 %v1974_v2, %v639_v11  ;;  %v1301_v11 = vor.u32 %v1455_v63, %v1300_v62 }
  0xc7   :  { %v562_v14 = vadd.f32 %v1974_v2, %v561_v12  ;;  %1395 = vmatmul.msk.bf16.gmra.mxu3 %vm443_vm0, %v1313_v21  ;;  %v1426_v12 = vld [vmem:[%s2379_s0 + $0xe4] sm:$0xf] }
  0xc8   :  { %v809_v31 = vadd.f32 %v1982_v5, %v640_v19 }
  0xc9   :  { %v731_v16 = vadd.f32 %v2005_v22, %v562_v14  ;;  %v882_v22 = vmax.f32 %v729_v54, 0.0  ;;  %v1190_v54 = vld [vmem:[%s2379_s0 + $0xe8] sm:$0xf0] }
  0xca   :  { %v2115_v39 = vpop.f32.mrf.mxu3  ;;  %v914_v41 = vmax.f32 %v809_v31, 0.0  ;;  %v1193_v18 = vor.u32 %v1426_v12, %v1190_v54 }
  0xcb   :  { %v883_v23 = vmax.f32 %v731_v16, 0.0  ;;  %v2095_v24 = vpop.f32.mrf.mxu1 }
  0xcd   :  { %v1484_v28 = vpack.c.bf16 %v883_v23, %v882_v22  ;;  %v641_v29 = vpop.f32.mrf.mxu2 }
  0xce   :  { %v642_v33 = vadd.f32 %v1974_v2, %v641_v29  ;;  %v564_v34 = vpop.f32.mrf.mxu0 }
  0xcf   :  { %1632 = vst [vmem:[%s2381_s3 + $0x10] sm:$0xff] %v1484_v28   ;;  %v565_v44 = vadd.f32 %v1974_v2, %v564_v34  ;;  %v1326_v28 = vld [vmem:[%s2379_s0 + $0x1f8] sm:$0xf0] }
  0xd0   :  { %v811_v5 = vadd.f32 %v1991_v13, %v642_v33  ;;  %v1329_v31 = vor.u32 %v1460_v27, %v1326_v28 }
  0xd1   :  { %603 = vmatmul.bf16.gmra.mxu0 %v1165_v30  ;;  %v734_v13 = vadd.f32 %v2028_v35, %v565_v44  ;;  %v1172_v35 = vld [vmem:[%s2379_s0 + $0xc0] sm:$0xf]  ;;  %v1180_v30 = vld [vmem:[%s2379_s0 + $0xd0] sm:$0xf] }
  0xd2   :  { %v915_v42 = vmax.f32 %v811_v5, 0.0  ;;  %683 = vmatmul.bf16.gmra.mxu2 %v1293_v36  ;;  %v2127_v52 = vpop.f32.mrf.mxu3  ;;  %v1173_v3 = vor.u32 %v1423_v58, %v1172_v35  ;;  %v1308_v36 = vld [vmem:[%s2379_s0 + $0x1d0] sm:$0xf] }
  0xd3   :  { %v2119_v45 = vpop.f32.mrf.mxu1 }
  0xd4   :  { %v1564_v46 = vpack.c.bf16 %v915_v42, %v914_v41 }
  0xd5   :  { %v644_v47 = vpop.f32.mrf.mxu2 }
  0xd6   :  { %1648 = vst [vmem:[%s2381_s3 + $0x90] sm:$0xff] %v1564_v46   ;;  %1379 = vmatmul.msk.bf16.gmra.mxu1 %vm443_vm0, %v1185_v43  ;;  %v566_v48 = vpop.f32.mrf.mxu0  ;;  %v645_v57 = vadd.f32 %v1974_v2, %v644_v47  ;;  %v1309_v47 = vor.u32 %v1457_v37, %v1308_v36  ;;  %v1429_v36 = vld [vmem:[%s2379_s0 + $0xf4] sm:$0xf0] }
  0xd7   :  { %v567_v49 = vadd.f32 %v1974_v2, %v566_v48  ;;  %1396 = vmatmul.msk.bf16.gmra.mxu3 %vm443_vm0, %v1321_v59  ;;  %v1428_v48 = vld [vmem:[%s2379_s0 + $0xf4] sm:$0xf] }
  0xd8   :  { %v814_v4 = vadd.f32 %v2025_v32, %v645_v57 }
  0xd9   :  { %v736_v53 = vadd.f32 %v2047_v50, %v567_v49  ;;  %v884_v50 = vmax.f32 %v734_v13, 0.0  ;;  %v1198_v13 = vld [vmem:[%s2379_s0 + $0xf8] sm:$0xf0] }
  0xda   :  { %v2164_v32 = vpop.f32.mrf.mxu3  ;;  %v916_v16 = vmax.f32 %v814_v4, 0.0  ;;  %v1201_v55 = vor.u32 %v1428_v48, %v1198_v13 }
  0xdb   :  { %v885_v60 = vmax.f32 %v736_v53, 0.0  ;;  %v2143_v61 = vpop.f32.mrf.mxu1 }
  0xdd   :  { %v1489_v51 = vpack.c.bf16 %v885_v60, %v884_v50  ;;  %v646_v1 = vpop.f32.mrf.mxu2 }
  0xde   :  { %v647_v6 = vadd.f32 %v1974_v2, %v646_v1  ;;  %v569_v10 = vpop.f32.mrf.mxu0  ;;  %v1427_v1 = vld [vmem:[%s2379_s0 + $0xe4] sm:$0xf0] }
  0xdf   :  { %1633 = vst [vmem:[%s2381_s3 + $0x18] sm:$0xff] %v1489_v51   ;;  %v570_v19 = vadd.f32 %v1974_v2, %v569_v10  ;;  %v1188_v51 = vld [vmem:[%s2379_s0 + $0xe0] sm:$0xf] }
  0xe0   :  { %v816_v14 = vadd.f32 %v2032_v40, %v647_v6  ;;  %v1189_v12 = vor.u32 %v1427_v1, %v1188_v51 }
  0xe1   :  { %608 = vmatmul.bf16.gmra.mxu0 %v1173_v3  ;;  %v739_v22 = vadd.f32 %v2071_v7, %v570_v19  ;;  %v1425_v7 = vld [vmem:[%s2379_s0 + $0xd4] sm:$0xf0]  ;;  %v1206_v19 = vld [vmem:[%s2379_s0 + $0x108] sm:$0xf0] }
  0xe2   :  { %v917_v17 = vmax.f32 %v816_v14, 0.0  ;;  %688 = vmatmul.bf16.gmra.mxu2 %v1301_v11  ;;  %v2197_v38 = vpop.f32.mrf.mxu3  ;;  %v1181_v42 = vor.u32 %v1425_v7, %v1180_v30 }
  0xe3   :  { %v2167_v8 = vpop.f32.mrf.mxu1 }
  0xe4   :  { %v1569_v20 = vpack.c.bf16 %v917_v17, %v916_v16 }
  0xe5   :  { %v649_v21 = vpop.f32.mrf.mxu2 }
  0xe6   :  { %1649 = vst [vmem:[%s2381_s3 + $0x98] sm:$0xff] %v1569_v20   ;;  %1380 = vmatmul.msk.bf16.gmra.mxu1 %vm443_vm0, %v1193_v18  ;;  %v571_v40 = vpop.f32.mrf.mxu0  ;;  %v650_v29 = vadd.f32 %v1974_v2, %v649_v21  ;;  %v1430_v18 = vld [vmem:[%s2379_s0 + $0x104] sm:$0xf] }
  0xe7   :  { %v572_v23 = vadd.f32 %v1974_v2, %v571_v40  ;;  %1397 = vmatmul.msk.bf16.gmra.mxu3 %vm443_vm0, %v1329_v31 }
  0xe8   :  { %v819_v43 = vadd.f32 %v2067_v0, %v650_v29 }
  0xe9   :  { %v741_v25 = vadd.f32 %v2095_v24, %v572_v23  ;;  %v886_v24 = vmax.f32 %v739_v22, 0.0  ;;  %v1209_v22 = vor.u32 %v1430_v18, %v1206_v19 }
  0xea   :  { %v918_v0 = vmax.f32 %v819_v43, 0.0  ;;  %v2215_v59 = vpop.f32.mrf.mxu3 }
  0xeb   :  { %v887_v33 = vmax.f32 %v741_v25, 0.0  ;;  %v2189_v34 = vpop.f32.mrf.mxu1 }
  0xed   :  { %v1494_v5 = vpack.c.bf16 %v887_v33, %v886_v24  ;;  %v651_v41 = vpop.f32.mrf.mxu2  ;;  %v1196_v33 = vld [vmem:[%s2379_s0 + $0xf0] sm:$0xf] }
  0xee   :  { %v652_v44 = vadd.f32 %v1974_v2, %v651_v41  ;;  %v574_v46 = vpop.f32.mrf.mxu0 }
  0xef   :  { %1634 = vst [vmem:[%s2381_s3 + $0x20] sm:$0xff] %v1494_v5   ;;  %v575_v56 = vadd.f32 %v1974_v2, %v574_v46 }
  0xf0   :  { %v821_v49 = vadd.f32 %v2079_v15, %v652_v44  ;;  %v1197_v44 = vor.u32 %v1429_v36, %v1196_v33 }
  0xf1   :  { %613 = vmatmul.bf16.gmra.mxu0 %v1181_v42  ;;  %v744_v50 = vadd.f32 %v2119_v45, %v575_v56  ;;  %v1316_v45 = vld [vmem:[%s2379_s0 + $0x1e0] sm:$0xf] }
  0xf2   :  { %v919_v53 = vmax.f32 %v821_v49, 0.0  ;;  %693 = vmatmul.bf16.gmra.mxu2 %v1309_v47  ;;  %v835_v20 = vpop.f32.mrf.mxu3 }
  0xf3   :  { %v2213_v57 = vpop.f32.mrf.mxu1  ;;  %v888_v3 = vmax.f32 %v744_v50, 0.0 }
  0xf4   :  { %v1574_v35 = vpack.c.bf16 %v919_v53, %v918_v0 }
  0xf5   :  { %v654_v58 = vpop.f32.mrf.mxu2 }
  0xf6   :  { %1650 = vst [vmem:[%s2381_s3 + $0xa0] sm:$0xff] %v1574_v35   ;;  %1381 = vmatmul.msk.bf16.gmra.mxu1 %vm443_vm0, %v1201_v55  ;;  %v576_v15 = vpop.f32.mrf.mxu0  ;;  %v655_v63 = vadd.f32 %v1974_v2, %v654_v58 }
  0xf7   :  { %v577_v60 = vadd.f32 %v1974_v2, %v576_v15 }
  0xf8   :  { %v824_v54 = vadd.f32 %v2115_v39, %v655_v63 }
  0xf9   :  { %v746_v62 = vadd.f32 %v2143_v61, %v577_v60  ;;  %v1459_v61 = vld [vmem:[%s2379_s0 + $0x1e4] sm:$0xf0] }
  0xfa   :  { %v1317_v17 = vor.u32 %v1459_v61, %v1316_v45  ;;  %v920_v39 = vmax.f32 %v824_v54, 0.0  ;;  %v838_v31 = vpop.f32.mrf.mxu3 }
  0xfb   :  { %v889_v4 = vmax.f32 %v746_v62, 0.0  ;;  %v755_v6 = vpop.f32.mrf.mxu1 }
  0xfd   :  { %v1499_v10 = vpack.c.bf16 %v889_v4, %v888_v3  ;;  %v656_v11 = vpop.f32.mrf.mxu2 }
  0xfe   :  { %v657_v14 = vadd.f32 %v1974_v2, %v656_v11  ;;  %v579_v16 = vpop.f32.mrf.mxu0 }
  0xff   :  { %1635 = vst [vmem:[%s2381_s3 + $0x28] sm:$0xff] %v1499_v10   ;;  %v580_v23 = vadd.f32 %v1974_v2, %v579_v16 }
 0x100   :  { %v826_v21 = vadd.f32 %v2127_v52, %v657_v14 }
 0x101   :  { %618 = vmatmul.bf16.gmra.mxu0 %v1189_v12  ;;  %v749_v30 = vadd.f32 %v2167_v8, %v580_v23  ;;  %v1324_v8 = vld [vmem:[%s2379_s0 + $0x1f0] sm:$0xf] }
 0x102   :  { %v921_v40 = vmax.f32 %v826_v21, 0.0  ;;  %698 = vmatmul.bf16.gmra.mxu2 %v1317_v17  ;;  %v840_v35 = vpop.f32.mrf.mxu3 }
 0x103   :  { %v758_v25 = vpop.f32.mrf.mxu1  ;;  %v890_v37 = vmax.f32 %v749_v30, 0.0 }
 0x104   :  { %v1579_v27 = vpack.c.bf16 %v921_v40, %v920_v39 }
 0x105   :  { %v659_v28 = vpop.f32.mrf.mxu2 }
 0x106   :  { %1651 = vst [vmem:[%s2381_s3 + $0xa8] sm:$0xff] %v1579_v27   ;;  %1382 = vmatmul.msk.bf16.gmra.mxu1 %vm443_vm0, %v1209_v22  ;;  %v581_v29 = vpop.f32.mrf.mxu0  ;;  %v660_v24 = vadd.f32 %v1974_v2, %v659_v28 }
 0x107   :  { %v582_v52 = vadd.f32 %v1974_v2, %v581_v29 }
 0x108   :  { %v829_v46 = vadd.f32 %v2164_v32, %v660_v24 }
 0x109   :  { %v751_v7 = vadd.f32 %v2189_v34, %v582_v52  ;;  %v1461_v34 = vld [vmem:[%s2379_s0 + $0x1f4] sm:$0xf0] }
 0x10a   :  { %v1325_v13 = vor.u32 %v1461_v34, %v1324_v8  ;;  %v922_v0 = vmax.f32 %v829_v46, 0.0  ;;  %v843_v45 = vpop.f32.mrf.mxu3 }
 0x10b   :  { %v891_v5 = vmax.f32 %v751_v7, 0.0  ;;  %v760_v41 = vpop.f32.mrf.mxu1 }
 0x10d   :  { %v1504_v42 = vpack.c.bf16 %v891_v5, %v890_v37  ;;  %v661_v43 = vpop.f32.mrf.mxu2 }
 0x10e   :  { %v662_v47 = vadd.f32 %v1974_v2, %v661_v43  ;;  %v584_v48 = vpop.f32.mrf.mxu0 }
 0x10f   :  { %1636 = vst [vmem:[%s2381_s3 + $0x30] sm:$0xff] %v1504_v42   ;;  %v585_v55 = vadd.f32 %v1974_v2, %v584_v48 }
 0x110   :  { %v831_v49 = vadd.f32 %v2197_v38, %v662_v47 }
 0x111   :  { %623 = vmatmul.bf16.gmra.mxu0 %v1197_v44  ;;  %v754_v50 = vadd.f32 %v2213_v57, %v585_v55 }
 0x112   :  { %v923_v53 = vmax.f32 %v831_v49, 0.0  ;;  %703 = vmatmul.bf16.gmra.mxu2 %v1325_v13  ;;  %v845_v21 = vpop.f32.mrf.mxu3 }
 0x113   :  { %v763_v56 = vpop.f32.mrf.mxu1  ;;  %v892_v63 = vmax.f32 %v754_v50, 0.0 }
 0x114   :  { %v1584_v58 = vpack.c.bf16 %v923_v53, %v922_v0 }
 0x115   :  { %v664_v32 = vpop.f32.mrf.mxu2 }
 0x116   :  { %1652 = vst [vmem:[%s2381_s3 + $0xb0] sm:$0xff] %v1584_v58   ;;  %v586_v15 = vpop.f32.mrf.mxu0  ;;  %v665_v62 = vadd.f32 %v1974_v2, %v664_v32 }
 0x117   :  { %v587_v60 = vadd.f32 %v1974_v2, %v586_v15 }
 0x118   :  { %v834_v61 = vadd.f32 %v2215_v59, %v665_v62 }
 0x119   :  { %v756_v38 = vadd.f32 %v755_v6, %v587_v60 }
 0x11a   :  { %v924_v12 = vmax.f32 %v834_v61, 0.0  ;;  %v848_v7 = vpop.f32.mrf.mxu3 }
 0x11b   :  { %v893_v51 = vmax.f32 %v756_v38, 0.0  ;;  %v765_v1 = vpop.f32.mrf.mxu1 }
 0x11d   :  { %v1509_v3 = vpack.c.bf16 %v893_v51, %v892_v63  ;;  %v666_v4 = vpop.f32.mrf.mxu2 }
 0x11e   :  { %v667_v10 = vadd.f32 %v1974_v2, %v666_v4  ;;  %v589_v11 = vpop.f32.mrf.mxu0 }
 0x11f   :  { %1637 = vst [vmem:[%s2381_s3 + $0x38] sm:$0xff] %v1509_v3   ;;  %v590_v54 = vadd.f32 %v1974_v2, %v589_v11 }
 0x120   :  { %v836_v57 = vadd.f32 %v835_v20, %v667_v10 }
 0x121   :  { %v759_v18 = vadd.f32 %v758_v25, %v590_v54 }
 0x122   :  { %v925_v6 = vmax.f32 %v836_v57, 0.0  ;;  %v850_v48 = vpop.f32.mrf.mxu3 }
 0x123   :  { %v768_v14 = vpop.f32.mrf.mxu1  ;;  %v894_v20 = vmax.f32 %v759_v18, 0.0 }
 0x124   :  { %v1589_v16 = vpack.c.bf16 %v925_v6, %v924_v12 }
 0x125   :  { %v669_v17 = vpop.f32.mrf.mxu2 }
 0x126   :  { %1653 = vst [vmem:[%s2381_s3 + $0xb8] sm:$0xff] %v1589_v16   ;;  %v591_v59 = vpop.f32.mrf.mxu0  ;;  %v670_v40 = vadd.f32 %v1974_v2, %v669_v17 }
 0x127   :  { %v592_v19 = vadd.f32 %v1974_v2, %v591_v59 }
 0x128   :  { %v839_v29 = vadd.f32 %v838_v31, %v670_v40 }
 0x129   :  { %v761_v39 = vadd.f32 %v760_v41, %v592_v19 }
 0x12a   :  { %v926_v24 = vmax.f32 %v839_v29, 0.0  ;;  %v853_v38 = vpop.f32.mrf.mxu3 }
 0x12b   :  { %v895_v22 = vmax.f32 %v761_v39, 0.0  ;;  %v770_v23 = vpop.f32.mrf.mxu1 }
 0x12d   :  { %v1514_v27 = vpack.c.bf16 %v895_v22, %v894_v20  ;;  %v671_v28 = vpop.f32.mrf.mxu2 }
 0x12e   :  { %v672_v30 = vadd.f32 %v1974_v2, %v671_v28  ;;  %v594_v52 = vpop.f32.mrf.mxu0 }
 0x12f   :  { %1638 = vst [vmem:[%s2381_s3 + $0x40] sm:$0xff] %v1514_v27   ;;  %v595_v36 = vadd.f32 %v1974_v2, %v594_v52 }
 0x130   :  { %v841_v25 = vadd.f32 %v840_v35, %v672_v30 }
 0x131   :  { %v764_v8 = vadd.f32 %v763_v56, %v595_v36 }
 0x132   :  { %v927_v33 = vmax.f32 %v841_v25, 0.0  ;;  %v855_v54 = vpop.f32.mrf.mxu3 }
 0x133   :  { %v773_v37 = vpop.f32.mrf.mxu1  ;;  %v896_v44 = vmax.f32 %v764_v8, 0.0 }
 0x134   :  { %v1594_v5 = vpack.c.bf16 %v927_v33, %v926_v24 }
 0x135   :  { %v674_v41 = vpop.f32.mrf.mxu2 }
 0x136   :  { %1654 = vst [vmem:[%s2381_s3 + $0xc0] sm:$0xff] %v1594_v5   ;;  %v596_v31 = vpop.f32.mrf.mxu0  ;;  %v675_v43 = vadd.f32 %v1974_v2, %v674_v41 }
 0x137   :  { %v597_v34 = vadd.f32 %v1974_v2, %v596_v31 }
 0x138   :  { %v844_v0 = vadd.f32 %v843_v45, %v675_v43 }
 0x139   :  { %v766_v42 = vadd.f32 %v765_v1, %v597_v34 }
 0x13a   :  { %v928_v35 = vmax.f32 %v844_v0, 0.0 }
 0x13b   :  { %v897_v46 = vmax.f32 %v766_v42, 0.0  ;;  %v775_v47 = vpop.f32.mrf.mxu1 }
 0x13d   :  { %v1519_v13 = vpack.c.bf16 %v897_v46, %v896_v44  ;;  %v676_v49 = vpop.f32.mrf.mxu2 }
 0x13e   :  { %v677_v53 = vadd.f32 %v1974_v2, %v676_v49  ;;  %v599_v55 = vpop.f32.mrf.mxu0 }
 0x13f   :  { %1639 = vst [vmem:[%s2381_s3 + $0x48] sm:$0xff] %v1519_v13   ;;  %v600_v32 = vadd.f32 %v1974_v2, %v599_v55 }
 0x140   :  { %v846_v56 = vadd.f32 %v845_v21, %v677_v53 }
 0x141   :  { %v769_v63 = vadd.f32 %v768_v14, %v600_v32 }
 0x142   :  { %v929_v58 = vmax.f32 %v846_v56, 0.0 }
 0x143   :  { %v778_v15 = vpop.f32.mrf.mxu1  ;;  %v898_v4 = vmax.f32 %v769_v63, 0.0 }
 0x144   :  { %v1599_v50 = vpack.c.bf16 %v929_v58, %v928_v35 }
 0x145   :  { %v679_v60 = vpop.f32.mrf.mxu2 }
 0x146   :  { %1655 = vst [vmem:[%s2381_s3 + $0xc8] sm:$0xff] %v1599_v50   ;;  %v601_v62 = vpop.f32.mrf.mxu0  ;;  %v680_v3 = vadd.f32 %v1974_v2, %v679_v60 }
 0x147   :  { %v602_v51 = vadd.f32 %v1974_v2, %v601_v62 }
 0x148   :  { %v849_v57 = vadd.f32 %v848_v7, %v680_v3 }
 0x149   :  { %v771_v1 = vadd.f32 %v770_v23, %v602_v51  ;;  %v858_v23 = vpop.f32.mrf.mxu3 }
 0x14a   :  { %v930_v16 = vmax.f32 %v849_v57, 0.0 }
 0x14b   :  { %v899_v45 = vmax.f32 %v771_v1, 0.0  ;;  %v780_v61 = vpop.f32.mrf.mxu1 }
 0x14d   :  { %v1524_v10 = vpack.c.bf16 %v899_v45, %v898_v4  ;;  %v681_v11 = vpop.f32.mrf.mxu2 }
 0x14e   :  { %v682_v12 = vadd.f32 %v1974_v2, %v681_v11  ;;  %v604_v6 = vpop.f32.mrf.mxu0 }
 0x14f   :  { %1640 = vst [vmem:[%s2381_s3 + $0x50] sm:$0xff] %v1524_v10   ;;  %v605_v59 = vadd.f32 %v1974_v2, %v604_v6 }
 0x150   :  { %v851_v14 = vadd.f32 %v850_v48, %v682_v12 }
 0x151   :  { %v774_v40 = vadd.f32 %v773_v37, %v605_v59  ;;  %v860_v8 = vpop.f32.mrf.mxu3 }
 0x152   :  { %v931_v17 = vmax.f32 %v851_v14, 0.0 }
 0x153   :  { %v783_v18 = vpop.f32.mrf.mxu1  ;;  %v900_v28 = vmax.f32 %v774_v40, 0.0 }
 0x154   :  { %v1604_v19 = vpack.c.bf16 %v931_v17, %v930_v16 }
 0x155   :  { %v684_v21 = vpop.f32.mrf.mxu2 }
 0x156   :  { %1656 = vst [vmem:[%s2381_s3 + $0xd0] sm:$0xff] %v1604_v19   ;;  %v606_v39 = vpop.f32.mrf.mxu0  ;;  %v685_v27 = vadd.f32 %v1974_v2, %v684_v21 }
 0x157   :  { %v607_v20 = vadd.f32 %v1974_v2, %v606_v39 }
 0x158   :  { %v854_v7 = vadd.f32 %v853_v38, %v685_v27 }
 0x159   :  { %v776_v22 = vadd.f32 %v775_v47, %v607_v20  ;;  %v863_v56 = vpop.f32.mrf.mxu3 }
 0x15a   :  { %v932_v37 = vmax.f32 %v854_v7, 0.0 }
 0x15b   :  { %v901_v29 = vmax.f32 %v776_v22, 0.0  ;;  %v785_v30 = vpop.f32.mrf.mxu1 }
 0x15d   :  { %v1529_v52 = vpack.c.bf16 %v901_v29, %v900_v28  ;;  %v686_v25 = vpop.f32.mrf.mxu2  ;;  %v630_v29 = vadd.f32 %v1974_v2, %v1987_v9 }
 0x15e   :  { %v687_v24 = vadd.f32 %v1974_v2, %v686_v25  ;;  %v609_v33 = vpop.f32.mrf.mxu0 }
 0x15f   :  { %1641 = vst [vmem:[%s2381_s3 + $0x58] sm:$0xff] %v1529_v52   ;;  %v610_v41 = vadd.f32 %v1974_v2, %v609_v33  ;;  %v632_v52 = vadd.f32 %v1974_v2, %v2014_v26 }
 0x160   :  { %v856_v36 = vadd.f32 %v855_v54, %v687_v24 }
 0x161   :  { %v779_v44 = vadd.f32 %v778_v15, %v610_v41  ;;  %v865_v45 = vpop.f32.mrf.mxu3 }
 0x162   :  { %v933_v5 = vmax.f32 %v856_v36, 0.0 }
 0x163   :  { %v788_v31 = vpop.f32.mrf.mxu1  ;;  %v902_v13 = vmax.f32 %v779_v44, 0.0 }
 0x164   :  { %v1609_v34 = vpack.c.bf16 %v933_v5, %v932_v37 }
 0x165   :  { %v689_v42 = vpop.f32.mrf.mxu2 }
 0x166   :  { %1657 = vst [vmem:[%s2381_s3 + $0xd8] sm:$0xff] %v1609_v34   ;;  %v611_v43 = vpop.f32.mrf.mxu0  ;;  %v690_v48 = vadd.f32 %v1974_v2, %v689_v42 }
 0x167   :  { %v612_v46 = vadd.f32 %v1974_v2, %v611_v43 }
 0x168   :  { %v859_v35 = vadd.f32 %v858_v23, %v690_v48 }
 0x169   :  { %v781_v47 = vadd.f32 %v780_v61, %v612_v46 }
 0x16a   :  { %v934_v50 = vmax.f32 %v859_v35, 0.0 }
 0x16b   :  { %v903_v49 = vmax.f32 %v781_v47, 0.0  ;;  %v790_v0 = vpop.f32.mrf.mxu1 }
 0x16d   :  { %v1534_v53 = vpack.c.bf16 %v903_v49, %v902_v13  ;;  %v691_v55 = vpop.f32.mrf.mxu2 }
 0x16e   :  { %v692_v58 = vadd.f32 %v1974_v2, %v691_v55  ;;  %v614_v32 = vpop.f32.mrf.mxu0 }
 0x16f   :  { %1642 = vst [vmem:[%s2381_s3 + $0x60] sm:$0xff] %v1534_v53   ;;  %v615_v38 = vadd.f32 %v1974_v2, %v614_v32 }
 0x170   :  { %v861_v15 = vadd.f32 %v860_v8, %v692_v58 }
 0x171   :  { %v784_v3 = vadd.f32 %v783_v18, %v615_v38  ;;  %v868_v18 = vpop.f32.mrf.mxu3 }
 0x172   :  { %v935_v60 = vmax.f32 %v861_v15, 0.0 }
 0x173   :  { %v793_v62 = vpop.f32.mrf.mxu1  ;;  %v904_v11 = vmax.f32 %v784_v3, 0.0 }
 0x174   :  { %v1614_v63 = vpack.c.bf16 %v935_v60, %v934_v50 }
 0x175   :  { %v694_v51 = vpop.f32.mrf.mxu2 }
 0x176   :  { %1658 = vst [vmem:[%s2381_s3 + $0xe0] sm:$0xff] %v1614_v63   ;;  %v616_v1 = vpop.f32.mrf.mxu0  ;;  %v695_v10 = vadd.f32 %v1974_v2, %v694_v51 }
 0x177   :  { %v617_v4 = vadd.f32 %v1974_v2, %v616_v1 }
 0x178   :  { %v864_v14 = vadd.f32 %v863_v56, %v695_v10 }
 0x179   :  { %v786_v61 = vadd.f32 %v785_v30, %v617_v4  ;;  %v870_v36 = vpop.f32.mrf.mxu3 }
 0x17a   :  { %v936_v19 = vmax.f32 %v864_v14, 0.0 }
 0x17b   :  { %v905_v57 = vmax.f32 %v786_v61, 0.0  ;;  %v795_v12 = vpop.f32.mrf.mxu1 }
 0x17d   :  { %v1539_v6 = vpack.c.bf16 %v905_v57, %v904_v11  ;;  %v696_v54 = vpop.f32.mrf.mxu2 }
 0x17e   :  { %v697_v16 = vadd.f32 %v1974_v2, %v696_v54  ;;  %v619_v17 = vpop.f32.mrf.mxu0 }
 0x17f   :  { %1643 = vst [vmem:[%s2381_s3 + $0x68] sm:$0xff] %v1539_v6   ;;  %v620_v39 = vadd.f32 %v1974_v2, %v619_v17 }
 0x180   :  { %v866_v59 = vadd.f32 %v865_v45, %v697_v16 }
 0x181   :  { %v789_v27 = vadd.f32 %v788_v31, %v620_v39  ;;  %v873_v49 = vpop.f32.mrf.mxu3 }
 0x182   :  { %v937_v21 = vmax.f32 %v866_v59, 0.0 }
 0x183   :  { %v798_v40 = vpop.f32.mrf.mxu1  ;;  %v906_v24 = vmax.f32 %v789_v27, 0.0 }
 0x184   :  { %v1619_v20 = vpack.c.bf16 %v937_v21, %v936_v19  ;;  %v799_v25 = vadd.f32 %v798_v40, %v630_v29 }
 0x185   :  { %v699_v22 = vpop.f32.mrf.mxu2 }
 0x186   :  { %1659 = vst [vmem:[%s2381_s3 + $0xe8] sm:$0xff] %v1619_v20   ;;  %v621_v23 = vpop.f32.mrf.mxu0  ;;  %v700_v7 = vadd.f32 %v1974_v2, %v699_v22  ;;  %v910_v31 = vmax.f32 %v799_v25, 0.0 }
 0x187   :  { %v622_v28 = vadd.f32 %v1974_v2, %v621_v23 }
 0x188   :  { %v869_v34 = vadd.f32 %v868_v18, %v700_v7 }
 0x189   :  { %v791_v30 = vadd.f32 %v790_v0, %v622_v28  ;;  %v875_v51 = vpop.f32.mrf.mxu3 }
 0x18a   :  { %v938_v46 = vmax.f32 %v869_v34, 0.0 }
 0x18b   :  { %v907_v33 = vmax.f32 %v791_v30, 0.0  ;;  %v800_v37 = vpop.f32.mrf.mxu1 }
 0x18c   :  { %v801_v5 = vadd.f32 %v800_v37, %v632_v52 }
 0x18d   :  { %v1544_v41 = vpack.c.bf16 %v907_v33, %v906_v24  ;;  %v701_v8 = vpop.f32.mrf.mxu2 }
 0x18e   :  { %v911_v42 = vmax.f32 %v801_v5, 0.0  ;;  %v702_v43 = vadd.f32 %v1974_v2, %v701_v8  ;;  %v624_v9 = vpop.f32.mrf.mxu0 }
 0x18f   :  { %1644 = vst [vmem:[%s2381_s3 + $0x70] sm:$0xff] %v1544_v41   ;;  %v625_v48 = vadd.f32 %v1974_v2, %v624_v9 }
 0x190   :  { %v1554_v26 = vpack.c.bf16 %v911_v42, %v910_v31  ;;  %v871_v44 = vadd.f32 %v870_v36, %v702_v43 }
 0x191   :  { %v794_v55 = vadd.f32 %v793_v62, %v625_v48 }
 0x192   :  { %1646 = vst [vmem:[%s2381_s3 + $0x80] sm:$0xff] %v1554_v26   ;;  %v939_v47 = vmax.f32 %v871_v44, 0.0 }
 0x193   :  { %v908_v32 = vmax.f32 %v794_v55, 0.0 }
 0x194   :  { %v1624_v13 = vpack.c.bf16 %v939_v47, %v938_v46 }
 0x195   :  { %v704_v0 = vpop.f32.mrf.mxu2 }
 0x196   :  { %1660 = vst [vmem:[%s2381_s3 + $0xf0] sm:$0xff] %v1624_v13   ;;  %v626_v53 = vpop.f32.mrf.mxu0  ;;  %v705_v58 = vadd.f32 %v1974_v2, %v704_v0 }
 0x197   :  { %v627_v56 = vadd.f32 %v1974_v2, %v626_v53 }
 0x198   :  { %v874_v38 = vadd.f32 %v873_v49, %v705_v58 }
 0x199   :  { %v796_v35 = vadd.f32 %v795_v12, %v627_v56 }
 0x19a   :  { %v940_v3 = vmax.f32 %v874_v38, 0.0 }
 0x19b   :  { %v909_v15 = vmax.f32 %v796_v35, 0.0 }
 0x19d   :  { %v1549_v50 = vpack.c.bf16 %v909_v15, %v908_v32  ;;  %v706_v60 = vpop.f32.mrf.mxu2 }
 0x19e   :  { %v707_v63 = vadd.f32 %v1974_v2, %v706_v60 }
 0x19f   :  { %1645 = vst [vmem:[%s2381_s3 + $0x78] sm:$0xff] %v1549_v50  }
 0x1a0   :  { %v876_v1 = vadd.f32 %v875_v51, %v707_v63 }
 0x1a2   :  { %v941_v62 = vmax.f32 %v876_v1, 0.0 }
 0x1a4   :  { %v1629_v4 = vpack.c.bf16 %v941_v62, %v940_v3 }
 0x1a6   :  { %1661 = vst [vmem:[%s2381_s3 + $0xf8] sm:$0xff] %v1629_v4  }

// kernel: _device_forward.12
= control target key start
LH: loop header
LB: loop body
LE: loop exit
PB: predicated region body
PF: predicated region fallthrough
CT: control target
= control target key end

     0   :  { %vm179_vm0 = vcmask 130048   ;;  %s740_s1 = inlined_call_operand.vmem [shape: bf16[144,128], index: 1, kind: input, shape index: {}]   ;;  %s741_s0 = inlined_call_operand.vmem [shape: bf16[128,144], index: 0, kind: input, shape index: {}]   ;;  %s742_s2 = inlined_call_operand.vmem [shape: f32[1,128], index: 2, kind: input, shape index: {}]   ;;  %s743_s3 = inlined_call_operand.vmem [shape: bf16[128,128], index: 3, kind: output, shape index: {}]  }
   0x1   :  { %v485_v0 = vld [vmem:[%s740_s1 + $0x38] sm:$0xff]  ;;  %v486_v1 = vld [vmem:[%s740_s1 + $0x40] sm:$0xff]  ;;  %v358_v3 = vld [vmem:[%s741_s0 + $0x8] sm:$0xf0] }
   0x2   :  { %v462_v2 = vld [vmem:[%s741_s0 + $0x4] sm:$0xf]  ;;  %204 = vmatpush.bf16.msra.mxu0 %v485_v0  ;;  %534 = vmatpush.bf16.msra.mxu2 %v485_v0  ;;  %v484_v5 = vld [vmem:[%s740_s1 + $0x30] sm:$0xff]  ;;  %v483_v6 = vld [vmem:[%s740_s1 + $0x28] sm:$0xff] }
   0x3   :  { %v361_v4 = vor.u32 %v462_v2, %v358_v3  ;;  %260 = vmatpush.bf16.msra.mxu1 %v486_v1  ;;  %542 = vmatpush.bf16.msra.mxu3 %v486_v1  ;;  %v472_v7 = vld [vmem:[%s741_s0 + $0x54] sm:$0xf]  ;;  %v398_v8 = vld [vmem:[%s741_s0 + $0x58] sm:$0xf0]  ;;  %v482_v10 = vld [vmem:[%s740_s1 + $0x20] sm:$0xff] }
   0x4   :  { %v401_v9 = vor.u32 %v472_v7, %v398_v8  ;;  %v481_v11 = vld [vmem:[%s740_s1 + $0x18] sm:$0xff]  ;;  %v464_v12 = vld [vmem:[%s741_s0 + $0x14] sm:$0xf]  ;;  %v479_v16 = vld [vmem:[%s740_s1 + $0x8] sm:$0xff] }
   0x5   :  { %v366_v13 = vld [vmem:[%s741_s0 + $0x18] sm:$0xf0]  ;;  %v480_v15 = vld [vmem:[%s740_s1 + $0x10] sm:$0xff]  ;;  %v474_v17 = vld [vmem:[%s741_s0 + $0x64] sm:$0xf] }
   0x6   :  { %454 = vmatmul.msk.bf16.vlgmr.msra.gmra.mxu1 %vm179_vm0, %v361_v4  ;;  %205 = vmatpush.bf16.msra.mxu0 %v484_v5  ;;  %v369_v14 = vor.u32 %v464_v12, %v366_v13  ;;  %v406_v18 = vld [vmem:[%s741_s0 + $0x68] sm:$0xf0]  ;;  %v478_v20 = vld [vmem:[%s740_s1] sm:$0xff]  ;;  %v463_v22 = vld [vmem:[%s741_s0 + $0x4] sm:$0xf0] }
   0x7   :  { %535 = vmatpush.bf16.msra.mxu2 %v484_v5  ;;  %459 = vmatmul.msk.bf16.vlgmr.msra.gmra.mxu3 %vm179_vm0, %v401_v9  ;;  %v409_v19 = vor.u32 %v474_v17, %v406_v18  ;;  %v356_v21 = vld [vmem:[%s741_s0] sm:$0xf]  ;;  %v471_v24 = vld [vmem:[%s741_s0 + $0x44] sm:$0xf0]  ;;  %v466_v27 = vld [vmem:[%s741_s0 + $0x24] sm:$0xf] }
   0x8   :  { %v388_v23 = vld [vmem:[%s741_s0 + $0x40] sm:$0xf]  ;;  %v357_v25 = vor.u32 %v463_v22, %v356_v21  ;;  %v374_v28 = vld [vmem:[%s741_s0 + $0x28] sm:$0xf0]  ;;  %v476_v30 = vld [vmem:[%s741_s0 + $0x74] sm:$0xf] }
   0x9   :  { %v389_v26 = vor.u32 %v471_v24, %v388_v23  ;;  %v377_v29 = vor.u32 %v466_v27, %v374_v28  ;;  %v414_v31 = vld [vmem:[%s741_s0 + $0x78] sm:$0xf0]  ;;  %v364_v33 = vld [vmem:[%s741_s0 + $0x10] sm:$0xf]  ;;  %v465_v34 = vld [vmem:[%s741_s0 + $0x14] sm:$0xf0] }
   0xa   :  { %206 = vmatpush.bf16.msra.mxu0 %v483_v6  ;;  %v417_v32 = vor.u32 %v476_v30, %v414_v31  ;;  %v396_v35 = vld [vmem:[%s741_s0 + $0x50] sm:$0xf]  ;;  %v473_v36 = vld [vmem:[%s741_s0 + $0x54] sm:$0xf0]  ;;  %v365_v37 = vor.u32 %v465_v34, %v364_v33  ;;  %v468_v39 = vld [vmem:[%s741_s0 + $0x34] sm:$0xf] }
   0xb   :  { %536 = vmatpush.bf16.msra.mxu2 %v483_v6  ;;  %v397_v38 = vor.u32 %v473_v36, %v396_v35  ;;  %v382_v40 = vld [vmem:[%s741_s0 + $0x38] sm:$0xf0]  ;;  %v372_v42 = vld [vmem:[%s741_s0 + $0x20] sm:$0xf]  ;;  %v467_v43 = vld [vmem:[%s741_s0 + $0x24] sm:$0xf0] }
   0xc   :  { %v385_v41 = vor.u32 %v468_v39, %v382_v40  ;;  %v404_v44 = vld [vmem:[%s741_s0 + $0x60] sm:$0xf]  ;;  %v475_v45 = vld [vmem:[%s741_s0 + $0x64] sm:$0xf0]  ;;  %v373_v46 = vor.u32 %v467_v43, %v372_v42  ;;  %v470_v48 = vld [vmem:[%s741_s0 + $0x44] sm:$0xf] }
   0xd   :  { %v405_v47 = vor.u32 %v475_v45, %v404_v44  ;;  %v390_v49 = vld [vmem:[%s741_s0 + $0x48] sm:$0xf0]  ;;  %v380_v51 = vld [vmem:[%s741_s0 + $0x30] sm:$0xf]  ;;  %v469_v52 = vld [vmem:[%s741_s0 + $0x34] sm:$0xf0] }
   0xe   :  { %207 = vmatpush.bf16.msra.mxu0 %v482_v10  ;;  %v393_v50 = vor.u32 %v470_v48, %v390_v49  ;;  %v412_v53 = vld [vmem:[%s741_s0 + $0x70] sm:$0xf]  ;;  %v477_v54 = vld [vmem:[%s741_s0 + $0x74] sm:$0xf0]  ;;  %v381_v55 = vor.u32 %v469_v52, %v380_v51  ;;  %v698_v62 = vld [vmem:[%s742_s2] ss:$0 sm:$0xff] }
   0xf   :  { %537 = vmatpush.bf16.msra.mxu2 %v482_v10  ;;  %v413_v56 = vor.u32 %v477_v54, %v412_v53 }
  0x12   :  { %208 = vmatpush.bf16.msra.mxu0 %v481_v11 }
  0x13   :  { %538 = vmatpush.bf16.msra.mxu2 %v481_v11 }
  0x16   :  { %455 = vmatmul.msk.bf16.gmra.mxu1 %vm179_vm0, %v369_v14  ;;  %209 = vmatpush.bf16.msra.mxu0 %v480_v15 }
  0x17   :  { %539 = vmatpush.bf16.msra.mxu2 %v480_v15  ;;  %460 = vmatmul.msk.bf16.gmra.mxu3 %vm179_vm0, %v409_v19 }
  0x1a   :  { %210 = vmatpush.bf16.msra.mxu0 %v479_v16 }
  0x1b   :  { %540 = vmatpush.bf16.msra.mxu2 %v479_v16 }
  0x1e   :  { %211 = vmatpush.bf16.msra.mxu0 %v478_v20 }
  0x1f   :  { %541 = vmatpush.bf16.msra.mxu2 %v478_v20 }
  0x21   :  { %212 = vmatmul.bf16.vlgmr.msra.gmra.mxu0 %v357_v25 }
  0x22   :  { %232 = vmatmul.bf16.vlgmr.msra.gmra.mxu2 %v389_v26 }
  0x26   :  { %456 = vmatmul.msk.bf16.gmra.mxu1 %vm179_vm0, %v377_v29 }
  0x27   :  { %461 = vmatmul.msk.bf16.gmra.mxu3 %vm179_vm0, %v417_v32 }
  0x31   :  { %217 = vmatmul.bf16.gmra.mxu0 %v365_v37 }
  0x32   :  { %237 = vmatmul.bf16.gmra.mxu2 %v397_v38 }
  0x36   :  { %457 = vmatmul.msk.bf16.gmra.mxu1 %vm179_vm0, %v385_v41 }
  0x41   :  { %222 = vmatmul.bf16.gmra.mxu0 %v373_v46 }
  0x42   :  { %242 = vmatmul.bf16.gmra.mxu2 %v405_v47 }
  0x46   :  { %458 = vmatmul.msk.bf16.gmra.mxu1 %vm179_vm0, %v393_v50 }
  0x51   :  { %227 = vmatmul.bf16.gmra.mxu0 %v381_v55 }
  0x52   :  { %247 = vmatmul.bf16.gmra.mxu2 %v413_v56 }
  0x83   :  { %v262_v57 = vpop.f32.mrf.mxu1 }
  0x8a   :  { %v287_v11 = vpop.f32.mrf.mxu3 }
  0x8b   :  { %v264_v58 = vpop.f32.mrf.mxu1 }
  0x92   :  { %v289_v19 = vpop.f32.mrf.mxu3 }
  0x93   :  { %v267_v59 = vpop.f32.mrf.mxu1 }
  0x9a   :  { %v292_v31 = vpop.f32.mrf.mxu3 }
  0x9b   :  { %v269_v60 = vpop.f32.mrf.mxu1 }
  0x9e   :  { %v213_v61 = vpop.f32.mrf.mxu0 }
  0x9f   :  { %v214_v63 = vadd.f32 %v698_v62, %v213_v61 }
  0xa1   :  { %v263_v3 = vadd.f32 %v262_v57, %v214_v63 }
  0xa2   :  { %v294_v48 = vpop.f32.mrf.mxu3 }
  0xa3   :  { %v272_v0 = vpop.f32.mrf.mxu1  ;;  %v302_v6 = vmax.f32 %v263_v3, 0.0 }
  0xa5   :  { %v233_v1 = vpop.f32.mrf.mxu2 }
  0xa6   :  { %v215_v2 = vpop.f32.mrf.mxu0  ;;  %v234_v41 = vadd.f32 %v698_v62, %v233_v1 }
  0xa7   :  { %v216_v4 = vadd.f32 %v698_v62, %v215_v2 }
  0xa9   :  { %v265_v5 = vadd.f32 %v264_v58, %v216_v4 }
  0xaa   :  { %v297_v1 = vpop.f32.mrf.mxu3 }
  0xab   :  { %v303_v7 = vmax.f32 %v265_v5, 0.0  ;;  %v274_v8 = vpop.f32.mrf.mxu1 }
  0xad   :  { %v490_v9 = vpack.c.bf16 %v303_v7, %v302_v6  ;;  %v235_v10 = vpop.f32.mrf.mxu2 }
  0xae   :  { %v218_v12 = vpop.f32.mrf.mxu0  ;;  %v236_v43 = vadd.f32 %v698_v62, %v235_v10 }
  0xaf   :  { %491 = vst [vmem:[%s743_s3] sm:$0xff] %v490_v9   ;;  %v219_v13 = vadd.f32 %v698_v62, %v218_v12 }
  0xb1   :  { %v268_v17 = vadd.f32 %v267_v59, %v219_v13 }
  0xb3   :  { %v277_v14 = vpop.f32.mrf.mxu1  ;;  %v304_v22 = vmax.f32 %v268_v17, 0.0 }
  0xb5   :  { %v238_v15 = vpop.f32.mrf.mxu2 }
  0xb6   :  { %v220_v16 = vpop.f32.mrf.mxu0  ;;  %v239_v21 = vadd.f32 %v698_v62, %v238_v15  ;;  %v299_v15 = vpop.f32.mrf.mxu3 }
  0xb7   :  { %v221_v18 = vadd.f32 %v698_v62, %v220_v16 }
  0xb8   :  { %v288_v27 = vadd.f32 %v287_v11, %v239_v21 }
  0xb9   :  { %v270_v20 = vadd.f32 %v269_v60, %v221_v18 }
  0xba   :  { %v312_v32 = vmax.f32 %v288_v27, 0.0 }
  0xbb   :  { %v305_v23 = vmax.f32 %v270_v20, 0.0  ;;  %v279_v24 = vpop.f32.mrf.mxu1 }
  0xbd   :  { %v495_v25 = vpack.c.bf16 %v305_v23, %v304_v22  ;;  %v240_v26 = vpop.f32.mrf.mxu2 }
  0xbe   :  { %v241_v28 = vadd.f32 %v698_v62, %v240_v26  ;;  %v223_v29 = vpop.f32.mrf.mxu0 }
  0xbf   :  { %527 = vst [vmem:[%s743_s3 + $0x8] sm:$0xff] %v495_v25   ;;  %v224_v34 = vadd.f32 %v698_v62, %v223_v29 }
  0xc0   :  { %v290_v30 = vadd.f32 %v289_v19, %v241_v28 }
  0xc1   :  { %v273_v39 = vadd.f32 %v272_v0, %v224_v34 }
  0xc2   :  { %v313_v33 = vmax.f32 %v290_v30, 0.0 }
  0xc3   :  { %v282_v35 = vpop.f32.mrf.mxu1  ;;  %v306_v46 = vmax.f32 %v273_v39, 0.0 }
  0xc4   :  { %v515_v36 = vpack.c.bf16 %v313_v33, %v312_v32  ;;  %v283_v44 = vadd.f32 %v282_v35, %v234_v41 }
  0xc5   :  { %v243_v37 = vpop.f32.mrf.mxu2 }
  0xc6   :  { %531 = vst [vmem:[%s743_s3 + $0x28] sm:$0xff] %v515_v36   ;;  %v225_v38 = vpop.f32.mrf.mxu0  ;;  %v244_v45 = vadd.f32 %v698_v62, %v243_v37  ;;  %v310_v53 = vmax.f32 %v283_v44, 0.0 }
  0xc7   :  { %v226_v40 = vadd.f32 %v698_v62, %v225_v38 }
  0xc8   :  { %v293_v54 = vadd.f32 %v292_v31, %v244_v45 }
  0xc9   :  { %v275_v42 = vadd.f32 %v274_v8, %v226_v40 }
  0xca   :  { %v314_v60 = vmax.f32 %v293_v54, 0.0 }
  0xcb   :  { %v307_v47 = vmax.f32 %v275_v42, 0.0  ;;  %v284_v49 = vpop.f32.mrf.mxu1 }
  0xcc   :  { %v285_v50 = vadd.f32 %v284_v49, %v236_v43 }
  0xcd   :  { %v500_v51 = vpack.c.bf16 %v307_v47, %v306_v46  ;;  %v245_v52 = vpop.f32.mrf.mxu2 }
  0xce   :  { %v311_v55 = vmax.f32 %v285_v50, 0.0  ;;  %v246_v56 = vadd.f32 %v698_v62, %v245_v52  ;;  %v228_v57 = vpop.f32.mrf.mxu0 }
  0xcf   :  { %528 = vst [vmem:[%s743_s3 + $0x10] sm:$0xff] %v500_v51   ;;  %v229_v63 = vadd.f32 %v698_v62, %v228_v57 }
  0xd0   :  { %v510_v58 = vpack.c.bf16 %v311_v55, %v310_v53  ;;  %v295_v59 = vadd.f32 %v294_v48, %v246_v56 }
  0xd1   :  { %v278_v4 = vadd.f32 %v277_v14, %v229_v63 }
  0xd2   :  { %530 = vst [vmem:[%s743_s3 + $0x20] sm:$0xff] %v510_v58   ;;  %v315_v61 = vmax.f32 %v295_v59, 0.0 }
  0xd3   :  { %v308_v8 = vmax.f32 %v278_v4, 0.0 }
  0xd4   :  { %v520_v0 = vpack.c.bf16 %v315_v61, %v314_v60 }
  0xd5   :  { %v248_v2 = vpop.f32.mrf.mxu2 }
  0xd6   :  { %532 = vst [vmem:[%s743_s3 + $0x30] sm:$0xff] %v520_v0   ;;  %v230_v3 = vpop.f32.mrf.mxu0  ;;  %v249_v7 = vadd.f32 %v698_v62, %v248_v2 }
  0xd7   :  { %v231_v5 = vadd.f32 %v698_v62, %v230_v3 }
  0xd8   :  { %v298_v12 = vadd.f32 %v297_v1, %v249_v7 }
  0xd9   :  { %v280_v6 = vadd.f32 %v279_v24, %v231_v5 }
  0xda   :  { %v316_v17 = vmax.f32 %v298_v12, 0.0 }
  0xdb   :  { %v309_v9 = vmax.f32 %v280_v6, 0.0 }
  0xdd   :  { %v505_v10 = vpack.c.bf16 %v309_v9, %v308_v8  ;;  %v250_v11 = vpop.f32.mrf.mxu2 }
  0xde   :  { %v251_v13 = vadd.f32 %v698_v62, %v250_v11 }
  0xdf   :  { %529 = vst [vmem:[%s743_s3 + $0x18] sm:$0xff] %v505_v10  }
  0xe0   :  { %v300_v16 = vadd.f32 %v299_v15, %v251_v13 }
  0xe2   :  { %v317_v14 = vmax.f32 %v300_v16, 0.0 }
  0xe4   :  { %v525_v18 = vpack.c.bf16 %v317_v14, %v316_v17 }
  0xe6   :  { %533 = vst [vmem:[%s743_s3 + $0x38] sm:$0xff] %v525_v18  }

// kernel: _device_forward.13
= control target key start
LH: loop header
LB: loop body
LE: loop exit
PB: predicated region body
PF: predicated region fallthrough
CT: control target
= control target key end

     0   :  { %vm201_vm0 = vcmask 261120   ;;  %s544_s1 = inlined_call_operand.vmem [shape: bf16[288,128], index: 1, kind: input, shape index: {}]   ;;  %s545_s0 = inlined_call_operand.vmem [shape: bf16[32,288], index: 0, kind: input, shape index: {}]   ;;  %s546_s2 = inlined_call_operand.vmem [shape: f32[1,128], index: 2, kind: input, shape index: {}]   ;;  %s547_s3 = inlined_call_operand.vmem [shape: bf16[32,128], index: 3, kind: output, shape index: {}]  }
   0x1   :  { %v392_v0 = vld [vmem:[%s544_s1 + $0x38] sm:$0xff]  ;;  %v391_v2 = vld [vmem:[%s544_s1 + $0x30] sm:$0xff]  ;;  %v402_v3 = vld [vmem:[%s544_s1 + $0x88] sm:$0xff] }
   0x2   :  { %v400_v1 = vld [vmem:[%s544_s1 + $0x78] sm:$0xff]  ;;  %208 = vmatpush.bf16.msra.mxu0 %v392_v0  ;;  %414 = vmatpush.bf16.msra.mxu3 %v392_v0  ;;  %v399_v4 = vld [vmem:[%s544_s1 + $0x70] sm:$0xff]  ;;  %v401_v5 = vld [vmem:[%s544_s1 + $0x80] sm:$0xff] }
   0x3   :  { %227 = vmatpush.bf16.msra.mxu1 %v400_v1  ;;  %252 = vmatpush.bf16.msra.mxu2 %v402_v3  ;;  %v291_v6 = vld [vmem:[%s545_s0 + $0x8] sm:$0xf]  ;;  %v381_v7 = vld [vmem:[%s545_s0 + $0x10] sm:$0xf0]  ;;  %v389_v11 = vld [vmem:[%s544_s1 + $0x20] sm:$0xff] }
   0x4   :  { %v390_v8 = vld [vmem:[%s544_s1 + $0x28] sm:$0xff]  ;;  %v292_v10 = vor.u32 %v381_v7, %v291_v6  ;;  %v397_v12 = vld [vmem:[%s544_s1 + $0x60] sm:$0xff]  ;;  %v388_v13 = vld [vmem:[%s544_s1 + $0x18] sm:$0xff] }
   0x5   :  { %v398_v9 = vld [vmem:[%s544_s1 + $0x68] sm:$0xff]  ;;  %v396_v14 = vld [vmem:[%s544_s1 + $0x58] sm:$0xff]  ;;  %v387_v15 = vld [vmem:[%s544_s1 + $0x10] sm:$0xff] }
   0x6   :  { %209 = vmatpush.bf16.msra.mxu0 %v391_v2  ;;  %415 = vmatpush.bf16.msra.mxu3 %v391_v2  ;;  %v395_v16 = vld [vmem:[%s544_s1 + $0x50] sm:$0xff]  ;;  %v303_v17 = vld [vmem:[%s545_s0 + $0x20] sm:$0xf]  ;;  %v384_v18 = vld [vmem:[%s545_s0 + $0x28] sm:$0xf0] }
   0x7   :  { %228 = vmatpush.bf16.msra.mxu1 %v399_v4  ;;  %253 = vmatpush.bf16.msra.mxu2 %v401_v5  ;;  %v386_v19 = vld [vmem:[%s544_s1 + $0x8] sm:$0xff]  ;;  %v304_v21 = vor.u32 %v384_v18, %v303_v17  ;;  %v385_v22 = vld [vmem:[%s544_s1] sm:$0xff]  ;;  %v295_v25 = vld [vmem:[%s545_s0 + $0x18] sm:$0xf] }
   0x8   :  { %v394_v20 = vld [vmem:[%s544_s1 + $0x48] sm:$0xff]  ;;  %v283_v23 = vld [vmem:[%s545_s0] sm:$0xf]  ;;  %v383_v26 = vld [vmem:[%s545_s0 + $0x20] sm:$0xf0] }
   0x9   :  { %v380_v24 = vld [vmem:[%s545_s0 + $0x8] sm:$0xf0]  ;;  %v393_v27 = vld [vmem:[%s544_s1 + $0x40] sm:$0xff]  ;;  %v285_v29 = vld [vmem:[%s545_s0 + $0xc] sm:$0xf0]  ;;  %v296_v31 = vor.u32 %v383_v26, %v295_v25 }
   0xa   :  { %210 = vmatpush.bf16.msra.mxu0 %v390_v8  ;;  %416 = vmatpush.bf16.msra.mxu3 %v390_v8  ;;  %v379_v28 = vld [vmem:[%s545_s0 + $0x4] sm:$0xf]  ;;  %v284_v30 = vor.u32 %v380_v24, %v283_v23  ;;  %v382_v33 = vld [vmem:[%s545_s0 + $0x1c] sm:$0xf]  ;;  %v297_v34 = vld [vmem:[%s545_s0 + $0x24] sm:$0xf0] }
   0xb   :  { %229 = vmatpush.bf16.msra.mxu1 %v398_v9  ;;  %377 = vmatmul.msk.bf16.vlgmr.msra.gmra.mxu2 %vm201_vm0, %v292_v10  ;;  %v288_v32 = vor.u32 %v379_v28, %v285_v29  ;;  %v300_v35 = vor.u32 %v382_v33, %v297_v34  ;;  %v422_v37 = vld [vmem:[%s546_s2] ss:$0 sm:$0xff] }
   0xe   :  { %211 = vmatpush.bf16.msra.mxu0 %v389_v11  ;;  %417 = vmatpush.bf16.msra.mxu3 %v389_v11 }
   0xf   :  { %230 = vmatpush.bf16.msra.mxu1 %v397_v12 }
  0x12   :  { %212 = vmatpush.bf16.msra.mxu0 %v388_v13  ;;  %418 = vmatpush.bf16.msra.mxu3 %v388_v13 }
  0x13   :  { %231 = vmatpush.bf16.msra.mxu1 %v396_v14 }
  0x16   :  { %213 = vmatpush.bf16.msra.mxu0 %v387_v15  ;;  %419 = vmatpush.bf16.msra.mxu3 %v387_v15 }
  0x17   :  { %232 = vmatpush.bf16.msra.mxu1 %v395_v16 }
  0x1a   :  { %214 = vmatpush.bf16.msra.mxu0 %v386_v19  ;;  %420 = vmatpush.bf16.msra.mxu3 %v386_v19 }
  0x1b   :  { %233 = vmatpush.bf16.msra.mxu1 %v394_v20  ;;  %378 = vmatmul.msk.bf16.gmra.mxu2 %vm201_vm0, %v304_v21 }
  0x1e   :  { %215 = vmatpush.bf16.msra.mxu0 %v385_v22  ;;  %421 = vmatpush.bf16.msra.mxu3 %v385_v22 }
  0x1f   :  { %234 = vmatpush.bf16.msra.mxu1 %v393_v27 }
  0x21   :  { %216 = vmatmul.bf16.vlgmr.msra.gmra.mxu0 %v284_v30  ;;  %221 = vmatmul.bf16.vlgmr.msra.gmra.mxu3 %v296_v31 }
  0x22   :  { %235 = vmatmul.bf16.vlgmr.msra.gmra.mxu1 %v288_v32 }
  0x32   :  { %240 = vmatmul.bf16.gmra.mxu1 %v300_v35 }
  0x8e   :  { %v255_v36 = vpop.f32.mrf.mxu2 }
  0x96   :  { %v257_v42 = vpop.f32.mrf.mxu2 }
  0x9e   :  { %v217_v38 = vpop.f32.mrf.mxu0  ;;  %v260_v53 = vpop.f32.mrf.mxu2 }
  0x9f   :  { %v236_v39 = vpop.f32.mrf.mxu1  ;;  %v218_v40 = vadd.f32 %v422_v37, %v217_v38 }
  0xa1   :  { %v237_v41 = vadd.f32 %v236_v39, %v218_v40 }
  0xa3   :  { %v256_v46 = vadd.f32 %v255_v36, %v237_v41 }
  0xa4   :  { %v222_v47 = vpop.f32.mrf.mxu3 }
  0xa5   :  { %v265_v50 = vmax.f32 %v256_v46, 0.0  ;;  %v223_v55 = vadd.f32 %v422_v37, %v222_v47 }
  0xa6   :  { %v219_v43 = vpop.f32.mrf.mxu0  ;;  %v262_v62 = vpop.f32.mrf.mxu2 }
  0xa7   :  { %v220_v44 = vadd.f32 %v422_v37, %v219_v43  ;;  %v238_v45 = vpop.f32.mrf.mxu1 }
  0xa9   :  { %v239_v48 = vadd.f32 %v238_v45, %v220_v44 }
  0xab   :  { %v258_v49 = vadd.f32 %v257_v42, %v239_v48 }
  0xac   :  { %v224_v56 = vpop.f32.mrf.mxu3 }
  0xad   :  { %v266_v51 = vmax.f32 %v258_v49, 0.0  ;;  %v225_v58 = vadd.f32 %v422_v37, %v224_v56 }
  0xaf   :  { %v406_v52 = vpack.c.bf16 %v266_v51, %v265_v50  ;;  %v241_v54 = vpop.f32.mrf.mxu1 }
  0xb0   :  { %v242_v57 = vadd.f32 %v241_v54, %v223_v55 }
  0xb1   :  { %407 = vst [vmem:[%s547_s3] sm:$0xff] %v406_v52  }
  0xb2   :  { %v261_v60 = vadd.f32 %v260_v53, %v242_v57 }
  0xb4   :  { %v267_v0 = vmax.f32 %v261_v60, 0.0 }
  0xb7   :  { %v243_v59 = vpop.f32.mrf.mxu1 }
  0xb8   :  { %v244_v61 = vadd.f32 %v243_v59, %v225_v58 }
  0xba   :  { %v263_v63 = vadd.f32 %v262_v62, %v244_v61 }
  0xbc   :  { %v268_v1 = vmax.f32 %v263_v63, 0.0 }
  0xbe   :  { %v411_v2 = vpack.c.bf16 %v268_v1, %v267_v0 }
  0xc0   :  { %413 = vst [vmem:[%s547_s3 + $0x8] sm:$0xff] %v411_v2  }

// kernel: _device_forward.14
= control target key start
LH: loop header
LB: loop body
LE: loop exit
PB: predicated region body
PF: predicated region fallthrough
CT: control target
= control target key end

     0   :  { %vm327_vm0 = vcmask 523264   ;;  %s728_s1 = inlined_call_operand.vmem [shape: bf16[576,128], index: 1, kind: input, shape index: {}]   ;;  %s729_s2 = inlined_call_operand.vmem [shape: f32[1,128], index: 2, kind: input, shape index: {}]   ;;  %s730_s0 = inlined_call_operand.vmem [shape: bf16[8,576], index: 0, kind: input, shape index: {}]   ;;  %s731_s3 = inlined_call_operand.vmem [shape: bf16[8,128], index: 3, kind: output, shape index: {}]  }
   0x1   :  { %v555_v0 = vld [vmem:[%s728_s1 + $0x38] sm:$0xff]  ;;  %v554_v4 = vld [vmem:[%s728_s1 + $0x30] sm:$0xff]  ;;  %v553_v8 = vld [vmem:[%s728_s1 + $0x28] sm:$0xff] }
   0x2   :  { %v571_v1 = vld [vmem:[%s728_s1 + $0xb8] sm:$0xff]  ;;  %331 = vmatpush.bf16.msra.mxu0 %v555_v0  ;;  %v570_v5 = vld [vmem:[%s728_s1 + $0xb0] sm:$0xff]  ;;  %v569_v9 = vld [vmem:[%s728_s1 + $0xa8] sm:$0xff] }
   0x3   :  { %v579_v2 = vld [vmem:[%s728_s1 + $0xf8] sm:$0xff]  ;;  %357 = vmatpush.bf16.msra.mxu2 %v571_v1  ;;  %v578_v6 = vld [vmem:[%s728_s1 + $0xf0] sm:$0xff]  ;;  %v577_v10 = vld [vmem:[%s728_s1 + $0xe8] sm:$0xff] }
   0x4   :  { %v563_v3 = vld [vmem:[%s728_s1 + $0x78] sm:$0xff]  ;;  %370 = vmatpush.bf16.msra.mxu3 %v579_v2  ;;  %v562_v7 = vld [vmem:[%s728_s1 + $0x70] sm:$0xff]  ;;  %v561_v11 = vld [vmem:[%s728_s1 + $0x68] sm:$0xff] }
   0x5   :  { %344 = vmatpush.bf16.msra.mxu1 %v563_v3  ;;  %v552_v12 = vld [vmem:[%s728_s1 + $0x20] sm:$0xff]  ;;  %v551_v16 = vld [vmem:[%s728_s1 + $0x18] sm:$0xff]  ;;  %v550_v20 = vld [vmem:[%s728_s1 + $0x10] sm:$0xff] }
   0x6   :  { %332 = vmatpush.bf16.msra.mxu0 %v554_v4  ;;  %v568_v13 = vld [vmem:[%s728_s1 + $0xa0] sm:$0xff]  ;;  %v567_v17 = vld [vmem:[%s728_s1 + $0x98] sm:$0xff]  ;;  %v566_v21 = vld [vmem:[%s728_s1 + $0x90] sm:$0xff] }
   0x7   :  { %358 = vmatpush.bf16.msra.mxu2 %v570_v5  ;;  %v576_v14 = vld [vmem:[%s728_s1 + $0xe0] sm:$0xff]  ;;  %v575_v18 = vld [vmem:[%s728_s1 + $0xd8] sm:$0xff]  ;;  %v574_v22 = vld [vmem:[%s728_s1 + $0xd0] sm:$0xff] }
   0x8   :  { %371 = vmatpush.bf16.msra.mxu3 %v578_v6  ;;  %v560_v15 = vld [vmem:[%s728_s1 + $0x60] sm:$0xff]  ;;  %v559_v19 = vld [vmem:[%s728_s1 + $0x58] sm:$0xff]  ;;  %v558_v23 = vld [vmem:[%s728_s1 + $0x50] sm:$0xff] }
   0x9   :  { %345 = vmatpush.bf16.msra.mxu1 %v562_v7  ;;  %v549_v24 = vld [vmem:[%s728_s1 + $0x8] sm:$0xff]  ;;  %v15_v26 = vld [vmem:[%s730_s0] sm:$0xff]  ;;  %v583_v38 = vld [vmem:[%s728_s1 + $0x118] sm:$0xff] }
   0xa   :  { %333 = vmatpush.bf16.msra.mxu0 %v553_v8  ;;  %v565_v25 = vld [vmem:[%s728_s1 + $0x88] sm:$0xff]  ;;  %v97_v30 = vunpack.c.l.b16 %v15_v26  ;;  %v548_v32 = vld [vmem:[%s728_s1] sm:$0xff]  ;;  %v98_v35 = vunpack.c.h.b16 %v15_v26  ;;  %v582_v43 = vld [vmem:[%s728_s1 + $0x110] sm:$0xff] }
   0xb   :  { %359 = vmatpush.bf16.msra.mxu2 %v569_v9  ;;  %v16_v27 = vld [vmem:[%s730_s0 + $0x8] sm:$0xff]  ;;  %v564_v33 = vld [vmem:[%s728_s1 + $0x80] sm:$0xff]  ;;  %v17_v45 = vld [vmem:[%s730_s0 + $0x10] sm:$0xf] }
   0xc   :  { %372 = vmatpush.bf16.msra.mxu3 %v577_v10  ;;  %v573_v28 = vld [vmem:[%s728_s1 + $0xc8] sm:$0xff]  ;;  %v99_v31 = vunpack.c.l.b16 %v16_v27  ;;  %v100_v34 = vunpack.c.h.b16 %v16_v27  ;;  %v572_v36 = vld [vmem:[%s728_s1 + $0xc0] sm:$0xff]  ;;  %v102_v39 = vpack.c.b16 %v97_v30, %v97_v30  ;;  %v103_v42 = vpack.c.b16 %v98_v35, %v98_v35 }
   0xd   :  { %346 = vmatpush.bf16.msra.mxu1 %v561_v11  ;;  %v557_v29 = vld [vmem:[%s728_s1 + $0x48] sm:$0xff]  ;;  %v556_v37 = vld [vmem:[%s728_s1 + $0x40] sm:$0xff]  ;;  %v101_v47 = vunpack.c.l.b16 %v17_v45 }
   0xe   :  { %334 = vmatpush.bf16.msra.mxu0 %v552_v12  ;;  %v104_v40 = vpack.c.b16 %v99_v31, %v99_v31  ;;  %v105_v41 = vpack.c.b16 %v100_v34, %v100_v34  ;;  %v581_v44 = vld [vmem:[%s728_s1 + $0x108] sm:$0xff]  ;;  %v580_v46 = vld [vmem:[%s728_s1 + $0x100] sm:$0xff] }
   0xf   :  { %360 = vmatpush.bf16.msra.mxu2 %v568_v13  ;;  %v106_v48 = vpack.c.b16 %v101_v47, %v101_v47  ;;  %v584_v50 = vld [vmem:[%s729_s2] ss:$0 sm:$0xff] }
  0x10   :  { %373 = vmatpush.bf16.msra.mxu3 %v576_v14 }
  0x11   :  { %347 = vmatpush.bf16.msra.mxu1 %v560_v15 }
  0x12   :  { %335 = vmatpush.bf16.msra.mxu0 %v551_v16 }
  0x13   :  { %361 = vmatpush.bf16.msra.mxu2 %v567_v17 }
  0x14   :  { %374 = vmatpush.bf16.msra.mxu3 %v575_v18 }
  0x15   :  { %348 = vmatpush.bf16.msra.mxu1 %v559_v19 }
  0x16   :  { %336 = vmatpush.bf16.msra.mxu0 %v550_v20 }
  0x17   :  { %362 = vmatpush.bf16.msra.mxu2 %v566_v21 }
  0x18   :  { %375 = vmatpush.bf16.msra.mxu3 %v574_v22 }
  0x19   :  { %349 = vmatpush.bf16.msra.mxu1 %v558_v23 }
  0x1a   :  { %337 = vmatpush.bf16.msra.mxu0 %v549_v24 }
  0x1b   :  { %363 = vmatpush.bf16.msra.mxu2 %v565_v25 }
  0x1c   :  { %376 = vmatpush.bf16.msra.mxu3 %v573_v28 }
  0x1d   :  { %350 = vmatpush.bf16.msra.mxu1 %v557_v29 }
  0x1e   :  { %338 = vmatpush.bf16.msra.mxu0 %v548_v32 }
  0x1f   :  { %364 = vmatpush.bf16.msra.mxu2 %v564_v33 }
  0x20   :  { %377 = vmatpush.bf16.msra.mxu3 %v572_v36 }
  0x21   :  { %351 = vmatpush.bf16.msra.mxu1 %v556_v37  ;;  %339 = vmatmul.bf16.vlgmr.msra.gmra.mxu0 %v102_v39 }
  0x22   :  { %387 = vmatpush.bf16.msrb.mxu0 %v583_v38  ;;  %365 = vmatmul.bf16.vlgmr.msra.gmra.mxu2 %v104_v40 }
  0x23   :  { %378 = vmatmul.bf16.vlgmr.msra.gmra.mxu3 %v105_v41 }
  0x24   :  { %352 = vmatmul.bf16.vlgmr.msra.gmra.mxu1 %v103_v42 }
  0x26   :  { %388 = vmatpush.bf16.msrb.mxu0 %v582_v43 }
  0x2a   :  { %389 = vmatpush.bf16.msrb.mxu0 %v581_v44 }
  0x2e   :  { %390 = vmatpush.bf16.msrb.mxu0 %v580_v46 }
  0x31   :  { %547 = vmatmul.msk.bf16.vlgmr.msrb.gmra.mxu0 %vm327_vm0, %v106_v48 }
  0x9e   :  { %v340_v49 = vpop.f32.mrf.mxu0 }
  0x9f   :  { %v341_v52 = vadd.f32 %v584_v50, %v340_v49 }
  0xa1   :  { %v353_v51 = vpop.f32.mrf.mxu1 }
  0xa2   :  { %v354_v56 = vadd.f32 %v353_v51, %v341_v52 }
  0xa5   :  { %v366_v53 = vpop.f32.mrf.mxu2 }
  0xa6   :  { %v379_v54 = vpop.f32.mrf.mxu3  ;;  %v342_v55 = vpop.f32.mrf.mxu0  ;;  %v367_v58 = vadd.f32 %v366_v53, %v354_v56 }
  0xa8   :  { %v380_v60 = vadd.f32 %v379_v54, %v367_v58 }
  0xa9   :  { %v355_v57 = vpop.f32.mrf.mxu1 }
  0xad   :  { %v368_v59 = vpop.f32.mrf.mxu2 }
  0xae   :  { %v381_v61 = vpop.f32.mrf.mxu3  ;;  %v392_v62 = vpop.f32.mrf.mxu0 }
  0xaf   :  { %v393_v63 = vadd.f32 %v392_v62, %v380_v60 }
  0xb1   :  { %v396_v0 = vmax.f32 %v393_v63, 0.0 }
  0xb3   :  { %v397_v1 = vpack.c.bf16 %v396_v0, %v396_v0 }
  0xb5   :  { %398 = vst [vmem:[%s731_s3] sm:$0xf] %v397_v1 }
  0xb6   :  { %v394_v2 = vpop.f32.mrf.mxu0 }

// kernel: _device_forward.15
= control target key start
LH: loop header
LB: loop body
LE: loop exit
PB: predicated region body
PF: predicated region fallthrough
CT: control target
= control target key end

     0   :  { %s718_s18 = smov [#allocation3]   ;;  %s810_s0 = inlined_call_operand.vmem [shape: s32[7], index: 0, kind: input, shape index: {}]   ;;  %s811_s1 = inlined_call_operand.vmem [shape: bf16[896,128], index: 1, kind: input, shape index: {}]   ;;  %s812_s2 = inlined_call_operand.vmem [shape: bf16[4,128,128], index: 2, kind: input, shape index: {}]   ;;  %s813_s3 = inlined_call_operand.vmem [shape: f32[4,1,128], index: 3, kind: input, shape index: {}]   ;;  %s814_s4 = inlined_call_operand.vmem [shape: bf16[896,128], index: 4, kind: output, shape index: {}]  }
   0x1   :  { %s10_s17 = sshll.u32 %s810_s0, 4  ;;  %s11_s17 = int_to_ptr.vmem [resolvable:$true] %s10_s17 }
   0x2   :  { %13 = dma.vmem_to_smem %s11_s17, 16, %s718_s18, [#allocation2] }
   0x3   :  { %712 = dma.done.wait [#allocation2], 16 }
   0x4   :  { %713 = vsyncadd [#allocation2], 4294967280 }
   0x5   :  { %16 = sfence }
   0x6   :  { %s747_s19 = smov 0  }
   0x7 LB: > { %s753_s20 = sadd.s32 4294967295, %s716_s19   ;;  %p525_p0 = scmp.ge.s32.totalorder %s716_s19, 1  ;;  %s716_s19 = sphi %s747_s19, %s22_s19  }
   0x8   : > { %p173_p1 = scmp.lt.s32.totalorder %s716_s19, 8 }
   0xa   : > { %p174_p2 = pnand %p525_p0, %p173_p1 }
   0xb   : > { %s213_s0 = sld [smem:[#allocation3 + %s753_s20]] (!%p174_p2)  ;;  %s526_s29 = sshll.u32 (!%p174_p2), %s753_s20, 4 }
   0xc   : > { %177 = sbr.rel (%p174_p2) target bundleno = 217 (0xd9), region = 32  ;;  %s220_s21 = sld [smem:[#allocation3 + %s753_s20]] (!%p174_p2) }
   0xd   : > { %p208_p5 = scmp.lt.s32.totalorder (!%p174_p2), %s526_s29, 111 }
  0x11   : > { %p214_p3 = scmp.lt.s32.totalorder %s213_s0, 3  ;;  %s820_s29 = smov (!%p208_p5, %s526_s29), 111 }
  0x12   : > { %p221_p4 = scmp.lt.s32.totalorder %s220_s21, 3  ;;  %s527_s30 = sshll.u32 %s820_s29, 2 }
  0x13   : > { %s816_s0 = smov (!%p214_p3, %s213_s0), 3  ;;  %s211_s7 = scalar_lea.vmem %s811_s1, %s527_s30 }
  0x14   : > { %s818_s21 = smov (!%p221_p4, %s220_s21), 3  ;;  %s598_s22 = sshll.u32 %s816_s0, 6  ;;  %v599_v8 = vld [vmem:[%s211_s7] sm:$0xff]  ;;  %v601_v9 = vld [vmem:[%s211_s7 + $0x10] sm:$0xff]  ;;  %v600_v12 = vld [vmem:[%s211_s7 + $0x8] sm:$0xff] }
  0x15   : > { %s764_s25 = scalar_lea.vmem %s812_s2, %s598_s22  ;;  %s223_s28 = scalar_lea.vmem %s813_s3, %s818_s21  ;;  %v603_v10 = vld [vmem:[%s211_s7 + $0x20] sm:$0xff]  ;;  %v605_v11 = vld [vmem:[%s211_s7 + $0x30] sm:$0xff]  ;;  %v602_v13 = vld [vmem:[%s211_s7 + $0x18] sm:$0xff] }
  0x16   : > { %v614_v0 = vld [vmem:[%s764_s25 + $0x38] sm:$0xff]  ;;  %v613_v1 = vld [vmem:[%s764_s25 + $0x30] sm:$0xff]  ;;  %v612_v2 = vld [vmem:[%s764_s25 + $0x28] sm:$0xff]  ;;  %s797_s12 = scalar_lea.vmem %s814_s4, %s527_s30 }
  0x17   : > { %363 = vmatpush.bf16.msra.mxu0 %v614_v0  ;;  %662 = vmatpush.bf16.msra.mxu1 %v614_v0  ;;  %v611_v3 = vld [vmem:[%s764_s25 + $0x20] sm:$0xff]  ;;  %v610_v4 = vld [vmem:[%s764_s25 + $0x18] sm:$0xff]  ;;  %v609_v5 = vld [vmem:[%s764_s25 + $0x10] sm:$0xff] }
  0x18   : > { %663 = vmatpush.bf16.msra.mxu2 %v614_v0  ;;  %664 = vmatpush.bf16.msra.mxu3 %v614_v0  ;;  %v608_v6 = vld [vmem:[%s764_s25 + $0x8] sm:$0xff]  ;;  %v607_v7 = vld [vmem:[%s764_s25] sm:$0xff]  ;;  %v606_v15 = vld [vmem:[%s211_s7 + $0x38] sm:$0xff] }
  0x19   : > { %v604_v14 = vld [vmem:[%s211_s7 + $0x28] sm:$0xff]  ;;  %v695_v18 = vld [vmem:[%s223_s28] ss:$0 sm:$0xff] }
  0x1b   : > { %364 = vmatpush.bf16.msra.mxu0 %v613_v1  ;;  %665 = vmatpush.bf16.msra.mxu1 %v613_v1 }
  0x1c   : > { %666 = vmatpush.bf16.msra.mxu2 %v613_v1  ;;  %667 = vmatpush.bf16.msra.mxu3 %v613_v1 }
  0x1f   : > { %365 = vmatpush.bf16.msra.mxu0 %v612_v2  ;;  %668 = vmatpush.bf16.msra.mxu1 %v612_v2 }
  0x20   : > { %669 = vmatpush.bf16.msra.mxu2 %v612_v2  ;;  %670 = vmatpush.bf16.msra.mxu3 %v612_v2 }
  0x23   : > { %366 = vmatpush.bf16.msra.mxu0 %v611_v3  ;;  %671 = vmatpush.bf16.msra.mxu1 %v611_v3 }
  0x24   : > { %672 = vmatpush.bf16.msra.mxu2 %v611_v3  ;;  %673 = vmatpush.bf16.msra.mxu3 %v611_v3 }
  0x27   : > { %367 = vmatpush.bf16.msra.mxu0 %v610_v4  ;;  %674 = vmatpush.bf16.msra.mxu1 %v610_v4 }
  0x28   : > { %675 = vmatpush.bf16.msra.mxu2 %v610_v4  ;;  %676 = vmatpush.bf16.msra.mxu3 %v610_v4 }
  0x2b   : > { %368 = vmatpush.bf16.msra.mxu0 %v609_v5  ;;  %677 = vmatpush.bf16.msra.mxu1 %v609_v5 }
  0x2c   : > { %678 = vmatpush.bf16.msra.mxu2 %v609_v5  ;;  %679 = vmatpush.bf16.msra.mxu3 %v609_v5 }
  0x2f   : > { %369 = vmatpush.bf16.msra.mxu0 %v608_v6  ;;  %680 = vmatpush.bf16.msra.mxu1 %v608_v6 }
  0x30   : > { %681 = vmatpush.bf16.msra.mxu2 %v608_v6  ;;  %682 = vmatpush.bf16.msra.mxu3 %v608_v6 }
  0x33   : > { %370 = vmatpush.bf16.msra.mxu0 %v607_v7  ;;  %683 = vmatpush.bf16.msra.mxu1 %v607_v7 }
  0x34   : > { %684 = vmatpush.bf16.msra.mxu2 %v607_v7  ;;  %685 = vmatpush.bf16.msra.mxu3 %v607_v7 }
  0x36   : > { %371 = vmatmul.bf16.vlgmr.msra.gmra.mxu0 %v599_v8  ;;  %381 = vmatmul.bf16.vlgmr.msra.gmra.mxu1 %v601_v9 }
  0x37   : > { %391 = vmatmul.bf16.vlgmr.msra.gmra.mxu2 %v603_v10  ;;  %401 = vmatmul.bf16.vlgmr.msra.gmra.mxu3 %v605_v11 }
  0x46   : > { %376 = vmatmul.bf16.gmra.mxu0 %v600_v12  ;;  %386 = vmatmul.bf16.gmra.mxu1 %v602_v13 }
  0x47   : > { %396 = vmatmul.bf16.gmra.mxu2 %v604_v14  ;;  %406 = vmatmul.bf16.gmra.mxu3 %v606_v15 }
  0xb3   : > { %v372_v16 = vpop.f32.mrf.mxu0  ;;  %v382_v17 = vpop.f32.mrf.mxu1 }
  0xb4   : > { %v373_v23 = vadd.f32 %v695_v18, %v372_v16  ;;  %v383_v24 = vadd.f32 %v695_v18, %v382_v17 }
  0xba   : > { %v392_v19 = vpop.f32.mrf.mxu2  ;;  %v402_v20 = vpop.f32.mrf.mxu3 }
  0xbb   : > { %v374_v21 = vpop.f32.mrf.mxu0  ;;  %v384_v22 = vpop.f32.mrf.mxu1  ;;  %v393_v31 = vadd.f32 %v695_v18, %v392_v19  ;;  %v403_v32 = vadd.f32 %v695_v18, %v402_v20 }
  0xbc   : > { %v375_v25 = vadd.f32 %v695_v18, %v374_v21  ;;  %v385_v26 = vadd.f32 %v695_v18, %v384_v22 }
  0xbe   : > { %v618_v27 = vpack.c.bf16 %v375_v25, %v373_v23  ;;  %v628_v28 = vpack.c.bf16 %v385_v26, %v383_v24 }
  0xc0   : > { %619 = vst [vmem:[%s797_s12] sm:$0xff] %v618_v27  }
  0xc1   : > { %656 = vst [vmem:[%s797_s12 + $0x10] sm:$0xff] %v628_v28  }
  0xc2   : > { %v394_v29 = vpop.f32.mrf.mxu2  ;;  %v404_v30 = vpop.f32.mrf.mxu3 }
  0xc3   : > { %v395_v33 = vadd.f32 %v695_v18, %v394_v29  ;;  %v405_v34 = vadd.f32 %v695_v18, %v404_v30  ;;  %v377_v35 = vpop.f32.mrf.mxu0  ;;  %v387_v36 = vpop.f32.mrf.mxu1 }
  0xc4   : > { %v378_v43 = vadd.f32 %v695_v18, %v377_v35  ;;  %v388_v44 = vadd.f32 %v695_v18, %v387_v36 }
  0xc5   : > { %v638_v37 = vpack.c.bf16 %v395_v33, %v393_v31  ;;  %v648_v38 = vpack.c.bf16 %v405_v34, %v403_v32 }
  0xc7   : > { %658 = vst [vmem:[%s797_s12 + $0x20] sm:$0xff] %v638_v37  }
  0xc8   : > { %660 = vst [vmem:[%s797_s12 + $0x30] sm:$0xff] %v648_v38  }
  0xca   : > { %v397_v39 = vpop.f32.mrf.mxu2  ;;  %v407_v40 = vpop.f32.mrf.mxu3 }
  0xcb   : > { %v379_v41 = vpop.f32.mrf.mxu0  ;;  %v389_v42 = vpop.f32.mrf.mxu1  ;;  %v398_v51 = vadd.f32 %v695_v18, %v397_v39  ;;  %v408_v52 = vadd.f32 %v695_v18, %v407_v40 }
  0xcc   : > { %v380_v45 = vadd.f32 %v695_v18, %v379_v41  ;;  %v390_v46 = vadd.f32 %v695_v18, %v389_v42 }
  0xce   : > { %v623_v47 = vpack.c.bf16 %v380_v45, %v378_v43  ;;  %v633_v48 = vpack.c.bf16 %v390_v46, %v388_v44 }
  0xd0   : > { %655 = vst [vmem:[%s797_s12 + $0x8] sm:$0xff] %v623_v47  }
  0xd1   : > { %657 = vst [vmem:[%s797_s12 + $0x18] sm:$0xff] %v633_v48  }
  0xd2   : > { %v399_v49 = vpop.f32.mrf.mxu2  ;;  %v409_v50 = vpop.f32.mrf.mxu3 }
  0xd3   : > { %v400_v53 = vadd.f32 %v695_v18, %v399_v49  ;;  %v410_v54 = vadd.f32 %v695_v18, %v409_v50 }
  0xd5   : > { %v643_v55 = vpack.c.bf16 %v400_v53, %v398_v51  ;;  %v653_v56 = vpack.c.bf16 %v410_v54, %v408_v52 }
  0xd7   : > { %659 = vst [vmem:[%s797_s12 + $0x28] sm:$0xff] %v643_v55  }
  0xd8   : > { %661 = vst [vmem:[%s797_s12 + $0x38] sm:$0xff] %v653_v56  }
  0xd9 PF: > { %s22_s19 = sadd.s32 1, %s716_s19  }
  0xda   : > { %p19_p6 = scmp.ge.s32.totalorder %s22_s19, 9  }
  0xdc   :  { %21 = sbr.rel (!%p19_p6) target bundleno = 7 (0x7), region = 68 }

// kernel: _device_forward.16
= control target key start
LH: loop header
LB: loop body
LE: loop exit
PB: predicated region body
PF: predicated region fallthrough
CT: control target
= control target key end

     0   :  { %s1143_s18 = smov [#allocation3]   ;;  %s1322_s0 = inlined_call_operand.vmem [shape: s32[7], index: 0, kind: input, shape index: {}]   ;;  %s1323_s1 = inlined_call_operand.vmem [shape: bf16[896,288], index: 1, kind: input, shape index: {}]   ;;  %s1324_s2 = inlined_call_operand.vmem [shape: bf16[4,288,128], index: 2, kind: input, shape index: {}]   ;;  %s1325_s3 = inlined_call_operand.vmem [shape: f32[4,1,128], index: 3, kind: input, shape index: {}]   ;;  %s1326_s4 = inlined_call_operand.vmem [shape: bf16[896,128], index: 4, kind: output, shape index: {}]  }
   0x1   :  { %s10_s17 = sshll.u32 %s1322_s0, 4  ;;  %s11_s17 = int_to_ptr.vmem [resolvable:$true] %s10_s17 }
   0x2   :  { %13 = dma.vmem_to_smem %s11_s17, 16, %s1143_s18, [#allocation2] }
   0x3   :  { %1137 = dma.done.wait [#allocation2], 16 }
   0x4   :  { %1138 = vsyncadd [#allocation2], 4294967280 }
   0x5   :  { %16 = sfence }
   0x6   :  { %s1172_s19 = smov 0  }
   0x7 LB: > { %s1178_s20 = sadd.s32 4294967295, %s1141_s19   ;;  %p820_p0 = scmp.ge.s32.totalorder %s1141_s19, 1  ;;  %s1141_s19 = sphi %s1172_s19, %s22_s19  }
   0x8   : > { %p174_p1 = scmp.lt.s32.totalorder %s1141_s19, 8 }
   0xa   : > { %p175_p2 = pnand %p820_p0, %p174_p1 }
   0xb   : > { %s216_s0 = sld [smem:[#allocation3 + %s1178_s20]] (!%p175_p2)  ;;  %s821_s21 = sshll.u32 (!%p175_p2), %s1178_s20, 4 }
   0xc   : > { %178 = sbr.rel (%p175_p2) target bundleno = 289 (0x121), region = 32  ;;  %p210_p3 = scmp.lt.s32.totalorder (!%p175_p2), %s821_s21, 111 }
   0xd   : > { %s223_s30 = sld [smem:[#allocation3 + %s1178_s20]] (!%p175_p2) }
  0x11   : > { %s1328_s21 = smov (!%p210_p3, %s821_s21), 111  ;;  %p217_p4 = scmp.lt.s32.totalorder %s216_s0, 3  ;;  %vm535_vm0 = vcmask 261120  }
  0x12   : > { %s1109_s22 = smul.u32 12, %s1328_s21  ;;  %s825_s10 = sshll.u32 %s1328_s21, 2 }
  0x13   : > { %s1330_s0 = smov (!%p217_p4, %s216_s0), 3  ;;  %p224_p5 = scmp.lt.s32.totalorder %s223_s30, 3 }
  0x14   : > { %s1110_s23 = smul.u32 144, %s1330_s0  ;;  %s1195_s29 = scalar_lea.vmem %s1323_s1, %s1109_s22 }
  0x15   : > { %v836_v4 = vld [vmem:[%s1195_s29 + $0x8] sm:$0xf]  ;;  %v1006_v7 = vld [vmem:[%s1195_s29 + $0x10] sm:$0xf0]  ;;  %v848_v17 = vld [vmem:[%s1195_s29 + $0x20] sm:$0xf]  ;;  %s1295_s13 = scalar_lea.vmem %s1326_s4, %s825_s10 }
  0x16   : > { %s1190_s26 = scalar_lea.vmem %s1324_s2, %s1110_s23  ;;  %v837_v8 = vor.u32 %v1006_v7, %v836_v4  ;;  %v1009_v18 = vld [vmem:[%s1195_s29 + $0x28] sm:$0xf0]  ;;  %v828_v22 = vld [vmem:[%s1195_s29] sm:$0xf]  ;;  %v900_v25 = vld [vmem:[%s1195_s29 + $0x90] sm:$0xf] }
  0x17   : > { %v1035_v0 = vld [vmem:[%s1190_s26 + $0x38] sm:$0xff]  ;;  %v1045_v1 = vld [vmem:[%s1190_s26 + $0x88] sm:$0xff]  ;;  %v1034_v3 = vld [vmem:[%s1190_s26 + $0x30] sm:$0xff]  ;;  %v849_v19 = vor.u32 %v1009_v18, %v848_v17  ;;  %s1332_s30 = smov (!%p224_p5, %s223_s30), 3 }
  0x18   : > { %v1200_v2 = vld [vmem:[%s1190_s26 + $0x78] sm:$0xff]  ;;  %560 = vmatpush.bf16.msra.mxu0 %v1035_v0  ;;  %1093 = vmatpush.bf16.msra.mxu3 %v1035_v0  ;;  %v1044_v5 = vld [vmem:[%s1190_s26 + $0x80] sm:$0xff]  ;;  %v1042_v6 = vld [vmem:[%s1190_s26 + $0x70] sm:$0xff]  ;;  %s226_s7 = scalar_lea.vmem %s1325_s3, %s1332_s30 }
  0x19   : > { %664 = vmatpush.bf16.msra.mxu2 %v1045_v1  ;;  %609 = vmatpush.bf16.msra.mxu1 %v1200_v2  ;;  %v1033_v9 = vld [vmem:[%s1190_s26 + $0x28] sm:$0xff]  ;;  %v1032_v11 = vld [vmem:[%s1190_s26 + $0x20] sm:$0xff]  ;;  %v1031_v13 = vld [vmem:[%s1190_s26 + $0x18] sm:$0xff] }
  0x1a   : > { %v1041_v10 = vld [vmem:[%s1190_s26 + $0x68] sm:$0xff]  ;;  %v1040_v12 = vld [vmem:[%s1190_s26 + $0x60] sm:$0xff]  ;;  %v1039_v14 = vld [vmem:[%s1190_s26 + $0x58] sm:$0xff] }
  0x1b   : > { %v1030_v15 = vld [vmem:[%s1190_s26 + $0x10] sm:$0xff]  ;;  %v1029_v20 = vld [vmem:[%s1190_s26 + $0x8] sm:$0xff]  ;;  %v1028_v24 = vld [vmem:[%s1190_s26] sm:$0xff] }
  0x1c   : > { %561 = vmatpush.bf16.msra.mxu0 %v1034_v3  ;;  %1094 = vmatpush.bf16.msra.mxu3 %v1034_v3  ;;  %v1038_v16 = vld [vmem:[%s1190_s26 + $0x50] sm:$0xff]  ;;  %v1037_v21 = vld [vmem:[%s1190_s26 + $0x48] sm:$0xff]  ;;  %v1023_v26 = vld [vmem:[%s1195_s29 + $0x98] sm:$0xf0] }
  0x1d   : > { %665 = vmatpush.bf16.msra.mxu2 %v1044_v5  ;;  %610 = vmatpush.bf16.msra.mxu1 %v1042_v6  ;;  %v1005_v23 = vld [vmem:[%s1195_s29 + $0x8] sm:$0xf0]  ;;  %v1036_v27 = vld [vmem:[%s1190_s26 + $0x40] sm:$0xff]  ;;  %v830_v29 = vld [vmem:[%s1195_s29 + $0xc] sm:$0xf0]  ;;  %v901_v31 = vor.u32 %v1023_v26, %v900_v25 }
  0x1e   : > { %v1004_v28 = vld [vmem:[%s1195_s29 + $0x4] sm:$0xf]  ;;  %v829_v30 = vor.u32 %v1005_v23, %v828_v22  ;;  %v860_v33 = vld [vmem:[%s1195_s29 + $0x38] sm:$0xf]  ;;  %v912_v38 = vld [vmem:[%s1195_s29 + $0xa8] sm:$0xf] }
  0x1f   : > { %v833_v32 = vor.u32 %v1004_v28, %v830_v29  ;;  %v1012_v34 = vld [vmem:[%s1195_s29 + $0x40] sm:$0xf0]  ;;  %v840_v36 = vld [vmem:[%s1195_s29 + $0x18] sm:$0xf]  ;;  %v1026_v39 = vld [vmem:[%s1195_s29 + $0xb0] sm:$0xf0] }
  0x20   : > { %994 = vmatmul.msk.bf16.vlgmr.msra.gmra.mxu2 %vm535_vm0, %v837_v8  ;;  %562 = vmatpush.bf16.msra.mxu0 %v1033_v9  ;;  %v861_v35 = vor.u32 %v1012_v34, %v860_v33  ;;  %v1008_v37 = vld [vmem:[%s1195_s29 + $0x20] sm:$0xf0]  ;;  %v1007_v40 = vld [vmem:[%s1195_s29 + $0x1c] sm:$0xf]  ;;  %v842_v41 = vld [vmem:[%s1195_s29 + $0x24] sm:$0xf0]  ;;  %v913_v43 = vor.u32 %v1026_v39, %v912_v38 }
  0x21   : > { %1095 = vmatpush.bf16.msra.mxu3 %v1033_v9  ;;  %611 = vmatpush.bf16.msra.mxu1 %v1041_v10  ;;  %v841_v42 = vor.u32 %v1008_v37, %v840_v36  ;;  %v845_v44 = vor.u32 %v1007_v40, %v842_v41  ;;  %v872_v45 = vld [vmem:[%s1195_s29 + $0x50] sm:$0xf]  ;;  %v1015_v46 = vld [vmem:[%s1195_s29 + $0x58] sm:$0xf0]  ;;  %v1022_v50 = vld [vmem:[%s1195_s29 + $0x94] sm:$0xf] }
  0x22   : > { %v873_v47 = vor.u32 %v1015_v46, %v872_v45  ;;  %v852_v48 = vld [vmem:[%s1195_s29 + $0x30] sm:$0xf]  ;;  %v1011_v49 = vld [vmem:[%s1195_s29 + $0x38] sm:$0xf0]  ;;  %v902_v51 = vld [vmem:[%s1195_s29 + $0x9c] sm:$0xf0] }
  0x23   : > { %v1010_v52 = vld [vmem:[%s1195_s29 + $0x34] sm:$0xf]  ;;  %v854_v53 = vld [vmem:[%s1195_s29 + $0x3c] sm:$0xf0]  ;;  %v853_v54 = vor.u32 %v1011_v49, %v852_v48  ;;  %v905_v55 = vor.u32 %v1022_v50, %v902_v51  ;;  %v884_v57 = vld [vmem:[%s1195_s29 + $0x68] sm:$0xf] }
  0x24   : > { %563 = vmatpush.bf16.msra.mxu0 %v1032_v11  ;;  %v857_v56 = vor.u32 %v1010_v52, %v854_v53  ;;  %v1018_v58 = vld [vmem:[%s1195_s29 + $0x70] sm:$0xf0]  ;;  %v864_v60 = vld [vmem:[%s1195_s29 + $0x48] sm:$0xf]  ;;  %v1025_v62 = vld [vmem:[%s1195_s29 + $0xac] sm:$0xf] }
  0x25   : > { %1096 = vmatpush.bf16.msra.mxu3 %v1032_v11  ;;  %612 = vmatpush.bf16.msra.mxu1 %v1040_v12  ;;  %v885_v59 = vor.u32 %v1018_v58, %v884_v57  ;;  %v1014_v61 = vld [vmem:[%s1195_s29 + $0x50] sm:$0xf0]  ;;  %v914_v63 = vld [vmem:[%s1195_s29 + $0xb4] sm:$0xf0]  ;;  %v1013_v0 = vld [vmem:[%s1195_s29 + $0x4c] sm:$0xf] }
  0x26   : > { %v866_v1 = vld [vmem:[%s1195_s29 + $0x54] sm:$0xf0]  ;;  %v917_v3 = vor.u32 %v1025_v62, %v914_v63  ;;  %v896_v5 = vld [vmem:[%s1195_s29 + $0x80] sm:$0xf]  ;;  %v1017_v9 = vld [vmem:[%s1195_s29 + $0x68] sm:$0xf0] }
  0x27   : > { %v869_v4 = vor.u32 %v1013_v0, %v866_v1  ;;  %v876_v8 = vld [vmem:[%s1195_s29 + $0x60] sm:$0xf]  ;;  %v878_v11 = vld [vmem:[%s1195_s29 + $0x6c] sm:$0xf0]  ;;  %v888_v17 = vld [vmem:[%s1195_s29 + $0x78] sm:$0xf] }
  0x28   : > { %564 = vmatpush.bf16.msra.mxu0 %v1031_v13  ;;  %v1020_v18 = vld [vmem:[%s1195_s29 + $0x80] sm:$0xf0]  ;;  %v920_v23 = vld [vmem:[%s1195_s29 + $0xb0] sm:$0xf] }
  0x29   : > { %1097 = vmatpush.bf16.msra.mxu3 %v1031_v13  ;;  %613 = vmatpush.bf16.msra.mxu1 %v1039_v14 }
  0x2c   : > { %565 = vmatpush.bf16.msra.mxu0 %v1030_v15 }
  0x2d   : > { %1098 = vmatpush.bf16.msra.mxu3 %v1030_v15  ;;  %614 = vmatpush.bf16.msra.mxu1 %v1038_v16  ;;  %v1024_v15 = vld [vmem:[%s1195_s29 + $0xa0] sm:$0xf0] }
  0x30   : > { %995 = vmatmul.msk.bf16.gmra.mxu2 %vm535_vm0, %v849_v19  ;;  %566 = vmatpush.bf16.msra.mxu0 %v1029_v20  ;;  %v1019_v19 = vld [vmem:[%s1195_s29 + $0x7c] sm:$0xf] }
  0x31   : > { %1099 = vmatpush.bf16.msra.mxu3 %v1029_v20  ;;  %615 = vmatpush.bf16.msra.mxu1 %v1037_v21  ;;  %v890_v20 = vld [vmem:[%s1195_s29 + $0x84] sm:$0xf0] }
  0x32   : > { %v893_v22 = vor.u32 %v1019_v19, %v890_v20 }
  0x34   : > { %567 = vmatpush.bf16.msra.mxu0 %v1028_v24 }
  0x35   : > { %1100 = vmatpush.bf16.msra.mxu3 %v1028_v24  ;;  %616 = vmatpush.bf16.msra.mxu1 %v1036_v27  ;;  %v1027_v24 = vld [vmem:[%s1195_s29 + $0xb8] sm:$0xf0] }
  0x36   : > { %v921_v25 = vor.u32 %v1027_v24, %v920_v23 }
  0x37   : > { %568 = vmatmul.bf16.vlgmr.msra.gmra.mxu0 %v829_v30  ;;  %v1287_v30 = vld [vmem:[%s226_s7] ss:$0 sm:$0xff] }
  0x38   : > { %598 = vmatmul.bf16.vlgmr.msra.gmra.mxu3 %v901_v31  ;;  %617 = vmatmul.bf16.vlgmr.msra.gmra.mxu1 %v833_v32 }
  0x39   : > { %1101 = vmatpush.bf16.msrb.mxu3 %v1200_v2  ;;  %v865_v2 = vor.u32 %v1014_v61, %v864_v60 }
  0x3d   : > { %1102 = vmatpush.bf16.msrb.mxu3 %v1042_v6  ;;  %v1021_v6 = vld [vmem:[%s1195_s29 + $0x88] sm:$0xf0] }
  0x3e   : > { %v897_v7 = vor.u32 %v1021_v6, %v896_v5 }
  0x40   : > { %996 = vmatmul.msk.bf16.gmra.mxu2 %vm535_vm0, %v861_v35 }
  0x41   : > { %1103 = vmatpush.bf16.msrb.mxu3 %v1041_v10  ;;  %v1016_v10 = vld [vmem:[%s1195_s29 + $0x64] sm:$0xf] }
  0x42   : > { %v881_v13 = vor.u32 %v1016_v10, %v878_v11 }
  0x45   : > { %1104 = vmatpush.bf16.msrb.mxu3 %v1040_v12  ;;  %v877_v12 = vor.u32 %v1017_v9, %v876_v8 }
  0x47   : > { %573 = vmatmul.bf16.gmra.mxu0 %v841_v42 }
  0x48   : > { %603 = vmatmul.bf16.gmra.mxu3 %v913_v43  ;;  %622 = vmatmul.bf16.gmra.mxu1 %v845_v44 }
  0x49   : > { %1105 = vmatpush.bf16.msrb.mxu3 %v1039_v14  ;;  %v908_v14 = vld [vmem:[%s1195_s29 + $0x98] sm:$0xf] }
  0x4d   : > { %1106 = vmatpush.bf16.msrb.mxu3 %v1038_v16  ;;  %v909_v16 = vor.u32 %v1024_v15, %v908_v14 }
  0x50   : > { %997 = vmatmul.msk.bf16.gmra.mxu2 %vm535_vm0, %v873_v47 }
  0x51   : > { %1107 = vmatpush.bf16.msrb.mxu3 %v1037_v21  ;;  %v889_v21 = vor.u32 %v1020_v18, %v888_v17 }
  0x55   : > { %1108 = vmatpush.bf16.msrb.mxu3 %v1036_v27 }
  0x57   : > { %578 = vmatmul.bf16.gmra.mxu0 %v853_v54 }
  0x58   : > { %647 = vmatmul.bf16.vlgmr.msrb.gmra.mxu3 %v905_v55  ;;  %627 = vmatmul.bf16.gmra.mxu1 %v857_v56 }
  0x60   : > { %998 = vmatmul.msk.bf16.gmra.mxu2 %vm535_vm0, %v885_v59 }
  0x67   : > { %583 = vmatmul.bf16.gmra.mxu0 %v865_v2 }
  0x68   : > { %652 = vmatmul.bf16.gmra.mxu3 %v917_v3  ;;  %632 = vmatmul.bf16.gmra.mxu1 %v869_v4 }
  0x70   : > { %999 = vmatmul.msk.bf16.gmra.mxu2 %vm535_vm0, %v897_v7 }
  0x77   : > { %588 = vmatmul.bf16.gmra.mxu0 %v877_v12 }
  0x78   : > { %637 = vmatmul.bf16.gmra.mxu1 %v881_v13 }
  0x80   : > { %1000 = vmatmul.msk.bf16.gmra.mxu2 %vm535_vm0, %v909_v16 }
  0x87   : > { %593 = vmatmul.bf16.gmra.mxu0 %v889_v21 }
  0x88   : > { %642 = vmatmul.bf16.gmra.mxu1 %v893_v22 }
  0x90   : > { %1001 = vmatmul.msk.bf16.gmra.mxu2 %vm535_vm0, %v921_v25 }
  0xa3   : > { %v667_v26 = vpop.f32.mrf.mxu2 }
  0xab   : > { %v669_v27 = vpop.f32.mrf.mxu2 }
  0xb3   : > { %v672_v28 = vpop.f32.mrf.mxu2 }
  0xb4   : > { %v569_v29 = vpop.f32.mrf.mxu0 }
  0xb5   : > { %v618_v31 = vpop.f32.mrf.mxu1  ;;  %v570_v32 = vadd.f32 %v1287_v30, %v569_v29 }
  0xb7   : > { %v619_v35 = vadd.f32 %v618_v31, %v570_v32 }
  0xb9   : > { %v668_v39 = vadd.f32 %v667_v26, %v619_v35 }
  0xbb   : > { %v674_v33 = vpop.f32.mrf.mxu2  ;;  %v599_v52 = vpop.f32.mrf.mxu3 }
  0xbc   : > { %v571_v34 = vpop.f32.mrf.mxu0 }
  0xbd   : > { %v572_v36 = vadd.f32 %v1287_v30, %v571_v34  ;;  %v620_v37 = vpop.f32.mrf.mxu1 }
  0xbf   : > { %v621_v38 = vadd.f32 %v620_v37, %v572_v36 }
  0xc1   : > { %v670_v40 = vadd.f32 %v669_v27, %v621_v38 }
  0xc3   : > { %v1049_v41 = vpack.c.bf16 %v670_v40, %v668_v39  ;;  %v677_v42 = vpop.f32.mrf.mxu2  ;;  %v601_v60 = vpop.f32.mrf.mxu3  ;;  %v600_v40 = vadd.f32 %v1287_v30, %v599_v52 }
  0xc4   : > { %v574_v43 = vpop.f32.mrf.mxu0 }
  0xc5   : > { %1050 = vst [vmem:[%s1295_s13] sm:$0xff] %v1049_v41   ;;  %v623_v44 = vpop.f32.mrf.mxu1  ;;  %v575_v45 = vadd.f32 %v1287_v30, %v574_v43  ;;  %v602_v41 = vadd.f32 %v1287_v30, %v601_v60 }
  0xc7   : > { %v624_v48 = vadd.f32 %v623_v44, %v575_v45 }
  0xc9   : > { %v673_v53 = vadd.f32 %v672_v28, %v624_v48 }
  0xcb   : > { %v679_v46 = vpop.f32.mrf.mxu2  ;;  %v604_v8 = vpop.f32.mrf.mxu3 }
  0xcc   : > { %v576_v47 = vpop.f32.mrf.mxu0 }
  0xcd   : > { %v577_v49 = vadd.f32 %v1287_v30, %v576_v47  ;;  %v625_v50 = vpop.f32.mrf.mxu1 }
  0xcf   : > { %v626_v51 = vadd.f32 %v625_v50, %v577_v49 }
  0xd1   : > { %v675_v54 = vadd.f32 %v674_v33, %v626_v51 }
  0xd3   : > { %v1054_v55 = vpack.c.bf16 %v675_v54, %v673_v53  ;;  %v682_v56 = vpop.f32.mrf.mxu2  ;;  %v606_v16 = vpop.f32.mrf.mxu3 }
  0xd4   : > { %v579_v57 = vpop.f32.mrf.mxu0  ;;  %v607_v60 = vadd.f32 %v1287_v30, %v606_v16 }
  0xd5   : > { %1086 = vst [vmem:[%s1295_s13 + $0x8] sm:$0xff] %v1054_v55   ;;  %v628_v58 = vpop.f32.mrf.mxu1  ;;  %v580_v59 = vadd.f32 %v1287_v30, %v579_v57 }
  0xd7   : > { %v629_v63 = vadd.f32 %v628_v58, %v580_v59  ;;  %v605_v59 = vadd.f32 %v1287_v30, %v604_v8 }
  0xd9   : > { %v678_v3 = vadd.f32 %v677_v42, %v629_v63 }
  0xdb   : > { %v684_v61 = vpop.f32.mrf.mxu2  ;;  %v648_v24 = vpop.f32.mrf.mxu3 }
  0xdc   : > { %v581_v62 = vpop.f32.mrf.mxu0  ;;  %v649_v43 = vadd.f32 %v648_v24, %v600_v40 }
  0xdd   : > { %v582_v0 = vadd.f32 %v1287_v30, %v581_v62  ;;  %v630_v1 = vpop.f32.mrf.mxu1 }
  0xdf   : > { %v631_v2 = vadd.f32 %v630_v1, %v582_v0 }
  0xe1   : > { %v680_v4 = vadd.f32 %v679_v46, %v631_v2 }
  0xe3   : > { %v1059_v5 = vpack.c.bf16 %v680_v4, %v678_v3  ;;  %v687_v6 = vpop.f32.mrf.mxu2  ;;  %v650_v35 = vpop.f32.mrf.mxu3 }
  0xe4   : > { %v584_v7 = vpop.f32.mrf.mxu0  ;;  %v651_v44 = vadd.f32 %v650_v35, %v602_v41 }
  0xe5   : > { %1087 = vst [vmem:[%s1295_s13 + $0x10] sm:$0xff] %v1059_v5   ;;  %v633_v9 = vpop.f32.mrf.mxu1  ;;  %v585_v10 = vadd.f32 %v1287_v30, %v584_v7 }
  0xe7   : > { %v634_v13 = vadd.f32 %v633_v9, %v585_v10 }
  0xe9   : > { %v683_v18 = vadd.f32 %v682_v56, %v634_v13 }
  0xeb   : > { %v689_v11 = vpop.f32.mrf.mxu2  ;;  %v653_v49 = vpop.f32.mrf.mxu3 }
  0xec   : > { %v586_v12 = vpop.f32.mrf.mxu0  ;;  %v654_v62 = vadd.f32 %v653_v49, %v605_v59 }
  0xed   : > { %v587_v14 = vadd.f32 %v1287_v30, %v586_v12  ;;  %v635_v15 = vpop.f32.mrf.mxu1 }
  0xef   : > { %v636_v17 = vadd.f32 %v635_v15, %v587_v14 }
  0xf1   : > { %v685_v19 = vadd.f32 %v684_v61, %v636_v17 }
  0xf3   : > { %v1064_v20 = vpack.c.bf16 %v685_v19, %v683_v18  ;;  %v692_v21 = vpop.f32.mrf.mxu2  ;;  %v655_v61 = vpop.f32.mrf.mxu3 }
  0xf4   : > { %v589_v22 = vpop.f32.mrf.mxu0  ;;  %v656_v63 = vadd.f32 %v655_v61, %v607_v60 }
  0xf5   : > { %1088 = vst [vmem:[%s1295_s13 + $0x18] sm:$0xff] %v1064_v20   ;;  %v638_v23 = vpop.f32.mrf.mxu1  ;;  %v590_v25 = vadd.f32 %v1287_v30, %v589_v22 }
  0xf7   : > { %v639_v28 = vadd.f32 %v638_v23, %v590_v25 }
  0xf9   : > { %v688_v33 = vadd.f32 %v687_v6, %v639_v28 }
  0xfb   : > { %v694_v26 = vpop.f32.mrf.mxu2 }
  0xfc   : > { %v591_v27 = vpop.f32.mrf.mxu0 }
  0xfd   : > { %v592_v29 = vadd.f32 %v1287_v30, %v591_v27  ;;  %v640_v31 = vpop.f32.mrf.mxu1 }
  0xff   : > { %v641_v32 = vadd.f32 %v640_v31, %v592_v29 }
 0x101   : > { %v690_v34 = vadd.f32 %v689_v11, %v641_v32 }
 0x103   : > { %v1069_v36 = vpack.c.bf16 %v690_v34, %v688_v33  ;;  %v697_v37 = vpop.f32.mrf.mxu2 }
 0x104   : > { %v594_v38 = vpop.f32.mrf.mxu0  ;;  %v698_v46 = vadd.f32 %v697_v37, %v649_v43 }
 0x105   : > { %1089 = vst [vmem:[%s1295_s13 + $0x20] sm:$0xff] %v1069_v36   ;;  %v643_v39 = vpop.f32.mrf.mxu1  ;;  %v595_v42 = vadd.f32 %v1287_v30, %v594_v38 }
 0x107   : > { %v644_v50 = vadd.f32 %v643_v39, %v595_v42 }
 0x109   : > { %v693_v52 = vadd.f32 %v692_v21, %v644_v50 }
 0x10b   : > { %v699_v45 = vpop.f32.mrf.mxu2 }
 0x10c   : > { %v700_v47 = vadd.f32 %v699_v45, %v651_v44  ;;  %v596_v48 = vpop.f32.mrf.mxu0 }
 0x10d   : > { %v597_v51 = vadd.f32 %v1287_v30, %v596_v48  ;;  %v645_v53 = vpop.f32.mrf.mxu1 }
 0x10e   : > { %v1079_v54 = vpack.c.bf16 %v700_v47, %v698_v46 }
 0x10f   : > { %v646_v55 = vadd.f32 %v645_v53, %v597_v51 }
 0x110   : > { %1091 = vst [vmem:[%s1295_s13 + $0x30] sm:$0xff] %v1079_v54  }
 0x111   : > { %v695_v56 = vadd.f32 %v694_v26, %v646_v55 }
 0x113   : > { %v1074_v57 = vpack.c.bf16 %v695_v56, %v693_v52  ;;  %v702_v58 = vpop.f32.mrf.mxu2 }
 0x114   : > { %v703_v1 = vadd.f32 %v702_v58, %v654_v62 }
 0x115   : > { %1090 = vst [vmem:[%s1295_s13 + $0x28] sm:$0xff] %v1074_v57  }
 0x11b   : > { %v704_v0 = vpop.f32.mrf.mxu2 }
 0x11c   : > { %v705_v2 = vadd.f32 %v704_v0, %v656_v63 }
 0x11e   : > { %v1084_v3 = vpack.c.bf16 %v705_v2, %v703_v1 }
 0x120   : > { %1092 = vst [vmem:[%s1295_s13 + $0x38] sm:$0xff] %v1084_v3  }
 0x121 PF: > { %s22_s19 = sadd.s32 1, %s1141_s19  }
 0x122   : > { %p19_p6 = scmp.ge.s32.totalorder %s22_s19, 9  }
 0x124   :  { %21 = sbr.rel (!%p19_p6) target bundleno = 7 (0x7), region = 68 }

// kernel: _device_forward.17
= control target key start
LH: loop header
LB: loop body
LE: loop exit
PB: predicated region body
PF: predicated region fallthrough
CT: control target
= control target key end

     0   :  { %vm973_vm0 = vcmask 261120   ;;  %s4315_s1 = inlined_call_operand.vmem [shape: bf16[288,128], index: 1, kind: input, shape index: {}]   ;;  %s4316_s0 = inlined_call_operand.vmem [shape: bf16[680,288], index: 0, kind: input, shape index: {}]   ;;  %s4317_s2 = inlined_call_operand.vmem [shape: f32[1,128], index: 2, kind: input, shape index: {}]   ;;  %s4318_s3 = inlined_call_operand.vmem [shape: bf16[680,128], index: 3, kind: output, shape index: {}]  }
   0x1   :  { %v2783_v0 = vld [vmem:[%s4315_s1 + $0x38] sm:$0xff]  ;;  %v3092_v1 = vld [vmem:[%s4315_s1 + $0x88] sm:$0xff]  ;;  %v2782_v3 = vld [vmem:[%s4315_s1 + $0x30] sm:$0xff] }
   0x2   :  { %v2791_v2 = vld [vmem:[%s4315_s1 + $0x78] sm:$0xff]  ;;  %1103 = vmatpush.bf16.msra.mxu0 %v2783_v0  ;;  %3045 = vmatpush.bf16.msra.mxu3 %v2783_v0  ;;  %v3103_v4 = vld [vmem:[%s4315_s1 + $0x80] sm:$0xff]  ;;  %v2790_v5 = vld [vmem:[%s4315_s1 + $0x70] sm:$0xff] }
   0x3   :  { %1555 = vmatpush.bf16.msra.mxu2 %v3092_v1  ;;  %1326 = vmatpush.bf16.msra.mxu1 %v2791_v2  ;;  %v2041_v6 = vld [vmem:[%s4316_s0 + $0x8] sm:$0xf]  ;;  %v2652_v7 = vld [vmem:[%s4316_s0 + $0x10] sm:$0xf0]  ;;  %v2780_v11 = vld [vmem:[%s4315_s1 + $0x20] sm:$0xff] }
   0x4   :  { %v2042_v8 = vor.u32 %v2652_v7, %v2041_v6  ;;  %v2781_v9 = vld [vmem:[%s4315_s1 + $0x28] sm:$0xff]  ;;  %v2788_v12 = vld [vmem:[%s4315_s1 + $0x60] sm:$0xff]  ;;  %v2779_v13 = vld [vmem:[%s4315_s1 + $0x18] sm:$0xff] }
   0x5   :  { %v2789_v10 = vld [vmem:[%s4315_s1 + $0x68] sm:$0xff]  ;;  %v2787_v14 = vld [vmem:[%s4315_s1 + $0x58] sm:$0xff]  ;;  %v2778_v15 = vld [vmem:[%s4315_s1 + $0x10] sm:$0xff] }
   0x6   :  { %1104 = vmatpush.bf16.msra.mxu0 %v2782_v3  ;;  %3046 = vmatpush.bf16.msra.mxu3 %v2782_v3  ;;  %v2786_v16 = vld [vmem:[%s4315_s1 + $0x50] sm:$0xff]  ;;  %v2053_v17 = vld [vmem:[%s4316_s0 + $0x20] sm:$0xf]  ;;  %v2655_v18 = vld [vmem:[%s4316_s0 + $0x28] sm:$0xf0] }
   0x7   :  { %1556 = vmatpush.bf16.msra.mxu2 %v3103_v4  ;;  %1327 = vmatpush.bf16.msra.mxu1 %v2790_v5  ;;  %v2054_v19 = vor.u32 %v2655_v18, %v2053_v17  ;;  %v2777_v20 = vld [vmem:[%s4315_s1 + $0x8] sm:$0xff]  ;;  %v2776_v22 = vld [vmem:[%s4315_s1] sm:$0xff]  ;;  %v2035_v29 = vld [vmem:[%s4316_s0 + $0xc] sm:$0xf0] }
   0x8   :  { %v2785_v21 = vld [vmem:[%s4315_s1 + $0x48] sm:$0xff]  ;;  %v2784_v23 = vld [vmem:[%s4315_s1 + $0x40] sm:$0xff]  ;;  %v2065_v33 = vld [vmem:[%s4316_s0 + $0x38] sm:$0xf] }
   0x9   :  { %v2033_v24 = vld [vmem:[%s4316_s0] sm:$0xf]  ;;  %v2651_v25 = vld [vmem:[%s4316_s0 + $0x8] sm:$0xf0]  ;;  %v2650_v28 = vld [vmem:[%s4316_s0 + $0x4] sm:$0xf] }
   0xa   :  { %2607 = vmatmul.msk.bf16.vlgmr.msra.gmra.mxu2 %vm973_vm0, %v2042_v8  ;;  %1105 = vmatpush.bf16.msra.mxu0 %v2781_v9  ;;  %v2417_v26 = vld [vmem:[%s4316_s0 + $0x300] sm:$0xf]  ;;  %v2747_v27 = vld [vmem:[%s4316_s0 + $0x308] sm:$0xf0]  ;;  %v2034_v30 = vor.u32 %v2651_v25, %v2033_v24  ;;  %v2038_v32 = vor.u32 %v2650_v28, %v2035_v29  ;;  %v2658_v34 = vld [vmem:[%s4316_s0 + $0x40] sm:$0xf0] }
   0xb   :  { %3047 = vmatpush.bf16.msra.mxu3 %v2781_v9  ;;  %1328 = vmatpush.bf16.msra.mxu1 %v2789_v10  ;;  %v2418_v31 = vor.u32 %v2747_v27, %v2417_v26  ;;  %v2066_v35 = vor.u32 %v2658_v34, %v2065_v33  ;;  %v2045_v36 = vld [vmem:[%s4316_s0 + $0x18] sm:$0xf]  ;;  %v2654_v37 = vld [vmem:[%s4316_s0 + $0x20] sm:$0xf0]  ;;  %v2653_v40 = vld [vmem:[%s4316_s0 + $0x1c] sm:$0xf] }
   0xc   :  { %v2429_v38 = vld [vmem:[%s4316_s0 + $0x318] sm:$0xf]  ;;  %v2750_v39 = vld [vmem:[%s4316_s0 + $0x320] sm:$0xf0]  ;;  %v2047_v41 = vld [vmem:[%s4316_s0 + $0x24] sm:$0xf0]  ;;  %v2046_v42 = vor.u32 %v2654_v37, %v2045_v36 }
   0xd   :  { %v2430_v43 = vor.u32 %v2750_v39, %v2429_v38  ;;  %v2050_v44 = vor.u32 %v2653_v40, %v2047_v41  ;;  %v2077_v45 = vld [vmem:[%s4316_s0 + $0x50] sm:$0xf]  ;;  %v2661_v46 = vld [vmem:[%s4316_s0 + $0x58] sm:$0xf0]  ;;  %v2656_v52 = vld [vmem:[%s4316_s0 + $0x34] sm:$0xf] }
   0xe   :  { %1106 = vmatpush.bf16.msra.mxu0 %v2780_v11  ;;  %v2078_v47 = vor.u32 %v2661_v46, %v2077_v45  ;;  %v2057_v48 = vld [vmem:[%s4316_s0 + $0x30] sm:$0xf]  ;;  %v2657_v49 = vld [vmem:[%s4316_s0 + $0x38] sm:$0xf0]  ;;  %v2059_v53 = vld [vmem:[%s4316_s0 + $0x3c] sm:$0xf0] }
   0xf   :  { %3048 = vmatpush.bf16.msra.mxu3 %v2780_v11  ;;  %1329 = vmatpush.bf16.msra.mxu1 %v2788_v12  ;;  %v2441_v50 = vld [vmem:[%s4316_s0 + $0x330] sm:$0xf]  ;;  %v2753_v51 = vld [vmem:[%s4316_s0 + $0x338] sm:$0xf0]  ;;  %v2058_v54 = vor.u32 %v2657_v49, %v2057_v48  ;;  %v2062_v56 = vor.u32 %v2656_v52, %v2059_v53  ;;  %v2089_v57 = vld [vmem:[%s4316_s0 + $0x68] sm:$0xf] }
  0x10   :  { %v2442_v55 = vor.u32 %v2753_v51, %v2441_v50  ;;  %v2664_v58 = vld [vmem:[%s4316_s0 + $0x70] sm:$0xf0]  ;;  %v2069_v60 = vld [vmem:[%s4316_s0 + $0x48] sm:$0xf]  ;;  %v2659_v0 = vld [vmem:[%s4316_s0 + $0x4c] sm:$0xf] }
  0x11   :  { %v2090_v59 = vor.u32 %v2664_v58, %v2089_v57  ;;  %v2660_v61 = vld [vmem:[%s4316_s0 + $0x50] sm:$0xf0]  ;;  %v2453_v62 = vld [vmem:[%s4316_s0 + $0x348] sm:$0xf]  ;;  %v2667_v6 = vld [vmem:[%s4316_s0 + $0x88] sm:$0xf0] }
  0x12   :  { %1107 = vmatpush.bf16.msra.mxu0 %v2779_v13  ;;  %v2756_v63 = vld [vmem:[%s4316_s0 + $0x350] sm:$0xf0]  ;;  %v2081_v8 = vld [vmem:[%s4316_s0 + $0x60] sm:$0xf]  ;;  %v2663_v9 = vld [vmem:[%s4316_s0 + $0x68] sm:$0xf0] }
  0x13   :  { %3049 = vmatpush.bf16.msra.mxu3 %v2779_v13  ;;  %1330 = vmatpush.bf16.msra.mxu1 %v2787_v14  ;;  %v2454_v3 = vor.u32 %v2756_v63, %v2453_v62  ;;  %v2759_v11 = vld [vmem:[%s4316_s0 + $0x368] sm:$0xf0]  ;;  %v2083_v13 = vld [vmem:[%s4316_s0 + $0x6c] sm:$0xf0]  ;;  %v2113_v17 = vld [vmem:[%s4316_s0 + $0x98] sm:$0xf] }
  0x14   :  { %v2670_v18 = vld [vmem:[%s4316_s0 + $0xa0] sm:$0xf0]  ;;  %v2665_v24 = vld [vmem:[%s4316_s0 + $0x7c] sm:$0xf]  ;;  %v2095_v25 = vld [vmem:[%s4316_s0 + $0x84] sm:$0xf0] }
  0x15   :  { %v2098_v28 = vor.u32 %v2665_v24, %v2095_v25  ;;  %v2125_v29 = vld [vmem:[%s4316_s0 + $0xb0] sm:$0xf]  ;;  %v2669_v33 = vld [vmem:[%s4316_s0 + $0x98] sm:$0xf0]  ;;  %v2668_v36 = vld [vmem:[%s4316_s0 + $0x94] sm:$0xf] }
  0x16   :  { %1108 = vmatpush.bf16.msra.mxu0 %v2778_v15  ;;  %v2489_v34 = vld [vmem:[%s4316_s0 + $0x390] sm:$0xf]  ;;  %v2107_v37 = vld [vmem:[%s4316_s0 + $0x9c] sm:$0xf0]  ;;  %v2137_v41 = vld [vmem:[%s4316_s0 + $0xc8] sm:$0xf] }
  0x17   :  { %3050 = vmatpush.bf16.msra.mxu3 %v2778_v15  ;;  %1331 = vmatpush.bf16.msra.mxu1 %v2786_v16  ;;  %v2110_v40 = vor.u32 %v2668_v36, %v2107_v37  ;;  %v2672_v45 = vld [vmem:[%s4316_s0 + $0xb0] sm:$0xf0]  ;;  %v2501_v46 = vld [vmem:[%s4316_s0 + $0x3a8] sm:$0xf]  ;;  %v2671_v48 = vld [vmem:[%s4316_s0 + $0xac] sm:$0xf] }
  0x18   :  { %v2119_v49 = vld [vmem:[%s4316_s0 + $0xb4] sm:$0xf0]  ;;  %v2129_v58 = vld [vmem:[%s4316_s0 + $0xc0] sm:$0xf]  ;;  %v2674_v62 = vld [vmem:[%s4316_s0 + $0xc4] sm:$0xf] }
  0x19   :  { %v2122_v53 = vor.u32 %v2671_v48, %v2119_v49  ;;  %v2131_v63 = vld [vmem:[%s4316_s0 + $0xcc] sm:$0xf0]  ;;  %v2677_v24 = vld [vmem:[%s4316_s0 + $0xdc] sm:$0xf]  ;;  %v2143_v25 = vld [vmem:[%s4316_s0 + $0xe4] sm:$0xf0] }
  0x1a   :  { %2608 = vmatmul.msk.bf16.gmra.mxu2 %vm973_vm0, %v2054_v19  ;;  %1109 = vmatpush.bf16.msra.mxu0 %v2777_v20  ;;  %v2114_v19 = vor.u32 %v2670_v18, %v2113_v17  ;;  %v2173_v37 = vld [vmem:[%s4316_s0 + $0x110] sm:$0xf] }
  0x1b   :  { %3051 = vmatpush.bf16.msra.mxu3 %v2777_v20  ;;  %1332 = vmatpush.bf16.msra.mxu1 %v2785_v21  ;;  %v2093_v20 = vld [vmem:[%s4316_s0 + $0x78] sm:$0xf]  ;;  %v2153_v49 = vld [vmem:[%s4316_s0 + $0xf0] sm:$0xf] }
  0x1e   :  { %1110 = vmatpush.bf16.msra.mxu0 %v2776_v22 }
  0x1f   :  { %3052 = vmatpush.bf16.msra.mxu3 %v2776_v22  ;;  %1333 = vmatpush.bf16.msra.mxu1 %v2784_v23  ;;  %v2477_v22 = vld [vmem:[%s4316_s0 + $0x378] sm:$0xf] }
  0x21   :  { %1111 = vmatmul.bf16.vlgmr.msra.gmra.mxu0 %v2034_v30  ;;  %v2673_v30 = vld [vmem:[%s4316_s0 + $0xb8] sm:$0xf0] }
  0x22   :  { %1271 = vmatmul.bf16.vlgmr.msra.gmra.mxu3 %v2418_v31  ;;  %1334 = vmatmul.bf16.vlgmr.msra.gmra.mxu1 %v2038_v32  ;;  %v2126_v31 = vor.u32 %v2673_v30, %v2125_v29  ;;  %v2105_v32 = vld [vmem:[%s4316_s0 + $0x90] sm:$0xf] }
  0x23   :  { %3053 = vmatpush.bf16.msrb.mxu3 %v2791_v2  ;;  %v2070_v2 = vor.u32 %v2660_v61, %v2069_v60  ;;  %v2106_v38 = vor.u32 %v2669_v33, %v2105_v32  ;;  %v2513_v60 = vld [vmem:[%s4316_s0 + $0x3c0] sm:$0xf]  ;;  %v2771_v61 = vld [vmem:[%s4316_s0 + $0x3c8] sm:$0xf0]  ;;  %v2146_v33 = vor.u32 %v2677_v24, %v2143_v25 }
  0x27   :  { %3054 = vmatpush.bf16.msrb.mxu3 %v2790_v5  ;;  %v2101_v5 = vld [vmem:[%s4316_s0 + $0x80] sm:$0xf] }
  0x28   :  { %v2102_v7 = vor.u32 %v2667_v6, %v2101_v5  ;;  %v2134_v5 = vor.u32 %v2674_v62, %v2131_v63 }
  0x2a   :  { %2609 = vmatmul.msk.bf16.gmra.mxu2 %vm973_vm0, %v2066_v35  ;;  %v2765_v35 = vld [vmem:[%s4316_s0 + $0x398] sm:$0xf0] }
  0x2b   :  { %3055 = vmatpush.bf16.msrb.mxu3 %v2789_v10  ;;  %v2465_v10 = vld [vmem:[%s4316_s0 + $0x360] sm:$0xf]  ;;  %v2490_v39 = vor.u32 %v2765_v35, %v2489_v34 }
  0x2c   :  { %v2466_v15 = vor.u32 %v2759_v11, %v2465_v10 }
  0x2f   :  { %3056 = vmatpush.bf16.msrb.mxu3 %v2788_v12  ;;  %v2662_v12 = vld [vmem:[%s4316_s0 + $0x64] sm:$0xf] }
  0x31   :  { %1116 = vmatmul.bf16.gmra.mxu0 %v2046_v42  ;;  %v2676_v42 = vld [vmem:[%s4316_s0 + $0xd0] sm:$0xf0] }
  0x32   :  { %1276 = vmatmul.bf16.gmra.mxu3 %v2430_v43  ;;  %1339 = vmatmul.bf16.gmra.mxu1 %v2050_v44  ;;  %v2138_v43 = vor.u32 %v2676_v42, %v2137_v41  ;;  %v2117_v44 = vld [vmem:[%s4316_s0 + $0xa8] sm:$0xf] }
  0x33   :  { %3057 = vmatpush.bf16.msrb.mxu3 %v2787_v14  ;;  %v2082_v14 = vor.u32 %v2663_v9, %v2081_v8  ;;  %v2118_v51 = vor.u32 %v2672_v45, %v2117_v44  ;;  %v2161_v8 = vld [vmem:[%s4316_s0 + $0xf8] sm:$0xf]  ;;  %v2682_v9 = vld [vmem:[%s4316_s0 + $0x100] sm:$0xf0] }
  0x37   :  { %3058 = vmatpush.bf16.msrb.mxu3 %v2786_v16  ;;  %v2086_v16 = vor.u32 %v2662_v12, %v2083_v13 }
  0x3a   :  { %2610 = vmatmul.msk.bf16.gmra.mxu2 %vm973_vm0, %v2078_v47  ;;  %v2768_v47 = vld [vmem:[%s4316_s0 + $0x3b0] sm:$0xf0] }
  0x3b   :  { %3059 = vmatpush.bf16.msrb.mxu3 %v2785_v21  ;;  %v2666_v21 = vld [vmem:[%s4316_s0 + $0x80] sm:$0xf0]  ;;  %v2502_v52 = vor.u32 %v2768_v47, %v2501_v46  ;;  %v3432_v46 = vld [vmem:[%s4316_s0 + $0x3f0] sm:$0xff] }
  0x3c   :  { %v2094_v26 = vor.u32 %v2666_v21, %v2093_v20  ;;  %v2678_v20 = vld [vmem:[%s4316_s0 + $0xe0] sm:$0xf0]  ;;  %v2525_v21 = vld [vmem:[%s4316_s0 + $0x3d8] sm:$0xf] }
  0x3f   :  { %3060 = vmatpush.bf16.msrb.mxu3 %v2784_v23  ;;  %v2762_v23 = vld [vmem:[%s4316_s0 + $0x380] sm:$0xf0] }
  0x40   :  { %v2478_v27 = vor.u32 %v2762_v23, %v2477_v22  ;;  %v2774_v23 = vld [vmem:[%s4316_s0 + $0x3e0] sm:$0xf0] }
  0x41   :  { %1121 = vmatmul.bf16.gmra.mxu0 %v2058_v54  ;;  %v2149_v54 = vld [vmem:[%s4316_s0 + $0xe0] sm:$0xf]  ;;  %v2526_v32 = vor.u32 %v2774_v23, %v2525_v21  ;;  %v2167_v21 = vld [vmem:[%s4316_s0 + $0x114] sm:$0xf0] }
  0x42   :  { %1281 = vmatmul.bf16.gmra.mxu3 %v2442_v55  ;;  %1344 = vmatmul.bf16.gmra.mxu1 %v2062_v56  ;;  %v2679_v55 = vld [vmem:[%s4316_s0 + $0xe8] sm:$0xf0] }
  0x43   :  { %3061 = vmatpush.bf16.msra.mxu3 %v3092_v1  ;;  %v2071_v1 = vld [vmem:[%s4316_s0 + $0x54] sm:$0xf0]  ;;  %v2150_v57 = vor.u32 %v2679_v55, %v2149_v54  ;;  %v2155_v54 = vld [vmem:[%s4316_s0 + $0xfc] sm:$0xf0] }
  0x47   :  { %3062 = vmatpush.bf16.msra.mxu3 %v3103_v4  ;;  %v2074_v4 = vor.u32 %v2659_v0, %v2071_v1  ;;  %v3383_v1 = vld [vmem:[%s4317_s2] ss:$0 sm:$0xff] }
  0x4a   :  { %2611 = vmatmul.msk.bf16.gmra.mxu2 %vm973_vm0, %v2090_v59  ;;  %v2675_v59 = vld [vmem:[%s4316_s0 + $0xc8] sm:$0xf0] }
  0x51   :  { %1126 = vmatmul.bf16.gmra.mxu0 %v2070_v2  ;;  %v2130_v2 = vor.u32 %v2675_v59, %v2129_v58 }
  0x52   :  { %1286 = vmatmul.bf16.gmra.mxu3 %v2454_v3  ;;  %1349 = vmatmul.bf16.gmra.mxu1 %v2074_v4  ;;  %v2514_v4 = vor.u32 %v2771_v61, %v2513_v60 }
  0x5a   :  { %2612 = vmatmul.msk.bf16.gmra.mxu2 %vm973_vm0, %v2102_v7 }
  0x61   :  { %1131 = vmatmul.bf16.gmra.mxu0 %v2082_v14  ;;  %v2162_v14 = vor.u32 %v2682_v9, %v2161_v8 }
  0x62   :  { %1291 = vmatmul.bf16.gmra.mxu3 %v2466_v15  ;;  %1354 = vmatmul.bf16.gmra.mxu1 %v2086_v16 }
  0x6a   :  { %2613 = vmatmul.msk.bf16.gmra.mxu2 %vm973_vm0, %v2114_v19  ;;  %v2141_v19 = vld [vmem:[%s4316_s0 + $0xd8] sm:$0xf] }
  0x6b   :  { %v2142_v30 = vor.u32 %v2678_v20, %v2141_v19  ;;  %v2419_v19 = vld [vmem:[%s4316_s0 + $0x30c] sm:$0xf0]  ;;  %v2683_v20 = vld [vmem:[%s4316_s0 + $0x10c] sm:$0xf] }
  0x71   :  { %1136 = vmatmul.bf16.gmra.mxu0 %v2094_v26 }
  0x72   :  { %1296 = vmatmul.bf16.gmra.mxu3 %v2478_v27  ;;  %1359 = vmatmul.bf16.gmra.mxu1 %v2098_v28 }
  0x7a   :  { %2614 = vmatmul.msk.bf16.gmra.mxu2 %vm973_vm0, %v2126_v31 }
  0x81   :  { %1141 = vmatmul.bf16.gmra.mxu0 %v2106_v38  ;;  %v2685_v38 = vld [vmem:[%s4316_s0 + $0x118] sm:$0xf0] }
  0x82   :  { %1301 = vmatmul.bf16.gmra.mxu3 %v2490_v39  ;;  %1364 = vmatmul.bf16.gmra.mxu1 %v2110_v40 }
  0x8a   :  { %2615 = vmatmul.msk.bf16.gmra.mxu2 %vm973_vm0, %v2138_v43  ;;  %v2174_v43 = vor.u32 %v2685_v38, %v2173_v37 }
  0x8d   :  { %v1558_v50 = vpop.f32.mrf.mxu2 }
  0x91   :  { %1146 = vmatmul.bf16.gmra.mxu0 %v2118_v51  ;;  %v647_v51 = vunpack.c.l.b16 %v3432_v46 }
  0x92   :  { %1306 = vmatmul.bf16.gmra.mxu3 %v2502_v52  ;;  %1369 = vmatmul.bf16.gmra.mxu1 %v2122_v53  ;;  %v2680_v53 = vld [vmem:[%s4316_s0 + $0xf4] sm:$0xf] }
  0x93   :  { %v776_v61 = vpack.c.b16 %v647_v51, %v647_v51  ;;  %v2158_v62 = vor.u32 %v2680_v53, %v2155_v54  ;;  %v2431_v51 = vld [vmem:[%s4316_s0 + $0x324] sm:$0xf0]  ;;  %v2179_v53 = vld [vmem:[%s4316_s0 + $0x12c] sm:$0xf0] }
  0x95   :  { %v1560_v56 = vpop.f32.mrf.mxu2 }
  0x9a   :  { %2616 = vmatmul.msk.bf16.gmra.mxu2 %vm973_vm0, %v2150_v57 }
  0x9d   :  { %v1563_v0 = vpop.f32.mrf.mxu2 }
  0x9e   :  { %v1112_v3 = vpop.f32.mrf.mxu0 }
  0x9f   :  { %v1335_v6 = vpop.f32.mrf.mxu1  ;;  %v1113_v7 = vadd.f32 %v3383_v1, %v1112_v3  ;;  %v2185_v3 = vld [vmem:[%s4316_s0 + $0x128] sm:$0xf] }
  0xa1   :  { %1151 = vmatmul.bf16.gmra.mxu0 %v2130_v2  ;;  %v1336_v10 = vadd.f32 %v1335_v6, %v1113_v7 }
  0xa2   :  { %1311 = vmatmul.bf16.gmra.mxu3 %v2514_v4  ;;  %1374 = vmatmul.bf16.gmra.mxu1 %v2134_v5  ;;  %v2688_v4 = vld [vmem:[%s4316_s0 + $0x130] sm:$0xf0] }
  0xa3   :  { %v1559_v17 = vadd.f32 %v1558_v50, %v1336_v10  ;;  %v2681_v50 = vld [vmem:[%s4316_s0 + $0xf8] sm:$0xf0]  ;;  %v2186_v9 = vor.u32 %v2688_v4, %v2185_v3  ;;  %v2209_v3 = vld [vmem:[%s4316_s0 + $0x158] sm:$0xf]  ;;  %v2694_v4 = vld [vmem:[%s4316_s0 + $0x160] sm:$0xf0] }
  0xa4   :  { %v2154_v59 = vor.u32 %v2681_v50, %v2153_v49  ;;  %v2749_v49 = vld [vmem:[%s4316_s0 + $0x31c] sm:$0xf] }
  0xa5   :  { %v3392_v11 = vpop.f32.mrf.mxu3  ;;  %v1565_v12 = vpop.f32.mrf.mxu2  ;;  %v1772_v26 = vmax.f32 %v1559_v17, 0.0  ;;  %v2746_v17 = vld [vmem:[%s4316_s0 + $0x304] sm:$0xf] }
  0xa6   :  { %v1114_v13 = vpop.f32.mrf.mxu0 }
  0xa7   :  { %v1115_v15 = vadd.f32 %v3383_v1, %v1114_v13  ;;  %v1337_v16 = vpop.f32.mrf.mxu1 }
  0xa9   :  { %v1338_v18 = vadd.f32 %v1337_v16, %v1115_v15  ;;  %v2165_v15 = vld [vmem:[%s4316_s0 + $0x108] sm:$0xf]  ;;  %v2684_v16 = vld [vmem:[%s4316_s0 + $0x110] sm:$0xf0] }
  0xaa   :  { %2617 = vmatmul.msk.bf16.gmra.mxu2 %vm973_vm0, %v2162_v14 }
  0xab   :  { %v1561_v22 = vadd.f32 %v1560_v56, %v1338_v18 }
  0xad   :  { %v1773_v27 = vmax.f32 %v1561_v22, 0.0  ;;  %v3414_v28 = vpop.f32.mrf.mxu3  ;;  %v1568_v29 = vpop.f32.mrf.mxu2 }
  0xae   :  { %v1117_v31 = vpop.f32.mrf.mxu0 }
  0xaf   :  { %v2797_v34 = vpack.c.bf16 %v1773_v27, %v1772_v26  ;;  %v1340_v35 = vpop.f32.mrf.mxu1  ;;  %v1118_v36 = vadd.f32 %v3383_v1, %v1117_v31  ;;  %v2166_v26 = vor.u32 %v2684_v16, %v2165_v15  ;;  %v2189_v16 = vld [vmem:[%s4316_s0 + $0x138] sm:$0xf] }
  0xb1   :  { %2798 = vst [vmem:[%s4318_s3] sm:$0xff] %v2797_v34   ;;  %1156 = vmatmul.bf16.gmra.mxu0 %v2142_v30  ;;  %v1341_v39 = vadd.f32 %v1340_v35, %v1118_v36  ;;  %v2170_v30 = vor.u32 %v2683_v20, %v2167_v21  ;;  %v2197_v34 = vld [vmem:[%s4316_s0 + $0x140] sm:$0xf]  ;;  %v2691_v35 = vld [vmem:[%s4316_s0 + $0x148] sm:$0xf0]  ;;  %v2689_v21 = vld [vmem:[%s4316_s0 + $0x13c] sm:$0xf] }
  0xb2   :  { %1316 = vmatmul.bf16.gmra.mxu3 %v2526_v32  ;;  %1379 = vmatmul.bf16.gmra.mxu1 %v2146_v33  ;;  %v2443_v20 = vld [vmem:[%s4316_s0 + $0x33c] sm:$0xf0] }
  0xb3   :  { %v1564_v47 = vadd.f32 %v1563_v0, %v1341_v39 }
  0xb5   :  { %v3426_v40 = vpop.f32.mrf.mxu3  ;;  %v1570_v41 = vpop.f32.mrf.mxu2  ;;  %v1774_v55 = vmax.f32 %v1564_v47, 0.0  ;;  %v2177_v47 = vld [vmem:[%s4316_s0 + $0x120] sm:$0xf] }
  0xb6   :  { %v1119_v42 = vpop.f32.mrf.mxu0 }
  0xb7   :  { %v1120_v44 = vadd.f32 %v3383_v1, %v1119_v42  ;;  %v1342_v45 = vpop.f32.mrf.mxu1 }
  0xb9   :  { %v1343_v48 = vadd.f32 %v1342_v45, %v1120_v44 }
  0xba   :  { %2618 = vmatmul.msk.bf16.gmra.mxu2 %vm973_vm0, %v2174_v43 }
  0xbb   :  { %v1566_v52 = vadd.f32 %v1565_v12, %v1343_v48  ;;  %v2687_v48 = vld [vmem:[%s4316_s0 + $0x128] sm:$0xf0] }
  0xbd   :  { %v1775_v56 = vmax.f32 %v1566_v52, 0.0  ;;  %v3448_v57 = vpop.f32.mrf.mxu3  ;;  %v1573_v58 = vpop.f32.mrf.mxu2  ;;  %v2686_v52 = vld [vmem:[%s4316_s0 + $0x124] sm:$0xf] }
  0xbe   :  { %v1122_v60 = vpop.f32.mrf.mxu0 }
  0xbf   :  { %v2802_v63 = vpack.c.bf16 %v1775_v56, %v1774_v55  ;;  %v1345_v0 = vpop.f32.mrf.mxu1  ;;  %v1123_v2 = vadd.f32 %v3383_v1, %v1122_v60 }
  0xc1   :  { %3004 = vst [vmem:[%s4318_s3 + $0x8] sm:$0xff] %v2802_v63   ;;  %1161 = vmatmul.bf16.gmra.mxu0 %v2154_v59  ;;  %v1346_v5 = vadd.f32 %v1345_v0, %v1123_v2  ;;  %v2178_v59 = vor.u32 %v2687_v48, %v2177_v47 }
  0xc2   :  { %1321 = vmatmul.bf16.gmra.mxu3 %v776_v61  ;;  %1384 = vmatmul.bf16.gmra.mxu1 %v2158_v62  ;;  %v2434_v61 = vor.u32 %v2749_v49, %v2431_v51  ;;  %v2182_v62 = vor.u32 %v2686_v52, %v2179_v53  ;;  %v2693_v51 = vld [vmem:[%s4316_s0 + $0x158] sm:$0xf0]  ;;  %v2755_v52 = vld [vmem:[%s4316_s0 + $0x34c] sm:$0xf] }
  0xc3   :  { %v1569_v13 = vadd.f32 %v1568_v29, %v1346_v5  ;;  %v2422_v29 = vor.u32 %v2746_v17, %v2419_v19  ;;  %v2690_v17 = vld [vmem:[%s4316_s0 + $0x140] sm:$0xf0] }
  0xc5   :  { %v3460_v6 = vpop.f32.mrf.mxu3  ;;  %v1575_v7 = vpop.f32.mrf.mxu2  ;;  %v1776_v22 = vmax.f32 %v1569_v13, 0.0 }
  0xc6   :  { %v1124_v8 = vpop.f32.mrf.mxu0 }
  0xc7   :  { %v1125_v10 = vadd.f32 %v3383_v1, %v1124_v8  ;;  %v1347_v12 = vpop.f32.mrf.mxu1 }
  0xc9   :  { %v1348_v14 = vadd.f32 %v1347_v12, %v1125_v10  ;;  %v2210_v10 = vor.u32 %v2694_v4, %v2209_v3 }
  0xca   :  { %2619 = vmatmul.msk.bf16.gmra.mxu2 %vm973_vm0, %v2186_v9 }
  0xcb   :  { %v1571_v18 = vadd.f32 %v1570_v41, %v1348_v14  ;;  %v2198_v41 = vor.u32 %v2691_v35, %v2197_v34 }
  0xcd   :  { %v1777_v23 = vmax.f32 %v1571_v18, 0.0  ;;  %v3482_v24 = vpop.f32.mrf.mxu3  ;;  %v1578_v25 = vpop.f32.mrf.mxu2  ;;  %v2752_v18 = vld [vmem:[%s4316_s0 + $0x334] sm:$0xf] }
  0xce   :  { %v1127_v27 = vpop.f32.mrf.mxu0 }
  0xcf   :  { %v2807_v31 = vpack.c.bf16 %v1777_v23, %v1776_v22  ;;  %v1350_v32 = vpop.f32.mrf.mxu1  ;;  %v1128_v33 = vadd.f32 %v3383_v1, %v1127_v27  ;;  %v2191_v22 = vld [vmem:[%s4316_s0 + $0x144] sm:$0xf0] }
  0xd1   :  { %3005 = vst [vmem:[%s4318_s3 + $0x10] sm:$0xff] %v2807_v31   ;;  %1166 = vmatmul.bf16.gmra.mxu0 %v2166_v26  ;;  %v1351_v36 = vadd.f32 %v1350_v32, %v1128_v33  ;;  %v2446_v31 = vor.u32 %v2752_v18, %v2443_v20  ;;  %v2194_v32 = vor.u32 %v2689_v21, %v2191_v22  ;;  %v2213_v21 = vld [vmem:[%s4316_s0 + $0x168] sm:$0xf]  ;;  %v2696_v22 = vld [vmem:[%s4316_s0 + $0x170] sm:$0xf0] }
  0xd2   :  { %1494 = vmatmul.bf16.vlgmr.msrb.gmra.mxu3 %v2422_v29  ;;  %1389 = vmatmul.bf16.gmra.mxu1 %v2170_v30  ;;  %v2190_v29 = vor.u32 %v2690_v17, %v2189_v16 }
  0xd3   :  { %v1574_v44 = vadd.f32 %v1573_v58, %v1351_v36  ;;  %v2221_v36 = vld [vmem:[%s4316_s0 + $0x170] sm:$0xf] }
  0xd5   :  { %v3494_v37 = vpop.f32.mrf.mxu3  ;;  %v1580_v38 = vpop.f32.mrf.mxu2  ;;  %v1778_v54 = vmax.f32 %v1574_v44, 0.0 }
  0xd6   :  { %v1129_v39 = vpop.f32.mrf.mxu0 }
  0xd7   :  { %v1130_v42 = vadd.f32 %v3383_v1, %v1129_v39  ;;  %v1352_v43 = vpop.f32.mrf.mxu1 }
  0xd9   :  { %v1353_v45 = vadd.f32 %v1352_v43, %v1130_v42 }
  0xda   :  { %2620 = vmatmul.msk.bf16.gmra.mxu2 %vm973_vm0, %v2198_v41 }
  0xdb   :  { %v1576_v50 = vadd.f32 %v1575_v7, %v1353_v45 }
  0xdd   :  { %v1779_v55 = vmax.f32 %v1576_v50, 0.0  ;;  %v3516_v56 = vpop.f32.mrf.mxu3  ;;  %v1583_v58 = vpop.f32.mrf.mxu2  ;;  %v2201_v50 = vld [vmem:[%s4316_s0 + $0x150] sm:$0xf] }
  0xde   :  { %v1132_v60 = vpop.f32.mrf.mxu0 }
  0xdf   :  { %v2812_v63 = vpack.c.bf16 %v1779_v55, %v1778_v54  ;;  %v1355_v0 = vpop.f32.mrf.mxu1  ;;  %v1133_v2 = vadd.f32 %v3383_v1, %v1132_v60  ;;  %v2455_v54 = vld [vmem:[%s4316_s0 + $0x354] sm:$0xf0]  ;;  %v2692_v55 = vld [vmem:[%s4316_s0 + $0x154] sm:$0xf] }
  0xe1   :  { %3006 = vst [vmem:[%s4318_s3 + $0x18] sm:$0xff] %v2812_v63   ;;  %1171 = vmatmul.bf16.gmra.mxu0 %v2178_v59  ;;  %v1356_v5 = vadd.f32 %v1355_v0, %v1133_v2  ;;  %v2202_v63 = vor.u32 %v2693_v51, %v2201_v50  ;;  %v2458_v2 = vor.u32 %v2755_v52, %v2455_v54 }
  0xe2   :  { %1499 = vmatmul.bf16.gmra.mxu3 %v2434_v61  ;;  %1394 = vmatmul.bf16.gmra.mxu1 %v2182_v62 }
  0xe3   :  { %v1579_v14 = vadd.f32 %v1578_v25, %v1356_v5 }
  0xe5   :  { %v3528_v7 = vpop.f32.mrf.mxu3  ;;  %v1585_v8 = vpop.f32.mrf.mxu2  ;;  %v1780_v23 = vmax.f32 %v1579_v14, 0.0 }
  0xe6   :  { %v1134_v9 = vpop.f32.mrf.mxu0 }
  0xe7   :  { %v1135_v12 = vadd.f32 %v3383_v1, %v1134_v9  ;;  %v1357_v13 = vpop.f32.mrf.mxu1  ;;  %v2233_v9 = vld [vmem:[%s4316_s0 + $0x188] sm:$0xf] }
  0xe9   :  { %v1358_v15 = vadd.f32 %v1357_v13, %v1135_v12 }
  0xea   :  { %2621 = vmatmul.msk.bf16.gmra.mxu2 %vm973_vm0, %v2210_v10  ;;  %v2700_v10 = vld [vmem:[%s4316_s0 + $0x190] sm:$0xf0] }
  0xeb   :  { %v1581_v19 = vadd.f32 %v1580_v38, %v1358_v15  ;;  %v2697_v38 = vld [vmem:[%s4316_s0 + $0x178] sm:$0xf0]  ;;  %v2234_v16 = vor.u32 %v2700_v10, %v2233_v9 }
  0xec   :  { %v2222_v44 = vor.u32 %v2697_v38, %v2221_v36 }
  0xed   :  { %v1781_v25 = vmax.f32 %v1581_v19, 0.0  ;;  %v3550_v26 = vpop.f32.mrf.mxu3  ;;  %v1588_v27 = vpop.f32.mrf.mxu2 }
  0xee   :  { %v1137_v30 = vpop.f32.mrf.mxu0 }
  0xef   :  { %v2817_v33 = vpack.c.bf16 %v1781_v25, %v1780_v23  ;;  %v1360_v34 = vpop.f32.mrf.mxu1  ;;  %v1138_v35 = vadd.f32 %v3383_v1, %v1137_v30  ;;  %v2758_v23 = vld [vmem:[%s4316_s0 + $0x364] sm:$0xf]  ;;  %v2215_v30 = vld [vmem:[%s4316_s0 + $0x174] sm:$0xf0] }
  0xf1   :  { %3007 = vst [vmem:[%s4318_s3 + $0x20] sm:$0xff] %v2817_v33   ;;  %1176 = vmatmul.bf16.gmra.mxu0 %v2190_v29  ;;  %v1361_v39 = vadd.f32 %v1360_v34, %v1138_v35  ;;  %v2695_v29 = vld [vmem:[%s4316_s0 + $0x16c] sm:$0xf]  ;;  %v2214_v35 = vor.u32 %v2696_v22, %v2213_v21 }
  0xf2   :  { %1504 = vmatmul.bf16.gmra.mxu3 %v2446_v31  ;;  %1399 = vmatmul.bf16.gmra.mxu1 %v2194_v32 }
  0xf3   :  { %v1584_v48 = vadd.f32 %v1583_v58, %v1361_v39  ;;  %v2203_v58 = vld [vmem:[%s4316_s0 + $0x15c] sm:$0xf0]  ;;  %v2218_v39 = vor.u32 %v2695_v29, %v2215_v30 }
  0xf4   :  { %v2206_v3 = vor.u32 %v2692_v55, %v2203_v58 }
  0xf5   :  { %v3562_v41 = vpop.f32.mrf.mxu3  ;;  %v1590_v42 = vpop.f32.mrf.mxu2  ;;  %v1782_v59 = vmax.f32 %v1584_v48, 0.0 }
  0xf6   :  { %v1139_v43 = vpop.f32.mrf.mxu0 }
  0xf7   :  { %v1140_v45 = vadd.f32 %v3383_v1, %v1139_v43  ;;  %v1362_v47 = vpop.f32.mrf.mxu1 }
  0xf9   :  { %v1363_v49 = vadd.f32 %v1362_v47, %v1140_v45  ;;  %v2245_v45 = vld [vmem:[%s4316_s0 + $0x1a0] sm:$0xf]  ;;  %v2703_v47 = vld [vmem:[%s4316_s0 + $0x1a8] sm:$0xf0] }
  0xfa   :  { %2622 = vmatmul.msk.bf16.gmra.mxu2 %vm973_vm0, %v2222_v44  ;;  %v2246_v52 = vor.u32 %v2703_v47, %v2245_v45 }
  0xfb   :  { %v1586_v53 = vadd.f32 %v1585_v8, %v1363_v49 }
  0xfd   :  { %v1783_v60 = vmax.f32 %v1586_v53, 0.0  ;;  %v3584_v61 = vpop.f32.mrf.mxu3  ;;  %v1593_v62 = vpop.f32.mrf.mxu2 }
  0xfe   :  { %v1142_v0 = vpop.f32.mrf.mxu0 }
  0xff   :  { %v2822_v4 = vpack.c.bf16 %v1783_v60, %v1782_v59  ;;  %v1365_v5 = vpop.f32.mrf.mxu1  ;;  %v1143_v8 = vadd.f32 %v3383_v1, %v1142_v0  ;;  %v2225_v59 = vld [vmem:[%s4316_s0 + $0x180] sm:$0xf]  ;;  %v2699_v60 = vld [vmem:[%s4316_s0 + $0x188] sm:$0xf0] }
 0x100   :  { %v2226_v10 = vor.u32 %v2699_v60, %v2225_v59  ;;  %v2269_v59 = vld [vmem:[%s4316_s0 + $0x1d0] sm:$0xf]  ;;  %v2709_v60 = vld [vmem:[%s4316_s0 + $0x1d8] sm:$0xf0] }
 0x101   :  { %3008 = vst [vmem:[%s4318_s3 + $0x28] sm:$0xff] %v2822_v4   ;;  %1181 = vmatmul.bf16.gmra.mxu0 %v2202_v63  ;;  %v1366_v12 = vadd.f32 %v1365_v5, %v1143_v8  ;;  %v2761_v63 = vld [vmem:[%s4316_s0 + $0x37c] sm:$0xf] }
 0x102   :  { %1509 = vmatmul.bf16.gmra.mxu3 %v2458_v2  ;;  %1404 = vmatmul.bf16.gmra.mxu1 %v2206_v3  ;;  %v2698_v2 = vld [vmem:[%s4316_s0 + $0x184] sm:$0xf]  ;;  %v2227_v3 = vld [vmem:[%s4316_s0 + $0x18c] sm:$0xf0] }
 0x103   :  { %v1589_v19 = vadd.f32 %v1588_v27, %v1366_v12  ;;  %v2467_v27 = vld [vmem:[%s4316_s0 + $0x36c] sm:$0xf0] }
 0x104   :  { %v2470_v38 = vor.u32 %v2758_v23, %v2467_v27 }
 0x105   :  { %v3596_v13 = vpop.f32.mrf.mxu3  ;;  %v1595_v14 = vpop.f32.mrf.mxu2  ;;  %v1784_v31 = vmax.f32 %v1589_v19, 0.0  ;;  %v2257_v19 = vld [vmem:[%s4316_s0 + $0x1b8] sm:$0xf] }
 0x106   :  { %v1144_v15 = vpop.f32.mrf.mxu0 }
 0x107   :  { %v1145_v17 = vadd.f32 %v3383_v1, %v1144_v15  ;;  %v1367_v18 = vpop.f32.mrf.mxu1  ;;  %v2230_v15 = vor.u32 %v2698_v2, %v2227_v3  ;;  %v2270_v3 = vor.u32 %v2709_v60, %v2269_v59  ;;  %v2707_v60 = vld [vmem:[%s4316_s0 + $0x1cc] sm:$0xf] }
 0x109   :  { %v1368_v20 = vadd.f32 %v1367_v18, %v1145_v17 }
 0x10a   :  { %2623 = vmatmul.msk.bf16.gmra.mxu2 %vm973_vm0, %v2234_v16 }
 0x10b   :  { %v1591_v25 = vadd.f32 %v1590_v42, %v1368_v20  ;;  %v2706_v20 = vld [vmem:[%s4316_s0 + $0x1c0] sm:$0xf0] }
 0x10c   :  { %v2258_v27 = vor.u32 %v2706_v20, %v2257_v19  ;;  %v2251_v19 = vld [vmem:[%s4316_s0 + $0x1bc] sm:$0xf0] }
 0x10d   :  { %v1785_v32 = vmax.f32 %v1591_v25, 0.0  ;;  %v3618_v33 = vpop.f32.mrf.mxu3  ;;  %v1598_v34 = vpop.f32.mrf.mxu2 }
 0x10e   :  { %v1147_v36 = vpop.f32.mrf.mxu0 }
 0x10f   :  { %v2827_v42 = vpack.c.bf16 %v1785_v32, %v1784_v31  ;;  %v1370_v43 = vpop.f32.mrf.mxu1  ;;  %v1148_v44 = vadd.f32 %v3383_v1, %v1147_v36  ;;  %v2702_v36 = vld [vmem:[%s4316_s0 + $0x1a0] sm:$0xf0] }
 0x111   :  { %3009 = vst [vmem:[%s4318_s3 + $0x30] sm:$0xff] %v2827_v42   ;;  %1186 = vmatmul.bf16.gmra.mxu0 %v2214_v35  ;;  %v1371_v48 = vadd.f32 %v1370_v43, %v1148_v44  ;;  %v2237_v35 = vld [vmem:[%s4316_s0 + $0x198] sm:$0xf]  ;;  %v2701_v42 = vld [vmem:[%s4316_s0 + $0x19c] sm:$0xf] }
 0x112   :  { %1514 = vmatmul.bf16.gmra.mxu3 %v2470_v38  ;;  %1409 = vmatmul.bf16.gmra.mxu1 %v2218_v39  ;;  %v2764_v38 = vld [vmem:[%s4316_s0 + $0x394] sm:$0xf]  ;;  %v2239_v43 = vld [vmem:[%s4316_s0 + $0x1a4] sm:$0xf0] }
 0x113   :  { %v1594_v55 = vadd.f32 %v1593_v62, %v1371_v48  ;;  %v2479_v62 = vld [vmem:[%s4316_s0 + $0x384] sm:$0xf0] }
 0x115   :  { %v3630_v49 = vpop.f32.mrf.mxu3  ;;  %v1600_v50 = vpop.f32.mrf.mxu2  ;;  %v1786_v4 = vmax.f32 %v1594_v55, 0.0 }
 0x116   :  { %v1149_v51 = vpop.f32.mrf.mxu0 }
 0x117   :  { %v1150_v53 = vadd.f32 %v3383_v1, %v1149_v51  ;;  %v1372_v54 = vpop.f32.mrf.mxu1  ;;  %v2238_v51 = vor.u32 %v2702_v36, %v2237_v35 }
 0x119   :  { %v1373_v58 = vadd.f32 %v1372_v54, %v1150_v53  ;;  %v2242_v53 = vor.u32 %v2701_v42, %v2239_v43 }
 0x11a   :  { %2624 = vmatmul.msk.bf16.gmra.mxu2 %vm973_vm0, %v2246_v52 }
 0x11b   :  { %v1596_v0 = vadd.f32 %v1595_v14, %v1373_v58  ;;  %v2482_v14 = vor.u32 %v2761_v63, %v2479_v62 }
 0x11d   :  { %v1787_v5 = vmax.f32 %v1596_v0, 0.0  ;;  %v3652_v8 = vpop.f32.mrf.mxu3  ;;  %v1603_v9 = vpop.f32.mrf.mxu2 }
 0x11e   :  { %v1152_v12 = vpop.f32.mrf.mxu0 }
 0x11f   :  { %v2832_v16 = vpack.c.bf16 %v1787_v5, %v1786_v4  ;;  %v1375_v17 = vpop.f32.mrf.mxu1  ;;  %v1153_v18 = vadd.f32 %v3383_v1, %v1152_v12 }
 0x121   :  { %3010 = vst [vmem:[%s4318_s3 + $0x38] sm:$0xff] %v2832_v16   ;;  %1191 = vmatmul.bf16.gmra.mxu0 %v2226_v10  ;;  %v1376_v21 = vadd.f32 %v1375_v17, %v1153_v18  ;;  %v2767_v16 = vld [vmem:[%s4316_s0 + $0x3ac] sm:$0xf]  ;;  %v2704_v18 = vld [vmem:[%s4316_s0 + $0x1b4] sm:$0xf] }
 0x122   :  { %1519 = vmatmul.bf16.gmra.mxu3 %v2482_v14  ;;  %1414 = vmatmul.bf16.gmra.mxu1 %v2230_v15  ;;  %v2249_v14 = vld [vmem:[%s4316_s0 + $0x1b0] sm:$0xf]  ;;  %v2705_v15 = vld [vmem:[%s4316_s0 + $0x1b8] sm:$0xf0] }
 0x123   :  { %v1599_v31 = vadd.f32 %v1598_v34, %v1376_v21  ;;  %v2491_v34 = vld [vmem:[%s4316_s0 + $0x39c] sm:$0xf0] }
 0x125   :  { %v3664_v22 = vpop.f32.mrf.mxu3  ;;  %v1605_v23 = vpop.f32.mrf.mxu2  ;;  %v1788_v44 = vmax.f32 %v1599_v31, 0.0  ;;  %v2254_v31 = vor.u32 %v2704_v18, %v2251_v19  ;;  %v2715_v18 = vld [vmem:[%s4316_s0 + $0x208] sm:$0xf0]  ;;  %v1273_v19 = vadd.f32 %v3383_v1, %v3392_v11 }
 0x126   :  { %v1154_v25 = vpop.f32.mrf.mxu0  ;;  %v2711_v11 = vld [vmem:[%s4316_s0 + $0x1e8] sm:$0xf0] }
 0x127   :  { %v1155_v29 = vadd.f32 %v3383_v1, %v1154_v25  ;;  %v1377_v30 = vpop.f32.mrf.mxu1 }
 0x129   :  { %v1378_v32 = vadd.f32 %v1377_v30, %v1155_v29  ;;  %v2250_v29 = vor.u32 %v2705_v15, %v2249_v14 }
 0x12a   :  { %2625 = vmatmul.msk.bf16.gmra.mxu2 %vm973_vm0, %v2258_v27 }
 0x12b   :  { %v1601_v39 = vadd.f32 %v1600_v50, %v1378_v32  ;;  %v2494_v50 = vor.u32 %v2764_v38, %v2491_v34  ;;  %v2281_v38 = vld [vmem:[%s4316_s0 + $0x1e8] sm:$0xf] }
 0x12d   :  { %v1789_v45 = vmax.f32 %v1601_v39, 0.0  ;;  %v3686_v47 = vpop.f32.mrf.mxu3  ;;  %v1608_v48 = vpop.f32.mrf.mxu2  ;;  %v2712_v39 = vld [vmem:[%s4316_s0 + $0x1f0] sm:$0xf0] }
 0x12e   :  { %v1157_v52 = vpop.f32.mrf.mxu0 }
 0x12f   :  { %v2837_v54 = vpack.c.bf16 %v1789_v45, %v1788_v44  ;;  %v1380_v55 = vpop.f32.mrf.mxu1  ;;  %v1158_v58 = vadd.f32 %v3383_v1, %v1157_v52  ;;  %v2282_v45 = vor.u32 %v2712_v39, %v2281_v38  ;;  %v2273_v39 = vld [vmem:[%s4316_s0 + $0x1e0] sm:$0xf] }
 0x131   :  { %3011 = vst [vmem:[%s4318_s3 + $0x40] sm:$0xff] %v2837_v54   ;;  %1196 = vmatmul.bf16.gmra.mxu0 %v2238_v51  ;;  %v1381_v63 = vadd.f32 %v1380_v55, %v1158_v58  ;;  %v2261_v54 = vld [vmem:[%s4316_s0 + $0x1c8] sm:$0xf]  ;;  %v2708_v55 = vld [vmem:[%s4316_s0 + $0x1d0] sm:$0xf0] }
 0x132   :  { %1524 = vmatmul.bf16.gmra.mxu3 %v2494_v50  ;;  %1419 = vmatmul.bf16.gmra.mxu1 %v2242_v53  ;;  %v2770_v58 = vld [vmem:[%s4316_s0 + $0x3c4] sm:$0xf] }
 0x133   :  { %v1604_v10 = vadd.f32 %v1603_v9, %v1381_v63  ;;  %v2503_v9 = vld [vmem:[%s4316_s0 + $0x3b4] sm:$0xf0] }
 0x134   :  { %v2263_v63 = vld [vmem:[%s4316_s0 + $0x1d4] sm:$0xf0] }
 0x135   :  { %v3698_v0 = vpop.f32.mrf.mxu3  ;;  %v1610_v62 = vpop.f32.mrf.mxu2  ;;  %v1790_v20 = vmax.f32 %v1604_v10, 0.0  ;;  %v2262_v10 = vor.u32 %v2708_v55, %v2261_v54 }
 0x136   :  { %v1159_v2 = vpop.f32.mrf.mxu0 }
 0x137   :  { %v1160_v4 = vadd.f32 %v3383_v1, %v1159_v2  ;;  %v1382_v5 = vpop.f32.mrf.mxu1 }
 0x139   :  { %v1383_v12 = vadd.f32 %v1382_v5, %v1160_v4 }
 0x13a   :  { %2626 = vmatmul.msk.bf16.gmra.mxu2 %vm973_vm0, %v2270_v3 }
 0x13b   :  { %v1606_v17 = vadd.f32 %v1605_v23, %v1383_v12  ;;  %v2506_v23 = vor.u32 %v2767_v16, %v2503_v9  ;;  %v2293_v9 = vld [vmem:[%s4316_s0 + $0x200] sm:$0xf] }
 0x13d   :  { %v1791_v21 = vmax.f32 %v1606_v17, 0.0  ;;  %v3720_v25 = vpop.f32.mrf.mxu3  ;;  %v1613_v27 = vpop.f32.mrf.mxu2 }
 0x13e   :  { %v1162_v30 = vpop.f32.mrf.mxu0 }
 0x13f   :  { %v2842_v32 = vpack.c.bf16 %v1791_v21, %v1790_v20  ;;  %v1385_v35 = vpop.f32.mrf.mxu1  ;;  %v1163_v36 = vadd.f32 %v3383_v1, %v1162_v30 }
 0x141   :  { %3012 = vst [vmem:[%s4318_s3 + $0x48] sm:$0xff] %v2842_v32   ;;  %1201 = vmatmul.bf16.gmra.mxu0 %v2250_v29  ;;  %v1386_v34 = vadd.f32 %v1385_v35, %v1163_v36 }
 0x142   :  { %1529 = vmatmul.bf16.gmra.mxu3 %v2506_v23  ;;  %1424 = vmatmul.bf16.gmra.mxu1 %v2254_v31  ;;  %v2294_v31 = vor.u32 %v2715_v18, %v2293_v9 }
 0x143   :  { %v1609_v50 = vadd.f32 %v1608_v48, %v1386_v34  ;;  %v2515_v48 = vld [vmem:[%s4316_s0 + $0x3cc] sm:$0xf0]  ;;  %v2773_v34 = vld [vmem:[%s4316_s0 + $0x3dc] sm:$0xf] }
 0x144   :  { %v2518_v14 = vor.u32 %v2770_v58, %v2515_v48 }
 0x145   :  { %v3732_v42 = vpop.f32.mrf.mxu3  ;;  %v1615_v43 = vpop.f32.mrf.mxu2  ;;  %v1792_v2 = vmax.f32 %v1609_v50, 0.0 }
 0x146   :  { %v1164_v44 = vpop.f32.mrf.mxu0 }
 0x147   :  { %v1165_v51 = vadd.f32 %v3383_v1, %v1164_v44  ;;  %v1387_v52 = vpop.f32.mrf.mxu1 }
 0x149   :  { %v1388_v53 = vadd.f32 %v1387_v52, %v1165_v51  ;;  %v2275_v51 = vld [vmem:[%s4316_s0 + $0x1ec] sm:$0xf0]  ;;  %v1275_v52 = vadd.f32 %v3383_v1, %v3414_v28  ;;  %v2305_v28 = vld [vmem:[%s4316_s0 + $0x218] sm:$0xf] }
 0x14a   :  { %2627 = vmatmul.msk.bf16.gmra.mxu2 %vm973_vm0, %v2282_v45  ;;  %v2710_v45 = vld [vmem:[%s4316_s0 + $0x1e4] sm:$0xf] }
 0x14b   :  { %v1611_v59 = vadd.f32 %v1610_v62, %v1388_v53  ;;  %v2266_v62 = vor.u32 %v2707_v60, %v2263_v63  ;;  %v2278_v60 = vor.u32 %v2710_v45, %v2275_v51 }
 0x14d   :  { %v1793_v3 = vmax.f32 %v1611_v59, 0.0  ;;  %v1324_v4 = vpop.f32.mrf.mxu3  ;;  %v1618_v5 = vpop.f32.mrf.mxu2 }
 0x14e   :  { %v1167_v12 = vpop.f32.mrf.mxu0  ;;  %v2718_v4 = vld [vmem:[%s4316_s0 + $0x220] sm:$0xf0] }
 0x14f   :  { %v2847_v15 = vpack.c.bf16 %v1793_v3, %v1792_v2  ;;  %v1390_v16 = vpop.f32.mrf.mxu1  ;;  %v1168_v17 = vadd.f32 %v3383_v1, %v1167_v12 }
 0x151   :  { %3013 = vst [vmem:[%s4318_s3 + $0x50] sm:$0xff] %v2847_v15   ;;  %1206 = vmatmul.bf16.gmra.mxu0 %v2262_v10  ;;  %v1391_v20 = vadd.f32 %v1390_v16, %v1168_v17  ;;  %v1278_v10 = vadd.f32 %v3383_v1, %v3426_v40  ;;  %v2306_v17 = vor.u32 %v2718_v4, %v2305_v28  ;;  %v2285_v40 = vld [vmem:[%s4316_s0 + $0x1f8] sm:$0xf] }
 0x152   :  { %1534 = vmatmul.bf16.gmra.mxu3 %v2518_v14  ;;  %1429 = vmatmul.bf16.gmra.mxu1 %v2266_v62 }
 0x153   :  { %v1614_v36 = vadd.f32 %v1613_v27, %v1391_v20  ;;  %v2527_v27 = vld [vmem:[%s4316_s0 + $0x3e4] sm:$0xf0] }
 0x154   :  { %v2530_v48 = vor.u32 %v2773_v34, %v2527_v27 }
 0x155   :  { %v1495_v21 = vpop.f32.mrf.mxu3  ;;  %v1620_v29 = vpop.f32.mrf.mxu2  ;;  %v1794_v50 = vmax.f32 %v1614_v36, 0.0 }
 0x156   :  { %v3766_v30 = vadd.f32 %v1495_v21, %v1273_v19  ;;  %v1169_v23 = vpop.f32.mrf.mxu0  ;;  %v648_v21 = vunpack.c.h.b16 %v3432_v46  ;;  %v1280_v46 = vadd.f32 %v3383_v1, %v3448_v57  ;;  %v2317_v57 = vld [vmem:[%s4316_s0 + $0x230] sm:$0xf] }
 0x157   :  { %v1170_v32 = vadd.f32 %v3383_v1, %v1169_v23  ;;  %v1392_v35 = vpop.f32.mrf.mxu1  ;;  %v2714_v23 = vld [vmem:[%s4316_s0 + $0x200] sm:$0xf0] }
 0x159   :  { %v1393_v38 = vadd.f32 %v1392_v35, %v1170_v32  ;;  %v2713_v32 = vld [vmem:[%s4316_s0 + $0x1fc] sm:$0xf] }
 0x15a   :  { %2628 = vmatmul.msk.bf16.gmra.mxu2 %vm973_vm0, %v2294_v31 }
 0x15b   :  { %v1616_v44 = vadd.f32 %v1615_v43, %v1393_v38  ;;  %v2274_v43 = vor.u32 %v2711_v11, %v2273_v39  ;;  %v2286_v11 = vor.u32 %v2714_v23, %v2285_v40 }
 0x15d   :  { %v1795_v53 = vmax.f32 %v1616_v44, 0.0  ;;  %v1497_v54 = vpop.f32.mrf.mxu3  ;;  %v1623_v55 = vpop.f32.mrf.mxu2 }
 0x15e   :  { %v3790_v58 = vadd.f32 %v1497_v54, %v1275_v52  ;;  %v1172_v59 = vpop.f32.mrf.mxu0 }
 0x15f   :  { %v2852_v63 = vpack.c.bf16 %v1795_v53, %v1794_v50  ;;  %v1395_v2 = vpop.f32.mrf.mxu1  ;;  %v1173_v3 = vadd.f32 %v3383_v1, %v1172_v59  ;;  %v2721_v50 = vld [vmem:[%s4316_s0 + $0x238] sm:$0xf0]  ;;  %v1283_v53 = vadd.f32 %v3383_v1, %v3460_v6 }
 0x160   :  { %v2717_v6 = vld [vmem:[%s4316_s0 + $0x218] sm:$0xf0] }
 0x161   :  { %3014 = vst [vmem:[%s4318_s3 + $0x58] sm:$0xff] %v2852_v63   ;;  %1211 = vmatmul.bf16.gmra.mxu0 %v2274_v43  ;;  %v1396_v12 = vadd.f32 %v1395_v2, %v1173_v3  ;;  %v2318_v63 = vor.u32 %v2721_v50, %v2317_v57 }
 0x162   :  { %1539 = vmatmul.bf16.gmra.mxu3 %v2530_v48  ;;  %1434 = vmatmul.bf16.gmra.mxu1 %v2278_v60 }
 0x163   :  { %v1619_v19 = vadd.f32 %v1618_v5, %v1396_v12  ;;  %v2287_v5 = vld [vmem:[%s4316_s0 + $0x204] sm:$0xf0]  ;;  %v2449_v12 = vld [vmem:[%s4316_s0 + $0x338] sm:$0xf] }
 0x164   :  { %v2290_v27 = vor.u32 %v2713_v32, %v2287_v5 }
 0x165   :  { %v1500_v14 = vpop.f32.mrf.mxu3  ;;  %v1625_v62 = vpop.f32.mrf.mxu2  ;;  %v1796_v35 = vmax.f32 %v1619_v19, 0.0 }
 0x166   :  { %v3804_v15 = vadd.f32 %v1500_v14, %v1278_v10  ;;  %v1174_v16 = vpop.f32.mrf.mxu0  ;;  %v2297_v10 = vld [vmem:[%s4316_s0 + $0x210] sm:$0xf] }
 0x167   :  { %v1175_v9 = vadd.f32 %v3383_v1, %v1174_v16  ;;  %v1397_v18 = vpop.f32.mrf.mxu1  ;;  %v2716_v16 = vld [vmem:[%s4316_s0 + $0x214] sm:$0xf] }
 0x169   :  { %v1398_v20 = vadd.f32 %v1397_v18, %v1175_v9  ;;  %v1285_v9 = vadd.f32 %v3383_v1, %v3482_v24  ;;  %v2329_v24 = vld [vmem:[%s4316_s0 + $0x248] sm:$0xf] }
 0x16a   :  { %2629 = vmatmul.msk.bf16.gmra.mxu2 %vm973_vm0, %v2306_v17  ;;  %v2299_v17 = vld [vmem:[%s4316_s0 + $0x21c] sm:$0xf0] }
 0x16b   :  { %v1621_v31 = vadd.f32 %v1620_v29, %v1398_v20  ;;  %v777_v29 = vpack.c.b16 %v648_v21, %v648_v21  ;;  %v2302_v32 = vor.u32 %v2716_v16, %v2299_v17 }
 0x16d   :  { %v1797_v36 = vmax.f32 %v1621_v31, 0.0  ;;  %v1502_v38 = vpop.f32.mrf.mxu3  ;;  %v1628_v39 = vpop.f32.mrf.mxu2 }
 0x16e   :  { %v3823_v34 = vadd.f32 %v1502_v38, %v1280_v46  ;;  %v1177_v44 = vpop.f32.mrf.mxu0  ;;  %v1288_v38 = vadd.f32 %v3383_v1, %v3494_v37  ;;  %v2720_v37 = vld [vmem:[%s4316_s0 + $0x230] sm:$0xf0] }
 0x16f   :  { %v2857_v45 = vpack.c.bf16 %v1797_v36, %v1796_v35  ;;  %v1400_v51 = vpop.f32.mrf.mxu1  ;;  %v1178_v52 = vadd.f32 %v3383_v1, %v1177_v44  ;;  %v2724_v36 = vld [vmem:[%s4316_s0 + $0x250] sm:$0xf0] }
 0x171   :  { %3015 = vst [vmem:[%s4318_s3 + $0x60] sm:$0xff] %v2857_v45   ;;  %1216 = vmatmul.bf16.gmra.mxu0 %v2286_v11  ;;  %v1401_v54 = vadd.f32 %v1400_v51, %v1178_v52  ;;  %v2330_v51 = vor.u32 %v2724_v36, %v2329_v24 }
 0x172   :  { %1544 = vmatmul.bf16.gmra.mxu3 %v777_v29  ;;  %1439 = vmatmul.bf16.gmra.mxu1 %v2290_v27 }
 0x173   :  { %v1624_v28 = vadd.f32 %v1623_v55, %v1401_v54  ;;  %v2754_v55 = vld [vmem:[%s4316_s0 + $0x340] sm:$0xf0]  ;;  %v2309_v54 = vld [vmem:[%s4316_s0 + $0x228] sm:$0xf] }
 0x174   :  { %v2450_v31 = vor.u32 %v2754_v55, %v2449_v12 }
 0x175   :  { %v1505_v43 = vpop.f32.mrf.mxu3  ;;  %v1630_v59 = vpop.f32.mrf.mxu2  ;;  %v1798_v18 = vmax.f32 %v1624_v28, 0.0 }
 0x176   :  { %v3837_v48 = vadd.f32 %v1505_v43, %v1283_v53  ;;  %v1179_v60 = vpop.f32.mrf.mxu0  ;;  %v2461_v43 = vld [vmem:[%s4316_s0 + $0x350] sm:$0xf] }
 0x177   :  { %v1180_v2 = vadd.f32 %v3383_v1, %v1179_v60  ;;  %v1402_v3 = vpop.f32.mrf.mxu1 }
 0x179   :  { %v1403_v4 = vadd.f32 %v1402_v3, %v1180_v2  ;;  %v3903_v2 = vld [vmem:[%s4317_s2] ss:$0 sm:$0xff] }
 0x17a   :  { %2630 = vmatmul.msk.bf16.gmra.mxu2 %vm973_vm0, %v2318_v63  ;;  %v2311_v63 = vld [vmem:[%s4316_s0 + $0x234] sm:$0xf0] }
 0x17b   :  { %v1626_v14 = vadd.f32 %v1625_v62, %v1403_v4  ;;  %v2298_v62 = vor.u32 %v2717_v6, %v2297_v10  ;;  %v2310_v6 = vor.u32 %v2720_v37, %v2309_v54 }
 0x17d   :  { %v1799_v19 = vmax.f32 %v1626_v14, 0.0  ;;  %v1507_v20 = vpop.f32.mrf.mxu3  ;;  %v3861_v21 = vpop.f32.mrf.mxu2 }
 0x17e   :  { %v3863_v40 = vadd.f32 %v1507_v20, %v1285_v9  ;;  %v1182_v23 = vpop.f32.mrf.mxu0  ;;  %v1293_v20 = vadd.f32 %v3903_v2, %v3528_v7  ;;  %v2723_v7 = vld [vmem:[%s4316_s0 + $0x248] sm:$0xf0] }
 0x17f   :  { %v2862_v5 = vpack.c.bf16 %v1799_v19, %v1798_v18  ;;  %v1405_v46 = vpop.f32.mrf.mxu1  ;;  %v1183_v35 = vadd.f32 %v3383_v1, %v1182_v23  ;;  %v2727_v19 = vld [vmem:[%s4316_s0 + $0x268] sm:$0xf0] }
 0x181   :  { %3016 = vst [vmem:[%s4318_s3 + $0x68] sm:$0xff] %v2862_v5   ;;  %1221 = vmatmul.bf16.gmra.mxu0 %v2298_v62  ;;  %v1406_v11 = vadd.f32 %v1405_v46, %v1183_v35 }
 0x182   :  { %2641 = vmatmul.msk.bf16.vlgmr.msra.gmra.mxu3 %vm973_vm0, %v2450_v31  ;;  %1444 = vmatmul.bf16.gmra.mxu1 %v2302_v32 }
 0x183   :  { %v1629_v50 = vadd.f32 %v1628_v39, %v1406_v11  ;;  %v2719_v39 = vld [vmem:[%s4316_s0 + $0x22c] sm:$0xf]  ;;  %v2321_v11 = vld [vmem:[%s4316_s0 + $0x240] sm:$0xf] }
 0x184   :  { %v2314_v16 = vor.u32 %v2719_v39, %v2311_v63 }
 0x185   :  { %v1510_v44 = vpop.f32.mrf.mxu3  ;;  %v1635_v29 = vpop.f32.mrf.mxu2  ;;  %v1800_v3 = vmax.f32 %v1629_v50, 0.0 }
 0x186   :  { %v3878_v27 = vadd.f32 %v1510_v44, %v1288_v38  ;;  %v1184_v45 = vpop.f32.mrf.mxu0  ;;  %v2473_v44 = vld [vmem:[%s4316_s0 + $0x368] sm:$0xf] }
 0x187   :  { %v1185_v52 = vadd.f32 %v3383_v1, %v1184_v45  ;;  %v1407_v57 = vpop.f32.mrf.mxu1  ;;  %v2757_v1 = vld [vmem:[%s4316_s0 + $0x358] sm:$0xf0] }
 0x188   :  { %v2462_v55 = vor.u32 %v2757_v1, %v2461_v43 }
 0x189   :  { %v1408_v53 = vadd.f32 %v1407_v57, %v1185_v52  ;;  %v2323_v52 = vld [vmem:[%s4316_s0 + $0x24c] sm:$0xf0]  ;;  %v1295_v57 = vadd.f32 %v3903_v2, %v3550_v26  ;;  %v2353_v26 = vld [vmem:[%s4316_s0 + $0x278] sm:$0xf] }
 0x18a   :  { %2631 = vmatmul.msk.bf16.gmra.mxu2 %vm973_vm0, %v2330_v51  ;;  %v2722_v51 = vld [vmem:[%s4316_s0 + $0x244] sm:$0xf] }
 0x18b   :  { %v1631_v60 = vadd.f32 %v1630_v59, %v1408_v53  ;;  %v1290_v59 = vadd.f32 %v3903_v2, %v3516_v56  ;;  %v2341_v56 = vld [vmem:[%s4316_s0 + $0x260] sm:$0xf]  ;;  %v2326_v39 = vor.u32 %v2722_v51, %v2323_v52 }
 0x18c   :  { %v2342_v46 = vor.u32 %v2727_v19, %v2341_v56 }
 0x18d   :  { %v1801_v28 = vmax.f32 %v1631_v60, 0.0  ;;  %v1512_v4 = vpop.f32.mrf.mxu3  ;;  %v1638_v10 = vpop.f32.mrf.mxu2 }
 0x18e   :  { %v3907_v12 = vadd.f32 %v1512_v4, %v1290_v59  ;;  %v1187_v14 = vpop.f32.mrf.mxu0  ;;  %v1298_v4 = vadd.f32 %v3903_v2, %v3562_v41  ;;  %v2726_v41 = vld [vmem:[%s4316_s0 + $0x260] sm:$0xf0] }
 0x18f   :  { %v2867_v17 = vpack.c.bf16 %v1801_v28, %v1800_v3  ;;  %v1410_v9 = vpop.f32.mrf.mxu1  ;;  %v1188_v18 = vadd.f32 %v3903_v2, %v1187_v14  ;;  %v2730_v28 = vld [vmem:[%s4316_s0 + $0x280] sm:$0xf0] }
 0x191   :  { %3017 = vst [vmem:[%s4318_s3 + $0x70] sm:$0xff] %v2867_v17   ;;  %1226 = vmatmul.bf16.gmra.mxu0 %v2310_v6  ;;  %v1411_v62 = vadd.f32 %v1410_v9, %v1188_v18  ;;  %v2354_v9 = vor.u32 %v2730_v28, %v2353_v26 }
 0x192   :  { %2642 = vmatmul.msk.bf16.gmra.mxu3 %vm973_vm0, %v2462_v55  ;;  %1449 = vmatmul.bf16.gmra.mxu1 %v2314_v16 }
 0x193   :  { %v1634_v36 = vadd.f32 %v3861_v21, %v1411_v62  ;;  %v2760_v21 = vld [vmem:[%s4316_s0 + $0x370] sm:$0xf0]  ;;  %v2333_v62 = vld [vmem:[%s4316_s0 + $0x258] sm:$0xf] }
 0x194   :  { %v2474_v1 = vor.u32 %v2760_v21, %v2473_v44 }
 0x195   :  { %v1515_v23 = vpop.f32.mrf.mxu3  ;;  %v1640_v31 = vpop.f32.mrf.mxu2  ;;  %v1802_v50 = vmax.f32 %v1634_v36, 0.0 }
 0x196   :  { %v3922_v32 = vadd.f32 %v1515_v23, %v1293_v20  ;;  %v1189_v5 = vpop.f32.mrf.mxu0  ;;  %v2485_v23 = vld [vmem:[%s4316_s0 + $0x380] sm:$0xf] }
 0x197   :  { %v1190_v35 = vadd.f32 %v3903_v2, %v1189_v5  ;;  %v1412_v24 = vpop.f32.mrf.mxu1 }
 0x199   :  { %v1413_v38 = vadd.f32 %v1412_v24, %v1190_v35  ;;  %v2335_v35 = vld [vmem:[%s4316_s0 + $0x264] sm:$0xf0]  ;;  %v1300_v24 = vadd.f32 %v3903_v2, %v3584_v61  ;;  %v2365_v61 = vld [vmem:[%s4316_s0 + $0x290] sm:$0xf] }
 0x19a   :  { %2632 = vmatmul.msk.bf16.gmra.mxu2 %vm973_vm0, %v2342_v46  ;;  %v2725_v46 = vld [vmem:[%s4316_s0 + $0x25c] sm:$0xf] }
 0x19b   :  { %v1636_v45 = vadd.f32 %v1635_v29, %v1413_v38  ;;  %v2322_v29 = vor.u32 %v2723_v7, %v2321_v11  ;;  %v2338_v51 = vor.u32 %v2725_v46, %v2335_v35 }
 0x19d   :  { %v1803_v53 = vmax.f32 %v1636_v45, 0.0  ;;  %v1517_v54 = vpop.f32.mrf.mxu3  ;;  %v1643_v37 = vpop.f32.mrf.mxu2 }
 0x19e   :  { %v3947_v43 = vadd.f32 %v1517_v54, %v1295_v57  ;;  %v1192_v60 = vpop.f32.mrf.mxu0  ;;  %v1303_v54 = vadd.f32 %v3903_v2, %v3596_v13  ;;  %v2729_v13 = vld [vmem:[%s4316_s0 + $0x278] sm:$0xf0] }
 0x19f   :  { %v2872_v63 = vpack.c.bf16 %v1803_v53, %v1802_v50  ;;  %v1415_v59 = vpop.f32.mrf.mxu1  ;;  %v1193_v3 = vadd.f32 %v3903_v2, %v1192_v60  ;;  %v2733_v53 = vld [vmem:[%s4316_s0 + $0x298] sm:$0xf0] }
 0x1a1   :  { %3018 = vst [vmem:[%s4318_s3 + $0x78] sm:$0xff] %v2872_v63   ;;  %1231 = vmatmul.bf16.gmra.mxu0 %v2322_v29  ;;  %v1416_v6 = vadd.f32 %v1415_v59, %v1193_v3  ;;  %v2366_v59 = vor.u32 %v2733_v53, %v2365_v61 }
 0x1a2   :  { %2643 = vmatmul.msk.bf16.gmra.mxu3 %vm973_vm0, %v2474_v1  ;;  %1454 = vmatmul.bf16.gmra.mxu1 %v2326_v39 }
 0x1a3   :  { %v1639_v19 = vadd.f32 %v1638_v10, %v1416_v6  ;;  %v2763_v10 = vld [vmem:[%s4316_s0 + $0x388] sm:$0xf0]  ;;  %v2345_v6 = vld [vmem:[%s4316_s0 + $0x270] sm:$0xf] }
 0x1a4   :  { %v2486_v21 = vor.u32 %v2763_v10, %v2485_v23 }
 0x1a5   :  { %v1520_v14 = vpop.f32.mrf.mxu3  ;;  %v1645_v55 = vpop.f32.mrf.mxu2  ;;  %v1804_v36 = vmax.f32 %v1639_v19, 0.0 }
 0x1a6   :  { %v3962_v16 = vadd.f32 %v1520_v14, %v1298_v4  ;;  %v1194_v17 = vpop.f32.mrf.mxu0  ;;  %v2497_v14 = vld [vmem:[%s4316_s0 + $0x398] sm:$0xf] }
 0x1a7   :  { %v1195_v18 = vadd.f32 %v3903_v2, %v1194_v17  ;;  %v1417_v56 = vpop.f32.mrf.mxu1 }
 0x1a9   :  { %v1418_v20 = vadd.f32 %v1417_v56, %v1195_v18  ;;  %v2347_v18 = vld [vmem:[%s4316_s0 + $0x27c] sm:$0xf0]  ;;  %v1305_v56 = vadd.f32 %v3903_v2, %v3618_v33  ;;  %v2377_v33 = vld [vmem:[%s4316_s0 + $0x2a8] sm:$0xf] }
 0x1aa   :  { %2633 = vmatmul.msk.bf16.gmra.mxu2 %vm973_vm0, %v2354_v9  ;;  %v2728_v9 = vld [vmem:[%s4316_s0 + $0x274] sm:$0xf] }
 0x1ab   :  { %v1641_v5 = vadd.f32 %v1640_v31, %v1418_v20  ;;  %v2334_v31 = vor.u32 %v2726_v41, %v2333_v62  ;;  %v2350_v46 = vor.u32 %v2728_v9, %v2347_v18 }
 0x1ad   :  { %v1805_v38 = vmax.f32 %v1641_v5, 0.0  ;;  %v1522_v11 = vpop.f32.mrf.mxu3  ;;  %v1648_v7 = vpop.f32.mrf.mxu2 }
 0x1ae   :  { %v3986_v44 = vadd.f32 %v1522_v11, %v1300_v24  ;;  %v1197_v45 = vpop.f32.mrf.mxu0  ;;  %v1308_v11 = vadd.f32 %v3903_v2, %v3630_v49  ;;  %v2732_v49 = vld [vmem:[%s4316_s0 + $0x290] sm:$0xf0] }
 0x1af   :  { %v2877_v52 = vpack.c.bf16 %v1805_v38, %v1804_v36  ;;  %v1420_v57 = vpop.f32.mrf.mxu1  ;;  %v1198_v50 = vadd.f32 %v3903_v2, %v1197_v45  ;;  %v2736_v38 = vld [vmem:[%s4316_s0 + $0x2b0] sm:$0xf0] }
 0x1b1   :  { %3019 = vst [vmem:[%s4318_s3 + $0x80] sm:$0xff] %v2877_v52   ;;  %1236 = vmatmul.bf16.gmra.mxu0 %v2334_v31  ;;  %v1421_v29 = vadd.f32 %v1420_v57, %v1198_v50  ;;  %v2378_v57 = vor.u32 %v2736_v38, %v2377_v33 }
 0x1b2   :  { %2644 = vmatmul.msk.bf16.gmra.mxu3 %vm973_vm0, %v2486_v21  ;;  %1459 = vmatmul.bf16.gmra.mxu1 %v2338_v51 }
 0x1b3   :  { %v1644_v28 = vadd.f32 %v1643_v37, %v1421_v29  ;;  %v2766_v37 = vld [vmem:[%s4316_s0 + $0x3a0] sm:$0xf0]  ;;  %v2357_v29 = vld [vmem:[%s4316_s0 + $0x288] sm:$0xf] }
 0x1b4   :  { %v2498_v10 = vor.u32 %v2766_v37, %v2497_v14 }
 0x1b5   :  { %v1525_v60 = vpop.f32.mrf.mxu3  ;;  %v1650_v1 = vpop.f32.mrf.mxu2  ;;  %v1806_v19 = vmax.f32 %v1644_v28, 0.0 }
 0x1b6   :  { %v4001_v39 = vadd.f32 %v1525_v60, %v1303_v54  ;;  %v1199_v63 = vpop.f32.mrf.mxu0  ;;  %v2509_v60 = vld [vmem:[%s4316_s0 + $0x3b0] sm:$0xf] }
 0x1b7   :  { %v1200_v3 = vadd.f32 %v3903_v2, %v1199_v63  ;;  %v1422_v26 = vpop.f32.mrf.mxu1 }
 0x1b9   :  { %v1423_v4 = vadd.f32 %v1422_v26, %v1200_v3  ;;  %v2359_v3 = vld [vmem:[%s4316_s0 + $0x294] sm:$0xf0]  ;;  %v1310_v26 = vadd.f32 %v3903_v2, %v3652_v8  ;;  %v2389_v8 = vld [vmem:[%s4316_s0 + $0x2c0] sm:$0xf] }
 0x1ba   :  { %2634 = vmatmul.msk.bf16.gmra.mxu2 %vm973_vm0, %v2366_v59  ;;  %v2731_v59 = vld [vmem:[%s4316_s0 + $0x28c] sm:$0xf] }
 0x1bb   :  { %v1646_v17 = vadd.f32 %v1645_v55, %v1423_v4  ;;  %v2346_v55 = vor.u32 %v2729_v13, %v2345_v6  ;;  %v2362_v9 = vor.u32 %v2731_v59, %v2359_v3 }
 0x1bd   :  { %v1807_v20 = vmax.f32 %v1646_v17, 0.0  ;;  %v1527_v62 = vpop.f32.mrf.mxu3  ;;  %v1653_v41 = vpop.f32.mrf.mxu2 }
 0x1be   :  { %v4025_v23 = vadd.f32 %v1527_v62, %v1305_v56  ;;  %v1202_v5 = vpop.f32.mrf.mxu0  ;;  %v1313_v62 = vadd.f32 %v3903_v2, %v3664_v22  ;;  %v2735_v22 = vld [vmem:[%s4316_s0 + $0x2a8] sm:$0xf0] }
 0x1bf   :  { %v2882_v35 = vpack.c.bf16 %v1807_v20, %v1806_v19  ;;  %v1425_v24 = vpop.f32.mrf.mxu1  ;;  %v1203_v36 = vadd.f32 %v3903_v2, %v1202_v5  ;;  %v2739_v20 = vld [vmem:[%s4316_s0 + $0x2c8] sm:$0xf0] }
 0x1c1   :  { %3020 = vst [vmem:[%s4318_s3 + $0x88] sm:$0xff] %v2882_v35   ;;  %1241 = vmatmul.bf16.gmra.mxu0 %v2346_v55  ;;  %v1426_v31 = vadd.f32 %v1425_v24, %v1203_v36  ;;  %v2390_v24 = vor.u32 %v2739_v20, %v2389_v8 }
 0x1c2   :  { %2645 = vmatmul.msk.bf16.gmra.mxu3 %vm973_vm0, %v2498_v10  ;;  %1464 = vmatmul.bf16.gmra.mxu1 %v2350_v46 }
 0x1c3   :  { %v1649_v53 = vadd.f32 %v1648_v7, %v1426_v31  ;;  %v2769_v7 = vld [vmem:[%s4316_s0 + $0x3b8] sm:$0xf0]  ;;  %v2369_v31 = vld [vmem:[%s4316_s0 + $0x2a0] sm:$0xf] }
 0x1c4   :  { %v2510_v37 = vor.u32 %v2769_v7, %v2509_v60 }
 0x1c5   :  { %v1530_v45 = vpop.f32.mrf.mxu3  ;;  %v1655_v21 = vpop.f32.mrf.mxu2  ;;  %v1808_v28 = vmax.f32 %v1649_v53, 0.0 }
 0x1c6   :  { %v4040_v51 = vadd.f32 %v1530_v45, %v1308_v11  ;;  %v1204_v52 = vpop.f32.mrf.mxu0  ;;  %v2521_v45 = vld [vmem:[%s4316_s0 + $0x3c8] sm:$0xf] }
 0x1c7   :  { %v1205_v50 = vadd.f32 %v3903_v2, %v1204_v52  ;;  %v1427_v61 = vpop.f32.mrf.mxu1 }
 0x1c9   :  { %v1428_v54 = vadd.f32 %v1427_v61, %v1205_v50  ;;  %v2371_v50 = vld [vmem:[%s4316_s0 + $0x2ac] sm:$0xf0]  ;;  %v1315_v61 = vadd.f32 %v3903_v2, %v3686_v47  ;;  %v2401_v47 = vld [vmem:[%s4316_s0 + $0x2d8] sm:$0xf] }
 0x1ca   :  { %2635 = vmatmul.msk.bf16.gmra.mxu2 %vm973_vm0, %v2378_v57  ;;  %v2734_v57 = vld [vmem:[%s4316_s0 + $0x2a4] sm:$0xf] }
 0x1cb   :  { %v1651_v63 = vadd.f32 %v1650_v1, %v1428_v54  ;;  %v2358_v1 = vor.u32 %v2732_v49, %v2357_v29  ;;  %v2374_v59 = vor.u32 %v2734_v57, %v2371_v50 }
 0x1cd   :  { %v1809_v4 = vmax.f32 %v1651_v63, 0.0  ;;  %v1532_v6 = vpop.f32.mrf.mxu3  ;;  %v1658_v13 = vpop.f32.mrf.mxu2 }
 0x1ce   :  { %v4064_v14 = vadd.f32 %v1532_v6, %v1310_v26  ;;  %v1207_v17 = vpop.f32.mrf.mxu0  ;;  %v1318_v6 = vadd.f32 %v3903_v2, %v3698_v0  ;;  %v2738_v0 = vld [vmem:[%s4316_s0 + $0x2c0] sm:$0xf0] }
 0x1cf   :  { %v2887_v18 = vpack.c.bf16 %v1809_v4, %v1808_v28  ;;  %v1430_v56 = vpop.f32.mrf.mxu1  ;;  %v1208_v19 = vadd.f32 %v3903_v2, %v1207_v17  ;;  %v2742_v4 = vld [vmem:[%s4316_s0 + $0x2e0] sm:$0xf0] }
 0x1d1   :  { %3021 = vst [vmem:[%s4318_s3 + $0x90] sm:$0xff] %v2887_v18   ;;  %1246 = vmatmul.bf16.gmra.mxu0 %v2358_v1  ;;  %v1431_v55 = vadd.f32 %v1430_v56, %v1208_v19  ;;  %v2402_v56 = vor.u32 %v2742_v4, %v2401_v47  ;;  %v184_v4 = vld [vmem:[%s4316_s0 + $0x3f8] sm:$0xf] }
 0x1d2   :  { %2646 = vmatmul.msk.bf16.gmra.mxu3 %vm973_vm0, %v2510_v37  ;;  %1469 = vmatmul.bf16.gmra.mxu1 %v2362_v9 }
 0x1d3   :  { %v1654_v38 = vadd.f32 %v1653_v41, %v1431_v55  ;;  %v2772_v41 = vld [vmem:[%s4316_s0 + $0x3d0] sm:$0xf0]  ;;  %v2381_v55 = vld [vmem:[%s4316_s0 + $0x2b8] sm:$0xf] }
 0x1d4   :  { %v2522_v7 = vor.u32 %v2772_v41, %v2521_v45 }
 0x1d5   :  { %v1535_v5 = vpop.f32.mrf.mxu3  ;;  %v1660_v10 = vpop.f32.mrf.mxu2  ;;  %v1810_v53 = vmax.f32 %v1654_v38, 0.0 }
 0x1d6   :  { %v4079_v46 = vadd.f32 %v1535_v5, %v1313_v62  ;;  %v1209_v35 = vpop.f32.mrf.mxu0  ;;  %v2533_v5 = vld [vmem:[%s4316_s0 + $0x3e0] sm:$0xf] }
 0x1d7   :  { %v1210_v36 = vadd.f32 %v3903_v2, %v1209_v35  ;;  %v1432_v33 = vpop.f32.mrf.mxu1 }
 0x1d9   :  { %v1433_v11 = vadd.f32 %v1432_v33, %v1210_v36  ;;  %v2383_v36 = vld [vmem:[%s4316_s0 + $0x2c4] sm:$0xf0]  ;;  %v1320_v33 = vadd.f32 %v3903_v2, %v3720_v25  ;;  %v2413_v25 = vld [vmem:[%s4316_s0 + $0x2f0] sm:$0xf] }
 0x1da   :  { %2636 = vmatmul.msk.bf16.gmra.mxu2 %vm973_vm0, %v2390_v24  ;;  %v2737_v24 = vld [vmem:[%s4316_s0 + $0x2bc] sm:$0xf] }
 0x1db   :  { %v1656_v52 = vadd.f32 %v1655_v21, %v1433_v11  ;;  %v2370_v21 = vor.u32 %v2735_v22, %v2369_v31  ;;  %v2386_v57 = vor.u32 %v2737_v24, %v2383_v36 }
 0x1dd   :  { %v1811_v54 = vmax.f32 %v1656_v52, 0.0  ;;  %v1537_v29 = vpop.f32.mrf.mxu3  ;;  %v4103_v49 = vpop.f32.mrf.mxu2 }
 0x1de   :  { %v4105_v60 = vadd.f32 %v1537_v29, %v1315_v61  ;;  %v1212_v63 = vpop.f32.mrf.mxu0  ;;  %v1323_v29 = vadd.f32 %v3903_v2, %v3732_v42  ;;  %v2393_v42 = vld [vmem:[%s4316_s0 + $0x2d0] sm:$0xf] }
 0x1df   :  { %v2892_v3 = vpack.c.bf16 %v1811_v54, %v1810_v53  ;;  %v1435_v26 = vpop.f32.mrf.mxu1  ;;  %v1213_v28 = vadd.f32 %v3903_v2, %v1212_v63  ;;  %v2745_v54 = vld [vmem:[%s4316_s0 + $0x2f8] sm:$0xf0] }
 0x1e1   :  { %3022 = vst [vmem:[%s4318_s3 + $0x98] sm:$0xff] %v2892_v3   ;;  %1251 = vmatmul.bf16.gmra.mxu0 %v2370_v21  ;;  %v1436_v1 = vadd.f32 %v1435_v26, %v1213_v28  ;;  %v2414_v26 = vor.u32 %v2745_v54, %v2413_v25  ;;  %v2405_v25 = vld [vmem:[%s4316_s0 + $0x2e8] sm:$0xf]  ;;  %v2744_v54 = vld [vmem:[%s4316_s0 + $0x2f0] sm:$0xf0] }
 0x1e2   :  { %2647 = vmatmul.msk.bf16.gmra.mxu3 %vm973_vm0, %v2522_v7  ;;  %1474 = vmatmul.bf16.gmra.mxu1 %v2374_v59 }
 0x1e3   :  { %v1659_v20 = vadd.f32 %v1658_v13, %v1436_v1  ;;  %v2775_v13 = vld [vmem:[%s4316_s0 + $0x3e8] sm:$0xf0] }
 0x1e4   :  { %v2534_v41 = vor.u32 %v2775_v13, %v2533_v5 }
 0x1e5   :  { %v1540_v17 = vpop.f32.mrf.mxu3  ;;  %v1665_v37 = vpop.f32.mrf.mxu2  ;;  %v1812_v38 = vmax.f32 %v1659_v20, 0.0 }
 0x1e6   :  { %v4120_v9 = vadd.f32 %v1540_v17, %v1318_v6  ;;  %v1214_v18 = vpop.f32.mrf.mxu0  ;;  %v2741_v17 = vld [vmem:[%s4316_s0 + $0x2d8] sm:$0xf0] }
 0x1e7   :  { %v1215_v19 = vadd.f32 %v3903_v2, %v1214_v18  ;;  %v1437_v8 = vpop.f32.mrf.mxu1  ;;  %v649_v18 = vunpack.c.l.b16 %v184_v4  ;;  %v2406_v4 = vor.u32 %v2744_v54, %v2405_v25 }
 0x1e9   :  { %v1438_v62 = vadd.f32 %v1437_v8, %v1215_v19  ;;  %v2740_v19 = vld [vmem:[%s4316_s0 + $0x2d4] sm:$0xf] }
 0x1ea   :  { %2637 = vmatmul.msk.bf16.gmra.mxu2 %vm973_vm0, %v2402_v56 }
 0x1eb   :  { %v1661_v35 = vadd.f32 %v1660_v10, %v1438_v62  ;;  %v2382_v10 = vor.u32 %v2738_v0, %v2381_v55  ;;  %v2394_v0 = vor.u32 %v2741_v17, %v2393_v42 }
 0x1ed   :  { %v1813_v11 = vmax.f32 %v1661_v35, 0.0  ;;  %v1542_v31 = vpop.f32.mrf.mxu3  ;;  %v1668_v22 = vpop.f32.mrf.mxu2  ;;  %v778_v35 = vpack.c.b16 %v649_v18, %v649_v18 }
 0x1ee   :  { %v4144_v45 = vadd.f32 %v1542_v31, %v1320_v33  ;;  %v1217_v52 = vpop.f32.mrf.mxu0  ;;  %v2425_v33 = vld [vmem:[%s4316_s0 + $0x308] sm:$0xf] }
 0x1ef   :  { %v2897_v50 = vpack.c.bf16 %v1813_v11, %v1812_v38  ;;  %v1440_v61 = vpop.f32.mrf.mxu1  ;;  %v1218_v53 = vadd.f32 %v3903_v2, %v1217_v52  ;;  %v2748_v38 = vld [vmem:[%s4316_s0 + $0x310] sm:$0xf0] }
 0x1f1   :  { %3023 = vst [vmem:[%s4318_s3 + $0xa0] sm:$0xff] %v2897_v50   ;;  %1256 = vmatmul.bf16.gmra.mxu0 %v2382_v10  ;;  %v1441_v21 = vadd.f32 %v1440_v61, %v1218_v53 }
 0x1f2   :  { %2648 = vmatmul.msk.bf16.gmra.mxu3 %vm973_vm0, %v2534_v41  ;;  %1479 = vmatmul.bf16.gmra.mxu1 %v2386_v57  ;;  %v2426_v41 = vor.u32 %v2748_v38, %v2425_v33 }
 0x1f3   :  { %v1664_v6 = vadd.f32 %v4103_v49, %v1441_v21  ;;  %v2395_v49 = vld [vmem:[%s4316_s0 + $0x2dc] sm:$0xf0]  ;;  %v2743_v21 = vld [vmem:[%s4316_s0 + $0x2ec] sm:$0xf] }
 0x1f4   :  { %v2398_v13 = vor.u32 %v2740_v19, %v2395_v49  ;;  %v2437_v49 = vld [vmem:[%s4316_s0 + $0x320] sm:$0xf] }
 0x1f5   :  { %v1545_v63 = vpop.f32.mrf.mxu3  ;;  %v1670_v7 = vpop.f32.mrf.mxu2  ;;  %v1814_v8 = vmax.f32 %v1664_v6, 0.0 }
 0x1f6   :  { %v4159_v59 = vadd.f32 %v1545_v63, %v1323_v29  ;;  %v1219_v3 = vpop.f32.mrf.mxu0 }
 0x1f7   :  { %v1220_v28 = vadd.f32 %v3903_v2, %v1219_v3  ;;  %v1442_v47 = vpop.f32.mrf.mxu1 }
 0x1f9   :  { %v1443_v1 = vadd.f32 %v1442_v47, %v1220_v28 }
 0x1fa   :  { %2638 = vmatmul.msk.bf16.gmra.mxu2 %vm973_vm0, %v2414_v26 }
 0x1fb   :  { %v1666_v56 = vadd.f32 %v1665_v37, %v1443_v1 }
 0x1fd   :  { %v1815_v20 = vmax.f32 %v1666_v56, 0.0  ;;  %v1547_v62 = vpop.f32.mrf.mxu3  ;;  %v1673_v55 = vpop.f32.mrf.mxu2 }
 0x1fe   :  { %v1222_v5 = vpop.f32.mrf.mxu0 }
 0x1ff   :  { %v2902_v24 = vpack.c.bf16 %v1815_v20, %v1814_v8  ;;  %v1445_v36 = vpop.f32.mrf.mxu1  ;;  %v1223_v37 = vadd.f32 %v3903_v2, %v1222_v5 }
 0x201   :  { %3024 = vst [vmem:[%s4318_s3 + $0xa8] sm:$0xff] %v2902_v24   ;;  %1261 = vmatmul.bf16.gmra.mxu0 %v2394_v0  ;;  %v1446_v11 = vadd.f32 %v1445_v36, %v1223_v37 }
 0x202   :  { %2649 = vmatmul.msk.bf16.gmra.mxu3 %vm973_vm0, %v778_v35  ;;  %1484 = vmatmul.bf16.gmra.mxu1 %v2398_v13 }
 0x203   :  { %v1669_v61 = vadd.f32 %v1668_v22, %v1446_v11  ;;  %v2407_v22 = vld [vmem:[%s4316_s0 + $0x2f4] sm:$0xf0] }
 0x204   :  { %v2410_v42 = vor.u32 %v2743_v21, %v2407_v22 }
 0x205   :  { %v1675_v31 = vpop.f32.mrf.mxu2  ;;  %v1728_v10 = vpop.f32.mrf.mxu3  ;;  %v1816_v3 = vmax.f32 %v1669_v61, 0.0 }
 0x206   :  { %v1224_v52 = vpop.f32.mrf.mxu0  ;;  %v1729_v63 = vadd.f32 %v1728_v10, %v3837_v48 }
 0x207   :  { %v1225_v57 = vadd.f32 %v3903_v2, %v1224_v52  ;;  %v1447_v50 = vpop.f32.mrf.mxu1 }
 0x208   :  { %v1840_v18 = vmax.f32 %v1729_v63, 0.0 }
 0x209   :  { %v1448_v53 = vadd.f32 %v1447_v50, %v1225_v57 }
 0x20a   :  { %2639 = vmatmul.msk.bf16.gmra.mxu2 %vm973_vm0, %v2426_v41 }
 0x20b   :  { %v1671_v29 = vadd.f32 %v1670_v7, %v1448_v53 }
 0x20d   :  { %v1817_v26 = vmax.f32 %v1671_v29, 0.0  ;;  %v1678_v28 = vpop.f32.mrf.mxu2  ;;  %v1730_v47 = vpop.f32.mrf.mxu3 }
 0x20e   :  { %v1731_v6 = vadd.f32 %v1730_v47, %v3863_v40  ;;  %v1227_v1 = vpop.f32.mrf.mxu0  ;;  %v2751_v40 = vld [vmem:[%s4316_s0 + $0x328] sm:$0xf0] }
 0x20f   :  { %v2907_v7 = vpack.c.bf16 %v1817_v26, %v1816_v3  ;;  %v1450_v17 = vpop.f32.mrf.mxu1  ;;  %v1228_v19 = vadd.f32 %v3903_v2, %v1227_v1  ;;  %v2438_v5 = vor.u32 %v2751_v40, %v2437_v49 }
 0x210   :  { %v1841_v56 = vmax.f32 %v1731_v6, 0.0 }
 0x211   :  { %3025 = vst [vmem:[%s4318_s3 + $0xb0] sm:$0xff] %v2907_v7   ;;  %1266 = vmatmul.bf16.gmra.mxu0 %v2406_v4  ;;  %v1451_v8 = vadd.f32 %v1450_v17, %v1228_v19 }
 0x212   :  { %v2967_v48 = vpack.c.bf16 %v1841_v56, %v1840_v18  ;;  %1489 = vmatmul.bf16.gmra.mxu1 %v2410_v42 }
 0x213   :  { %v1674_v24 = vadd.f32 %v1673_v55, %v1451_v8 }
 0x214   :  { %3037 = vst [vmem:[%s4318_s3 + $0x110] sm:$0xff] %v2967_v48  }
 0x215   :  { %v1680_v20 = vpop.f32.mrf.mxu2  ;;  %v1733_v62 = vpop.f32.mrf.mxu3  ;;  %v1818_v38 = vmax.f32 %v1674_v24, 0.0 }
 0x216   :  { %v1229_v0 = vpop.f32.mrf.mxu0  ;;  %v1734_v33 = vadd.f32 %v1733_v62, %v3878_v27 }
 0x217   :  { %v1230_v35 = vadd.f32 %v3903_v2, %v1229_v0  ;;  %v1452_v13 = vpop.f32.mrf.mxu1 }
 0x218   :  { %v1842_v53 = vmax.f32 %v1734_v33, 0.0 }
 0x219   :  { %v1453_v36 = vadd.f32 %v1452_v13, %v1230_v35 }
 0x21a   :  { %2640 = vmatmul.msk.bf16.gmra.mxu2 %vm973_vm0, %v2438_v5 }
 0x21b   :  { %v1676_v37 = vadd.f32 %v1675_v31, %v1453_v36 }
 0x21d   :  { %v1819_v11 = vmax.f32 %v1676_v37, 0.0  ;;  %v1683_v10 = vpop.f32.mrf.mxu2  ;;  %v1735_v52 = vpop.f32.mrf.mxu3 }
 0x21e   :  { %v1736_v41 = vadd.f32 %v1735_v52, %v3907_v12  ;;  %v1232_v57 = vpop.f32.mrf.mxu0 }
 0x21f   :  { %v2912_v50 = vpack.c.bf16 %v1819_v11, %v1818_v38  ;;  %v1455_v61 = vpop.f32.mrf.mxu1  ;;  %v1233_v55 = vadd.f32 %v3903_v2, %v1232_v57 }
 0x220   :  { %v1843_v25 = vmax.f32 %v1736_v41, 0.0 }
 0x221   :  { %3026 = vst [vmem:[%s4318_s3 + $0xb8] sm:$0xff] %v2912_v50   ;;  %v1456_v27 = vadd.f32 %v1455_v61, %v1233_v55 }
 0x222   :  { %v2972_v31 = vpack.c.bf16 %v1843_v25, %v1842_v53 }
 0x223   :  { %v1679_v63 = vadd.f32 %v1678_v28, %v1456_v27 }
 0x224   :  { %3038 = vst [vmem:[%s4318_s3 + $0x118] sm:$0xff] %v2972_v31  }
 0x225   :  { %v1685_v54 = vpop.f32.mrf.mxu2  ;;  %v1738_v29 = vpop.f32.mrf.mxu3  ;;  %v1820_v4 = vmax.f32 %v1679_v63, 0.0 }
 0x226   :  { %v1234_v12 = vpop.f32.mrf.mxu0  ;;  %v1739_v47 = vadd.f32 %v1738_v29, %v3922_v32 }
 0x227   :  { %v1235_v21 = vadd.f32 %v3903_v2, %v1234_v12  ;;  %v1457_v22 = vpop.f32.mrf.mxu1 }
 0x228   :  { %v1844_v19 = vmax.f32 %v1739_v47, 0.0 }
 0x229   :  { %v1458_v3 = vadd.f32 %v1457_v22, %v1235_v21 }
 0x22b   :  { %v1681_v26 = vadd.f32 %v1680_v20, %v1458_v3 }
 0x22d   :  { %v1821_v6 = vmax.f32 %v1681_v26, 0.0  ;;  %v1688_v1 = vpop.f32.mrf.mxu2  ;;  %v1740_v42 = vpop.f32.mrf.mxu3 }
 0x22e   :  { %v1741_v7 = vadd.f32 %v1740_v42, %v3947_v43  ;;  %v1237_v17 = vpop.f32.mrf.mxu0 }
 0x22f   :  { %v2917_v18 = vpack.c.bf16 %v1821_v6, %v1820_v4  ;;  %v1460_v56 = vpop.f32.mrf.mxu1  ;;  %v1238_v28 = vadd.f32 %v3903_v2, %v1237_v17 }
 0x230   :  { %v1845_v48 = vmax.f32 %v1741_v7, 0.0 }
 0x231   :  { %3027 = vst [vmem:[%s4318_s3 + $0xc0] sm:$0xff] %v2917_v18   ;;  %v1461_v32 = vadd.f32 %v1460_v56, %v1238_v28 }
 0x232   :  { %v2977_v49 = vpack.c.bf16 %v1845_v48, %v1844_v19 }
 0x233   :  { %v1684_v0 = vadd.f32 %v1683_v10, %v1461_v32 }
 0x234   :  { %3039 = vst [vmem:[%s4318_s3 + $0x120] sm:$0xff] %v2977_v49  }
 0x235   :  { %v1690_v40 = vpop.f32.mrf.mxu2  ;;  %v1743_v8 = vpop.f32.mrf.mxu3  ;;  %v1822_v24 = vmax.f32 %v1684_v0, 0.0 }
 0x236   :  { %v1239_v43 = vpop.f32.mrf.mxu0  ;;  %v1744_v13 = vadd.f32 %v1743_v8, %v3962_v16 }
 0x237   :  { %v1240_v20 = vadd.f32 %v3903_v2, %v1239_v43  ;;  %v1462_v62 = vpop.f32.mrf.mxu1 }
 0x238   :  { %v1846_v57 = vmax.f32 %v1744_v13, 0.0 }
 0x239   :  { %v1463_v5 = vadd.f32 %v1462_v62, %v1240_v20 }
 0x23b   :  { %v1686_v35 = vadd.f32 %v1685_v54, %v1463_v5 }
 0x23d   :  { %v1823_v36 = vmax.f32 %v1686_v35, 0.0  ;;  %v1693_v37 = vpop.f32.mrf.mxu2  ;;  %v1745_v33 = vpop.f32.mrf.mxu3 }
 0x23e   :  { %v1746_v38 = vadd.f32 %v1745_v33, %v3986_v44  ;;  %v1242_v11 = vpop.f32.mrf.mxu0 }
 0x23f   :  { %v2922_v52 = vpack.c.bf16 %v1823_v36, %v1822_v24  ;;  %v1465_v41 = vpop.f32.mrf.mxu1  ;;  %v1243_v10 = vadd.f32 %v3903_v2, %v1242_v11 }
 0x240   :  { %v1847_v50 = vmax.f32 %v1746_v38, 0.0 }
 0x241   :  { %3028 = vst [vmem:[%s4318_s3 + $0xc8] sm:$0xff] %v2922_v52   ;;  %v1466_v16 = vadd.f32 %v1465_v41, %v1243_v10 }
 0x242   :  { %v2982_v61 = vpack.c.bf16 %v1847_v50, %v1846_v57 }
 0x243   :  { %v1689_v27 = vadd.f32 %v1688_v1, %v1466_v16 }
 0x244   :  { %3040 = vst [vmem:[%s4318_s3 + $0x128] sm:$0xff] %v2982_v61  }
 0x245   :  { %v1695_v53 = vpop.f32.mrf.mxu2  ;;  %v1748_v25 = vpop.f32.mrf.mxu3  ;;  %v1824_v21 = vmax.f32 %v1689_v27, 0.0 }
 0x246   :  { %v1244_v44 = vpop.f32.mrf.mxu0  ;;  %v1749_v12 = vadd.f32 %v1748_v25, %v4001_v39 }
 0x247   :  { %v1245_v55 = vadd.f32 %v3903_v2, %v1244_v44  ;;  %v1467_v31 = vpop.f32.mrf.mxu1 }
 0x248   :  { %v1848_v42 = vmax.f32 %v1749_v12, 0.0 }
 0x249   :  { %v1468_v54 = vadd.f32 %v1467_v31, %v1245_v55 }
 0x24b   :  { %v1691_v29 = vadd.f32 %v1690_v40, %v1468_v54 }
 0x24d   :  { %v1825_v22 = vmax.f32 %v1691_v29, 0.0  ;;  %v1698_v63 = vpop.f32.mrf.mxu2  ;;  %v1750_v3 = vpop.f32.mrf.mxu3 }
 0x24e   :  { %v1751_v26 = vadd.f32 %v1750_v3, %v4025_v23  ;;  %v1247_v47 = vpop.f32.mrf.mxu0 }
 0x24f   :  { %v2927_v4 = vpack.c.bf16 %v1825_v22, %v1824_v21  ;;  %v1470_v6 = vpop.f32.mrf.mxu1  ;;  %v1248_v1 = vadd.f32 %v3903_v2, %v1247_v47 }
 0x250   :  { %v1849_v7 = vmax.f32 %v1751_v26, 0.0 }
 0x251   :  { %3029 = vst [vmem:[%s4318_s3 + $0xd0] sm:$0xff] %v2927_v4   ;;  %v1471_v39 = vadd.f32 %v1470_v6, %v1248_v1 }
 0x252   :  { %v2987_v17 = vpack.c.bf16 %v1849_v7, %v1848_v42 }
 0x253   :  { %v1694_v28 = vadd.f32 %v1693_v37, %v1471_v39 }
 0x254   :  { %3041 = vst [vmem:[%s4318_s3 + $0x130] sm:$0xff] %v2987_v17  }
 0x255   :  { %v1700_v18 = vpop.f32.mrf.mxu2  ;;  %v1753_v56 = vpop.f32.mrf.mxu3  ;;  %v1826_v8 = vmax.f32 %v1694_v28, 0.0 }
 0x256   :  { %v1249_v23 = vpop.f32.mrf.mxu0  ;;  %v1754_v40 = vadd.f32 %v1753_v56, %v4040_v51 }
 0x257   :  { %v1250_v19 = vadd.f32 %v3903_v2, %v1249_v23  ;;  %v1472_v48 = vpop.f32.mrf.mxu1 }
 0x258   :  { %v1850_v24 = vmax.f32 %v1754_v40, 0.0 }
 0x259   :  { %v1473_v49 = vadd.f32 %v1472_v48, %v1250_v19 }
 0x25b   :  { %v1696_v32 = vadd.f32 %v1695_v53, %v1473_v49 }
 0x25d   :  { %v1827_v43 = vmax.f32 %v1696_v32, 0.0  ;;  %v1703_v20 = vpop.f32.mrf.mxu2  ;;  %v1755_v62 = vpop.f32.mrf.mxu3 }
 0x25e   :  { %v1756_v0 = vadd.f32 %v1755_v62, %v4064_v14  ;;  %v1252_v5 = vpop.f32.mrf.mxu0 }
 0x25f   :  { %v2932_v35 = vpack.c.bf16 %v1827_v43, %v1826_v8  ;;  %v1475_v13 = vpop.f32.mrf.mxu1  ;;  %v1253_v37 = vadd.f32 %v3903_v2, %v1252_v5 }
 0x260   :  { %v1851_v36 = vmax.f32 %v1756_v0, 0.0 }
 0x261   :  { %3030 = vst [vmem:[%s4318_s3 + $0xd8] sm:$0xff] %v2932_v35   ;;  %v1476_v51 = vadd.f32 %v1475_v13, %v1253_v37 }
 0x262   :  { %v2992_v33 = vpack.c.bf16 %v1851_v36, %v1850_v24 }
 0x263   :  { %v1699_v57 = vadd.f32 %v1698_v63, %v1476_v51 }
 0x264   :  { %3042 = vst [vmem:[%s4318_s3 + $0x138] sm:$0xff] %v2992_v33  }
 0x265   :  { %v1705_v38 = vpop.f32.mrf.mxu2  ;;  %v1758_v11 = vpop.f32.mrf.mxu3  ;;  %v1828_v16 = vmax.f32 %v1699_v57, 0.0 }
 0x266   :  { %v1254_v14 = vpop.f32.mrf.mxu0  ;;  %v1759_v61 = vadd.f32 %v1758_v11, %v4079_v46 }
 0x267   :  { %v1255_v52 = vadd.f32 %v3903_v2, %v1254_v14  ;;  %v1477_v41 = vpop.f32.mrf.mxu1 }
 0x268   :  { %v1852_v29 = vmax.f32 %v1759_v61, 0.0 }
 0x269   :  { %v1478_v50 = vadd.f32 %v1477_v41, %v1255_v52 }
 0x26b   :  { %v1701_v10 = vadd.f32 %v1700_v18, %v1478_v50 }
 0x26d   :  { %v1829_v53 = vmax.f32 %v1701_v10, 0.0  ;;  %v1708_v25 = vpop.f32.mrf.mxu2  ;;  %v1760_v44 = vpop.f32.mrf.mxu3 }
 0x26e   :  { %v1761_v55 = vadd.f32 %v1760_v44, %v4105_v60  ;;  %v1257_v31 = vpop.f32.mrf.mxu0 }
 0x26f   :  { %v2937_v27 = vpack.c.bf16 %v1829_v53, %v1828_v16  ;;  %v1480_v54 = vpop.f32.mrf.mxu1  ;;  %v1258_v21 = vadd.f32 %v3903_v2, %v1257_v31  ;;  %v3065_v16 = vld [vmem:[%s4317_s2] ss:$0 sm:$0xff] }
 0x270   :  { %v1853_v12 = vmax.f32 %v1761_v55, 0.0 }
 0x271   :  { %3031 = vst [vmem:[%s4318_s3 + $0xe0] sm:$0xff] %v2937_v27   ;;  %v1481_v46 = vadd.f32 %v1480_v54, %v1258_v21 }
 0x272   :  { %v2997_v22 = vpack.c.bf16 %v1853_v12, %v1852_v29 }
 0x273   :  { %v1704_v4 = vadd.f32 %v1703_v20, %v1481_v46 }
 0x274   :  { %3043 = vst [vmem:[%s4318_s3 + $0x140] sm:$0xff] %v2997_v22  }
 0x275   :  { %v1710_v63 = vpop.f32.mrf.mxu2  ;;  %v1763_v3 = vpop.f32.mrf.mxu3  ;;  %v1830_v1 = vmax.f32 %v1704_v4, 0.0 }
 0x276   :  { %v1259_v60 = vpop.f32.mrf.mxu0  ;;  %v1764_v7 = vadd.f32 %v1763_v3, %v4120_v9 }
 0x277   :  { %v1260_v26 = vadd.f32 %v3903_v2, %v1259_v60  ;;  %v1482_v47 = vpop.f32.mrf.mxu1 }
 0x278   :  { %v1854_v28 = vmax.f32 %v1764_v7, 0.0 }
 0x279   :  { %v1483_v6 = vadd.f32 %v1482_v47, %v1260_v26 }
 0x27b   :  { %v1706_v42 = vadd.f32 %v1705_v38, %v1483_v6 }
 0x27d   :  { %v1831_v17 = vmax.f32 %v1706_v42, 0.0  ;;  %v1713_v39 = vpop.f32.mrf.mxu2  ;;  %v1765_v18 = vpop.f32.mrf.mxu3 }
 0x27e   :  { %v1766_v56 = vadd.f32 %v1765_v18, %v4144_v45  ;;  %v1262_v23 = vpop.f32.mrf.mxu0 }
 0x27f   :  { %v2942_v19 = vpack.c.bf16 %v1831_v17, %v1830_v1  ;;  %v1485_v48 = vpop.f32.mrf.mxu1  ;;  %v1263_v32 = vadd.f32 %v3903_v2, %v1262_v23 }
 0x280   :  { %v1855_v49 = vmax.f32 %v1766_v56, 0.0 }
 0x281   :  { %3032 = vst [vmem:[%s4318_s3 + $0xe8] sm:$0xff] %v2942_v19   ;;  %v1486_v9 = vadd.f32 %v1485_v48, %v1263_v32 }
 0x282   :  { %v3002_v40 = vpack.c.bf16 %v1855_v49, %v1854_v28 }
 0x283   :  { %v1709_v35 = vadd.f32 %v1708_v25, %v1486_v9 }
 0x284   :  { %3044 = vst [vmem:[%s4318_s3 + $0x148] sm:$0xff] %v3002_v40  }
 0x285   :  { %v1715_v8 = vpop.f32.mrf.mxu2  ;;  %v1768_v43 = vpop.f32.mrf.mxu3  ;;  %v1832_v37 = vmax.f32 %v1709_v35, 0.0 }
 0x286   :  { %v1769_v45 = vadd.f32 %v1768_v43, %v4159_v59  ;;  %v1264_v20 = vpop.f32.mrf.mxu0 }
 0x287   :  { %v1265_v62 = vadd.f32 %v3903_v2, %v1264_v20  ;;  %v1487_v0 = vpop.f32.mrf.mxu1 }
 0x288   :  { %v1856_v5 = vmax.f32 %v1769_v45, 0.0 }
 0x289   :  { %v1488_v13 = vadd.f32 %v1487_v0, %v1265_v62 }
 0x28a   :  { %v1941_v24 = vpack.c.bf16 %v1856_v5, %v1856_v5 }
 0x28b   :  { %v1711_v36 = vadd.f32 %v1710_v63, %v1488_v13 }
 0x28c   :  { %2026 = vst [vmem:[%s4318_s3 + $0x150] sm:$0xf] %v1941_v24 }
 0x28d   :  { %v1833_v33 = vmax.f32 %v1711_v36, 0.0  ;;  %v1718_v51 = vpop.f32.mrf.mxu2  ;;  %v1770_v38 = vpop.f32.mrf.mxu3 }
 0x28e   :  { %v1267_v11 = vpop.f32.mrf.mxu0  ;;  %v1719_v41 = vadd.f32 %v1718_v51, %v3766_v30 }
 0x28f   :  { %v2947_v14 = vpack.c.bf16 %v1833_v33, %v1832_v37  ;;  %v1490_v59 = vpop.f32.mrf.mxu1  ;;  %v1268_v52 = vadd.f32 %v3903_v2, %v1267_v11 }
 0x290   :  { %v1836_v44 = vmax.f32 %v1719_v41, 0.0 }
 0x291   :  { %3033 = vst [vmem:[%s4318_s3 + $0xf0] sm:$0xff] %v2947_v14   ;;  %v1491_v57 = vadd.f32 %v1490_v59, %v1268_v52 }
 0x293   :  { %v1714_v31 = vadd.f32 %v1713_v39, %v1491_v57 }
 0x295   :  { %v1720_v50 = vpop.f32.mrf.mxu2  ;;  %v1834_v30 = vmax.f32 %v1714_v31, 0.0 }
 0x296   :  { %v1721_v10 = vadd.f32 %v1720_v50, %v3790_v58  ;;  %v1269_v61 = vpop.f32.mrf.mxu0 }
 0x297   :  { %v1270_v53 = vadd.f32 %v3065_v16, %v1269_v61  ;;  %v1492_v25 = vpop.f32.mrf.mxu1 }
 0x298   :  { %v1837_v55 = vmax.f32 %v1721_v10, 0.0 }
 0x299   :  { %v1493_v27 = vadd.f32 %v1492_v25, %v1270_v53 }
 0x29a   :  { %v2957_v54 = vpack.c.bf16 %v1837_v55, %v1836_v44 }
 0x29b   :  { %v1716_v29 = vadd.f32 %v1715_v8, %v1493_v27 }
 0x29c   :  { %3035 = vst [vmem:[%s4318_s3 + $0x100] sm:$0xff] %v2957_v54  }
 0x29d   :  { %v1835_v2 = vmax.f32 %v1716_v29, 0.0  ;;  %v1723_v58 = vpop.f32.mrf.mxu2 }
 0x29e   :  { %v1724_v21 = vadd.f32 %v1723_v58, %v3804_v15 }
 0x29f   :  { %v2952_v12 = vpack.c.bf16 %v1835_v2, %v1834_v30 }
 0x2a0   :  { %v1838_v63 = vmax.f32 %v1724_v21, 0.0 }
 0x2a1   :  { %3034 = vst [vmem:[%s4318_s3 + $0xf8] sm:$0xff] %v2952_v12  }
 0x2a5   :  { %v1725_v22 = vpop.f32.mrf.mxu2 }
 0x2a6   :  { %v1726_v46 = vadd.f32 %v1725_v22, %v3823_v34 }
 0x2a8   :  { %v1839_v3 = vmax.f32 %v1726_v46, 0.0 }
 0x2aa   :  { %v2962_v60 = vpack.c.bf16 %v1839_v3, %v1838_v63 }
 0x2ac   :  { %3036 = vst [vmem:[%s4318_s3 + $0x108] sm:$0xff] %v2962_v60  }

// kernel: _device_forward.18
= control target key start
LH: loop header
LB: loop body
LE: loop exit
PB: predicated region body
PF: predicated region fallthrough
CT: control target
= control target key end

     0   :  { %vm973_vm0 = vcmask 261120   ;;  %s4011_s1 = inlined_call_operand.vmem [shape: bf16[288,128], index: 1, kind: input, shape index: {}]   ;;  %s4012_s0 = inlined_call_operand.vmem [shape: bf16[680,288], index: 0, kind: input, shape index: {}]   ;;  %s4013_s2 = inlined_call_operand.vmem [shape: f32[1,128], index: 2, kind: input, shape index: {}]   ;;  %s4014_s3 = inlined_call_operand.vmem [shape: f32[680,128], index: 3, kind: output, shape index: {}]  }
   0x1   :  { %v2613_v0 = vld [vmem:[%s4011_s1 + $0x38] sm:$0xff]  ;;  %v2670_v1 = vld [vmem:[%s4011_s1 + $0x88] sm:$0xff]  ;;  %v2612_v3 = vld [vmem:[%s4011_s1 + $0x30] sm:$0xff] }
   0x2   :  { %v2621_v2 = vld [vmem:[%s4011_s1 + $0x78] sm:$0xff]  ;;  %1103 = vmatpush.bf16.msra.mxu0 %v2613_v0  ;;  %2624 = vmatpush.bf16.msra.mxu3 %v2613_v0  ;;  %v2681_v4 = vld [vmem:[%s4011_s1 + $0x80] sm:$0xff]  ;;  %v2620_v5 = vld [vmem:[%s4011_s1 + $0x70] sm:$0xff] }
   0x3   :  { %1555 = vmatpush.bf16.msra.mxu2 %v2670_v1  ;;  %1326 = vmatpush.bf16.msra.mxu1 %v2621_v2  ;;  %v1871_v6 = vld [vmem:[%s4012_s0 + $0x8] sm:$0xf]  ;;  %v2482_v7 = vld [vmem:[%s4012_s0 + $0x10] sm:$0xf0]  ;;  %v2610_v11 = vld [vmem:[%s4011_s1 + $0x20] sm:$0xff] }
   0x4   :  { %v1872_v8 = vor.u32 %v2482_v7, %v1871_v6  ;;  %v2611_v9 = vld [vmem:[%s4011_s1 + $0x28] sm:$0xff]  ;;  %v2618_v12 = vld [vmem:[%s4011_s1 + $0x60] sm:$0xff]  ;;  %v2609_v13 = vld [vmem:[%s4011_s1 + $0x18] sm:$0xff] }
   0x5   :  { %v2619_v10 = vld [vmem:[%s4011_s1 + $0x68] sm:$0xff]  ;;  %v2617_v14 = vld [vmem:[%s4011_s1 + $0x58] sm:$0xff]  ;;  %v2608_v15 = vld [vmem:[%s4011_s1 + $0x10] sm:$0xff] }
   0x6   :  { %1104 = vmatpush.bf16.msra.mxu0 %v2612_v3  ;;  %2625 = vmatpush.bf16.msra.mxu3 %v2612_v3  ;;  %v2616_v16 = vld [vmem:[%s4011_s1 + $0x50] sm:$0xff]  ;;  %v1883_v17 = vld [vmem:[%s4012_s0 + $0x20] sm:$0xf]  ;;  %v2485_v18 = vld [vmem:[%s4012_s0 + $0x28] sm:$0xf0] }
   0x7   :  { %1556 = vmatpush.bf16.msra.mxu2 %v2681_v4  ;;  %1327 = vmatpush.bf16.msra.mxu1 %v2620_v5  ;;  %v1884_v19 = vor.u32 %v2485_v18, %v1883_v17  ;;  %v2607_v20 = vld [vmem:[%s4011_s1 + $0x8] sm:$0xff]  ;;  %v2606_v22 = vld [vmem:[%s4011_s1] sm:$0xff]  ;;  %v1865_v29 = vld [vmem:[%s4012_s0 + $0xc] sm:$0xf0] }
   0x8   :  { %v2615_v21 = vld [vmem:[%s4011_s1 + $0x48] sm:$0xff]  ;;  %v2614_v23 = vld [vmem:[%s4011_s1 + $0x40] sm:$0xff]  ;;  %v1895_v33 = vld [vmem:[%s4012_s0 + $0x38] sm:$0xf] }
   0x9   :  { %v1863_v24 = vld [vmem:[%s4012_s0] sm:$0xf]  ;;  %v2481_v25 = vld [vmem:[%s4012_s0 + $0x8] sm:$0xf0]  ;;  %v2480_v28 = vld [vmem:[%s4012_s0 + $0x4] sm:$0xf] }
   0xa   :  { %2437 = vmatmul.msk.bf16.vlgmr.msra.gmra.mxu2 %vm973_vm0, %v1872_v8  ;;  %1105 = vmatpush.bf16.msra.mxu0 %v2611_v9  ;;  %v2247_v26 = vld [vmem:[%s4012_s0 + $0x300] sm:$0xf]  ;;  %v2577_v27 = vld [vmem:[%s4012_s0 + $0x308] sm:$0xf0]  ;;  %v1864_v30 = vor.u32 %v2481_v25, %v1863_v24  ;;  %v1868_v32 = vor.u32 %v2480_v28, %v1865_v29  ;;  %v2488_v34 = vld [vmem:[%s4012_s0 + $0x40] sm:$0xf0] }
   0xb   :  { %2626 = vmatpush.bf16.msra.mxu3 %v2611_v9  ;;  %1328 = vmatpush.bf16.msra.mxu1 %v2619_v10  ;;  %v2248_v31 = vor.u32 %v2577_v27, %v2247_v26  ;;  %v1896_v35 = vor.u32 %v2488_v34, %v1895_v33  ;;  %v1875_v36 = vld [vmem:[%s4012_s0 + $0x18] sm:$0xf]  ;;  %v2484_v37 = vld [vmem:[%s4012_s0 + $0x20] sm:$0xf0]  ;;  %v2483_v40 = vld [vmem:[%s4012_s0 + $0x1c] sm:$0xf] }
   0xc   :  { %v2259_v38 = vld [vmem:[%s4012_s0 + $0x318] sm:$0xf]  ;;  %v2580_v39 = vld [vmem:[%s4012_s0 + $0x320] sm:$0xf0]  ;;  %v1877_v41 = vld [vmem:[%s4012_s0 + $0x24] sm:$0xf0]  ;;  %v1876_v42 = vor.u32 %v2484_v37, %v1875_v36 }
   0xd   :  { %v2260_v43 = vor.u32 %v2580_v39, %v2259_v38  ;;  %v1880_v44 = vor.u32 %v2483_v40, %v1877_v41  ;;  %v1907_v45 = vld [vmem:[%s4012_s0 + $0x50] sm:$0xf]  ;;  %v2491_v46 = vld [vmem:[%s4012_s0 + $0x58] sm:$0xf0]  ;;  %v2486_v52 = vld [vmem:[%s4012_s0 + $0x34] sm:$0xf] }
   0xe   :  { %1106 = vmatpush.bf16.msra.mxu0 %v2610_v11  ;;  %v1908_v47 = vor.u32 %v2491_v46, %v1907_v45  ;;  %v1887_v48 = vld [vmem:[%s4012_s0 + $0x30] sm:$0xf]  ;;  %v2487_v49 = vld [vmem:[%s4012_s0 + $0x38] sm:$0xf0]  ;;  %v1889_v53 = vld [vmem:[%s4012_s0 + $0x3c] sm:$0xf0] }
   0xf   :  { %2627 = vmatpush.bf16.msra.mxu3 %v2610_v11  ;;  %1329 = vmatpush.bf16.msra.mxu1 %v2618_v12  ;;  %v2271_v50 = vld [vmem:[%s4012_s0 + $0x330] sm:$0xf]  ;;  %v2583_v51 = vld [vmem:[%s4012_s0 + $0x338] sm:$0xf0]  ;;  %v1888_v54 = vor.u32 %v2487_v49, %v1887_v48  ;;  %v1892_v56 = vor.u32 %v2486_v52, %v1889_v53  ;;  %v1919_v57 = vld [vmem:[%s4012_s0 + $0x68] sm:$0xf] }
  0x10   :  { %v2272_v55 = vor.u32 %v2583_v51, %v2271_v50  ;;  %v2494_v58 = vld [vmem:[%s4012_s0 + $0x70] sm:$0xf0]  ;;  %v1899_v60 = vld [vmem:[%s4012_s0 + $0x48] sm:$0xf]  ;;  %v2489_v0 = vld [vmem:[%s4012_s0 + $0x4c] sm:$0xf] }
  0x11   :  { %v1920_v59 = vor.u32 %v2494_v58, %v1919_v57  ;;  %v2490_v61 = vld [vmem:[%s4012_s0 + $0x50] sm:$0xf0]  ;;  %v2283_v62 = vld [vmem:[%s4012_s0 + $0x348] sm:$0xf]  ;;  %v2497_v6 = vld [vmem:[%s4012_s0 + $0x88] sm:$0xf0] }
  0x12   :  { %1107 = vmatpush.bf16.msra.mxu0 %v2609_v13  ;;  %v2586_v63 = vld [vmem:[%s4012_s0 + $0x350] sm:$0xf0]  ;;  %v1911_v8 = vld [vmem:[%s4012_s0 + $0x60] sm:$0xf]  ;;  %v2493_v9 = vld [vmem:[%s4012_s0 + $0x68] sm:$0xf0] }
  0x13   :  { %2628 = vmatpush.bf16.msra.mxu3 %v2609_v13  ;;  %1330 = vmatpush.bf16.msra.mxu1 %v2617_v14  ;;  %v2284_v3 = vor.u32 %v2586_v63, %v2283_v62  ;;  %v2589_v11 = vld [vmem:[%s4012_s0 + $0x368] sm:$0xf0]  ;;  %v1913_v13 = vld [vmem:[%s4012_s0 + $0x6c] sm:$0xf0]  ;;  %v1943_v17 = vld [vmem:[%s4012_s0 + $0x98] sm:$0xf] }
  0x14   :  { %v2500_v18 = vld [vmem:[%s4012_s0 + $0xa0] sm:$0xf0]  ;;  %v2495_v24 = vld [vmem:[%s4012_s0 + $0x7c] sm:$0xf]  ;;  %v1925_v25 = vld [vmem:[%s4012_s0 + $0x84] sm:$0xf0] }
  0x15   :  { %v1928_v28 = vor.u32 %v2495_v24, %v1925_v25  ;;  %v1955_v29 = vld [vmem:[%s4012_s0 + $0xb0] sm:$0xf]  ;;  %v2499_v33 = vld [vmem:[%s4012_s0 + $0x98] sm:$0xf0]  ;;  %v2498_v36 = vld [vmem:[%s4012_s0 + $0x94] sm:$0xf] }
  0x16   :  { %1108 = vmatpush.bf16.msra.mxu0 %v2608_v15  ;;  %v2319_v34 = vld [vmem:[%s4012_s0 + $0x390] sm:$0xf]  ;;  %v1937_v37 = vld [vmem:[%s4012_s0 + $0x9c] sm:$0xf0]  ;;  %v1967_v41 = vld [vmem:[%s4012_s0 + $0xc8] sm:$0xf] }
  0x17   :  { %2629 = vmatpush.bf16.msra.mxu3 %v2608_v15  ;;  %1331 = vmatpush.bf16.msra.mxu1 %v2616_v16  ;;  %v1940_v40 = vor.u32 %v2498_v36, %v1937_v37  ;;  %v2502_v45 = vld [vmem:[%s4012_s0 + $0xb0] sm:$0xf0]  ;;  %v2331_v46 = vld [vmem:[%s4012_s0 + $0x3a8] sm:$0xf]  ;;  %v2501_v48 = vld [vmem:[%s4012_s0 + $0xac] sm:$0xf] }
  0x18   :  { %v1949_v49 = vld [vmem:[%s4012_s0 + $0xb4] sm:$0xf0]  ;;  %v2942_v58 = vld [vmem:[%s4013_s2] ss:$0 sm:$0xff]  ;;  %v2601_v62 = vld [vmem:[%s4012_s0 + $0x3c8] sm:$0xf0] }
  0x19   :  { %v1952_v53 = vor.u32 %v2501_v48, %v1949_v49  ;;  %v2504_v63 = vld [vmem:[%s4012_s0 + $0xc4] sm:$0xf]  ;;  %v2507_v24 = vld [vmem:[%s4012_s0 + $0xdc] sm:$0xf]  ;;  %v1973_v25 = vld [vmem:[%s4012_s0 + $0xe4] sm:$0xf0] }
  0x1a   :  { %2438 = vmatmul.msk.bf16.gmra.mxu2 %vm973_vm0, %v1884_v19  ;;  %1109 = vmatpush.bf16.msra.mxu0 %v2607_v20  ;;  %v1944_v19 = vor.u32 %v2500_v18, %v1943_v17  ;;  %v2003_v36 = vld [vmem:[%s4012_s0 + $0x110] sm:$0xf]  ;;  %v2515_v37 = vld [vmem:[%s4012_s0 + $0x118] sm:$0xf0] }
  0x1b   :  { %2630 = vmatpush.bf16.msra.mxu3 %v2607_v20  ;;  %1332 = vmatpush.bf16.msra.mxu1 %v2615_v21  ;;  %v1923_v20 = vld [vmem:[%s4012_s0 + $0x78] sm:$0xf] }
  0x1e   :  { %1110 = vmatpush.bf16.msra.mxu0 %v2606_v22 }
  0x1f   :  { %2631 = vmatpush.bf16.msra.mxu3 %v2606_v22  ;;  %1333 = vmatpush.bf16.msra.mxu1 %v2614_v23  ;;  %v2307_v22 = vld [vmem:[%s4012_s0 + $0x378] sm:$0xf] }
  0x21   :  { %1111 = vmatmul.bf16.vlgmr.msra.gmra.mxu0 %v1864_v30  ;;  %v2503_v30 = vld [vmem:[%s4012_s0 + $0xb8] sm:$0xf0] }
  0x22   :  { %1271 = vmatmul.bf16.vlgmr.msra.gmra.mxu3 %v2248_v31  ;;  %1334 = vmatmul.bf16.vlgmr.msra.gmra.mxu1 %v1868_v32  ;;  %v1956_v31 = vor.u32 %v2503_v30, %v1955_v29  ;;  %v1935_v32 = vld [vmem:[%s4012_s0 + $0x90] sm:$0xf] }
  0x23   :  { %2632 = vmatpush.bf16.msrb.mxu3 %v2621_v2  ;;  %v1900_v2 = vor.u32 %v2490_v61, %v1899_v60  ;;  %v1936_v38 = vor.u32 %v2499_v33, %v1935_v32  ;;  %v2505_v60 = vld [vmem:[%s4012_s0 + $0xc8] sm:$0xf0]  ;;  %v2343_v61 = vld [vmem:[%s4012_s0 + $0x3c0] sm:$0xf] }
  0x27   :  { %2633 = vmatpush.bf16.msrb.mxu3 %v2620_v5  ;;  %v1931_v5 = vld [vmem:[%s4012_s0 + $0x80] sm:$0xf] }
  0x28   :  { %v1932_v7 = vor.u32 %v2497_v6, %v1931_v5 }
  0x2a   :  { %2439 = vmatmul.msk.bf16.gmra.mxu2 %vm973_vm0, %v1896_v35  ;;  %v2595_v35 = vld [vmem:[%s4012_s0 + $0x398] sm:$0xf0] }
  0x2b   :  { %2634 = vmatpush.bf16.msrb.mxu3 %v2619_v10  ;;  %v2295_v10 = vld [vmem:[%s4012_s0 + $0x360] sm:$0xf]  ;;  %v2320_v39 = vor.u32 %v2595_v35, %v2319_v34 }
  0x2c   :  { %v2296_v15 = vor.u32 %v2589_v11, %v2295_v10  ;;  %v1991_v10 = vld [vmem:[%s4012_s0 + $0xf8] sm:$0xf]  ;;  %v2512_v11 = vld [vmem:[%s4012_s0 + $0x100] sm:$0xf0] }
  0x2f   :  { %2635 = vmatpush.bf16.msrb.mxu3 %v2618_v12  ;;  %v2492_v12 = vld [vmem:[%s4012_s0 + $0x64] sm:$0xf] }
  0x31   :  { %1116 = vmatmul.bf16.gmra.mxu0 %v1876_v42  ;;  %v2506_v42 = vld [vmem:[%s4012_s0 + $0xd0] sm:$0xf0] }
  0x32   :  { %1276 = vmatmul.bf16.gmra.mxu3 %v2260_v43  ;;  %1339 = vmatmul.bf16.gmra.mxu1 %v1880_v44  ;;  %v1968_v43 = vor.u32 %v2506_v42, %v1967_v41  ;;  %v1947_v44 = vld [vmem:[%s4012_s0 + $0xa8] sm:$0xf]  ;;  %v2004_v41 = vor.u32 %v2515_v37, %v2003_v36  ;;  %v2007_v36 = vld [vmem:[%s4012_s0 + $0x120] sm:$0xf]  ;;  %v2517_v37 = vld [vmem:[%s4012_s0 + $0x128] sm:$0xf0] }
  0x33   :  { %2636 = vmatpush.bf16.msrb.mxu3 %v2617_v14  ;;  %v1912_v14 = vor.u32 %v2493_v9, %v1911_v8  ;;  %v1948_v51 = vor.u32 %v2502_v45, %v1947_v44  ;;  %v3016_v44 = vld [vmem:[%s4012_s0 + $0x3f0] sm:$0xff] }
  0x34   :  { %v647_v48 = vunpack.c.l.b16 %v3016_v44 }
  0x37   :  { %2637 = vmatpush.bf16.msrb.mxu3 %v2616_v16  ;;  %v1916_v16 = vor.u32 %v2492_v12, %v1913_v13 }
  0x3a   :  { %2440 = vmatmul.msk.bf16.gmra.mxu2 %vm973_vm0, %v1908_v47  ;;  %v2598_v47 = vld [vmem:[%s4012_s0 + $0x3b0] sm:$0xf0] }
  0x3b   :  { %2638 = vmatpush.bf16.msrb.mxu3 %v2615_v21  ;;  %v2496_v21 = vld [vmem:[%s4012_s0 + $0x80] sm:$0xf0]  ;;  %v2332_v52 = vor.u32 %v2598_v47, %v2331_v46  ;;  %v1983_v46 = vld [vmem:[%s4012_s0 + $0xf0] sm:$0xf]  ;;  %v2511_v47 = vld [vmem:[%s4012_s0 + $0xf8] sm:$0xf0] }
  0x3c   :  { %v1924_v26 = vor.u32 %v2496_v21, %v1923_v20  ;;  %v2508_v20 = vld [vmem:[%s4012_s0 + $0xe0] sm:$0xf0]  ;;  %v2355_v21 = vld [vmem:[%s4012_s0 + $0x3d8] sm:$0xf] }
  0x3f   :  { %2639 = vmatpush.bf16.msrb.mxu3 %v2614_v23  ;;  %v2592_v23 = vld [vmem:[%s4012_s0 + $0x380] sm:$0xf0] }
  0x40   :  { %v2308_v27 = vor.u32 %v2592_v23, %v2307_v22  ;;  %v2604_v23 = vld [vmem:[%s4012_s0 + $0x3e0] sm:$0xf0] }
  0x41   :  { %1121 = vmatmul.bf16.gmra.mxu0 %v1888_v54  ;;  %v1979_v54 = vld [vmem:[%s4012_s0 + $0xe0] sm:$0xf]  ;;  %v2356_v30 = vor.u32 %v2604_v23, %v2355_v21 }
  0x42   :  { %1281 = vmatmul.bf16.gmra.mxu3 %v2272_v55  ;;  %1344 = vmatmul.bf16.gmra.mxu1 %v1892_v56  ;;  %v2509_v55 = vld [vmem:[%s4012_s0 + $0xe8] sm:$0xf0] }
  0x43   :  { %2640 = vmatpush.bf16.msra.mxu3 %v2670_v1  ;;  %v1901_v1 = vld [vmem:[%s4012_s0 + $0x54] sm:$0xf0]  ;;  %v1980_v57 = vor.u32 %v2509_v55, %v1979_v54  ;;  %v1984_v54 = vor.u32 %v2511_v47, %v1983_v46  ;;  %v2008_v47 = vor.u32 %v2517_v37, %v2007_v36 }
  0x44   :  { %v2285_v37 = vld [vmem:[%s4012_s0 + $0x354] sm:$0xf0] }
  0x47   :  { %2641 = vmatpush.bf16.msra.mxu3 %v2681_v4  ;;  %v1904_v4 = vor.u32 %v2489_v0, %v1901_v1  ;;  %v1961_v0 = vld [vmem:[%s4012_s0 + $0xcc] sm:$0xf0] }
  0x48   :  { %v1964_v5 = vor.u32 %v2504_v63, %v1961_v0  ;;  %v2015_v63 = vld [vmem:[%s4012_s0 + $0x128] sm:$0xf]  ;;  %v2518_v0 = vld [vmem:[%s4012_s0 + $0x130] sm:$0xf0] }
  0x4a   :  { %2441 = vmatmul.msk.bf16.gmra.mxu2 %vm973_vm0, %v1920_v59  ;;  %v1959_v59 = vld [vmem:[%s4012_s0 + $0xc0] sm:$0xf] }
  0x51   :  { %1126 = vmatmul.bf16.gmra.mxu0 %v1900_v2  ;;  %v1960_v2 = vor.u32 %v2505_v60, %v1959_v59 }
  0x52   :  { %1286 = vmatmul.bf16.gmra.mxu3 %v2284_v3  ;;  %1349 = vmatmul.bf16.gmra.mxu1 %v1904_v4  ;;  %v2344_v4 = vor.u32 %v2601_v62, %v2343_v61 }
  0x5a   :  { %2442 = vmatmul.msk.bf16.gmra.mxu2 %vm973_vm0, %v1932_v7 }
  0x61   :  { %1131 = vmatmul.bf16.gmra.mxu0 %v1912_v14 }
  0x62   :  { %1291 = vmatmul.bf16.gmra.mxu3 %v2296_v15  ;;  %1354 = vmatmul.bf16.gmra.mxu1 %v1916_v16  ;;  %v1992_v15 = vor.u32 %v2512_v11, %v1991_v10  ;;  %v2576_v10 = vld [vmem:[%s4012_s0 + $0x304] sm:$0xf] }
  0x6a   :  { %2443 = vmatmul.msk.bf16.gmra.mxu2 %vm973_vm0, %v1944_v19  ;;  %v1971_v19 = vld [vmem:[%s4012_s0 + $0xd8] sm:$0xf] }
  0x71   :  { %1136 = vmatmul.bf16.gmra.mxu0 %v1924_v26 }
  0x72   :  { %1296 = vmatmul.bf16.gmra.mxu3 %v2308_v27  ;;  %1359 = vmatmul.bf16.gmra.mxu1 %v1928_v28  ;;  %v1972_v28 = vor.u32 %v2508_v20, %v1971_v19 }
  0x7a   :  { %2444 = vmatmul.msk.bf16.gmra.mxu2 %vm973_vm0, %v1956_v31  ;;  %v1976_v31 = vor.u32 %v2507_v24, %v1973_v25 }
  0x81   :  { %1141 = vmatmul.bf16.gmra.mxu0 %v1936_v38 }
  0x82   :  { %1301 = vmatmul.bf16.gmra.mxu3 %v2320_v39  ;;  %1364 = vmatmul.bf16.gmra.mxu1 %v1940_v40 }
  0x8a   :  { %2445 = vmatmul.msk.bf16.gmra.mxu2 %vm973_vm0, %v1968_v43 }
  0x8d   :  { %v1558_v50 = vpop.f32.mrf.mxu2 }
  0x91   :  { %1146 = vmatmul.bf16.gmra.mxu0 %v1948_v51  ;;  %v1985_v51 = vld [vmem:[%s4012_s0 + $0xfc] sm:$0xf0] }
  0x92   :  { %1306 = vmatmul.bf16.gmra.mxu3 %v2332_v52  ;;  %1369 = vmatmul.bf16.gmra.mxu1 %v1952_v53 }
  0x95   :  { %v1560_v56 = vpop.f32.mrf.mxu2 }
  0x9a   :  { %2446 = vmatmul.msk.bf16.gmra.mxu2 %vm973_vm0, %v1980_v57 }
  0x9d   :  { %v1563_v1 = vpop.f32.mrf.mxu2 }
  0x9e   :  { %v1112_v3 = vpop.f32.mrf.mxu0 }
  0x9f   :  { %v1113_v6 = vadd.f32 %v2942_v58, %v1112_v3  ;;  %v1335_v7 = vpop.f32.mrf.mxu1 }
  0xa1   :  { %v1336_v8 = vadd.f32 %v1335_v7, %v1113_v6  ;;  %1151 = vmatmul.bf16.gmra.mxu0 %v1960_v2 }
  0xa2   :  { %1311 = vmatmul.bf16.gmra.mxu3 %v2344_v4  ;;  %1374 = vmatmul.bf16.gmra.mxu1 %v1964_v5  ;;  %v2016_v4 = vor.u32 %v2518_v0, %v2015_v63 }
  0xa3   :  { %v1559_v9 = vadd.f32 %v1558_v50, %v1336_v8  ;;  %v2510_v50 = vld [vmem:[%s4012_s0 + $0xf4] sm:$0xf]  ;;  %v1995_v8 = vld [vmem:[%s4012_s0 + $0x108] sm:$0xf] }
  0xa4   :  { %v1988_v57 = vor.u32 %v2510_v50, %v1985_v51 }
  0xa5   :  { %1772 = vst [vmem:[%s4014_s3] sm:$0xff] %v1559_v9  ;;  %v2973_v12 = vpop.f32.mrf.mxu3  ;;  %v1565_v13 = vpop.f32.mrf.mxu2  ;;  %v2514_v9 = vld [vmem:[%s4012_s0 + $0x110] sm:$0xf0] }
  0xa6   :  { %v1114_v14 = vpop.f32.mrf.mxu0 }
  0xa7   :  { %v1115_v16 = vadd.f32 %v2942_v58, %v1114_v14  ;;  %v1337_v17 = vpop.f32.mrf.mxu1  ;;  %v2513_v14 = vld [vmem:[%s4012_s0 + $0x10c] sm:$0xf] }
  0xa9   :  { %v1338_v18 = vadd.f32 %v1337_v17, %v1115_v16 }
  0xaa   :  { %2447 = vmatmul.msk.bf16.gmra.mxu2 %vm973_vm0, %v1992_v15  ;;  %v1997_v15 = vld [vmem:[%s4012_s0 + $0x114] sm:$0xf0] }
  0xab   :  { %v1561_v22 = vadd.f32 %v1560_v56, %v1338_v18  ;;  %v776_v56 = vpack.c.b16 %v647_v48, %v647_v48  ;;  %v1996_v18 = vor.u32 %v2514_v9, %v1995_v8  ;;  %v2000_v21 = vor.u32 %v2513_v14, %v1997_v15  ;;  %v2519_v8 = vld [vmem:[%s4012_s0 + $0x13c] sm:$0xf]  ;;  %v2021_v9 = vld [vmem:[%s4012_s0 + $0x144] sm:$0xf0] }
  0xad   :  { %1773 = vst [vmem:[%s4014_s3 + $0x8] sm:$0xff] %v1561_v22  ;;  %v2998_v26 = vpop.f32.mrf.mxu3  ;;  %v1568_v27 = vpop.f32.mrf.mxu2 }
  0xae   :  { %v1117_v29 = vpop.f32.mrf.mxu0 }
  0xaf   :  { %v1118_v32 = vadd.f32 %v2942_v58, %v1117_v29  ;;  %v1340_v33 = vpop.f32.mrf.mxu1 }
  0xb1   :  { %v1341_v34 = vadd.f32 %v1340_v33, %v1118_v32  ;;  %1156 = vmatmul.bf16.gmra.mxu0 %v1972_v28  ;;  %v2521_v28 = vld [vmem:[%s4012_s0 + $0x148] sm:$0xf0] }
  0xb2   :  { %1316 = vmatmul.bf16.gmra.mxu3 %v2356_v30  ;;  %1379 = vmatmul.bf16.gmra.mxu1 %v1976_v31 }
  0xb3   :  { %v1564_v35 = vadd.f32 %v1563_v1, %v1341_v34 }
  0xb5   :  { %1774 = vst [vmem:[%s4014_s3 + $0x10] sm:$0xff] %v1564_v35  ;;  %v3010_v38 = vpop.f32.mrf.mxu3  ;;  %v1570_v39 = vpop.f32.mrf.mxu2 }
  0xb6   :  { %v1119_v40 = vpop.f32.mrf.mxu0 }
  0xb7   :  { %v1120_v42 = vadd.f32 %v2942_v58, %v1119_v40  ;;  %v1342_v43 = vpop.f32.mrf.mxu1 }
  0xb9   :  { %v1343_v45 = vadd.f32 %v1342_v43, %v1120_v42  ;;  %v2516_v42 = vld [vmem:[%s4012_s0 + $0x124] sm:$0xf]  ;;  %v2009_v43 = vld [vmem:[%s4012_s0 + $0x12c] sm:$0xf0] }
  0xba   :  { %2448 = vmatmul.msk.bf16.gmra.mxu2 %vm973_vm0, %v2004_v41  ;;  %v2261_v41 = vld [vmem:[%s4012_s0 + $0x324] sm:$0xf0]  ;;  %v2012_v50 = vor.u32 %v2516_v42, %v2009_v43 }
  0xbb   :  { %v1566_v49 = vadd.f32 %v1565_v13, %v1343_v45  ;;  %v2249_v13 = vld [vmem:[%s4012_s0 + $0x30c] sm:$0xf0] }
  0xbc   :  { %v2252_v20 = vor.u32 %v2576_v10, %v2249_v13 }
  0xbd   :  { %1775 = vst [vmem:[%s4014_s3 + $0x18] sm:$0xff] %v1566_v49  ;;  %v3035_v52 = vpop.f32.mrf.mxu3  ;;  %v1573_v53 = vpop.f32.mrf.mxu2 }
  0xbe   :  { %v1122_v55 = vpop.f32.mrf.mxu0 }
  0xbf   :  { %v1123_v59 = vadd.f32 %v2942_v58, %v1122_v55  ;;  %v1345_v60 = vpop.f32.mrf.mxu1 }
  0xc1   :  { %v1346_v61 = vadd.f32 %v1345_v60, %v1123_v59  ;;  %1161 = vmatmul.bf16.gmra.mxu0 %v1984_v54 }
  0xc2   :  { %1321 = vmatmul.bf16.gmra.mxu3 %v776_v56  ;;  %1384 = vmatmul.bf16.gmra.mxu1 %v1988_v57  ;;  %v2039_v56 = vld [vmem:[%s4012_s0 + $0x158] sm:$0xf]  ;;  %v2524_v57 = vld [vmem:[%s4012_s0 + $0x160] sm:$0xf0] }
  0xc3   :  { %v1569_v62 = vadd.f32 %v1568_v27, %v1346_v61  ;;  %v2027_v27 = vld [vmem:[%s4012_s0 + $0x140] sm:$0xf] }
  0xc4   :  { %v2028_v32 = vor.u32 %v2521_v28, %v2027_v27 }
  0xc5   :  { %1776 = vst [vmem:[%s4014_s3 + $0x20] sm:$0xff] %v1569_v62  ;;  %v3047_v1 = vpop.f32.mrf.mxu3  ;;  %v1575_v2 = vpop.f32.mrf.mxu2  ;;  %v2040_v62 = vor.u32 %v2524_v57, %v2039_v56 }
  0xc6   :  { %v1124_v3 = vpop.f32.mrf.mxu0 }
  0xc7   :  { %v1125_v5 = vadd.f32 %v2942_v58, %v1124_v3  ;;  %v1347_v6 = vpop.f32.mrf.mxu1  ;;  %v2019_v3 = vld [vmem:[%s4012_s0 + $0x138] sm:$0xf] }
  0xc9   :  { %v1348_v7 = vadd.f32 %v1347_v6, %v1125_v5  ;;  %v2582_v5 = vld [vmem:[%s4012_s0 + $0x334] sm:$0xf] }
  0xca   :  { %2449 = vmatmul.msk.bf16.gmra.mxu2 %vm973_vm0, %v2016_v4  ;;  %v2520_v4 = vld [vmem:[%s4012_s0 + $0x140] sm:$0xf0] }
  0xcb   :  { %v1571_v11 = vadd.f32 %v1570_v39, %v1348_v7  ;;  %v2579_v39 = vld [vmem:[%s4012_s0 + $0x31c] sm:$0xf]  ;;  %v2273_v7 = vld [vmem:[%s4012_s0 + $0x33c] sm:$0xf0]  ;;  %v2020_v13 = vor.u32 %v2520_v4, %v2019_v3  ;;  %v2526_v3 = vld [vmem:[%s4012_s0 + $0x170] sm:$0xf0] }
  0xcc   :  { %v2264_v49 = vor.u32 %v2579_v39, %v2261_v41  ;;  %v2276_v15 = vor.u32 %v2582_v5, %v2273_v7  ;;  %v2522_v39 = vld [vmem:[%s4012_s0 + $0x154] sm:$0xf]  ;;  %v2588_v4 = vld [vmem:[%s4012_s0 + $0x364] sm:$0xf]  ;;  %v2525_v7 = vld [vmem:[%s4012_s0 + $0x16c] sm:$0xf] }
  0xcd   :  { %1777 = vst [vmem:[%s4014_s3 + $0x28] sm:$0xff] %v1571_v11  ;;  %v3072_v16 = vpop.f32.mrf.mxu3  ;;  %v1578_v17 = vpop.f32.mrf.mxu2 }
  0xce   :  { %v1127_v19 = vpop.f32.mrf.mxu0 }
  0xcf   :  { %v1128_v22 = vadd.f32 %v2942_v58, %v1127_v19  ;;  %v1350_v23 = vpop.f32.mrf.mxu1 }
  0xd1   :  { %v1351_v24 = vadd.f32 %v1350_v23, %v1128_v22  ;;  %1166 = vmatmul.bf16.gmra.mxu0 %v1996_v18  ;;  %v2051_v22 = vld [vmem:[%s4012_s0 + $0x170] sm:$0xf]  ;;  %v2527_v23 = vld [vmem:[%s4012_s0 + $0x178] sm:$0xf0] }
  0xd2   :  { %1494 = vmatmul.bf16.vlgmr.msrb.gmra.mxu3 %v2252_v20  ;;  %1389 = vmatmul.bf16.gmra.mxu1 %v2000_v21  ;;  %v2052_v28 = vor.u32 %v2527_v23, %v2051_v22  ;;  %v2075_v22 = vld [vmem:[%s4012_s0 + $0x1a0] sm:$0xf]  ;;  %v2533_v23 = vld [vmem:[%s4012_s0 + $0x1a8] sm:$0xf0] }
  0xd3   :  { %v1574_v25 = vadd.f32 %v1573_v53, %v1351_v24 }
  0xd5   :  { %1778 = vst [vmem:[%s4014_s3 + $0x30] sm:$0xff] %v1574_v25  ;;  %v3084_v29 = vpop.f32.mrf.mxu3  ;;  %v1580_v30 = vpop.f32.mrf.mxu2 }
  0xd6   :  { %v1129_v31 = vpop.f32.mrf.mxu0 }
  0xd7   :  { %v1130_v33 = vadd.f32 %v2942_v58, %v1129_v31  ;;  %v1352_v34 = vpop.f32.mrf.mxu1 }
  0xd9   :  { %v1353_v35 = vadd.f32 %v1352_v34, %v1130_v33  ;;  %v2031_v33 = vld [vmem:[%s4012_s0 + $0x150] sm:$0xf]  ;;  %v2523_v34 = vld [vmem:[%s4012_s0 + $0x158] sm:$0xf0] }
  0xda   :  { %2450 = vmatmul.msk.bf16.gmra.mxu2 %vm973_vm0, %v2028_v32  ;;  %v2032_v43 = vor.u32 %v2523_v34, %v2031_v33  ;;  %v2055_v34 = vld [vmem:[%s4012_s0 + $0x180] sm:$0xf] }
  0xdb   :  { %v1576_v40 = vadd.f32 %v1575_v2, %v1353_v35  ;;  %v2585_v35 = vld [vmem:[%s4012_s0 + $0x34c] sm:$0xf] }
  0xdd   :  { %1779 = vst [vmem:[%s4014_s3 + $0x38] sm:$0xff] %v1576_v40  ;;  %v3109_v45 = vpop.f32.mrf.mxu3  ;;  %v1583_v46 = vpop.f32.mrf.mxu2  ;;  %v2033_v40 = vld [vmem:[%s4012_s0 + $0x15c] sm:$0xf0] }
  0xde   :  { %v1132_v48 = vpop.f32.mrf.mxu0 }
  0xdf   :  { %v1133_v51 = vadd.f32 %v2942_v58, %v1132_v48  ;;  %v1355_v53 = vpop.f32.mrf.mxu1  ;;  %v2036_v48 = vor.u32 %v2522_v39, %v2033_v40  ;;  %v2309_v39 = vld [vmem:[%s4012_s0 + $0x384] sm:$0xf0]  ;;  %v2528_v40 = vld [vmem:[%s4012_s0 + $0x184] sm:$0xf] }
  0xe1   :  { %v1356_v54 = vadd.f32 %v1355_v53, %v1133_v51  ;;  %1171 = vmatmul.bf16.gmra.mxu0 %v2008_v47  ;;  %v2288_v47 = vor.u32 %v2585_v35, %v2285_v37  ;;  %v2529_v35 = vld [vmem:[%s4012_s0 + $0x188] sm:$0xf0] }
  0xe2   :  { %1499 = vmatmul.bf16.gmra.mxu3 %v2264_v49  ;;  %1394 = vmatmul.bf16.gmra.mxu1 %v2012_v50 }
  0xe3   :  { %v1579_v55 = vadd.f32 %v1578_v17, %v1356_v54  ;;  %v2024_v17 = vor.u32 %v2519_v8, %v2021_v9  ;;  %v2063_v54 = vld [vmem:[%s4012_s0 + $0x188] sm:$0xf]  ;;  %v2045_v8 = vld [vmem:[%s4012_s0 + $0x174] sm:$0xf0] }
  0xe5   :  { %1780 = vst [vmem:[%s4014_s3 + $0x40] sm:$0xff] %v1579_v55  ;;  %v3121_v59 = vpop.f32.mrf.mxu3  ;;  %v1585_v60 = vpop.f32.mrf.mxu2  ;;  %v2530_v55 = vld [vmem:[%s4012_s0 + $0x190] sm:$0xf0] }
  0xe6   :  { %v1134_v61 = vpop.f32.mrf.mxu0 }
  0xe7   :  { %v1135_v63 = vadd.f32 %v2942_v58, %v1134_v61  ;;  %v1357_v0 = vpop.f32.mrf.mxu1  ;;  %v2064_v61 = vor.u32 %v2530_v55, %v2063_v54 }
  0xe9   :  { %v1358_v2 = vadd.f32 %v1357_v0, %v1135_v63 }
  0xea   :  { %2451 = vmatmul.msk.bf16.gmra.mxu2 %vm973_vm0, %v2040_v62 }
  0xeb   :  { %v1581_v6 = vadd.f32 %v1580_v30, %v1358_v2  ;;  %v2043_v2 = vld [vmem:[%s4012_s0 + $0x168] sm:$0xf] }
  0xed   :  { %1781 = vst [vmem:[%s4014_s3 + $0x48] sm:$0xff] %v1581_v6  ;;  %v3146_v10 = vpop.f32.mrf.mxu3  ;;  %v1588_v11 = vpop.f32.mrf.mxu2  ;;  %v2297_v6 = vld [vmem:[%s4012_s0 + $0x36c] sm:$0xf0] }
  0xee   :  { %v1137_v14 = vpop.f32.mrf.mxu0 }
  0xef   :  { %v1138_v18 = vadd.f32 %v2942_v58, %v1137_v14  ;;  %v1360_v19 = vpop.f32.mrf.mxu1 }
  0xf1   :  { %v1361_v20 = vadd.f32 %v1360_v19, %v1138_v18  ;;  %1176 = vmatmul.bf16.gmra.mxu0 %v2020_v13  ;;  %v2044_v13 = vor.u32 %v2526_v3, %v2043_v2 }
  0xf2   :  { %1504 = vmatmul.bf16.gmra.mxu3 %v2276_v15  ;;  %1399 = vmatmul.bf16.gmra.mxu1 %v2024_v17  ;;  %v2300_v15 = vor.u32 %v2588_v4, %v2297_v6  ;;  %v2048_v17 = vor.u32 %v2525_v7, %v2045_v8  ;;  %v2532_v6 = vld [vmem:[%s4012_s0 + $0x1a0] sm:$0xf0]  ;;  %v2594_v7 = vld [vmem:[%s4012_s0 + $0x394] sm:$0xf] }
  0xf3   :  { %v1584_v21 = vadd.f32 %v1583_v46, %v1361_v20 }
  0xf5   :  { %1782 = vst [vmem:[%s4014_s3 + $0x50] sm:$0xff] %v1584_v21  ;;  %v3158_v24 = vpop.f32.mrf.mxu3  ;;  %v1590_v25 = vpop.f32.mrf.mxu2 }
  0xf6   :  { %v1139_v27 = vpop.f32.mrf.mxu0 }
  0xf7   :  { %v1140_v30 = vadd.f32 %v2942_v58, %v1139_v27  ;;  %v1362_v31 = vpop.f32.mrf.mxu1 }
  0xf9   :  { %v1363_v32 = vadd.f32 %v1362_v31, %v1140_v30  ;;  %v2076_v30 = vor.u32 %v2533_v23, %v2075_v22 }
  0xfa   :  { %2452 = vmatmul.msk.bf16.gmra.mxu2 %vm973_vm0, %v2052_v28 }
  0xfb   :  { %v1586_v36 = vadd.f32 %v1585_v60, %v1363_v32 }
  0xfd   :  { %1783 = vst [vmem:[%s4014_s3 + $0x58] sm:$0xff] %v1586_v36  ;;  %v3183_v41 = vpop.f32.mrf.mxu3  ;;  %v1593_v42 = vpop.f32.mrf.mxu2  ;;  %v2591_v36 = vld [vmem:[%s4012_s0 + $0x37c] sm:$0xf] }
  0xfe   :  { %v1142_v46 = vpop.f32.mrf.mxu0 }
  0xff   :  { %v1143_v49 = vadd.f32 %v2942_v58, %v1142_v46  ;;  %v1365_v50 = vpop.f32.mrf.mxu1 }
 0x101   :  { %v1366_v51 = vadd.f32 %v1365_v50, %v1143_v49  ;;  %1181 = vmatmul.bf16.gmra.mxu0 %v2032_v43  ;;  %v2312_v49 = vor.u32 %v2591_v36, %v2309_v39 }
 0x102   :  { %1509 = vmatmul.bf16.gmra.mxu3 %v2288_v47  ;;  %1404 = vmatmul.bf16.gmra.mxu1 %v2036_v48  ;;  %v2056_v47 = vor.u32 %v2529_v35, %v2055_v34 }
 0x103   :  { %v1589_v53 = vadd.f32 %v1588_v11, %v1366_v51 }
 0x105   :  { %1784 = vst [vmem:[%s4014_s3 + $0x60] sm:$0xff] %v1589_v53  ;;  %v3195_v56 = vpop.f32.mrf.mxu3  ;;  %v1595_v57 = vpop.f32.mrf.mxu2 }
 0x106   :  { %v1144_v60 = vpop.f32.mrf.mxu0 }
 0x107   :  { %v1145_v62 = vadd.f32 %v2942_v58, %v1144_v60  ;;  %v1367_v63 = vpop.f32.mrf.mxu1  ;;  %v2536_v60 = vld [vmem:[%s4012_s0 + $0x1c0] sm:$0xf0] }
 0x109   :  { %v1368_v0 = vadd.f32 %v1367_v63, %v1145_v62 }
 0x10a   :  { %2453 = vmatmul.msk.bf16.gmra.mxu2 %vm973_vm0, %v2064_v61 }
 0x10b   :  { %v1591_v5 = vadd.f32 %v1590_v25, %v1368_v0 }
 0x10d   :  { %1785 = vst [vmem:[%s4014_s3 + $0x68] sm:$0xff] %v1591_v5  ;;  %v3220_v9 = vpop.f32.mrf.mxu3  ;;  %v1598_v11 = vpop.f32.mrf.mxu2  ;;  %v2067_v5 = vld [vmem:[%s4012_s0 + $0x198] sm:$0xf] }
 0x10e   :  { %v1147_v14 = vpop.f32.mrf.mxu0 }
 0x10f   :  { %v1148_v18 = vadd.f32 %v2942_v58, %v1147_v14  ;;  %v1370_v19 = vpop.f32.mrf.mxu1  ;;  %v2069_v14 = vld [vmem:[%s4012_s0 + $0x1a4] sm:$0xf0] }
 0x111   :  { %v1371_v20 = vadd.f32 %v1370_v19, %v1148_v18  ;;  %1186 = vmatmul.bf16.gmra.mxu0 %v2044_v13  ;;  %v2531_v13 = vld [vmem:[%s4012_s0 + $0x19c] sm:$0xf]  ;;  %v2068_v18 = vor.u32 %v2532_v6, %v2067_v5 }
 0x112   :  { %1514 = vmatmul.bf16.gmra.mxu3 %v2300_v15  ;;  %1409 = vmatmul.bf16.gmra.mxu1 %v2048_v17 }
 0x113   :  { %v1594_v21 = vadd.f32 %v1593_v42, %v1371_v20  ;;  %v2057_v42 = vld [vmem:[%s4012_s0 + $0x18c] sm:$0xf0] }
 0x114   :  { %v2060_v50 = vor.u32 %v2528_v40, %v2057_v42  ;;  %v2079_v40 = vld [vmem:[%s4012_s0 + $0x1b0] sm:$0xf]  ;;  %v2535_v42 = vld [vmem:[%s4012_s0 + $0x1b8] sm:$0xf0] }
 0x115   :  { %1786 = vst [vmem:[%s4014_s3 + $0x70] sm:$0xff] %v1594_v21  ;;  %v3232_v25 = vpop.f32.mrf.mxu3  ;;  %v1600_v27 = vpop.f32.mrf.mxu2  ;;  %v2072_v21 = vor.u32 %v2531_v13, %v2069_v14 }
 0x116   :  { %v1149_v28 = vpop.f32.mrf.mxu0 }
 0x117   :  { %v1150_v31 = vadd.f32 %v2942_v58, %v1149_v28  ;;  %v1372_v32 = vpop.f32.mrf.mxu1 }
 0x119   :  { %v1373_v33 = vadd.f32 %v1372_v32, %v1150_v31  ;;  %v2539_v31 = vld [vmem:[%s4012_s0 + $0x1d8] sm:$0xf0] }
 0x11a   :  { %2454 = vmatmul.msk.bf16.gmra.mxu2 %vm973_vm0, %v2076_v30  ;;  %v2099_v30 = vld [vmem:[%s4012_s0 + $0x1d0] sm:$0xf] }
 0x11b   :  { %v1596_v37 = vadd.f32 %v1595_v57, %v1373_v33  ;;  %v2087_v57 = vld [vmem:[%s4012_s0 + $0x1b8] sm:$0xf]  ;;  %v2100_v35 = vor.u32 %v2539_v31, %v2099_v30 }
 0x11c   :  { %v2088_v0 = vor.u32 %v2536_v60, %v2087_v57 }
 0x11d   :  { %1787 = vst [vmem:[%s4014_s3 + $0x78] sm:$0xff] %v1596_v37  ;;  %v3257_v43 = vpop.f32.mrf.mxu3  ;;  %v1603_v46 = vpop.f32.mrf.mxu2 }
 0x11e   :  { %v1152_v48 = vpop.f32.mrf.mxu0 }
 0x11f   :  { %v1153_v51 = vadd.f32 %v2942_v58, %v1152_v48  ;;  %v1375_v53 = vpop.f32.mrf.mxu1  ;;  %v2333_v48 = vld [vmem:[%s4012_s0 + $0x3b4] sm:$0xf0] }
 0x121   :  { %v1376_v54 = vadd.f32 %v1375_v53, %v1153_v51  ;;  %1191 = vmatmul.bf16.gmra.mxu0 %v2056_v47 }
 0x122   :  { %1519 = vmatmul.bf16.gmra.mxu3 %v2312_v49  ;;  %1414 = vmatmul.bf16.gmra.mxu1 %v2060_v50  ;;  %v2534_v49 = vld [vmem:[%s4012_s0 + $0x1b4] sm:$0xf]  ;;  %v2081_v50 = vld [vmem:[%s4012_s0 + $0x1bc] sm:$0xf0] }
 0x123   :  { %v1599_v55 = vadd.f32 %v1598_v11, %v1376_v54  ;;  %v2321_v11 = vld [vmem:[%s4012_s0 + $0x39c] sm:$0xf0]  ;;  %v2080_v54 = vor.u32 %v2535_v42, %v2079_v40  ;;  %v2084_v60 = vor.u32 %v2534_v49, %v2081_v50  ;;  %v2545_v42 = vld [vmem:[%s4012_s0 + $0x208] sm:$0xf0] }
 0x124   :  { %v2324_v20 = vor.u32 %v2594_v7, %v2321_v11  ;;  %v2123_v40 = vld [vmem:[%s4012_s0 + $0x200] sm:$0xf] }
 0x125   :  { %1788 = vst [vmem:[%s4014_s3 + $0x80] sm:$0xff] %v1599_v55  ;;  %v3269_v61 = vpop.f32.mrf.mxu3  ;;  %v1605_v62 = vpop.f32.mrf.mxu2 }
 0x126   :  { %v1154_v63 = vpop.f32.mrf.mxu0 }
 0x127   :  { %v1155_v2 = vadd.f32 %v2942_v58, %v1154_v63  ;;  %v1377_v3 = vpop.f32.mrf.mxu1 }
 0x129   :  { %v1378_v4 = vadd.f32 %v1377_v3, %v1155_v2  ;;  %v2111_v3 = vld [vmem:[%s4012_s0 + $0x1e8] sm:$0xf] }
 0x12a   :  { %2455 = vmatmul.msk.bf16.gmra.mxu2 %vm973_vm0, %v2088_v0 }
 0x12b   :  { %v1601_v8 = vadd.f32 %v1600_v27, %v1378_v4  ;;  %v2542_v4 = vld [vmem:[%s4012_s0 + $0x1f0] sm:$0xf0] }
 0x12d   :  { %1789 = vst [vmem:[%s4014_s3 + $0x88] sm:$0xff] %v1601_v8  ;;  %v3294_v15 = vpop.f32.mrf.mxu3  ;;  %v1608_v17 = vpop.f32.mrf.mxu2  ;;  %v2112_v8 = vor.u32 %v2542_v4, %v2111_v3  ;;  %v2105_v3 = vld [vmem:[%s4012_s0 + $0x1ec] sm:$0xf0]  ;;  %v1275_v4 = vadd.f32 %v2942_v58, %v2998_v26 }
 0x12e   :  { %v1157_v19 = vpop.f32.mrf.mxu0 }
 0x12f   :  { %v1158_v22 = vadd.f32 %v2942_v58, %v1157_v19  ;;  %v1380_v23 = vpop.f32.mrf.mxu1  ;;  %v2600_v19 = vld [vmem:[%s4012_s0 + $0x3c4] sm:$0xf] }
 0x131   :  { %v1381_v27 = vadd.f32 %v1380_v23, %v1158_v22  ;;  %1196 = vmatmul.bf16.gmra.mxu0 %v2068_v18  ;;  %v2538_v18 = vld [vmem:[%s4012_s0 + $0x1d0] sm:$0xf0]  ;;  %v2537_v22 = vld [vmem:[%s4012_s0 + $0x1cc] sm:$0xf]  ;;  %v2093_v23 = vld [vmem:[%s4012_s0 + $0x1d4] sm:$0xf0] }
 0x132   :  { %1524 = vmatmul.bf16.gmra.mxu3 %v2324_v20  ;;  %1419 = vmatmul.bf16.gmra.mxu1 %v2072_v21  ;;  %v2345_v21 = vld [vmem:[%s4012_s0 + $0x3cc] sm:$0xf0] }
 0x133   :  { %v1604_v28 = vadd.f32 %v1603_v46, %v1381_v27  ;;  %v2597_v46 = vld [vmem:[%s4012_s0 + $0x3ac] sm:$0xf] }
 0x134   :  { %v2336_v57 = vor.u32 %v2597_v46, %v2333_v48  ;;  %v1273_v46 = vadd.f32 %v2942_v58, %v2973_v12  ;;  %v2103_v12 = vld [vmem:[%s4012_s0 + $0x1e0] sm:$0xf] }
 0x135   :  { %1790 = vst [vmem:[%s4014_s3 + $0x90] sm:$0xff] %v1604_v28  ;;  %v3306_v32 = vpop.f32.mrf.mxu3  ;;  %v1610_v33 = vpop.f32.mrf.mxu2 }
 0x136   :  { %v1159_v34 = vpop.f32.mrf.mxu0 }
 0x137   :  { %v1160_v36 = vadd.f32 %v2942_v58, %v1159_v34  ;;  %v1382_v37 = vpop.f32.mrf.mxu1  ;;  %v2096_v34 = vor.u32 %v2537_v22, %v2093_v23  ;;  %v2548_v22 = vld [vmem:[%s4012_s0 + $0x220] sm:$0xf0]  ;;  %v1278_v23 = vadd.f32 %v2942_v58, %v3010_v38  ;;  %v2115_v38 = vld [vmem:[%s4012_s0 + $0x1f8] sm:$0xf] }
 0x139   :  { %v1383_v39 = vadd.f32 %v1382_v37, %v1160_v36 }
 0x13a   :  { %2456 = vmatmul.msk.bf16.gmra.mxu2 %vm973_vm0, %v2100_v35 }
 0x13b   :  { %v1606_v47 = vadd.f32 %v1605_v62, %v1383_v39 }
 0x13d   :  { %1791 = vst [vmem:[%s4014_s3 + $0x98] sm:$0xff] %v1606_v47  ;;  %v3331_v51 = vpop.f32.mrf.mxu3  ;;  %v1613_v53 = vpop.f32.mrf.mxu2 }
 0x13e   :  { %v1162_v55 = vpop.f32.mrf.mxu0 }
 0x13f   :  { %v1163_v62 = vadd.f32 %v2942_v58, %v1162_v55  ;;  %v1385_v63 = vpop.f32.mrf.mxu1 }
 0x141   :  { %v1386_v0 = vadd.f32 %v1385_v63, %v1163_v62  ;;  %1201 = vmatmul.bf16.gmra.mxu0 %v2080_v54  ;;  %v2603_v62 = vld [vmem:[%s4012_s0 + $0x3dc] sm:$0xf] }
 0x142   :  { %1529 = vmatmul.bf16.gmra.mxu3 %v2336_v57  ;;  %1424 = vmatmul.bf16.gmra.mxu1 %v2084_v60  ;;  %v2541_v60 = vld [vmem:[%s4012_s0 + $0x1e8] sm:$0xf0] }
 0x143   :  { %v1609_v2 = vadd.f32 %v1608_v17, %v1386_v0  ;;  %v2091_v17 = vld [vmem:[%s4012_s0 + $0x1c8] sm:$0xf] }
 0x144   :  { %v2092_v30 = vor.u32 %v2538_v18, %v2091_v17  ;;  %v2357_v0 = vld [vmem:[%s4012_s0 + $0x3e4] sm:$0xf0] }
 0x145   :  { %1792 = vst [vmem:[%s4014_s3 + $0xa0] sm:$0xff] %v1609_v2  ;;  %v3343_v5 = vpop.f32.mrf.mxu3  ;;  %v1615_v6 = vpop.f32.mrf.mxu2  ;;  %v2540_v2 = vld [vmem:[%s4012_s0 + $0x1e4] sm:$0xf] }
 0x146   :  { %v1164_v7 = vpop.f32.mrf.mxu0  ;;  %v2108_v17 = vor.u32 %v2540_v2, %v2105_v3  ;;  %v1283_v2 = vadd.f32 %v2942_v58, %v3047_v1  ;;  %v2127_v1 = vld [vmem:[%s4012_s0 + $0x210] sm:$0xf] }
 0x147   :  { %v1165_v11 = vadd.f32 %v2942_v58, %v1164_v7  ;;  %v1387_v13 = vpop.f32.mrf.mxu1 }
 0x149   :  { %v1388_v14 = vadd.f32 %v1387_v13, %v1165_v11 }
 0x14a   :  { %2457 = vmatmul.msk.bf16.gmra.mxu2 %vm973_vm0, %v2112_v8  ;;  %v2104_v8 = vor.u32 %v2541_v60, %v2103_v12 }
 0x14b   :  { %v1611_v20 = vadd.f32 %v1610_v33, %v1388_v14  ;;  %v2348_v33 = vor.u32 %v2600_v19, %v2345_v21  ;;  %v2360_v14 = vor.u32 %v2603_v62, %v2357_v0  ;;  %v2135_v21 = vld [vmem:[%s4012_s0 + $0x218] sm:$0xf]  ;;  %v2551_v0 = vld [vmem:[%s4012_s0 + $0x238] sm:$0xf0] }
 0x14d   :  { %1793 = vst [vmem:[%s4014_s3 + $0xa8] sm:$0xff] %v1611_v20  ;;  %v1324_v27 = vpop.f32.mrf.mxu3  ;;  %v1618_v28 = vpop.f32.mrf.mxu2 }
 0x14e   :  { %v1167_v31 = vpop.f32.mrf.mxu0 }
 0x14f   :  { %v1168_v35 = vadd.f32 %v2942_v58, %v1167_v31  ;;  %v1390_v36 = vpop.f32.mrf.mxu1 }
 0x151   :  { %v1391_v37 = vadd.f32 %v1390_v36, %v1168_v35  ;;  %1206 = vmatmul.bf16.gmra.mxu0 %v2092_v30 }
 0x152   :  { %1534 = vmatmul.bf16.gmra.mxu3 %v2348_v33  ;;  %1429 = vmatmul.bf16.gmra.mxu1 %v2096_v34  ;;  %v2136_v33 = vor.u32 %v2548_v22, %v2135_v21  ;;  %v2546_v21 = vld [vmem:[%s4012_s0 + $0x214] sm:$0xf]  ;;  %v2129_v22 = vld [vmem:[%s4012_s0 + $0x21c] sm:$0xf0] }
 0x153   :  { %v1614_v39 = vadd.f32 %v1613_v53, %v1391_v37  ;;  %v2124_v53 = vor.u32 %v2545_v42, %v2123_v40  ;;  %v648_v37 = vunpack.c.h.b16 %v3016_v44  ;;  %v2543_v42 = vld [vmem:[%s4012_s0 + $0x1fc] sm:$0xf]  ;;  %v1280_v44 = vadd.f32 %v2942_v58, %v3035_v52 }
 0x155   :  { %1794 = vst [vmem:[%s4014_s3 + $0xb0] sm:$0xff] %v1614_v39  ;;  %v1495_v47 = vpop.f32.mrf.mxu3  ;;  %v1620_v48 = vpop.f32.mrf.mxu2  ;;  %v2544_v39 = vld [vmem:[%s4012_s0 + $0x200] sm:$0xf0] }
 0x156   :  { %v3380_v49 = vadd.f32 %v1495_v47, %v1273_v46  ;;  %v1169_v50 = vpop.f32.mrf.mxu0  ;;  %v2117_v46 = vld [vmem:[%s4012_s0 + $0x204] sm:$0xf0] }
 0x157   :  { %v1170_v54 = vadd.f32 %v2942_v58, %v1169_v50  ;;  %v1392_v55 = vpop.f32.mrf.mxu1 }
 0x159   :  { %v1393_v57 = vadd.f32 %v1392_v55, %v1170_v54  ;;  %v777_v55 = vpack.c.b16 %v648_v37, %v648_v37 }
 0x15a   :  { %2458 = vmatmul.msk.bf16.gmra.mxu2 %vm973_vm0, %v2124_v53  ;;  %v2116_v53 = vor.u32 %v2544_v39, %v2115_v38 }
 0x15b   :  { %v1616_v63 = vadd.f32 %v1615_v6, %v1393_v57  ;;  %v2120_v57 = vor.u32 %v2543_v42, %v2117_v46  ;;  %v2554_v42 = vld [vmem:[%s4012_s0 + $0x250] sm:$0xf0]  ;;  %v1288_v46 = vadd.f32 %v2942_v58, %v3084_v29  ;;  %v2139_v29 = vld [vmem:[%s4012_s0 + $0x228] sm:$0xf] }
 0x15d   :  { %1795 = vst [vmem:[%s4014_s3 + $0xb8] sm:$0xff] %v1616_v63  ;;  %v1497_v6 = vpop.f32.mrf.mxu3  ;;  %v1623_v7 = vpop.f32.mrf.mxu2  ;;  %v2147_v63 = vld [vmem:[%s4012_s0 + $0x230] sm:$0xf] }
 0x15e   :  { %v3407_v11 = vadd.f32 %v1497_v6, %v1275_v4  ;;  %v1172_v13 = vpop.f32.mrf.mxu0 }
 0x15f   :  { %v1173_v18 = vadd.f32 %v2942_v58, %v1172_v13  ;;  %v1395_v19 = vpop.f32.mrf.mxu1 }
 0x161   :  { %v1396_v20 = vadd.f32 %v1395_v19, %v1173_v18  ;;  %1211 = vmatmul.bf16.gmra.mxu0 %v2104_v8  ;;  %v2148_v8 = vor.u32 %v2551_v0, %v2147_v63  ;;  %v2547_v18 = vld [vmem:[%s4012_s0 + $0x218] sm:$0xf0]  ;;  %v2279_v19 = vld [vmem:[%s4012_s0 + $0x338] sm:$0xf]  ;;  %v2549_v0 = vld [vmem:[%s4012_s0 + $0x22c] sm:$0xf] }
 0x162   :  { %1539 = vmatmul.bf16.gmra.mxu3 %v2360_v14  ;;  %1434 = vmatmul.bf16.gmra.mxu1 %v2108_v17  ;;  %v2587_v63 = vld [vmem:[%s4012_s0 + $0x358] sm:$0xf0] }
 0x163   :  { %v1619_v26 = vadd.f32 %v1618_v28, %v1396_v20 }
 0x165   :  { %1796 = vst [vmem:[%s4014_s3 + $0xc0] sm:$0xff] %v1619_v26  ;;  %v1500_v27 = vpop.f32.mrf.mxu3  ;;  %v1625_v30 = vpop.f32.mrf.mxu2  ;;  %v2584_v26 = vld [vmem:[%s4012_s0 + $0x340] sm:$0xf0] }
 0x166   :  { %v3421_v31 = vadd.f32 %v1500_v27, %v1278_v23  ;;  %v1174_v28 = vpop.f32.mrf.mxu0  ;;  %v1285_v23 = vadd.f32 %v2942_v58, %v3072_v16 }
 0x167   :  { %v1175_v34 = vadd.f32 %v2942_v58, %v1174_v28  ;;  %v1397_v35 = vpop.f32.mrf.mxu1  ;;  %v2128_v28 = vor.u32 %v2547_v18, %v2127_v1 }
 0x169   :  { %v1398_v36 = vadd.f32 %v1397_v35, %v1175_v34  ;;  %v2280_v35 = vor.u32 %v2584_v26, %v2279_v19  ;;  %v2171_v26 = vld [vmem:[%s4012_s0 + $0x260] sm:$0xf] }
 0x16a   :  { %2459 = vmatmul.msk.bf16.gmra.mxu2 %vm973_vm0, %v2136_v33 }
 0x16b   :  { %v1621_v40 = vadd.f32 %v1620_v48, %v1398_v36  ;;  %v2132_v36 = vor.u32 %v2546_v21, %v2129_v22  ;;  %v2557_v21 = vld [vmem:[%s4012_s0 + $0x268] sm:$0xf0]  ;;  %v3539_v22 = vld [vmem:[%s4013_s2] ss:$0 sm:$0xff] }
 0x16d   :  { %1797 = vst [vmem:[%s4014_s3 + $0xc8] sm:$0xff] %v1621_v40  ;;  %v1502_v47 = vpop.f32.mrf.mxu3  ;;  %v1628_v50 = vpop.f32.mrf.mxu2  ;;  %v2159_v40 = vld [vmem:[%s4012_s0 + $0x248] sm:$0xf] }
 0x16e   :  { %v3443_v54 = vadd.f32 %v1502_v47, %v1280_v44  ;;  %v1177_v48 = vpop.f32.mrf.mxu0 }
 0x16f   :  { %v1178_v12 = vadd.f32 %v2942_v58, %v1177_v48  ;;  %v1400_v60 = vpop.f32.mrf.mxu1  ;;  %v2160_v48 = vor.u32 %v2554_v42, %v2159_v40  ;;  %v2590_v40 = vld [vmem:[%s4012_s0 + $0x370] sm:$0xf0]  ;;  %v2552_v42 = vld [vmem:[%s4012_s0 + $0x244] sm:$0xf] }
 0x171   :  { %v1401_v62 = vadd.f32 %v1400_v60, %v1178_v12  ;;  %1216 = vmatmul.bf16.gmra.mxu0 %v2116_v53  ;;  %v2550_v60 = vld [vmem:[%s4012_s0 + $0x230] sm:$0xf0] }
 0x172   :  { %1544 = vmatmul.bf16.gmra.mxu3 %v777_v55  ;;  %1439 = vmatmul.bf16.gmra.mxu1 %v2120_v57 }
 0x173   :  { %v1624_v52 = vadd.f32 %v1623_v7, %v1401_v62  ;;  %v2291_v62 = vld [vmem:[%s4012_s0 + $0x350] sm:$0xf] }
 0x175   :  { %1798 = vst [vmem:[%s4014_s3 + $0xd0] sm:$0xff] %v1624_v52  ;;  %v1505_v3 = vpop.f32.mrf.mxu3  ;;  %v1630_v4 = vpop.f32.mrf.mxu2 }
 0x176   :  { %v3457_v6 = vadd.f32 %v1505_v3, %v1283_v2  ;;  %v1179_v7 = vpop.f32.mrf.mxu0  ;;  %v2141_v2 = vld [vmem:[%s4012_s0 + $0x234] sm:$0xf0]  ;;  %v1290_v3 = vadd.f32 %v2942_v58, %v3109_v45 }
 0x177   :  { %v1180_v13 = vadd.f32 %v2942_v58, %v1179_v7  ;;  %v1402_v14 = vpop.f32.mrf.mxu1  ;;  %v2144_v1 = vor.u32 %v2549_v0, %v2141_v2  ;;  %v2560_v0 = vld [vmem:[%s4012_s0 + $0x280] sm:$0xf0]  ;;  %v1298_v2 = vadd.f32 %v3539_v22, %v3158_v24  ;;  %v2163_v24 = vld [vmem:[%s4012_s0 + $0x258] sm:$0xf] }
 0x179   :  { %v1403_v17 = vadd.f32 %v1402_v14, %v1180_v13 }
 0x17a   :  { %2460 = vmatmul.msk.bf16.gmra.mxu2 %vm973_vm0, %v2148_v8  ;;  %v2140_v8 = vor.u32 %v2550_v60, %v2139_v29 }
 0x17b   :  { %v1626_v20 = vadd.f32 %v1625_v30, %v1403_v17  ;;  %v2292_v17 = vor.u32 %v2587_v63, %v2291_v62  ;;  %v2183_v63 = vld [vmem:[%s4012_s0 + $0x278] sm:$0xf] }
 0x17d   :  { %1799 = vst [vmem:[%s4014_s3 + $0xd8] sm:$0xff] %v1626_v20  ;;  %v1507_v27 = vpop.f32.mrf.mxu3  ;;  %v1633_v30 = vpop.f32.mrf.mxu2 }
 0x17e   :  { %v3484_v33 = vadd.f32 %v1507_v27, %v1285_v23  ;;  %v1182_v34 = vpop.f32.mrf.mxu0 }
 0x17f   :  { %v1183_v37 = vadd.f32 %v2942_v58, %v1182_v34  ;;  %v1405_v38 = vpop.f32.mrf.mxu1  ;;  %v2172_v34 = vor.u32 %v2557_v21, %v2171_v26  ;;  %v2593_v26 = vld [vmem:[%s4012_s0 + $0x388] sm:$0xf0]  ;;  %v2555_v21 = vld [vmem:[%s4012_s0 + $0x25c] sm:$0xf] }
 0x181   :  { %v1406_v39 = vadd.f32 %v1405_v38, %v1183_v37  ;;  %1221 = vmatmul.bf16.gmra.mxu0 %v2128_v28  ;;  %v2553_v38 = vld [vmem:[%s4012_s0 + $0x248] sm:$0xf0] }
 0x182   :  { %2471 = vmatmul.msk.bf16.vlgmr.msra.gmra.mxu3 %vm973_vm0, %v2280_v35  ;;  %1444 = vmatmul.bf16.gmra.mxu1 %v2132_v36 }
 0x183   :  { %v1629_v16 = vadd.f32 %v1628_v50, %v1406_v39  ;;  %v2303_v39 = vld [vmem:[%s4012_s0 + $0x368] sm:$0xf] }
 0x185   :  { %1800 = vst [vmem:[%s4014_s3 + $0xe0] sm:$0xff] %v1629_v16  ;;  %v1510_v44 = vpop.f32.mrf.mxu3  ;;  %v1635_v47 = vpop.f32.mrf.mxu2 }
 0x186   :  { %v3499_v53 = vadd.f32 %v1510_v44, %v1288_v46  ;;  %v1184_v50 = vpop.f32.mrf.mxu0  ;;  %v2153_v46 = vld [vmem:[%s4012_s0 + $0x24c] sm:$0xf0]  ;;  %v1295_v44 = vadd.f32 %v3539_v22, %v3146_v10 }
 0x187   :  { %v1185_v55 = vadd.f32 %v2942_v58, %v1184_v50  ;;  %v1407_v57 = vpop.f32.mrf.mxu1  ;;  %v2156_v29 = vor.u32 %v2552_v42, %v2153_v46  ;;  %v2563_v42 = vld [vmem:[%s4012_s0 + $0x298] sm:$0xf0]  ;;  %v1303_v46 = vadd.f32 %v3539_v22, %v3195_v56  ;;  %v2175_v56 = vld [vmem:[%s4012_s0 + $0x270] sm:$0xf] }
 0x189   :  { %v1408_v12 = vadd.f32 %v1407_v57, %v1185_v55 }
 0x18a   :  { %2461 = vmatmul.msk.bf16.gmra.mxu2 %vm973_vm0, %v2160_v48 }
 0x18b   :  { %v1631_v52 = vadd.f32 %v1630_v4, %v1408_v12  ;;  %v2304_v12 = vor.u32 %v2590_v40, %v2303_v39  ;;  %v2195_v40 = vld [vmem:[%s4012_s0 + $0x290] sm:$0xf] }
 0x18d   :  { %1801 = vst [vmem:[%s4014_s3 + $0xe8] sm:$0xff] %v1631_v52  ;;  %v1512_v4 = vpop.f32.mrf.mxu3  ;;  %v1638_v7 = vpop.f32.mrf.mxu2 }
 0x18e   :  { %v3526_v13 = vadd.f32 %v1512_v4, %v1290_v3  ;;  %v1187_v14 = vpop.f32.mrf.mxu0 }
 0x18f   :  { %v1188_v18 = vadd.f32 %v2942_v58, %v1187_v14  ;;  %v1410_v19 = vpop.f32.mrf.mxu1  ;;  %v1293_v58 = vadd.f32 %v3539_v22, %v3121_v59  ;;  %v2151_v59 = vld [vmem:[%s4012_s0 + $0x240] sm:$0xf]  ;;  %v2184_v14 = vor.u32 %v2560_v0, %v2183_v63  ;;  %v2596_v63 = vld [vmem:[%s4012_s0 + $0x3a0] sm:$0xf0]  ;;  %v2558_v0 = vld [vmem:[%s4012_s0 + $0x274] sm:$0xf] }
 0x190   :  { %v2152_v48 = vor.u32 %v2553_v38, %v2151_v59 }
 0x191   :  { %v1411_v20 = vadd.f32 %v1410_v19, %v1188_v18  ;;  %1226 = vmatmul.bf16.gmra.mxu0 %v2140_v8  ;;  %v2556_v19 = vld [vmem:[%s4012_s0 + $0x260] sm:$0xf0] }
 0x192   :  { %2472 = vmatmul.msk.bf16.gmra.mxu3 %vm973_vm0, %v2292_v17  ;;  %1449 = vmatmul.bf16.gmra.mxu1 %v2144_v1 }
 0x193   :  { %v1634_v45 = vadd.f32 %v1633_v30, %v1411_v20  ;;  %v2315_v20 = vld [vmem:[%s4012_s0 + $0x380] sm:$0xf] }
 0x195   :  { %1802 = vst [vmem:[%s4014_s3 + $0xf0] sm:$0xff] %v1634_v45  ;;  %v1515_v23 = vpop.f32.mrf.mxu3  ;;  %v1640_v27 = vpop.f32.mrf.mxu2 }
 0x196   :  { %v3546_v30 = vadd.f32 %v1515_v23, %v1293_v58  ;;  %v1189_v28 = vpop.f32.mrf.mxu0  ;;  %v2165_v58 = vld [vmem:[%s4012_s0 + $0x264] sm:$0xf0]  ;;  %v1300_v23 = vadd.f32 %v3539_v22, %v3183_v41 }
 0x197   :  { %v1190_v35 = vadd.f32 %v3539_v22, %v1189_v28  ;;  %v1412_v36 = vpop.f32.mrf.mxu1  ;;  %v2168_v59 = vor.u32 %v2555_v21, %v2165_v58  ;;  %v2566_v21 = vld [vmem:[%s4012_s0 + $0x2b0] sm:$0xf0]  ;;  %v1308_v58 = vadd.f32 %v3539_v22, %v3232_v25  ;;  %v2187_v25 = vld [vmem:[%s4012_s0 + $0x288] sm:$0xf] }
 0x199   :  { %v1413_v37 = vadd.f32 %v1412_v36, %v1190_v35 }
 0x19a   :  { %2462 = vmatmul.msk.bf16.gmra.mxu2 %vm973_vm0, %v2172_v34  ;;  %v2164_v34 = vor.u32 %v2556_v19, %v2163_v24 }
 0x19b   :  { %v1636_v16 = vadd.f32 %v1635_v47, %v1413_v37  ;;  %v2316_v37 = vor.u32 %v2593_v26, %v2315_v20  ;;  %v2207_v26 = vld [vmem:[%s4012_s0 + $0x2a8] sm:$0xf] }
 0x19d   :  { %1803 = vst [vmem:[%s4014_s3 + $0xf8] sm:$0xff] %v1636_v16  ;;  %v1517_v47 = vpop.f32.mrf.mxu3  ;;  %v1643_v50 = vpop.f32.mrf.mxu2 }
 0x19e   :  { %v3573_v55 = vadd.f32 %v1517_v47, %v1295_v44  ;;  %v1192_v57 = vpop.f32.mrf.mxu0 }
 0x19f   :  { %v1193_v60 = vadd.f32 %v3539_v22, %v1192_v57  ;;  %v1415_v62 = vpop.f32.mrf.mxu1  ;;  %v2196_v57 = vor.u32 %v2563_v42, %v2195_v40  ;;  %v2599_v40 = vld [vmem:[%s4012_s0 + $0x3b8] sm:$0xf0]  ;;  %v2561_v42 = vld [vmem:[%s4012_s0 + $0x28c] sm:$0xf] }
 0x1a1   :  { %v1416_v52 = vadd.f32 %v1415_v62, %v1193_v60  ;;  %1231 = vmatmul.bf16.gmra.mxu0 %v2152_v48  ;;  %v2559_v62 = vld [vmem:[%s4012_s0 + $0x278] sm:$0xf0] }
 0x1a2   :  { %2473 = vmatmul.msk.bf16.gmra.mxu3 %vm973_vm0, %v2304_v12  ;;  %1454 = vmatmul.bf16.gmra.mxu1 %v2156_v29 }
 0x1a3   :  { %v1639_v10 = vadd.f32 %v1638_v7, %v1416_v52  ;;  %v2327_v52 = vld [vmem:[%s4012_s0 + $0x398] sm:$0xf] }
 0x1a5   :  { %1804 = vst [vmem:[%s4014_s3 + $0x100] sm:$0xff] %v1639_v10  ;;  %v1520_v3 = vpop.f32.mrf.mxu3  ;;  %v1645_v4 = vpop.f32.mrf.mxu2 }
 0x1a6   :  { %v3588_v8 = vadd.f32 %v1520_v3, %v1298_v2  ;;  %v1194_v7 = vpop.f32.mrf.mxu0  ;;  %v2177_v2 = vld [vmem:[%s4012_s0 + $0x27c] sm:$0xf0]  ;;  %v1305_v3 = vadd.f32 %v3539_v22, %v3220_v9 }
 0x1a7   :  { %v1195_v17 = vadd.f32 %v3539_v22, %v1194_v7  ;;  %v1417_v1 = vpop.f32.mrf.mxu1  ;;  %v2180_v24 = vor.u32 %v2558_v0, %v2177_v2  ;;  %v2569_v0 = vld [vmem:[%s4012_s0 + $0x2c8] sm:$0xf0]  ;;  %v1313_v2 = vadd.f32 %v3539_v22, %v3269_v61  ;;  %v2199_v61 = vld [vmem:[%s4012_s0 + $0x2a0] sm:$0xf] }
 0x1a9   :  { %v1418_v18 = vadd.f32 %v1417_v1, %v1195_v17 }
 0x1aa   :  { %2463 = vmatmul.msk.bf16.gmra.mxu2 %vm973_vm0, %v2184_v14  ;;  %v2176_v14 = vor.u32 %v2559_v62, %v2175_v56 }
 0x1ab   :  { %v1641_v45 = vadd.f32 %v1640_v27, %v1418_v18  ;;  %v2328_v18 = vor.u32 %v2596_v63, %v2327_v52  ;;  %v2219_v63 = vld [vmem:[%s4012_s0 + $0x2c0] sm:$0xf] }
 0x1ad   :  { %1805 = vst [vmem:[%s4014_s3 + $0x108] sm:$0xff] %v1641_v45  ;;  %v1522_v27 = vpop.f32.mrf.mxu3  ;;  %v1648_v28 = vpop.f32.mrf.mxu2 }
 0x1ae   :  { %v3615_v35 = vadd.f32 %v1522_v27, %v1300_v23  ;;  %v1197_v36 = vpop.f32.mrf.mxu0 }
 0x1af   :  { %v1198_v38 = vadd.f32 %v3539_v22, %v1197_v36  ;;  %v1420_v39 = vpop.f32.mrf.mxu1  ;;  %v2208_v36 = vor.u32 %v2566_v21, %v2207_v26  ;;  %v2602_v26 = vld [vmem:[%s4012_s0 + $0x3d0] sm:$0xf0]  ;;  %v2564_v21 = vld [vmem:[%s4012_s0 + $0x2a4] sm:$0xf] }
 0x1b1   :  { %v1421_v16 = vadd.f32 %v1420_v39, %v1198_v38  ;;  %1236 = vmatmul.bf16.gmra.mxu0 %v2164_v34  ;;  %v2562_v39 = vld [vmem:[%s4012_s0 + $0x290] sm:$0xf0] }
 0x1b2   :  { %2474 = vmatmul.msk.bf16.gmra.mxu3 %vm973_vm0, %v2316_v37  ;;  %1459 = vmatmul.bf16.gmra.mxu1 %v2168_v59 }
 0x1b3   :  { %v1644_v41 = vadd.f32 %v1643_v50, %v1421_v16  ;;  %v2339_v16 = vld [vmem:[%s4012_s0 + $0x3b0] sm:$0xf] }
 0x1b5   :  { %1806 = vst [vmem:[%s4014_s3 + $0x110] sm:$0xff] %v1644_v41  ;;  %v1525_v44 = vpop.f32.mrf.mxu3  ;;  %v1650_v47 = vpop.f32.mrf.mxu2 }
 0x1b6   :  { %v3630_v48 = vadd.f32 %v1525_v44, %v1303_v46  ;;  %v1199_v50 = vpop.f32.mrf.mxu0  ;;  %v2189_v46 = vld [vmem:[%s4012_s0 + $0x294] sm:$0xf0]  ;;  %v1310_v44 = vadd.f32 %v3539_v22, %v3257_v43 }
 0x1b7   :  { %v1200_v12 = vadd.f32 %v3539_v22, %v1199_v50  ;;  %v1422_v29 = vpop.f32.mrf.mxu1  ;;  %v2192_v56 = vor.u32 %v2561_v42, %v2189_v46  ;;  %v2572_v42 = vld [vmem:[%s4012_s0 + $0x2e0] sm:$0xf0]  ;;  %v1318_v46 = vadd.f32 %v3539_v22, %v3306_v32  ;;  %v2211_v32 = vld [vmem:[%s4012_s0 + $0x2b8] sm:$0xf] }
 0x1b9   :  { %v1423_v60 = vadd.f32 %v1422_v29, %v1200_v12 }
 0x1ba   :  { %2464 = vmatmul.msk.bf16.gmra.mxu2 %vm973_vm0, %v2196_v57  ;;  %v2188_v57 = vor.u32 %v2562_v39, %v2187_v25 }
 0x1bb   :  { %v1646_v10 = vadd.f32 %v1645_v4, %v1423_v60  ;;  %v2340_v60 = vor.u32 %v2599_v40, %v2339_v16  ;;  %v2231_v40 = vld [vmem:[%s4012_s0 + $0x2d8] sm:$0xf] }
 0x1bd   :  { %1807 = vst [vmem:[%s4014_s3 + $0x118] sm:$0xff] %v1646_v10  ;;  %v1527_v4 = vpop.f32.mrf.mxu3  ;;  %v1653_v7 = vpop.f32.mrf.mxu2 }
 0x1be   :  { %v3657_v17 = vadd.f32 %v1527_v4, %v1305_v3  ;;  %v1202_v1 = vpop.f32.mrf.mxu0 }
 0x1bf   :  { %v1203_v19 = vadd.f32 %v3539_v22, %v1202_v1  ;;  %v1425_v20 = vpop.f32.mrf.mxu1  ;;  %v2220_v1 = vor.u32 %v2569_v0, %v2219_v63  ;;  %v2605_v63 = vld [vmem:[%s4012_s0 + $0x3e8] sm:$0xf0]  ;;  %v2567_v0 = vld [vmem:[%s4012_s0 + $0x2bc] sm:$0xf] }
 0x1c1   :  { %v1426_v45 = vadd.f32 %v1425_v20, %v1203_v19  ;;  %1241 = vmatmul.bf16.gmra.mxu0 %v2176_v14  ;;  %v2565_v20 = vld [vmem:[%s4012_s0 + $0x2a8] sm:$0xf0] }
 0x1c2   :  { %2475 = vmatmul.msk.bf16.gmra.mxu3 %vm973_vm0, %v2328_v18  ;;  %1464 = vmatmul.bf16.gmra.mxu1 %v2180_v24 }
 0x1c3   :  { %v1649_v9 = vadd.f32 %v1648_v28, %v1426_v45  ;;  %v2351_v45 = vld [vmem:[%s4012_s0 + $0x3c8] sm:$0xf] }
 0x1c5   :  { %1808 = vst [vmem:[%s4014_s3 + $0x120] sm:$0xff] %v1649_v9  ;;  %v1530_v23 = vpop.f32.mrf.mxu3  ;;  %v1655_v27 = vpop.f32.mrf.mxu2 }
 0x1c6   :  { %v3672_v34 = vadd.f32 %v1530_v23, %v1308_v58  ;;  %v1204_v28 = vpop.f32.mrf.mxu0  ;;  %v2201_v58 = vld [vmem:[%s4012_s0 + $0x2ac] sm:$0xf0]  ;;  %v1315_v23 = vadd.f32 %v3539_v22, %v3294_v15 }
 0x1c7   :  { %v1205_v37 = vadd.f32 %v3539_v22, %v1204_v28  ;;  %v1427_v59 = vpop.f32.mrf.mxu1  ;;  %v2204_v25 = vor.u32 %v2564_v21, %v2201_v58  ;;  %v2575_v21 = vld [vmem:[%s4012_s0 + $0x2f8] sm:$0xf0]  ;;  %v1323_v58 = vadd.f32 %v3539_v22, %v3343_v5  ;;  %v2223_v5 = vld [vmem:[%s4012_s0 + $0x2d0] sm:$0xf] }
 0x1c9   :  { %v1428_v38 = vadd.f32 %v1427_v59, %v1205_v37 }
 0x1ca   :  { %2465 = vmatmul.msk.bf16.gmra.mxu2 %vm973_vm0, %v2208_v36  ;;  %v2200_v36 = vor.u32 %v2565_v20, %v2199_v61 }
 0x1cb   :  { %v1651_v41 = vadd.f32 %v1650_v47, %v1428_v38  ;;  %v2352_v38 = vor.u32 %v2602_v26, %v2351_v45  ;;  %v2243_v26 = vld [vmem:[%s4012_s0 + $0x2f0] sm:$0xf] }
 0x1cd   :  { %1809 = vst [vmem:[%s4014_s3 + $0x128] sm:$0xff] %v1651_v41  ;;  %v1532_v47 = vpop.f32.mrf.mxu3  ;;  %v1658_v50 = vpop.f32.mrf.mxu2 }
 0x1ce   :  { %v3699_v12 = vadd.f32 %v1532_v47, %v1310_v44  ;;  %v1207_v29 = vpop.f32.mrf.mxu0 }
 0x1cf   :  { %v1208_v62 = vadd.f32 %v3539_v22, %v1207_v29  ;;  %v1430_v52 = vpop.f32.mrf.mxu1  ;;  %v2232_v29 = vor.u32 %v2572_v42, %v2231_v40  ;;  %v2570_v42 = vld [vmem:[%s4012_s0 + $0x2d4] sm:$0xf] }
 0x1d1   :  { %v1431_v10 = vadd.f32 %v1430_v52, %v1208_v62  ;;  %1246 = vmatmul.bf16.gmra.mxu0 %v2188_v57  ;;  %v2568_v52 = vld [vmem:[%s4012_s0 + $0x2c0] sm:$0xf0] }
 0x1d2   :  { %2476 = vmatmul.msk.bf16.gmra.mxu3 %vm973_vm0, %v2340_v60  ;;  %1469 = vmatmul.bf16.gmra.mxu1 %v2192_v56 }
 0x1d3   :  { %v1654_v43 = vadd.f32 %v1653_v7, %v1431_v10  ;;  %v2363_v10 = vld [vmem:[%s4012_s0 + $0x3e0] sm:$0xf] }
 0x1d5   :  { %1810 = vst [vmem:[%s4014_s3 + $0x130] sm:$0xff] %v1654_v43  ;;  %v1535_v3 = vpop.f32.mrf.mxu3  ;;  %v1660_v4 = vpop.f32.mrf.mxu2 }
 0x1d6   :  { %v3714_v14 = vadd.f32 %v1535_v3, %v1313_v2  ;;  %v1209_v7 = vpop.f32.mrf.mxu0  ;;  %v2213_v2 = vld [vmem:[%s4012_s0 + $0x2c4] sm:$0xf0]  ;;  %v1320_v3 = vadd.f32 %v3539_v22, %v3331_v51 }
 0x1d7   :  { %v1210_v18 = vadd.f32 %v3539_v22, %v1209_v7  ;;  %v1432_v24 = vpop.f32.mrf.mxu1  ;;  %v2216_v61 = vor.u32 %v2567_v0, %v2213_v2 }
 0x1d9   :  { %v1433_v19 = vadd.f32 %v1432_v24, %v1210_v18 }
 0x1da   :  { %2466 = vmatmul.msk.bf16.gmra.mxu2 %vm973_vm0, %v2220_v1  ;;  %v2212_v1 = vor.u32 %v2568_v52, %v2211_v32 }
 0x1db   :  { %v1656_v9 = vadd.f32 %v1655_v27, %v1433_v19  ;;  %v2364_v19 = vor.u32 %v2605_v63, %v2363_v10  ;;  %v2578_v63 = vld [vmem:[%s4012_s0 + $0x310] sm:$0xf0] }
 0x1dd   :  { %1811 = vst [vmem:[%s4014_s3 + $0x138] sm:$0xff] %v1656_v9  ;;  %v1537_v27 = vpop.f32.mrf.mxu3  ;;  %v1663_v28 = vpop.f32.mrf.mxu2 }
 0x1de   :  { %v3741_v37 = vadd.f32 %v1537_v27, %v1315_v23  ;;  %v1212_v59 = vpop.f32.mrf.mxu0 }
 0x1df   :  { %v1213_v39 = vadd.f32 %v3539_v22, %v1212_v59  ;;  %v1435_v16 = vpop.f32.mrf.mxu1  ;;  %v2244_v59 = vor.u32 %v2575_v21, %v2243_v26 }
 0x1e1   :  { %v1436_v41 = vadd.f32 %v1435_v16, %v1213_v39  ;;  %1251 = vmatmul.bf16.gmra.mxu0 %v2200_v36  ;;  %v184_v39 = vld [vmem:[%s4012_s0 + $0x3f8] sm:$0xf] }
 0x1e2   :  { %2477 = vmatmul.msk.bf16.gmra.mxu3 %vm973_vm0, %v2352_v38  ;;  %1474 = vmatmul.bf16.gmra.mxu1 %v2204_v25 }
 0x1e3   :  { %v1659_v15 = vadd.f32 %v1658_v50, %v1436_v41  ;;  %v2571_v41 = vld [vmem:[%s4012_s0 + $0x2d8] sm:$0xf0] }
 0x1e5   :  { %1812 = vst [vmem:[%s4014_s3 + $0x140] sm:$0xff] %v1659_v15  ;;  %v1540_v44 = vpop.f32.mrf.mxu3  ;;  %v1665_v47 = vpop.f32.mrf.mxu2  ;;  %v649_v15 = vunpack.c.l.b16 %v184_v39  ;;  %v2267_v39 = vld [vmem:[%s4012_s0 + $0x320] sm:$0xf] }
 0x1e6   :  { %v3756_v57 = vadd.f32 %v1540_v44, %v1318_v46  ;;  %v1214_v50 = vpop.f32.mrf.mxu0  ;;  %v2225_v46 = vld [vmem:[%s4012_s0 + $0x2dc] sm:$0xf0] }
 0x1e7   :  { %v1215_v60 = vadd.f32 %v3539_v22, %v1214_v50  ;;  %v1437_v56 = vpop.f32.mrf.mxu1 }
 0x1e9   :  { %v1438_v62 = vadd.f32 %v1437_v56, %v1215_v60  ;;  %v778_v56 = vpack.c.b16 %v649_v15, %v649_v15 }
 0x1ea   :  { %2467 = vmatmul.msk.bf16.gmra.mxu2 %vm973_vm0, %v2232_v29  ;;  %v2224_v29 = vor.u32 %v2571_v41, %v2223_v5 }
 0x1eb   :  { %v1661_v43 = vadd.f32 %v1660_v4, %v1438_v62  ;;  %v2228_v62 = vor.u32 %v2570_v42, %v2225_v46 }
 0x1ed   :  { %1813 = vst [vmem:[%s4014_s3 + $0x148] sm:$0xff] %v1661_v43  ;;  %v1542_v4 = vpop.f32.mrf.mxu3  ;;  %v1668_v7 = vpop.f32.mrf.mxu2  ;;  %v2255_v43 = vld [vmem:[%s4012_s0 + $0x308] sm:$0xf] }
 0x1ee   :  { %v3783_v18 = vadd.f32 %v1542_v4, %v1320_v3  ;;  %v1217_v24 = vpop.f32.mrf.mxu0 }
 0x1ef   :  { %v1218_v20 = vadd.f32 %v3539_v22, %v1217_v24  ;;  %v1440_v45 = vpop.f32.mrf.mxu1 }
 0x1f1   :  { %v1441_v9 = vadd.f32 %v1440_v45, %v1218_v20  ;;  %1256 = vmatmul.bf16.gmra.mxu0 %v2212_v1  ;;  %v2256_v1 = vor.u32 %v2578_v63, %v2255_v43  ;;  %v2573_v45 = vld [vmem:[%s4012_s0 + $0x2ec] sm:$0xf] }
 0x1f2   :  { %2478 = vmatmul.msk.bf16.gmra.mxu3 %vm973_vm0, %v2364_v19  ;;  %1479 = vmatmul.bf16.gmra.mxu1 %v2216_v61  ;;  %v2235_v61 = vld [vmem:[%s4012_s0 + $0x2e8] sm:$0xf] }
 0x1f3   :  { %v1664_v51 = vadd.f32 %v1663_v28, %v1441_v9  ;;  %v2237_v9 = vld [vmem:[%s4012_s0 + $0x2f4] sm:$0xf0] }
 0x1f5   :  { %1814 = vst [vmem:[%s4014_s3 + $0x150] sm:$0xff] %v1664_v51  ;;  %v1545_v23 = vpop.f32.mrf.mxu3  ;;  %v1670_v27 = vpop.f32.mrf.mxu2 }
 0x1f6   :  { %v3798_v36 = vadd.f32 %v1545_v23, %v1323_v58  ;;  %v1219_v28 = vpop.f32.mrf.mxu0 }
 0x1f7   :  { %v1220_v38 = vadd.f32 %v3539_v22, %v1219_v28  ;;  %v1442_v25 = vpop.f32.mrf.mxu1  ;;  %v2240_v28 = vor.u32 %v2573_v45, %v2237_v9 }
 0x1f9   :  { %v1443_v16 = vadd.f32 %v1442_v25, %v1220_v38 }
 0x1fa   :  { %2468 = vmatmul.msk.bf16.gmra.mxu2 %vm973_vm0, %v2244_v59 }
 0x1fb   :  { %v1666_v40 = vadd.f32 %v1665_v47, %v1443_v16 }
 0x1fd   :  { %1815 = vst [vmem:[%s4014_s3 + $0x158] sm:$0xff] %v1666_v40  ;;  %v1547_v44 = vpop.f32.mrf.mxu3  ;;  %v1673_v50 = vpop.f32.mrf.mxu2 }
 0x1fe   :  { %v1222_v60 = vpop.f32.mrf.mxu0 }
 0x1ff   :  { %v1223_v47 = vadd.f32 %v3539_v22, %v1222_v60  ;;  %v1445_v32 = vpop.f32.mrf.mxu1 }
 0x201   :  { %v1446_v52 = vadd.f32 %v1445_v32, %v1223_v47  ;;  %1261 = vmatmul.bf16.gmra.mxu0 %v2224_v29 }
 0x202   :  { %2479 = vmatmul.msk.bf16.gmra.mxu3 %vm973_vm0, %v778_v56  ;;  %1484 = vmatmul.bf16.gmra.mxu1 %v2228_v62 }
 0x203   :  { %v1669_v10 = vadd.f32 %v1668_v7, %v1446_v52 }
 0x205   :  { %1816 = vst [vmem:[%s4014_s3 + $0x160] sm:$0xff] %v1669_v10  ;;  %v1675_v0 = vpop.f32.mrf.mxu2  ;;  %v1728_v2 = vpop.f32.mrf.mxu3 }
 0x206   :  { %v1729_v3 = vadd.f32 %v1728_v2, %v3457_v6  ;;  %v1224_v4 = vpop.f32.mrf.mxu0  ;;  %v2574_v6 = vld [vmem:[%s4012_s0 + $0x2f0] sm:$0xf0] }
 0x207   :  { %v1225_v7 = vadd.f32 %v3539_v22, %v1224_v4  ;;  %v1447_v24 = vpop.f32.mrf.mxu1  ;;  %v2236_v21 = vor.u32 %v2574_v6, %v2235_v61 }
 0x208   :  { %1840 = vst [vmem:[%s4014_s3 + $0x220] sm:$0xff] %v1729_v3 }
 0x209   :  { %v1448_v19 = vadd.f32 %v1447_v24, %v1225_v7 }
 0x20a   :  { %2469 = vmatmul.msk.bf16.gmra.mxu2 %vm973_vm0, %v2256_v1 }
 0x20b   :  { %v1671_v20 = vadd.f32 %v1670_v27, %v1448_v19 }
 0x20d   :  { %1817 = vst [vmem:[%s4014_s3 + $0x168] sm:$0xff] %v1671_v20  ;;  %v1678_v51 = vpop.f32.mrf.mxu2  ;;  %v1730_v26 = vpop.f32.mrf.mxu3 }
 0x20e   :  { %v1731_v58 = vadd.f32 %v1730_v26, %v3484_v33  ;;  %v1227_v23 = vpop.f32.mrf.mxu0  ;;  %v2581_v33 = vld [vmem:[%s4012_s0 + $0x328] sm:$0xf0] }
 0x20f   :  { %v1228_v27 = vadd.f32 %v3539_v22, %v1227_v23  ;;  %v1450_v59 = vpop.f32.mrf.mxu1  ;;  %v2268_v40 = vor.u32 %v2581_v33, %v2267_v39 }
 0x210   :  { %1841 = vst [vmem:[%s4014_s3 + $0x228] sm:$0xff] %v1731_v58 }
 0x211   :  { %v1451_v38 = vadd.f32 %v1450_v59, %v1228_v27  ;;  %1266 = vmatmul.bf16.gmra.mxu0 %v2236_v21 }
 0x212   :  { %1489 = vmatmul.bf16.gmra.mxu1 %v2240_v28 }
 0x213   :  { %v1674_v25 = vadd.f32 %v1673_v50, %v1451_v38 }
 0x215   :  { %1818 = vst [vmem:[%s4014_s3 + $0x170] sm:$0xff] %v1674_v25  ;;  %v1680_v16 = vpop.f32.mrf.mxu2  ;;  %v1733_v5 = vpop.f32.mrf.mxu3 }
 0x216   :  { %v1734_v41 = vadd.f32 %v1733_v5, %v3499_v53  ;;  %v1229_v15 = vpop.f32.mrf.mxu0 }
 0x217   :  { %v1230_v42 = vadd.f32 %v3539_v22, %v1229_v15  ;;  %v1452_v46 = vpop.f32.mrf.mxu1 }
 0x218   :  { %1842 = vst [vmem:[%s4014_s3 + $0x230] sm:$0xff] %v1734_v41 }
 0x219   :  { %v1453_v44 = vadd.f32 %v1452_v46, %v1230_v42 }
 0x21a   :  { %2470 = vmatmul.msk.bf16.gmra.mxu2 %vm973_vm0, %v2268_v40 }
 0x21b   :  { %v1676_v50 = vadd.f32 %v1675_v0, %v1453_v44 }
 0x21d   :  { %1819 = vst [vmem:[%s4014_s3 + $0x178] sm:$0xff] %v1676_v50  ;;  %v1683_v29 = vpop.f32.mrf.mxu2  ;;  %v1735_v60 = vpop.f32.mrf.mxu3 }
 0x21e   :  { %v1736_v53 = vadd.f32 %v1735_v60, %v3526_v13  ;;  %v1232_v56 = vpop.f32.mrf.mxu0 }
 0x21f   :  { %v1233_v62 = vadd.f32 %v3539_v22, %v1232_v56  ;;  %v1455_v47 = vpop.f32.mrf.mxu1 }
 0x220   :  { %1843 = vst [vmem:[%s4014_s3 + $0x238] sm:$0xff] %v1736_v53 }
 0x221   :  { %v1456_v32 = vadd.f32 %v1455_v47, %v1233_v62 }
 0x223   :  { %v1679_v52 = vadd.f32 %v1678_v51, %v1456_v32 }
 0x225   :  { %1820 = vst [vmem:[%s4014_s3 + $0x180] sm:$0xff] %v1679_v52  ;;  %v1685_v10 = vpop.f32.mrf.mxu2  ;;  %v1738_v43 = vpop.f32.mrf.mxu3 }
 0x226   :  { %v1739_v63 = vadd.f32 %v1738_v43, %v3546_v30  ;;  %v1234_v0 = vpop.f32.mrf.mxu0 }
 0x227   :  { %v1235_v13 = vadd.f32 %v3539_v22, %v1234_v0  ;;  %v1457_v2 = vpop.f32.mrf.mxu1 }
 0x228   :  { %1844 = vst [vmem:[%s4014_s3 + $0x240] sm:$0xff] %v1739_v63 }
 0x229   :  { %v1458_v3 = vadd.f32 %v1457_v2, %v1235_v13 }
 0x22b   :  { %v1681_v4 = vadd.f32 %v1680_v16, %v1458_v3 }
 0x22d   :  { %1821 = vst [vmem:[%s4014_s3 + $0x188] sm:$0xff] %v1681_v4  ;;  %v1688_v1 = vpop.f32.mrf.mxu2  ;;  %v1740_v7 = vpop.f32.mrf.mxu3 }
 0x22e   :  { %v1741_v24 = vadd.f32 %v1740_v7, %v3573_v55  ;;  %v1237_v19 = vpop.f32.mrf.mxu0 }
 0x22f   :  { %v1238_v30 = vadd.f32 %v3539_v22, %v1237_v19  ;;  %v1460_v61 = vpop.f32.mrf.mxu1 }
 0x230   :  { %1845 = vst [vmem:[%s4014_s3 + $0x248] sm:$0xff] %v1741_v24 }
 0x231   :  { %v1461_v6 = vadd.f32 %v1460_v61, %v1238_v30 }
 0x233   :  { %v1684_v20 = vadd.f32 %v1683_v29, %v1461_v6 }
 0x235   :  { %1822 = vst [vmem:[%s4014_s3 + $0x190] sm:$0xff] %v1684_v20  ;;  %v1690_v45 = vpop.f32.mrf.mxu2  ;;  %v1743_v9 = vpop.f32.mrf.mxu3 }
 0x236   :  { %v1744_v51 = vadd.f32 %v1743_v9, %v3588_v8  ;;  %v1239_v26 = vpop.f32.mrf.mxu0 }
 0x237   :  { %v1240_v55 = vadd.f32 %v3539_v22, %v1239_v26  ;;  %v1462_v21 = vpop.f32.mrf.mxu1 }
 0x238   :  { %1846 = vst [vmem:[%s4014_s3 + $0x250] sm:$0xff] %v1744_v51 }
 0x239   :  { %v1463_v58 = vadd.f32 %v1462_v21, %v1240_v55 }
 0x23b   :  { %v1686_v23 = vadd.f32 %v1685_v10, %v1463_v58 }
 0x23d   :  { %1823 = vst [vmem:[%s4014_s3 + $0x198] sm:$0xff] %v1686_v23  ;;  %v1693_v28 = vpop.f32.mrf.mxu2  ;;  %v1745_v27 = vpop.f32.mrf.mxu3 }
 0x23e   :  { %v1746_v59 = vadd.f32 %v1745_v27, %v3615_v35  ;;  %v1242_v38 = vpop.f32.mrf.mxu0 }
 0x23f   :  { %v1243_v8 = vadd.f32 %v3539_v22, %v1242_v38  ;;  %v1465_v25 = vpop.f32.mrf.mxu1 }
 0x240   :  { %1847 = vst [vmem:[%s4014_s3 + $0x258] sm:$0xff] %v1746_v59 }
 0x241   :  { %v1466_v39 = vadd.f32 %v1465_v25, %v1243_v8 }
 0x243   :  { %v1689_v33 = vadd.f32 %v1688_v1, %v1466_v39 }
 0x245   :  { %1824 = vst [vmem:[%s4014_s3 + $0x1a0] sm:$0xff] %v1689_v33  ;;  %v1695_v16 = vpop.f32.mrf.mxu2  ;;  %v1748_v5 = vpop.f32.mrf.mxu3 }
 0x246   :  { %v1749_v41 = vadd.f32 %v1748_v5, %v3630_v48  ;;  %v1244_v15 = vpop.f32.mrf.mxu0 }
 0x247   :  { %v1245_v35 = vadd.f32 %v3539_v22, %v1244_v15  ;;  %v1467_v40 = vpop.f32.mrf.mxu1 }
 0x248   :  { %1848 = vst [vmem:[%s4014_s3 + $0x260] sm:$0xff] %v1749_v41 }
 0x249   :  { %v1468_v42 = vadd.f32 %v1467_v40, %v1245_v35 }
 0x24b   :  { %v1691_v46 = vadd.f32 %v1690_v45, %v1468_v42 }
 0x24d   :  { %1825 = vst [vmem:[%s4014_s3 + $0x1a8] sm:$0xff] %v1691_v46  ;;  %v1698_v44 = vpop.f32.mrf.mxu2  ;;  %v1750_v50 = vpop.f32.mrf.mxu3 }
 0x24e   :  { %v1751_v29 = vadd.f32 %v1750_v50, %v3657_v17  ;;  %v1247_v60 = vpop.f32.mrf.mxu0 }
 0x24f   :  { %v1248_v48 = vadd.f32 %v3539_v22, %v1247_v60  ;;  %v1470_v53 = vpop.f32.mrf.mxu1 }
 0x250   :  { %1849 = vst [vmem:[%s4014_s3 + $0x268] sm:$0xff] %v1751_v29 }
 0x251   :  { %v1471_v56 = vadd.f32 %v1470_v53, %v1248_v48 }
 0x253   :  { %v1694_v62 = vadd.f32 %v1693_v28, %v1471_v56 }
 0x255   :  { %1826 = vst [vmem:[%s4014_s3 + $0x1b0] sm:$0xff] %v1694_v62  ;;  %v1700_v47 = vpop.f32.mrf.mxu2  ;;  %v1753_v32 = vpop.f32.mrf.mxu3 }
 0x256   :  { %v1754_v52 = vadd.f32 %v1753_v32, %v3672_v34  ;;  %v1249_v10 = vpop.f32.mrf.mxu0 }
 0x257   :  { %v1250_v17 = vadd.f32 %v3539_v22, %v1249_v10  ;;  %v1472_v43 = vpop.f32.mrf.mxu1 }
 0x258   :  { %1850 = vst [vmem:[%s4014_s3 + $0x270] sm:$0xff] %v1754_v52 }
 0x259   :  { %v1473_v63 = vadd.f32 %v1472_v43, %v1250_v17 }
 0x25b   :  { %v1696_v0 = vadd.f32 %v1695_v16, %v1473_v63 }
 0x25d   :  { %1827 = vst [vmem:[%s4014_s3 + $0x1b8] sm:$0xff] %v1696_v0  ;;  %v1703_v13 = vpop.f32.mrf.mxu2  ;;  %v1755_v2 = vpop.f32.mrf.mxu3 }
 0x25e   :  { %v1756_v3 = vadd.f32 %v1755_v2, %v3699_v12  ;;  %v1252_v4 = vpop.f32.mrf.mxu0 }
 0x25f   :  { %v1253_v34 = vadd.f32 %v3539_v22, %v1252_v4  ;;  %v1475_v1 = vpop.f32.mrf.mxu1 }
 0x260   :  { %1851 = vst [vmem:[%s4014_s3 + $0x278] sm:$0xff] %v1756_v3 }
 0x261   :  { %v1476_v7 = vadd.f32 %v1475_v1, %v1253_v34 }
 0x263   :  { %v1699_v24 = vadd.f32 %v1698_v44, %v1476_v7 }
 0x265   :  { %1828 = vst [vmem:[%s4014_s3 + $0x1c0] sm:$0xff] %v1699_v24  ;;  %v1705_v19 = vpop.f32.mrf.mxu2  ;;  %v1758_v30 = vpop.f32.mrf.mxu3 }
 0x266   :  { %v1759_v61 = vadd.f32 %v1758_v30, %v3714_v14  ;;  %v1254_v6 = vpop.f32.mrf.mxu0 }
 0x267   :  { %v1255_v12 = vadd.f32 %v3539_v22, %v1254_v6  ;;  %v1477_v20 = vpop.f32.mrf.mxu1 }
 0x268   :  { %1852 = vst [vmem:[%s4014_s3 + $0x280] sm:$0xff] %v1759_v61 }
 0x269   :  { %v1478_v45 = vadd.f32 %v1477_v20, %v1255_v12 }
 0x26b   :  { %v1701_v9 = vadd.f32 %v1700_v47, %v1478_v45 }
 0x26d   :  { %1829 = vst [vmem:[%s4014_s3 + $0x1c8] sm:$0xff] %v1701_v9  ;;  %v1708_v51 = vpop.f32.mrf.mxu2  ;;  %v1760_v26 = vpop.f32.mrf.mxu3 }
 0x26e   :  { %v1761_v55 = vadd.f32 %v1760_v26, %v3741_v37  ;;  %v1257_v21 = vpop.f32.mrf.mxu0 }
 0x26f   :  { %v1258_v14 = vadd.f32 %v3539_v22, %v1257_v21  ;;  %v1480_v58 = vpop.f32.mrf.mxu1 }
 0x270   :  { %1853 = vst [vmem:[%s4014_s3 + $0x288] sm:$0xff] %v1761_v55 }
 0x271   :  { %v1481_v23 = vadd.f32 %v1480_v58, %v1258_v14 }
 0x273   :  { %v1704_v28 = vadd.f32 %v1703_v13, %v1481_v23 }
 0x275   :  { %1830 = vst [vmem:[%s4014_s3 + $0x1d0] sm:$0xff] %v1704_v28  ;;  %v1710_v27 = vpop.f32.mrf.mxu2  ;;  %v1763_v59 = vpop.f32.mrf.mxu3 }
 0x276   :  { %v1764_v38 = vadd.f32 %v1763_v59, %v3756_v57  ;;  %v1259_v8 = vpop.f32.mrf.mxu0 }
 0x277   :  { %v1260_v37 = vadd.f32 %v3539_v22, %v1259_v8  ;;  %v1482_v25 = vpop.f32.mrf.mxu1 }
 0x278   :  { %1854 = vst [vmem:[%s4014_s3 + $0x290] sm:$0xff] %v1764_v38 }
 0x279   :  { %v1483_v39 = vadd.f32 %v1482_v25, %v1260_v37 }
 0x27b   :  { %v1706_v33 = vadd.f32 %v1705_v19, %v1483_v39 }
 0x27d   :  { %1831 = vst [vmem:[%s4014_s3 + $0x1d8] sm:$0xff] %v1706_v33  ;;  %v1713_v16 = vpop.f32.mrf.mxu2  ;;  %v1765_v5 = vpop.f32.mrf.mxu3 }
 0x27e   :  { %v1766_v41 = vadd.f32 %v1765_v5, %v3783_v18  ;;  %v1262_v15 = vpop.f32.mrf.mxu0 }
 0x27f   :  { %v1263_v57 = vadd.f32 %v3539_v22, %v1262_v15  ;;  %v1485_v35 = vpop.f32.mrf.mxu1 }
 0x280   :  { %1855 = vst [vmem:[%s4014_s3 + $0x298] sm:$0xff] %v1766_v41 }
 0x281   :  { %v1486_v40 = vadd.f32 %v1485_v35, %v1263_v57 }
 0x283   :  { %v1709_v42 = vadd.f32 %v1708_v51, %v1486_v40 }
 0x285   :  { %1832 = vst [vmem:[%s4014_s3 + $0x1e0] sm:$0xff] %v1709_v42  ;;  %v1715_v46 = vpop.f32.mrf.mxu2  ;;  %v1768_v44 = vpop.f32.mrf.mxu3 }
 0x286   :  { %v1769_v50 = vadd.f32 %v1768_v44, %v3798_v36  ;;  %v1264_v29 = vpop.f32.mrf.mxu0 }
 0x287   :  { %v1265_v18 = vadd.f32 %v3539_v22, %v1264_v29  ;;  %v1487_v60 = vpop.f32.mrf.mxu1 }
 0x288   :  { %1856 = vst [vmem:[%s4014_s3 + $0x2a0] sm:$0xff] %v1769_v50 }
 0x289   :  { %v1488_v48 = vadd.f32 %v1487_v60, %v1265_v18 }
 0x28b   :  { %v1711_v53 = vadd.f32 %v1710_v27, %v1488_v48 }
 0x28d   :  { %1833 = vst [vmem:[%s4014_s3 + $0x1e8] sm:$0xff] %v1711_v53  ;;  %v1718_v56 = vpop.f32.mrf.mxu2  ;;  %v1770_v62 = vpop.f32.mrf.mxu3 }
 0x28e   :  { %v1719_v47 = vadd.f32 %v1718_v56, %v3380_v49  ;;  %v1267_v32 = vpop.f32.mrf.mxu0 }
 0x28f   :  { %v1268_v36 = vadd.f32 %v3539_v22, %v1267_v32  ;;  %v1490_v52 = vpop.f32.mrf.mxu1 }
 0x290   :  { %1836 = vst [vmem:[%s4014_s3 + $0x200] sm:$0xff] %v1719_v47 }
 0x291   :  { %v1491_v10 = vadd.f32 %v1490_v52, %v1268_v36 }
 0x293   :  { %v1714_v17 = vadd.f32 %v1713_v16, %v1491_v10 }
 0x295   :  { %1834 = vst [vmem:[%s4014_s3 + $0x1f0] sm:$0xff] %v1714_v17  ;;  %v1720_v43 = vpop.f32.mrf.mxu2 }
 0x296   :  { %v1721_v63 = vadd.f32 %v1720_v43, %v3407_v11  ;;  %v1269_v0 = vpop.f32.mrf.mxu0 }
 0x297   :  { %v1270_v49 = vadd.f32 %v3539_v22, %v1269_v0  ;;  %v1492_v13 = vpop.f32.mrf.mxu1 }
 0x298   :  { %1837 = vst [vmem:[%s4014_s3 + $0x208] sm:$0xff] %v1721_v63 }
 0x299   :  { %v1493_v2 = vadd.f32 %v1492_v13, %v1270_v49 }
 0x29b   :  { %v1716_v3 = vadd.f32 %v1715_v46, %v1493_v2 }
 0x29d   :  { %1835 = vst [vmem:[%s4014_s3 + $0x1f8] sm:$0xff] %v1716_v3  ;;  %v1723_v4 = vpop.f32.mrf.mxu2 }
 0x29e   :  { %v1724_v34 = vadd.f32 %v1723_v4, %v3421_v31 }
 0x2a0   :  { %1838 = vst [vmem:[%s4014_s3 + $0x210] sm:$0xff] %v1724_v34 }
 0x2a5   :  { %v1725_v11 = vpop.f32.mrf.mxu2 }
 0x2a6   :  { %v1726_v22 = vadd.f32 %v1725_v11, %v3443_v54 }
 0x2a8   :  { %1839 = vst [vmem:[%s4014_s3 + $0x218] sm:$0xff] %v1726_v22 }

// kernel: _device_forward.19
= control target key start
LH: loop header
LB: loop body
LE: loop exit
PB: predicated region body
PF: predicated region fallthrough
CT: control target
= control target key end

     0   :  { %s915_s6 = smov 0   ;;  %s917_s7 = smov 0   ;;  %s1256_s0 = inlined_call_operand.vmem [shape: f32[24,2560], index: 0, kind: input, shape index: {}]   ;;  %s1257_s1 = inlined_call_operand.vmem [shape: f32[16,2560], index: 1, kind: output, shape index: {}]  }
   0x1   :  { %s919_s8 = smov 0  }
   0x2 LB: > { %s804_s9 = sadd.s32 4294967295, %s903_s8   ;;  %s932_s10 = sadd.s32 1, %s903_s8   ;;  %s903_s8 = sphi %s919_s8, %s1277_s8   ;;  %s899_s7 = sphi %s917_s7, %s1276_s7   ;;  %s895_s6 = sphi %s915_s6, %s1275_s6  }
   0x3   : > { %s15_s11 = ssub.s32 %s903_s8, %s932_s10  ;;  %s18_s12 = sadd.s32 1, %s899_s7 }
   0x4   : > { %p16_p0 = scmp.eq.s32.totalorder %s15_s11, 0  ;;  %p25_p1 = scmp.ne.s32.totalorder %s899_s7, %s895_s6 }
   0x5   : > { %p26_p2 = scmp.eq.s32.totalorder %s903_s8, 0  ;;  %p55_p3 = scmp.eq.s32.totalorder %s804_s9, 4 }
   0x6   : > { %s943_s13 = scalar_select %p16_p0, %s899_s7, %s18_s12  }
   0x7   : > { %p27_p4 = por %p26_p2, %p25_p1  ;;  %p945_p5 = por %p55_p3, %p25_p1 }
   0x8   : > { %p807_p6 = scmp.ge.s32.totalorder %s903_s8, 5 }
   0xa   : > { %77 = sbr.rel (%p807_p6) target bundleno = 31 (0x1f), region = 16 }
   0xf   : > { %80 = sbr.rel (!%p27_p4) target bundleno = 31 (0x1f), region = 20  ;;  %s82_s15 = sand.u32 (%p27_p4), 1, %s899_s7  }
  0x10   : > { %s829_s16 = sshll.u32 (%p27_p4), %s903_s8, 5  ;;  %s831_s17 = smul.u32 (%p27_p4), 96, %s82_s15 }
  0x11   : > { %s87_s20 = scalar_lea.vmem (%p27_p4), %s1256_s0, %s829_s16 }
  0x12   : > { %v100_v0 = vld [vmem:[%s87_s20] sm:$0xff] (%p27_p4)  ;;  %v102_v1 = vld [vmem:[%s87_s20 + $0x8] sm:$0xff] (%p27_p4)  ;;  %v104_v2 = vld [vmem:[%s87_s20 + $0x10] sm:$0xff] (%p27_p4)  ;;  %s84_s21 = scalar_lea.vmem (%p27_p4), [#allocation2], %s831_s17 }
  0x13   : > { %101 = vst [vmem:[%s84_s21] sm:$0xff] (%p27_p4), %v100_v0  ;;  %v106_v3 = vld [vmem:[%s87_s20 + $0x18] sm:$0xff] (%p27_p4)  ;;  %v108_v4 = vld [vmem:[%s87_s20 + $0xa0] sm:$0xff] (%p27_p4)  ;;  %v110_v5 = vld [vmem:[%s87_s20 + $0xa8] sm:$0xff] (%p27_p4) }
  0x14   : > { %103 = vst [vmem:[%s84_s21 + $0x8] sm:$0xff] %v102_v1  ;;  %v112_v6 = vld [vmem:[%s87_s20 + $0xb0] sm:$0xff]  ;;  %v114_v7 = vld [vmem:[%s87_s20 + $0xb8] sm:$0xff]  ;;  %v116_v8 = vld [vmem:[%s87_s20 + $0x140] sm:$0xff] }
  0x15   : > { %105 = vst [vmem:[%s84_s21 + $0x10] sm:$0xff] %v104_v2  ;;  %v118_v9 = vld [vmem:[%s87_s20 + $0x148] sm:$0xff]  ;;  %v120_v10 = vld [vmem:[%s87_s20 + $0x150] sm:$0xff]  ;;  %v122_v11 = vld [vmem:[%s87_s20 + $0x158] sm:$0xff] }
  0x16   : > { %107 = vst [vmem:[%s84_s21 + $0x18] sm:$0xff] %v106_v3 }
  0x17   : > { %109 = vst [vmem:[%s84_s21 + $0x20] sm:$0xff] %v108_v4 }
  0x18   : > { %111 = vst [vmem:[%s84_s21 + $0x28] sm:$0xff] %v110_v5 }
  0x19   : > { %113 = vst [vmem:[%s84_s21 + $0x30] sm:$0xff] %v112_v6 }
  0x1a   : > { %115 = vst [vmem:[%s84_s21 + $0x38] sm:$0xff] %v114_v7 }
  0x1b   : > { %117 = vst [vmem:[%s84_s21 + $0x40] sm:$0xff] %v116_v8 }
  0x1c   : > { %119 = vst [vmem:[%s84_s21 + $0x48] sm:$0xff] %v118_v9 }
  0x1d   : > { %121 = vst [vmem:[%s84_s21 + $0x50] sm:$0xff] %v120_v10 }
  0x1e   : > { %123 = vst [vmem:[%s84_s21 + $0x58] sm:$0xff] %v122_v11 }
  0x1f PF: > { %p810_p7 = scmp.ge.s32.totalorder %s903_s8, 1  ;;  %p128_p8 = scmp.lt.s32.totalorder %s903_s8, 6 }
  0x21   : > { %p129_p9 = pnand %p810_p7, %p128_p8 }
  0x22   : > { %s135_s22 = sand.u32 (!%p129_p9), 1, %s895_s6  }
  0x23   : > { %132 = sbr.rel (%p129_p9) target bundleno = 158 (0x9e), region = 43  ;;  %s811_s25 = sshll.u32 (!%p129_p9), %s135_s22, 6 }
  0x24   : > { %s832_s23 = smul.u32 (!%p129_p9), 96, %s135_s22  ;;  %s1136_s26 = scalar_lea.vmem (!%p129_p9), [#allocation3], %s811_s25 }
  0x26   : > { %s960_s24 = scalar_lea.vmem (!%p129_p9), [#allocation2], %s832_s23 }
  0x28   : > { %v155_v12 = vld [vmem:[%s960_s24] sm:$0xff]  ;;  %v156_v18 = vld [vmem:[%s960_s24 + $0x8] sm:$0xff]  ;;  %v969_v23 = vld [vmem:[%s960_s24 + $0x10] sm:$0xff]  ;;  %v464_v46 = vlaneseq  ;;  %vm435_vm1 = vcmask 1042432   ;;  %vm666_vm10 = vcmask 1040384   ;;  %vm671_vm11 = vcmask 1041408  }
  0x29   : > { %v964_v13 = vld [vmem:[%s960_s24 + $0x20] sm:$0xff]  ;;  %v812_v14 = vmul.f32 -1.442695, %v155_v12  ;;  %v243_v15 = vmul.f32 0.2, %v155_v12  ;;  %v263_v16 = vrot.slane %v155_v12, 4 }
  0x2a   : > { %v279_v17 = vrot.slane %v964_v13, 4  ;;  %v813_v21 = vmul.f32 -1.442695, %v156_v18  ;;  %v244_v22 = vmul.f32 0.2, %v156_v18  ;;  %v973_v27 = vld [vmem:[%s960_s24 + $0x28] sm:$0xff] }
  0x2b   : > { %857 = vpow2.f32 %v812_v14  ;;  %v816_v19 = vclamps-f32 %v243_v15, 1.0  ;;  %v820_v20 = vclamps-f32 %v243_v15, 2.0  ;;  %v814_v32 = vmul.f32 -1.442695, %v969_v23  ;;  %v981_v42 = vld [vmem:[%s960_s24 + $0x18] sm:$0xff]  ;;  %v1000_v2 = vld [vmem:[%s960_s24 + $0x40] sm:$0xff] }
  0x2c   : > { %859 = vpow2.f32 %v813_v21  ;;  %v821_v28 = vclamps-f32 %v244_v22, 2.0  ;;  %v817_v33 = vclamps-f32 %v244_v22, 1.0  ;;  %v264_v34 = vrot.slane %v156_v18, 4  ;;  %s830_s27 = sshll.u32 (%p945_p5), %s804_s9, 5 }
  0x2d   : > { %v271_v24 = vmul.f32 %v816_v19, %v263_v16  ;;  %v287_v25 = vmul.f32 %v816_v19, %v279_v17  ;;  %v347_v26 = vmul.f32 %v820_v20, %v964_v13  ;;  %v280_v35 = vrot.slane %v973_v27, 4  ;;  %s716_s30 = scalar_lea.vmem (%p945_p5), %s1257_s1, %s830_s27 }
  0x2e   : > { %v348_v36 = vmul.f32 %v821_v28, %v973_v27  ;;  %v272_v44 = vmul.f32 %v817_v33, %v264_v34  ;;  %v815_v49 = vmul.f32 -1.442695, %v981_v42  ;;  %v987_v57 = vshrl.u32 %v464_v46, 7 }
  0x2f   : > { %v295_v29 = vrot.slane %v271_v24, 2  ;;  %v319_v30 = vrot.slane %v287_v25, 2  ;;  %v351_v31 = vmul.f32 1.442695, %v347_v26  ;;  %v288_v45 = vmul.f32 %v817_v33, %v280_v35 }
  0x30   : > { %v353_v41 = vmul.f32 1.442695, %v348_v36  ;;  %v296_v53 = vrot.slane %v272_v44, 2  ;;  %v992_v60 = vmul.f32 0.2, %v969_v23  ;;  %v1032_v36 = vld [vmem:[%s960_s24 + $0x48] sm:$0xff] }
  0x31   : > { %v858_v37 = vpop.eup %857  ;;  %v303_v38 = vadd.f32 %v295_v29, %v964_v13  ;;  %861 = vpow2.f32 %v351_v31  ;;  %v327_v40 = vadd.f32 %v319_v30, %v964_v13  ;;  %v320_v54 = vrot.slane %v288_v45, 2 }
  0x32   : > { %v179_v39 = vadd.f32 1.0, %v858_v37  ;;  %v860_v43 = vpop.eup %859  ;;  %863 = vpow2.f32 %v814_v32  ;;  %v304_v5 = vadd.f32 %v296_v53, %v973_v27  ;;  %v822_v20 = vclamps-f32 %v992_v60, 2.0 }
  0x33   : > { %v307_v47 = vmax.f32 %v303_v38, 0.0  ;;  %v983_v48 = vadd.f32 1.0, %v860_v43  ;;  %v331_v50 = vmax.f32 %v327_v40, 0.0  ;;  %v328_v6 = vadd.f32 %v320_v54, %v973_v27 }
  0x34   : > { %865 = vrcp.f32 %v179_v39  ;;  %v192_v52 = vand.u32 2147483647, %v179_v39  ;;  %v194_v55 = vand.u32 2147483648, %v179_v39  ;;  %vm188_vm0 = vweird.f32 %v179_v39 }
  0x35   : > { %867 = vpow2.f32 %v353_v41  ;;  %v989_v59 = vmin.f32 %v307_v47, 1.0  ;;  %v994_v62 = vmin.f32 %v331_v50, 1.0  ;;  %v207_v0 = vand.u32 2147483647, %v983_v48 }
  0x36   : > { %869 = vrcp.f32 %v983_v48  ;;  %v209_v1 = vand.u32 2147483648, %v983_v48  ;;  %vm1002_vm2 = vcmp.eq.f32.partialorder %v192_v52, 8.507059e+37  ;;  %v195_v8 = vor.u32 1.1754944e-38, %v194_v55 }
  0x37   : > { %v862_v51 = vpop.eup %861  ;;  %871 = vpow2.f32 %v815_v49  ;;  %vm203_vm4 = vweird.f32 %v983_v48  ;;  %vm1013_vm5 = vcmp.eq.f32.partialorder %v207_v0, 8.507059e+37  ;;  %v308_v25 = vmax.f32 %v304_v5, 0.0 }
  0x38   : > { %v363_v56 = vrot.slane %v862_v51, 2  ;;  %v864_v58 = vpop.eup %863  ;;  %v210_v19 = vor.u32 1.1754944e-38, %v209_v1  ;;  %v332_v26 = vmax.f32 %v328_v6, 0.0  ;;  %vm518_vm9 = vcmp.gt.f32.partialorder %v1000_v2, 0.5 }
  0x39   : > { %v1008_v11 = vadd.f32 1.0, %v864_v58  ;;  %v312_v41 = vmin.f32 %v308_v25, 1.0  ;;  %vm680_vm13 = vcmask 1043456  }
  0x3a   : > { %v866_v61 = vpop.eup %865  ;;  %v371_v63 = vmul.f32 %v363_v56, %v964_v13  ;;  %v336_v43 = vmin.f32 %v332_v26, 1.0 }
  0x3b   : > { %v184_v3 = vmul.f32 %v866_v61, %v179_v39  ;;  %v868_v7 = vpop.eup %867  ;;  %vm189_vm3 = vweird.f32 %v866_v61  ;;  %873 = vrcp.f32 %v1008_v11  ;;  %v222_v33 = vand.u32 2147483647, %v1008_v11 }
  0x3c   : > { %v379_v9 = vrot.slane %v371_v63, 4  ;;  %v407_v10 = vrot.slane %v371_v63, 3  ;;  %v870_v12 = vpop.eup %869  ;;  %v364_v15 = vrot.slane %v868_v7, 2  ;;  %vm1022_vm6 = vmor %vm188_vm0, %vm189_vm3  ;;  %v224_v53 = vand.u32 2147483648, %v1008_v11 }
  0x3d   : > { %v185_v14 = vsub.f32 1.0, %v184_v3  ;;  %v1018_v21 = vpop.eup %871  ;;  %v199_v24 = vmul.f32 %v870_v12, %v983_v48  ;;  %vm204_vm7 = vweird.f32 %v870_v12  ;;  %vm218_vm12 = vweird.f32 %v1008_v11 }
  0x3e   : > { %v387_v16 = vmax.f32 %v964_v13, %v379_v9  ;;  %v415_v17 = vmax.f32 %v1000_v2, %v407_v10  ;;  %v372_v30 = vmul.f32 %v364_v15, %v973_v27  ;;  %vm1042_vm8 = vmor %vm203_vm4, %vm204_vm7  ;;  %vm1077_vm15 = vcmp.eq.f32.partialorder %v222_v33, 8.507059e+37 }
  0x3f   : > { %v186_v22 = vmul.f32 %v866_v61, %v185_v14  ;;  %v200_v32 = vsub.f32 1.0, %v199_v24  ;;  %vm519_vm0 = vcmp.gt.f32.partialorder %v1032_v36, 0.5  ;;  %vm685_vm4 = vcmask 1044480  }
  0x40   : > { %v395_v28 = vrot.slane %v387_v16, 7  ;;  %v423_v29 = vrot.slane %v415_v17, 7  ;;  %v380_v37 = vrot.slane %v372_v30, 4  ;;  %v408_v38 = vrot.slane %v372_v30, 3 }
  0x41   : > { %v187_v31 = vadd.f32 %v866_v61, %v186_v22  ;;  %v201_v40 = vmul.f32 %v870_v12, %v200_v32  ;;  %v1051_v54 = vpop.eup %873 }
  0x42   : > { %v403_v34 = vmin.f32 %v1000_v2, %v395_v28  ;;  %v431_v35 = vmin.f32 %v1000_v2, %v423_v29  ;;  %v388_v49 = vmax.f32 %v973_v27, %v380_v37  ;;  %v416_v52 = vmax.f32 %v1032_v36, %v408_v38 }
  0x43   : > { %v191_v39 = vsel %vm1022_vm6, %v866_v61, %v187_v31  ;;  %v202_v51 = vadd.f32 %v870_v12, %v201_v40  ;;  %v225_v38 = vor.u32 1.1754944e-38, %v224_v53 }
  0x44   : > { %v1038_v44 = vsel %vm1002_vm2, %v195_v8, %v191_v39  ;;  %v526_v45 = vmul.f32 0.5, %v403_v34  ;;  %v554_v46 = vmul.f32 0.5, %v431_v35  ;;  %v396_v61 = vrot.slane %v388_v49, 7 }
  0x45   : > { %v436_v50 = vsel %vm435_vm1, %v1038_v44, -inf  ;;  %v206_v27 = vsel %vm1042_vm8, %v870_v12, %v202_v51  ;;  %v424_v63 = vrot.slane %v416_v52, 7  ;;  %vm219_vm2 = vweird.f32 %v1051_v54 }
  0x46   : > { %v437_v55 = vrot.slane %v436_v50, 4  ;;  %v534_v56 = vrot.slane %v526_v45, 7  ;;  %v558_v48 = vsub.f32 %v994_v62, %v554_v46  ;;  %v582_v58 = vadd.f32 %v554_v46, %v994_v62  ;;  %vm1100_vm6 = vmor %vm218_vm12, %vm219_vm2 }
  0x47   : > { %v1062_v6 = vsel %vm1013_vm5, %v210_v19, %v206_v27  ;;  %v404_v62 = vmin.f32 %v1032_v36, %v396_v61  ;;  %v432_v7 = vmin.f32 %v1032_v36, %v424_v63  ;;  %v214_v46 = vmul.f32 %v1051_v54, %v1008_v11 }
  0x48   : > { %v438_v0 = vmax.f32 %v436_v50, %v437_v55  ;;  %v542_v1 = vsub.f32 %v989_v59, %v534_v56  ;;  %v562_v3 = vmax.f32 %v558_v48, 0.0  ;;  %v570_v4 = vadd.f32 %v534_v56, %v989_v59 }
  0x49   : > { %v586_v5 = vmax.f32 %v582_v58, 0.0  ;;  %v443_v14 = vsel %vm435_vm1, %v1062_v6, -inf  ;;  %v527_v15 = vmul.f32 0.5, %v404_v62  ;;  %v555_v16 = vmul.f32 0.5, %v432_v7  ;;  %v1090_v7 = vld [vmem:[%s960_s24 + $0x30] sm:$0xff] }
  0x4a   : > { %v439_v8 = vrot.slane %v438_v0, 2  ;;  %v546_v9 = vmax.f32 %v542_v1, 0.0  ;;  %v566_v10 = vmin.f32 %v562_v3, 1.0  ;;  %v574_v12 = vmax.f32 %v570_v4, 0.0 }
  0x4b   : > { %v444_v19 = vrot.slane %v443_v14, 4  ;;  %v535_v24 = vrot.slane %v527_v15, 7  ;;  %v559_v25 = vsub.f32 %v336_v43, %v555_v16  ;;  %v590_v13 = vmin.f32 %v586_v5, 1.0 }
  0x4c   : > { %v440_v59 = vmax.f32 %v438_v0, %v439_v8  ;;  %v550_v17 = vmin.f32 %v546_v9, 1.0  ;;  %v578_v22 = vmin.f32 %v574_v12, 1.0  ;;  %v610_v18 = vrot.slane %v566_v10, 1 }
  0x4d   : > { %v445_v30 = vmax.f32 %v443_v14, %v444_v19  ;;  %v543_v31 = vsub.f32 %v312_v41, %v535_v24  ;;  %v563_v32 = vmax.f32 %v559_v25, 0.0  ;;  %v571_v34 = vadd.f32 %v535_v24, %v312_v41 }
  0x4e   : > { %v441_v26 = vrot.slane %v440_v59, 1  ;;  %v598_v28 = vrot.slane %v550_v17, 1  ;;  %v622_v29 = vrot.slane %v578_v22, 7  ;;  %v583_v45 = vadd.f32 %v555_v16, %v336_v43 }
  0x4f   : > { %v446_v39 = vrot.slane %v445_v30, 2  ;;  %v547_v40 = vmax.f32 %v543_v31, 0.0  ;;  %v634_v49 = vrot.slane %v590_v13, 7  ;;  %v575_v50 = vmax.f32 %v571_v34, 0.0 }
  0x50   : > { %v442_v35 = vmax.f32 %v440_v59, %v441_v26  ;;  %v667_v37 = vsel %vm666_vm10, %v598_v28, %v610_v18  ;;  %v567_v53 = vmin.f32 %v563_v32, 1.0  ;;  %v658_v56 = vrot.slane %v1038_v44, 2 }
  0x51   : > { %v672_v43 = vsel %vm671_vm11, %v667_v37, %v622_v29  ;;  %v447_v52 = vmax.f32 %v445_v30, %v446_v39  ;;  %v551_v2 = vmin.f32 %v547_v40, 1.0  ;;  %v587_v27 = vmax.f32 %v583_v45, 0.0 }
  0x52   : > { %vm466_vm14 = vcmp.ge.f32.partialorder %v1038_v44, %v442_v35  ;;  %v522_v47 = vsel %vm518_vm9, %v442_v35, -1.0  ;;  %v676_v61 = vsel %vm435_vm1, %v672_v43, %v634_v49  ;;  %v579_v63 = vmin.f32 %v575_v50, 1.0 }
  0x53   : > { %v470_v51 = vsel %vm466_vm14, %v987_v57, 3  ;;  %v646_v58 = vrot.slane %v522_v47, 7  ;;  %v448_v33 = vrot.slane %v447_v52, 1  ;;  %v215_v0 = vsub.f32 1.0, %v214_v46 }
  0x54   : > { %v474_v55 = vsel %vm435_vm1, %v470_v51, 2147483647  ;;  %v611_v3 = vrot.slane %v567_v53, 1  ;;  %v818_v4 = vclamps-f32 %v992_v60, 1.0  ;;  %v599_v62 = vrot.slane %v551_v2, 1 }
  0x55   : > { %v475_v48 = vrot.slane %v474_v55, 4  ;;  %v449_v1 = vmax.f32 %v447_v52, %v448_v33  ;;  %v216_v8 = vmul.f32 %v1051_v54, %v215_v0  ;;  %v265_v9 = vrot.slane %v969_v23, 4  ;;  %v165_v0 = vld [vmem:[%s960_s24 + $0x50] sm:$0xff] }
  0x56   : > { %v681_v12 = vsel %vm680_vm13, %v676_v61, %v646_v58  ;;  %v591_v14 = vmin.f32 %v587_v27, 1.0  ;;  %v623_v59 = vrot.slane %v579_v63, 7  ;;  %v281_v18 = vrot.slane %v1090_v7, 4 }
  0x57   : > { %vm476_vm3 = vcmp.lt.s32.totalorder %v474_v55, %v475_v48  ;;  %vm467_vm5 = vcmp.ge.f32.partialorder %v1062_v6, %v449_v1  ;;  %v217_v17 = vadd.f32 %v1051_v54, %v216_v8  ;;  %v273_v23 = vmul.f32 %v818_v4, %v265_v9 }
  0x58   : > { %v477_v5 = vsel %vm476_vm3, %v474_v55, %v475_v48  ;;  %v471_v16 = vsel %vm467_vm5, %v987_v57, 3  ;;  %v349_v11 = vmul.f32 %v822_v20, %v1090_v7  ;;  %v668_v25 = vsel %vm666_vm10, %v599_v62, %v611_v3 }
  0x59   : > { %v478_v10 = vrot.slane %v477_v5, 2  ;;  %v484_v22 = vsel %vm435_vm1, %v471_v16, 2147483647  ;;  %v221_v26 = vsel %vm1100_vm6, %v1051_v54, %v217_v17  ;;  %v635_v28 = vrot.slane %v591_v14, 7 }
  0x5a   : > { %v485_v24 = vrot.slane %v484_v22, 4  ;;  %v1117_v29 = vsel %vm1077_vm15, %v225_v38, %v221_v26  ;;  %v297_v30 = vrot.slane %v273_v23, 2  ;;  %v289_v31 = vmul.f32 %v818_v4, %v281_v18  ;;  %v1156_v23 = vld [vmem:[%s960_s24 + $0x38] sm:$0xff] }
  0x5b   : > { %vm479_vm7 = vcmp.lt.s32.totalorder %v477_v5, %v478_v10  ;;  %v355_v32 = vmul.f32 1.442695, %v349_v11  ;;  %v450_v60 = vsel %vm435_vm1, %v1117_v29, -inf  ;;  %v523_v54 = vsel %vm519_vm0, %v449_v1, -1.0 }
  0x5c   : > { %v480_v19 = vsel %vm479_vm7, %v477_v5, %v478_v10  ;;  %vm486_vm8 = vcmp.lt.s32.totalorder %v484_v22, %v485_v24  ;;  %v673_v34 = vsel %vm671_vm11, %v668_v25, %v623_v59  ;;  %v451_v38 = vrot.slane %v450_v60, 4 }
  0x5d   : > { %v481_v13 = vrot.slane %v480_v19, 1  ;;  %v487_v20 = vsel %vm486_vm8, %v484_v22, %v485_v24  ;;  %875 = vpow2.f32 %v355_v32  ;;  %vm690_vm12 = vcmask 1045504  }
  0x5e   : > { %v488_v37 = vrot.slane %v487_v20, 2  ;;  %v305_v40 = vadd.f32 %v297_v30, %v1090_v7  ;;  %v321_v45 = vrot.slane %v289_v31, 2  ;;  %v452_v46 = vmax.f32 %v450_v60, %v451_v38 }
  0x5f   : > { %vm482_vm9 = vcmp.lt.s32.totalorder %v480_v19, %v481_v13  ;;  %v1128_v47 = vadd.f32 1.0, %v1018_v21  ;;  %v647_v50 = vrot.slane %v523_v54, 7  ;;  %v677_v41 = vsel %vm435_vm1, %v673_v34, %v635_v28 }
  0x60   : > { %v483_v35 = vsel %vm482_vm9, %v480_v19, %v481_v13  ;;  %vm489_vm14 = vcmp.lt.s32.totalorder %v487_v20, %v488_v37  ;;  %v453_v52 = vrot.slane %v452_v46, 2  ;;  %v309_v21 = vmax.f32 %v305_v40, 0.0 }
  0x61   : > { %v514_v39 = vcvt.s32.f32 %v483_v35  ;;  %v490_v36 = vsel %vm489_vm14, %v487_v20, %v488_v37  ;;  %877 = vrcp.f32 %v1128_v47  ;;  %v329_v55 = vadd.f32 %v321_v45, %v1090_v7 }
  0x62   : > { %v491_v43 = vrot.slane %v490_v36, 1  ;;  %v454_v2 = vmax.f32 %v452_v46, %v453_v52  ;;  %v246_v48 = vmul.f32 0.2, %v981_v42  ;;  %v659_v33 = vrot.slane %v1062_v6, 2 }
  0x63   : > { %v686_v49 = vsel %vm685_vm4, %v681_v12, %v514_v39  ;;  %v876_v53 = vpop.eup %875  ;;  %v682_v27 = vsel %vm680_vm13, %v677_v41, %v647_v50  ;;  %v1144_v3 = vmin.f32 %v309_v21, 1.0  ;;  %vm520_vm0 = vcmp.gt.f32.partialorder %v165_v0, 0.5 }
  0x64   : > { %v691_v51 = vsel %vm690_vm12, %v686_v49, %v658_v56  ;;  %vm492_vm15 = vcmp.lt.s32.totalorder %v490_v36, %v491_v43  ;;  %v365_v61 = vrot.slane %v876_v53, 2  ;;  %v455_v1 = vrot.slane %v454_v2, 1 }
  0x65   : > { %699 = vst [vmem:[%s1136_s26] sm:$0xff] %v691_v51  ;;  %v493_v58 = vsel %vm492_vm15, %v490_v36, %v491_v43  ;;  %v819_v5 = vclamps-f32 %v246_v48, 1.0  ;;  %v266_v62 = vrot.slane %v981_v42, 4  ;;  %v333_v10 = vmax.f32 %v329_v55, 0.0 }
  0x66   : > { %v515_v63 = vcvt.s32.f32 %v493_v58  ;;  %v373_v4 = vmul.f32 %v365_v61, %v1090_v7  ;;  %v456_v12 = vmax.f32 %v454_v2, %v455_v1  ;;  %v823_v14 = vclamps-f32 %v246_v48, 2.0 }
  0x67   : > { %v878_v8 = vpop.eup %877  ;;  %vm233_vm3 = vweird.f32 %v1128_v47  ;;  %v237_v42 = vand.u32 2147483647, %v1128_v47  ;;  %v239_v22 = vand.u32 2147483648, %v1128_v47  ;;  %v274_v24 = vmul.f32 %v819_v5, %v266_v62 }
  0x68   : > { %v687_v9 = vsel %vm685_vm4, %v682_v27, %v515_v63  ;;  %v381_v16 = vrot.slane %v373_v4, 4  ;;  %v409_v59 = vrot.slane %v373_v4, 3  ;;  %v229_v17 = vmul.f32 %v878_v8, %v1128_v47 }
  0x69   : > { %v692_v15 = vsel %vm690_vm12, %v687_v9, %v659_v33  ;;  %vm468_vm2 = vcmp.ge.f32.partialorder %v1117_v29, %v456_v12  ;;  %vm234_vm5 = vweird.f32 %v878_v8  ;;  %v282_v13 = vrot.slane %v1156_v23, 4 }
  0x6a   : > { %700 = vst [vmem:[%s1136_s26 + $0x8] sm:$0xff] %v692_v15  ;;  %v389_v18 = vmax.f32 %v1090_v7, %v381_v16  ;;  %v417_v11 = vmax.f32 %v165_v0, %v409_v59  ;;  %v472_v19 = vsel %vm468_vm2, %v987_v57, 3  ;;  %v230_v26 = vsub.f32 1.0, %v229_v17  ;;  %vm1172_vm8 = vmor %vm233_vm3, %vm234_vm5 }
  0x6b   : > { %v494_v25 = vsel %vm435_vm1, %v472_v19, 2147483647  ;;  %v350_v32 = vmul.f32 %v823_v14, %v1156_v23  ;;  %v337_v60 = vmin.f32 %v333_v10, 1.0  ;;  %vm1166_vm6 = vcmp.eq.f32.partialorder %v237_v42, 8.507059e+37 }
  0x6c   : > { %v397_v28 = vrot.slane %v389_v18, 7  ;;  %v425_v30 = vrot.slane %v417_v11, 7  ;;  %v495_v31 = vrot.slane %v494_v25, 4  ;;  %v231_v20 = vmul.f32 %v878_v8, %v230_v26 }
  0x6d   : > { %v240_v7 = vor.u32 1.1754944e-38, %v239_v22  ;;  %v357_v38 = vmul.f32 1.442695, %v350_v32  ;;  %v290_v45 = vmul.f32 %v819_v5, %v282_v13  ;;  %v298_v46 = vrot.slane %v274_v24, 2  ;;  %v166_v24 = vld [vmem:[%s960_s24 + $0x58] sm:$0xff] }
  0x6e   : > { %v405_v34 = vmin.f32 %v165_v0, %v397_v28  ;;  %v433_v35 = vmin.f32 %v165_v0, %v425_v30  ;;  %vm496_vm7 = vcmp.lt.s32.totalorder %v494_v25, %v495_v31  ;;  %v232_v40 = vadd.f32 %v878_v8, %v231_v20 }
  0x6f   : > { %v497_v39 = vsel %vm496_vm7, %v494_v25, %v495_v31  ;;  %879 = vpow2.f32 %v357_v38  ;;  %v524_v41 = vsel %vm520_vm0, %v456_v12, -1.0  ;;  %v660_v51 = vrot.slane %v1117_v29, 2 }
  0x70   : > { %v498_v49 = vrot.slane %v497_v39, 2  ;;  %v528_v36 = vmul.f32 0.5, %v405_v34  ;;  %v556_v50 = vmul.f32 0.5, %v433_v35  ;;  %v236_v47 = vsel %vm1172_vm8, %v878_v8, %v232_v40 }
  0x71   : > { %v1182_v55 = vsel %vm1166_vm6, %v240_v7, %v236_v47  ;;  %v306_v2 = vadd.f32 %v298_v46, %v1156_v23  ;;  %v322_v48 = vrot.slane %v290_v45, 2  ;;  %v695_v5 = vsel %vm666_vm10, %v658_v56, 0.0 }
  0x72   : > { %vm499_vm9 = vcmp.lt.s32.totalorder %v497_v39, %v498_v49  ;;  %v536_v43 = vrot.slane %v528_v36, 7  ;;  %v560_v52 = vsub.f32 %v337_v60, %v556_v50  ;;  %v584_v21 = vadd.f32 %v556_v50, %v337_v60  ;;  %703 = vst [vmem:[%s1136_s26 + $0x20] sm:$0xff] %v695_v5 }
  0x73   : > { %v500_v53 = vsel %vm499_vm9, %v497_v39, %v498_v49  ;;  %v457_v1 = vsel %vm435_vm1, %v1182_v55, -inf  ;;  %v661_v4 = vrot.slane %v1182_v55, 2  ;;  %v696_v18 = vsel %vm666_vm10, %v659_v33, 0.0 }
  0x74   : > { %v501_v58 = vrot.slane %v500_v53, 1  ;;  %v544_v27 = vsub.f32 %v1144_v3, %v536_v43  ;;  %v564_v61 = vmax.f32 %v560_v52, 0.0  ;;  %v572_v63 = vadd.f32 %v536_v43, %v1144_v3  ;;  %704 = vst [vmem:[%s1136_s26 + $0x28] sm:$0xff] %v696_v18 }
  0x75   : > { %v588_v0 = vmax.f32 %v584_v21, 0.0  ;;  %v880_v62 = vpop.eup %879  ;;  %v330_v3 = vadd.f32 %v322_v48, %v1156_v23  ;;  %v458_v15 = vrot.slane %v457_v1, 4  ;;  %v697_v25 = vsel %vm666_vm10, %v660_v51, 0.0 }
  0x76   : > { %vm502_vm14 = vcmp.lt.s32.totalorder %v500_v53, %v501_v58  ;;  %v548_v8 = vmax.f32 %v544_v27, 0.0  ;;  %v568_v9 = vmin.f32 %v564_v61, 1.0  ;;  %v576_v10 = vmax.f32 %v572_v63, 0.0  ;;  %705 = vst [vmem:[%s1136_s26 + $0x30] sm:$0xff] %v697_v25  ;;  %v729_v25 = vld [vmem:[%s1136_s26] sm:$0xff] (%p945_p5) }
  0x77   : > { %v592_v12 = vmin.f32 %v588_v0, 1.0  ;;  %v366_v14 = vrot.slane %v880_v62, 2  ;;  %v503_v16 = vsel %vm502_vm14, %v500_v53, %v501_v58  ;;  %v459_v22 = vmax.f32 %v457_v1, %v458_v15  ;;  %730 = vst [vmem:[%s716_s30] sm:$0xff] (%p945_p5), %v729_v25 }
  0x78   : > { %v552_v59 = vmin.f32 %v548_v8, 1.0  ;;  %v580_v17 = vmin.f32 %v576_v10, 1.0  ;;  %v612_v44 = vrot.slane %v568_v9, 1  ;;  %v698_v26 = vsel %vm666_vm10, %v661_v4, 0.0 }
  0x79   : > { %v636_v42 = vrot.slane %v592_v12, 7  ;;  %v374_v56 = vmul.f32 %v366_v14, %v1156_v23  ;;  %v648_v13 = vrot.slane %v524_v41, 7  ;;  %v460_v31 = vrot.slane %v459_v22, 2  ;;  %706 = vst [vmem:[%s1136_s26 + $0x38] sm:$0xff] %v698_v26  ;;  %v731_v26 = vld [vmem:[%s1136_s26 + $0x8] sm:$0xff] (%p945_p5) }
  0x7a   : > { %v600_v11 = vrot.slane %v552_v59, 1  ;;  %v624_v19 = vrot.slane %v580_v17, 7  ;;  %v516_v6 = vcvt.s32.f32 %v503_v16  ;;  %v334_v32 = vmax.f32 %v330_v3, 0.0  ;;  %732 = vst [vmem:[%s716_s30 + $0x8] sm:$0xff] (%p945_p5), %v731_v26 }
  0x7b   : > { %v382_v28 = vrot.slane %v374_v56, 4  ;;  %v410_v30 = vrot.slane %v374_v56, 3  ;;  %v461_v7 = vmax.f32 %v459_v22, %v460_v31  ;;  %v310_v35 = vmax.f32 %v306_v2, 0.0 }
  0x7c   : > { %v669_v33 = vsel %vm666_vm10, %v600_v11, %v612_v44  ;;  %v338_v46 = vmin.f32 %v334_v32, 1.0  ;;  %vm521_vm2 = vcmp.gt.f32.partialorder %v166_v24, 0.5 }
  0x7d   : > { %v674_v60 = vsel %vm671_vm11, %v669_v33, %v624_v19  ;;  %v390_v20 = vmax.f32 %v1156_v23, %v382_v28  ;;  %v418_v54 = vmax.f32 %v166_v24, %v410_v30  ;;  %v462_v40 = vrot.slane %v461_v7, 1  ;;  %v739_v28 = vld [vmem:[%s1136_s26 + $0x28] sm:$0xff] (%p945_p5)  ;;  %v741_v30 = vld [vmem:[%s1136_s26 + $0x30] sm:$0xff] (%p945_p5) }
  0x7e   : > { %v678_v34 = vsel %vm435_vm1, %v674_v60, %v636_v42  ;;  %v314_v41 = vmin.f32 %v310_v35, 1.0  ;;  %740 = vst [vmem:[%s716_s30 + $0xa8] sm:$0xff] (%p945_p5), %v739_v28 }
  0x7f   : > { %v683_v37 = vsel %vm680_vm13, %v678_v34, %v648_v13  ;;  %v398_v38 = vrot.slane %v390_v20, 7  ;;  %v426_v39 = vrot.slane %v418_v54, 7  ;;  %v463_v23 = vmax.f32 %v461_v7, %v462_v40  ;;  %v737_v13 = vld [vmem:[%s1136_s26 + $0x20] sm:$0xff] (%p945_p5)  ;;  %742 = vst [vmem:[%s716_s30 + $0xb0] sm:$0xff] (%p945_p5), %v741_v30 }
  0x80   : > { %v688_v45 = vsel %vm685_vm4, %v683_v37, %v516_v6  ;;  %738 = vst [vmem:[%s716_s30 + $0xa0] sm:$0xff] (%p945_p5), %v737_v13  ;;  %v743_v31 = vld [vmem:[%s1136_s26 + $0x38] sm:$0xff] (%p945_p5) }
  0x81   : > { %v693_v49 = vsel %vm690_vm12, %v688_v45, %v660_v51  ;;  %v406_v36 = vmin.f32 %v166_v24, %v398_v38  ;;  %v434_v50 = vmin.f32 %v166_v24, %v426_v39  ;;  %vm469_vm15 = vcmp.ge.f32.partialorder %v1182_v55, %v463_v23  ;;  %744 = vst [vmem:[%s716_s30 + $0xb8] sm:$0xff] (%p945_p5), %v743_v31 }
  0x82   : > { %701 = vst [vmem:[%s1136_s26 + $0x10] sm:$0xff] %v693_v49  ;;  %v473_v52 = vsel %vm469_vm15, %v987_v57, 3  ;;  %v525_v9 = vsel %vm521_vm2, %v463_v23, -1.0 }
  0x83   : > { %v529_v47 = vmul.f32 0.5, %v406_v36  ;;  %v557_v43 = vmul.f32 0.5, %v434_v50  ;;  %v504_v21 = vsel %vm435_vm1, %v473_v52, 2147483647  ;;  %v649_v17 = vrot.slane %v525_v9, 7 }
  0x84   : > { %v505_v58 = vrot.slane %v504_v21, 4 }
  0x85   : > { %v537_v53 = vrot.slane %v529_v47, 7  ;;  %v561_v2 = vsub.f32 %v338_v46, %v557_v43  ;;  %v585_v48 = vadd.f32 %v557_v43, %v338_v46 }
  0x86   : > { %vm506_vm0 = vcmp.lt.s32.totalorder %v504_v21, %v505_v58 }
  0x87   : > { %v545_v29 = vsub.f32 %v314_v41, %v537_v53  ;;  %v565_v27 = vmax.f32 %v561_v2, 0.0  ;;  %v573_v51 = vadd.f32 %v537_v53, %v314_v41  ;;  %v589_v61 = vmax.f32 %v585_v48, 0.0 }
  0x88   : > { %v507_v63 = vsel %vm506_vm0, %v504_v21, %v505_v58 }
  0x89   : > { %v549_v0 = vmax.f32 %v545_v29, 0.0  ;;  %v569_v1 = vmin.f32 %v565_v27, 1.0  ;;  %v577_v5 = vmax.f32 %v573_v51, 0.0  ;;  %v508_v62 = vrot.slane %v507_v63, 2  ;;  %v733_v55 = vld [vmem:[%s1136_s26 + $0x10] sm:$0xff] (%p945_p5) }
  0x8a   : > { %v593_v8 = vmin.f32 %v589_v61, 1.0  ;;  %734 = vst [vmem:[%s716_s30 + $0x10] sm:$0xff] (%p945_p5), %v733_v55 }
  0x8b   : > { %v553_v57 = vmin.f32 %v549_v0, 1.0  ;;  %v581_v10 = vmin.f32 %v577_v5, 1.0  ;;  %v613_v12 = vrot.slane %v569_v1, 1  ;;  %vm509_vm3 = vcmp.lt.s32.totalorder %v507_v63, %v508_v62 }
  0x8c   : > { %v510_v3 = vsel %vm509_vm3, %v507_v63, %v508_v62  ;;  %v637_v16 = vrot.slane %v593_v8, 7 }
  0x8d   : > { %v601_v14 = vrot.slane %v553_v57, 1  ;;  %v625_v15 = vrot.slane %v581_v10, 7  ;;  %v511_v59 = vrot.slane %v510_v3, 1 }
  0x8f   : > { %v670_v44 = vsel %vm666_vm10, %v601_v14, %v613_v12  ;;  %vm512_vm5 = vcmp.lt.s32.totalorder %v510_v3, %v511_v59 }
  0x90   : > { %v675_v42 = vsel %vm671_vm11, %v670_v44, %v625_v15  ;;  %v513_v56 = vsel %vm512_vm5, %v510_v3, %v511_v59 }
  0x91   : > { %v679_v22 = vsel %vm435_vm1, %v675_v42, %v637_v16  ;;  %v517_v18 = vcvt.s32.f32 %v513_v56  ;;  %713 = sbr.rel (!%p945_p5) target bundleno = 158 (0x9e), region = 51 }
  0x92   : > { %v684_v11 = vsel %vm680_vm13, %v679_v22, %v649_v17 }
  0x93   : > { %v689_v19 = vsel %vm685_vm4, %v684_v11, %v517_v18 }
  0x94   : > { %v694_v24 = vsel %vm690_vm12, %v689_v19, %v661_v4 }
  0x95   : > { %702 = vst [vmem:[%s1136_s26 + $0x18] sm:$0xff] %v694_v24 }
  0x9c   : > { %v735_v4 = vld [vmem:[%s1136_s26 + $0x18] sm:$0xff] }
  0x9d   : > { %736 = vst [vmem:[%s716_s30 + $0x18] sm:$0xff] %v735_v4 }
  0x9e PF: > { %p8_p10 = scmp.ge.s32.totalorder %s932_s10, 7   ;;  %s1275_s6 = smov %s899_s7 }
  0x9f   : > { %s1276_s7 = smov %s943_s13  ;;  %s1277_s8 = smov %s932_s10 }
  0xa0   :  { %10 = sbr.rel (!%p8_p10) target bundleno = 2 (0x2), region = 105 }

</bundles_post_ra>
